<compile_context>
chip_gen: v5e
topology: v5e:2x2
jax: 0.10.0
libtpu: 0.0.40
codegen_flags: <defaults>
</compile_context>

<pallas_src>
import math
from functools import partial

import jax
import jax.numpy as jnp
from jax.experimental import pallas as pl
from jax.experimental.pallas import tpu as pltpu

# ----------------------------- small config -----------------------------------
DIM = 128            # stands in for 768
NUM_TOKENS = 8       # stands in for 257
NUM_TIME_EMBEDS = 1
DEPTH = 2
HEADS = 4
DIM_HEAD = 32
FF_MULT = 4
ROT_DIM = min(32, DIM_HEAD)
NUM_BUCKETS = 32
MAX_DISTANCE = 128
COSINE_SIM_SCALE = 16.0
LN_EPS = 1e-5
NEG_INF = -3.4028234663852886e38   # -finfo(float32).max (bias stays f32; do not bf16-cast)
BATCH_TILE = 2                     # batch rows processed per grid step (amortizes weight DMA)
VMEM_LIMIT = 48 * 1024 * 1024      # <= v7x 64 MiB physical per TC; > v5e/v6e scoped defaults


# ----------------------------- in-kernel helpers -------------------------------
def _ln(x, g, stable=False):
    # DALLE2 LayerNorm: gain only, population variance, eps=1e-5
    if stable:
        # reference parity: divide by (possibly zero / negative) row max
        x = x / jnp.max(x, axis=-1, keepdims=True)
    mu = jnp.mean(x, axis=-1, keepdims=True)
    var = jnp.mean((x - mu) ** 2, axis=-1, keepdims=True)
    return (x - mu) * jax.lax.rsqrt(var + LN_EPS) * g


def _l2norm(x):
    return x * jax.lax.rsqrt(jnp.sum(x * x, axis=-1, keepdims=True) + 1e-12)


# ----------------------------- Pallas kernels ----------------------------------
def transformer_stack_kernel(x_ref, bias_ref, cosq_ref, sinq_ref, cosk_ref, sink_ref,
                             ang_ref, qw_ref, qrw_ref, kw_ref, krw_ref, vw_ref,
                             nkv_ref, ow_ref, ong_ref, fng_ref,
                             w1a_ref, w1b_ref, w2_ref,
                             fin_g_ref, fin_w_ref,
                             img_ref,
                             resid, k_scr, v_scr, qrow_scr, attn_scr):
    l = pl.program_id(1)
    bt, n, dim = x_ref.shape
    nk_pad, dh = k_scr.shape
    hd = qw_ref.shape[-1]
    heads = hd // dh
    nt = img_ref.shape[1]
    scale = jnp.float32(math.sqrt(COSINE_SIM_SCALE))

    @pl.when(l == 0)
    def _():
        # residual stream lives in VMEM scratch across the whole layer stack
        resid[...] = x_ref[...].reshape(bt * n, dim)
        # pad rows of the key/value scratch are never written by a layer; zero
        # them once per batch block (scratch is uninitialized at kernel start).
        if nk_pad > n + 1:
            k_scr[n + 1:, :] = jnp.zeros((nk_pad - n - 1, dh), jnp.float32)
            v_scr[n + 1:, :] = jnp.zeros((nk_pad - n - 1, dh), jnp.float32)

    x = resid[...]                                              # (bt*n, dim) f32

    # ---------------- attention ----------------
    h = _ln(x, ang_ref[0]).astype(jnp.bfloat16)
    # rotary folded into the projections: rotate_half(h @ W) == h @ (W @ P)
    q = (jnp.dot(h, qw_ref[0], preferred_element_type=jnp.float32) * cosq_ref[...]
         + jnp.dot(h, qrw_ref[0], preferred_element_type=jnp.float32) * sinq_ref[...])
    k = (jnp.dot(h, kw_ref[0], preferred_element_type=jnp.float32) * cosk_ref[...]
         + jnp.dot(h, krw_ref[0], preferred_element_type=jnp.float32) * sink_ref[...])
    v = jnp.dot(h, vw_ref[0], preferred_element_type=jnp.float32)

    nkv = nkv_ref[0]                                            # (2, dh) null k/v
    for b in range(bt):                                         # per-sample attention core
        # heads folded onto rows: (n, heads*dh) -> (heads*n, dh) assembled in scratch
        for hh in range(heads):
            qrow_scr[hh * n:(hh + 1) * n, :] = q[b * n:(b + 1) * n, hh * dh:(hh + 1) * dh]
        qr = (_l2norm(qrow_scr[...]) * scale).astype(jnp.bfloat16)   # one l2norm for all heads

        # keys / values: real rows then null row; pad rows already zero
        k_scr[:n, :] = k[b * n:(b + 1) * n, :]
        v_scr[:n, :] = v[b * n:(b + 1) * n, :]
        k_scr[n:n + 1, :] = nkv[0:1, :]
        v_scr[n:n + 1, :] = nkv[1:2, :]
        kn = (_l2norm(k_scr[...]) * scale).astype(jnp.bfloat16)

        sim = jax.lax.dot_general(qr, kn, (((1,), (1,)), ((), ())),
                                  preferred_element_type=jnp.float32)   # (heads*n, nk_pad)
        sim = sim + bias_ref[...]            # rel-pos bias + causal/pad mask, head-major rows
        # no row-max subtraction: real scores are cosine-sim bounded (|sim| <= 16 + bias)
        # and masked columns are exactly NEG_INF so exp() underflows to 0.
        p = jnp.exp(sim)
        inv_d = pl.reciprocal(jnp.sum(p, axis=-1, keepdims=True), approx=True)
        pv = jnp.dot(p.astype(jnp.bfloat16), v_scr[...].astype(jnp.bfloat16),
                     preferred_element_type=jnp.float32) * inv_d        # (heads*n, dh)
        # reassemble (heads*n, dh) -> (n, heads*dh) directly into the attention slab
        for hh in range(heads):
            attn_scr[b * n:(b + 1) * n, hh * dh:(hh + 1) * dh] = pv[hh * n:(hh + 1) * n, :]

    attn = attn_scr[...].astype(jnp.bfloat16)                           # (bt*n, heads*dh)
    o = jnp.dot(attn, ow_ref[0], preferred_element_type=jnp.float32)
    x = x + _ln(o, ong_ref[0])                                          # to_out LN + residual

    # ---------------- feed-forward (SwiGLU) ----------------
    h2 = _ln(x, fng_ref[0]).astype(jnp.bfloat16)
    a = jnp.dot(h2, w1a_ref[0], preferred_element_type=jnp.float32)
    g = jnp.dot(h2, w1b_ref[0], preferred_element_type=jnp.float32)
    y = (a * (g * jax.nn.sigmoid(g))).astype(jnp.bfloat16)
    x = x + jnp.dot(y, w2_ref[0], preferred_element_type=jnp.float32)

    resid[...] = x

    # ---------------- fused final stable-LN + projection (last layer only) ----------------
    @pl.when(l == pl.num_programs(1) - 1)
    def _():
        for b in range(bt):
            xi = x[b * n + (n - nt): b * n + n, :]                      # last NUM_TOKENS rows
            hf = _ln(xi, fin_g_ref[...], stable=True)
            img_ref[b] = jnp.dot(hf.astype(jnp.bfloat16), fin_w_ref[...],
                                 preferred_element_type=jnp.float32).astype(img_ref.dtype)


def time_mlp_kernel(e_ref, w1_ref, b1_ref, w2_ref, b2_ref, w3_ref, b3_ref, o_ref):
    h = jnp.dot(e_ref[...], w1_ref[...], preferred_element_type=jnp.float32) + b1_ref[...]
    h = h * jax.nn.sigmoid(h)                     # SiLU
    h = jnp.dot(h, w2_ref[...], preferred_element_type=jnp.float32) + b2_ref[...]
    h = h * jax.nn.sigmoid(h)
    o_ref[...] = (jnp.dot(h, w3_ref[...], preferred_element_type=jnp.float32)
                  + b3_ref[...]).astype(o_ref.dtype)


# ----------------------------- pallas_call wrappers -----------------------------
def transformer_stack(tokens, bias_flat, cos_q, sin_q, cos_k, sin_k, lp, fin_g, fin_w, *, bt):
    B, n, dim = tokens.shape
    depth = lp['q_w'].shape[0]
    hd = lp['q_w'].shape[-1]
    dh = lp['k_w'].shape[-1]
    heads = hd // dh
    nk_pad = bias_flat.shape[-1]

    def inv_spec(a):                     # grid-invariant full-array block
        nd = a.ndim
        return pl.BlockSpec(a.shape, lambda b, l, _nd=nd: (0,) * _nd)

    def layer_spec(a):                   # stacked-per-layer block, pipelined over l
        tail = a.shape[1:]
        nd = len(tail)
        return pl.BlockSpec((1,) + tail, lambda b, l, _nd=nd: (l,) + (0,) * _nd)

    invariants = [bias_flat, cos_q, sin_q, cos_k, sin_k]
    layer_ws = [lp['attn_norm_g'], lp['q_w'], lp['q_rot_w'], lp['k_w'], lp['k_rot_w'],
                lp['v_w'], lp['null_kv'], lp['out_w'], lp['out_norm_g'], lp['ff_norm_g'],
                lp['w1a'], lp['w1b'], lp['w2']]
    finals = [fin_g, fin_w]

    in_specs = ([pl.BlockSpec((bt, n, dim), lambda b, l: (b, 0, 0))]
                + [inv_spec(a) for a in invariants]
                + [layer_spec(a) for a in layer_ws]
                + [inv_spec(a) for a in finals])

    return pl.pallas_call(
        transformer_stack_kernel,
        out_shape=jax.ShapeDtypeStruct((B, NUM_TOKENS, dim), tokens.dtype),
        grid=(B // bt, depth),
        in_specs=in_specs,
        out_specs=pl.BlockSpec((bt, NUM_TOKENS, dim), lambda b, l: (b, 0, 0)),
        scratch_shapes=[pltpu.VMEM((bt * n, dim), jnp.float32),      # residual stream
                        pltpu.VMEM((nk_pad, dh), jnp.float32),       # keys (padded)
                        pltpu.VMEM((nk_pad, dh), jnp.float32),       # values (padded)
                        pltpu.VMEM((heads * n, dh), jnp.float32),    # heads-on-rows q
                        pltpu.VMEM((bt * n, hd), jnp.float32)],      # attention output slab
        compiler_params=pltpu.CompilerParams(
            dimension_semantics=("parallel", "arbitrary"),
            vmem_limit_bytes=VMEM_LIMIT),
    )(tokens, *invariants, *layer_ws, *finals)


def time_mlp(sin_emb, tm):
    B = sin_emb.shape[0]
    return pl.pallas_call(
        time_mlp_kernel,
        out_shape=jax.ShapeDtypeStruct((B, DIM * NUM_TIME_EMBEDS), jnp.float32),
    )(sin_emb, tm['w1'], tm['b1'], tm['w2'], tm['b2'], tm['w3'], tm['b3'])


# ----------------------------- JAX glue (tables / embeddings) -------------------
def rel_pos_bias_padded(n, nk_pad, emb):
    # T5-style relative position bias (causal bucketing), emb: (num_buckets, heads).
    # Reference column order is [null, key_0..key_{n-1}]; kernel uses
    # [key_0..key_{n-1}, null, pad...], so permute + pad + bake causal/pad mask.
    q_pos = jnp.arange(n)
    k_pos = jnp.arange(n + 1)
    rel = k_pos[None, :] - q_pos[:, None]
    nneg = jnp.maximum(-rel, 0)
    max_exact = NUM_BUCKETS // 2
    is_small = nneg < max_exact
    nf = jnp.maximum(nneg.astype(jnp.float32), 1.0)   # avoid log(0); masked by is_small
    val_large = max_exact + (jnp.log(nf / max_exact)
                             / math.log(MAX_DISTANCE / max_exact)
                             * (NUM_BUCKETS - max_exact)).astype(jnp.int32)
    val_large = jnp.minimum(val_large, NUM_BUCKETS - 1)
    buckets = jnp.where(is_small, nneg, val_large)
    vals = jnp.take(emb, buckets, axis=0)              # (n, n+1, heads)
    bias = jnp.transpose(vals, (2, 0, 1)).astype(jnp.float32)   # (H, n, n+1)

    bias = jnp.concatenate([bias[:, :, 1:], bias[:, :, :1]], axis=-1)   # keys..., null
    bias = jnp.pad(bias, ((0, 0), (0, 0), (0, nk_pad - (n + 1))))
    rows = jnp.arange(n)[:, None]
    cols = jnp.arange(nk_pad)[None, :]
    # causal: key j visible iff j <= i; null column (index n) always visible; pads masked
    visible = (cols <= rows) | (cols == n)
    return jnp.where(visible[None], bias, jnp.float32(NEG_INF))


def rotate_half_matrix():
    # rotate_half(t) == t @ P  (interleaved (-x2, x1) swap expressed as a matmul)
    idx = jnp.arange(ROT_DIM // 2)
    P = jnp.zeros((DIM_HEAD, DIM_HEAD), jnp.float32)
    P = P.at[2 * idx + 1, 2 * idx].set(-1.0)
    P = P.at[2 * idx, 2 * idx + 1].set(1.0)
    return P


def rotary_cos_sin(n):
    # rotary_embedding_torch semantics: interleaved pairs, rot_dim = min(32, dim_head)
    inv_freq = 1.0 / (10000.0 ** (jnp.arange(0, ROT_DIM, 2, dtype=jnp.float32) / ROT_DIM))
    freqs = jnp.arange(n, dtype=jnp.float32)[:, None] * inv_freq[None, :]
    freqs = jnp.repeat(freqs, 2, axis=-1)              # (n, ROT_DIM) interleaved
    cos = jnp.cos(freqs)
    sin = jnp.sin(freqs)
    if ROT_DIM < DIM_HEAD:                             # pass-through for the tail dims
        pad = DIM_HEAD - ROT_DIM
        cos = jnp.concatenate([cos, jnp.ones((n, pad), jnp.float32)], axis=-1)
        sin = jnp.concatenate([sin, jnp.zeros((n, pad), jnp.float32)], axis=-1)
    return cos, sin


def sinusoidal_pos_emb(t, dim):
    half = dim // 2
    scale = math.log(10000.0) / (half - 1)
    freqs = jnp.exp(jnp.arange(half, dtype=jnp.float32) * -scale)
    emb = t.astype(jnp.float32)[:, None] * freqs[None, :]
    return jnp.concatenate([jnp.sin(emb), jnp.cos(emb)], axis=-1)


# ----------------------------- parameter init ----------------------------------
def init_params(key):
    ks = iter(jax.random.split(key, 64))

    def nrm(shape, std=0.02, dtype=jnp.bfloat16):
        return (jax.random.normal(next(ks), shape, jnp.float32) * std).astype(dtype)

    HD = HEADS * DIM_HEAD
    inner_ff = FF_MULT * DIM
    hidden = int(2 * DIM * NUM_TIME_EMBEDS)   # time-MLP expansion_factor = 2

    layers = {
        'attn_norm_g': jnp.ones((DEPTH, 1, DIM), jnp.float32),
        'q_w': nrm((DEPTH, DIM, HD)),                       # to_q, head-batched, bf16
        'k_w': nrm((DEPTH, DIM, DIM_HEAD)),                 # shared (multi-query) key
        'v_w': nrm((DEPTH, DIM, DIM_HEAD)),
        'null_kv': jax.random.normal(next(ks), (DEPTH, 2, DIM_HEAD), jnp.float32),
        'out_w': nrm((DEPTH, HD, DIM)),                     # to_out linear
        'out_norm_g': jnp.ones((DEPTH, 1, DIM), jnp.float32),
        'ff_norm_g': jnp.ones((DEPTH, 1, DIM), jnp.float32),
        'w1a': nrm((DEPTH, DIM, inner_ff)),                 # SwiGLU value path
        'w1b': nrm((DEPTH, DIM, inner_ff)),                 # SwiGLU gate path
        'w2': nrm((DEPTH, inner_ff, DIM)),
    }
    # fold rotate_half into the q/k projection weights (exact signed column permutation)
    P = rotate_half_matrix()
    P_bd = jnp.kron(jnp.eye(HEADS, dtype=jnp.float32), P)
    layers['q_rot_w'] = jnp.matmul(layers['q_w'].astype(jnp.float32), P_bd).astype(jnp.bfloat16)
    layers['k_rot_w'] = jnp.matmul(layers['k_w'].astype(jnp.float32), P).astype(jnp.bfloat16)

    return {
        'rel_pos_emb': nrm((NUM_BUCKETS, HEADS), dtype=jnp.float32),
        'learned_query': jax.random.normal(next(ks), (NUM_TOKENS, DIM), jnp.float32)
                         * (DIM ** -0.5),
        'null_brain_embeds': jax.random.normal(next(ks), (NUM_TOKENS, DIM), jnp.float32),
        'null_image_embed': jax.random.normal(next(ks), (NUM_TOKENS, DIM), jnp.float32),
        'time_mlp': {
            'w1': nrm((DIM, hidden), dtype=jnp.float32),
            'b1': jnp.zeros((1, hidden), jnp.float32),
            'w2': nrm((hidden, hidden), dtype=jnp.float32),
            'b2': jnp.zeros((1, hidden), jnp.float32),
            'w3': nrm((hidden, DIM * NUM_TIME_EMBEDS), dtype=jnp.float32),
            'b3': jnp.zeros((1, DIM * NUM_TIME_EMBEDS), jnp.float32),
        },
        'final_norm_g': jnp.ones((1, DIM), jnp.float32),
        'project_out': nrm((DIM, DIM)),                     # bf16
        'layers': layers,
    }


# ----------------------------- forward ------------------------------------------
def versatile_prior_forward(params, image_embed, diffusion_timesteps, brain_embed,
                            brain_cond_drop_prob=0.0, image_cond_drop_prob=0.0):
    B = image_embed.shape[0]
    image_embed = image_embed.reshape(B, -1, DIM)
    brain_embed = brain_embed.reshape(B, -1, DIM)

    # prob_mask_like: deterministic for prob in {0, 1}
    # TODO(synk): stochastic keep-mask (0 < drop_prob < 1) needs an explicit RNG key.
    def keep_mask(drop_prob):
        return (jnp.ones if (1.0 - drop_prob) >= 1.0 else jnp.zeros)((B, 1, 1), bool)

    brain_embed = jnp.where(keep_mask(brain_cond_drop_prob), brain_embed,
                            params['null_brain_embeds'][None])
    image_embed = jnp.where(keep_mask(image_cond_drop_prob), image_embed,
                            params['null_image_embed'][None])

    # time embedding: SinusoidalPosEmb (glue) + MLP (Pallas)
    sin_emb = sinusoidal_pos_emb(diffusion_timesteps, DIM)
    time_embed = time_mlp(sin_emb, params['time_mlp']).reshape(B, NUM_TIME_EMBEDS, DIM)

    # learned_query_mode == 'pos_emb'
    image_embed = image_embed + params['learned_query'][None]
    tokens = jnp.concatenate([brain_embed, time_embed, image_embed], axis=1)

    n = tokens.shape[1]
    nk_pad = ((n + 1 + 7) // 8) * 8                     # pad key axis to sublane multiple
    bias = rel_pos_bias_padded(n, nk_pad, params['rel_pos_emb'])
    bias_flat = bias.reshape(HEADS * n, nk_pad)         # head-major rows (matches kernel)

    bt = B if B <= BATCH_TILE else BATCH_TILE
    assert B % bt == 0, "batch must be divisible by the batch tile"

    cos, sin = rotary_cos_sin(n)
    cos_k = jnp.tile(cos, (bt, 1))
    sin_k = jnp.tile(sin, (bt, 1))
    cos_q = jnp.tile(cos, (bt, HEADS))                  # per-head-tiled, batch-tiled
    sin_q = jnp.tile(sin, (bt, HEADS))

    # fused transformer stack + final stable-LN + projection on last NUM_TOKENS rows
    return transformer_stack(tokens, bias_flat, cos_q, sin_q, cos_k, sin_k,
                             params['layers'], params['final_norm_g'],
                             params['project_out'], bt=bt)


# ----------------------------- main ----------------------------------------------
if __name__ == "__main__":
    key = jax.random.PRNGKey(0)
    kp, ki, kb, kt = jax.random.split(key, 4)
    params = init_params(kp)

    B = 2
    image_embed = jax.random.normal(ki, (B, NUM_TOKENS * DIM), jnp.float32)
    brain_embed = jax.random.normal(kb, (B, NUM_TOKENS * DIM), jnp.float32)
    diffusion_timesteps = jax.random.uniform(kt, (B,), jnp.float32, 0.0, 1000.0)

    fwd = jax.jit(partial(versatile_prior_forward, params))
    out = fwd(image_embed, diffusion_timesteps, brain_embed)
    jax.block_until_ready(out)
    assert out.shape == (B, NUM_TOKENS, DIM) and out.dtype == jnp.float32
    print("KERNEL_OK")
</pallas_src>

<mosaic_0001>
module attributes {stable_mosaic.version = 11 : i64} {
  func.func @time_mlp_kernel(%arg0: memref<2x128xf32, #tpu.memory_space<vmem>>, %arg1: memref<128x256xf32, #tpu.memory_space<vmem>>, %arg2: memref<1x256xf32, #tpu.memory_space<vmem>>, %arg3: memref<256x256xf32, #tpu.memory_space<vmem>>, %arg4: memref<1x256xf32, #tpu.memory_space<vmem>>, %arg5: memref<256x128xf32, #tpu.memory_space<vmem>>, %arg6: memref<1x128xf32, #tpu.memory_space<vmem>>, %arg7: memref<2x128xf32, #tpu.memory_space<vmem>>) attributes {dimension_semantics = [], scalar_prefetch = 0 : i64, scratch_operands = 0 : i64, tpu.core_type = #tpu.core_type<tc>} {
    %c0 = arith.constant 0 : index
    %c0_0 = arith.constant 0 : index
    %0 = vector.load %arg0[%c0, %c0_0] : memref<2x128xf32, #tpu.memory_space<vmem>>, vector<2x128xf32>
    %c0_1 = arith.constant 0 : index
    %c0_2 = arith.constant 0 : index
    %1 = vector.load %arg1[%c0_1, %c0_2] : memref<128x256xf32, #tpu.memory_space<vmem>>, vector<128x256xf32>
    %cst = arith.constant dense<0.000000e+00> : vector<2x256xf32>
    %2 = tpu.matmul %0, %1, %cst {dimension_numbers = #tpu.dot_dimension_numbers<[1], [0], [0], [1], [0, 0, 1, 1], [], []>} : vector<2x128xf32>, vector<128x256xf32>, vector<2x256xf32> -> vector<2x256xf32>
    %c0_3 = arith.constant 0 : index
    %c0_4 = arith.constant 0 : index
    %3 = vector.load %arg2[%c0_3, %c0_4] : memref<1x256xf32, #tpu.memory_space<vmem>>, vector<1x256xf32>
    %4 = vector.broadcast %3 : vector<1x256xf32> to vector<2x256xf32>
    %5 = arith.addf %2, %4 : vector<2x256xf32>
    %6 = arith.negf %5 : vector<2x256xf32>
    %7 = math.exp %6 : vector<2x256xf32>
    %cst_5 = arith.constant 1.000000e+00 : f32
    %8 = vector.broadcast %cst_5 : f32 to vector<2x256xf32>
    %9 = arith.addf %8, %7 : vector<2x256xf32>
    %10 = arith.divf %8, %9 : vector<2x256xf32>
    %11 = arith.mulf %5, %10 : vector<2x256xf32>
    %c0_6 = arith.constant 0 : index
    %c0_7 = arith.constant 0 : index
    %12 = vector.load %arg3[%c0_6, %c0_7] : memref<256x256xf32, #tpu.memory_space<vmem>>, vector<256x256xf32>
    %cst_8 = arith.constant dense<0.000000e+00> : vector<2x256xf32>
    %13 = tpu.matmul %11, %12, %cst_8 {dimension_numbers = #tpu.dot_dimension_numbers<[1], [0], [0], [1], [0, 0, 1, 1], [], []>} : vector<2x256xf32>, vector<256x256xf32>, vector<2x256xf32> -> vector<2x256xf32>
    %c0_9 = arith.constant 0 : index
    %c0_10 = arith.constant 0 : index
    %14 = vector.load %arg4[%c0_9, %c0_10] : memref<1x256xf32, #tpu.memory_space<vmem>>, vector<1x256xf32>
    %15 = vector.broadcast %14 : vector<1x256xf32> to vector<2x256xf32>
    %16 = arith.addf %13, %15 : vector<2x256xf32>
    %17 = arith.negf %16 : vector<2x256xf32>
    %18 = math.exp %17 : vector<2x256xf32>
    %cst_11 = arith.constant 1.000000e+00 : f32
    %19 = vector.broadcast %cst_11 : f32 to vector<2x256xf32>
    %20 = arith.addf %19, %18 : vector<2x256xf32>
    %21 = arith.divf %19, %20 : vector<2x256xf32>
    %22 = arith.mulf %16, %21 : vector<2x256xf32>
    %c0_12 = arith.constant 0 : index
    %c0_13 = arith.constant 0 : index
    %23 = vector.load %arg5[%c0_12, %c0_13] : memref<256x128xf32, #tpu.memory_space<vmem>>, vector<256x128xf32>
    %cst_14 = arith.constant dense<0.000000e+00> : vector<2x128xf32>
    %24 = tpu.matmul %22, %23, %cst_14 {dimension_numbers = #tpu.dot_dimension_numbers<[1], [0], [0], [1], [0, 0, 1, 1], [], []>} : vector<2x256xf32>, vector<256x128xf32>, vector<2x128xf32> -> vector<2x128xf32>
    %c0_15 = arith.constant 0 : index
    %c0_16 = arith.constant 0 : index
    %25 = vector.load %arg6[%c0_15, %c0_16] : memref<1x128xf32, #tpu.memory_space<vmem>>, vector<1x128xf32>
    %26 = vector.broadcast %25 : vector<1x128xf32> to vector<2x128xf32>
    %27 = arith.addf %24, %26 : vector<2x128xf32>
    %c0_17 = arith.constant 0 : index
    %c0_18 = arith.constant 0 : index
    %28 = vector.load %arg7[%c0_17, %c0_18] : memref<2x128xf32, #tpu.memory_space<vmem>>, vector<2x128xf32>
    tpu.vector_store %arg7[%c0_17, %c0_18], %27 {strides = array<i32>} : memref<2x128xf32, #tpu.memory_space<vmem>>, vector<2x128xf32>,
    return
  }
}

module attributes {stable_mosaic.version = 11 : i64} {
  func.func @transformer_stack_kernel(%arg0: i32, %arg1: i32, %arg2: memref<2x17x128xf32, #tpu.memory_space<vmem>>, %arg3: memref<68x24xf32, #tpu.memory_space<vmem>>, %arg4: memref<34x128xf32, #tpu.memory_space<vmem>>, %arg5: memref<34x128xf32, #tpu.memory_space<vmem>>, %arg6: memref<34x32xf32, #tpu.memory_space<vmem>>, %arg7: memref<34x32xf32, #tpu.memory_space<vmem>>, %arg8: memref<1x1x128xf32, #tpu.memory_space<vmem>>, %arg9: memref<1x128x128xbf16, #tpu.memory_space<vmem>>, %arg10: memref<1x128x128xbf16, #tpu.memory_space<vmem>>, %arg11: memref<1x128x32xbf16, #tpu.memory_space<vmem>>, %arg12: memref<1x128x32xbf16, #tpu.memory_space<vmem>>, %arg13: memref<1x128x32xbf16, #tpu.memory_space<vmem>>, %arg14: memref<1x2x32xf32, #tpu.memory_space<vmem>>, %arg15: memref<1x128x128xbf16, #tpu.memory_space<vmem>>, %arg16: memref<1x1x128xf32, #tpu.memory_space<vmem>>, %arg17: memref<1x1x128xf32, #tpu.memory_space<vmem>>, %arg18: memref<1x128x512xbf16, #tpu.memory_space<vmem>>, %arg19: memref<1x128x512xbf16, #tpu.memory_space<vmem>>, %arg20: memref<1x512x128xbf16, #tpu.memory_space<vmem>>, %arg21: memref<1x128xf32, #tpu.memory_space<vmem>>, %arg22: memref<128x128xbf16, #tpu.memory_space<vmem>>, %arg23: memref<2x8x128xf32, #tpu.memory_space<vmem>>, %arg24: memref<34x128xf32, #tpu.memory_space<vmem>>, %arg25: memref<24x32xf32, #tpu.memory_space<vmem>>, %arg26: memref<24x32xf32, #tpu.memory_space<vmem>>, %arg27: memref<68x32xf32, #tpu.memory_space<vmem>>, %arg28: memref<34x128xf32, #tpu.memory_space<vmem>>) attributes {dimension_semantics = [#tpu.dimension_semantics<parallel>, #tpu.dimension_semantics<arbitrary>], iteration_bounds = array<i64: 1, 2>, scalar_prefetch = 0 : i64, scratch_operands = 5 : i64, tpu.core_type = #tpu.core_type<tc>, window_params = [{transform_indices = @transform_0, window_bounds = array<i64: 2, 17, 128>}, {pipeline_mode = #tpu.pipeline_mode<synchronous>, transform_indices = @transform_1, window_bounds = array<i64: 68, 24>}, {pipeline_mode = #tpu.pipeline_mode<synchronous>, transform_indices = @transform_2, window_bounds = array<i64: 34, 128>}, {pipeline_mode = #tpu.pipeline_mode<synchronous>, transform_indices = @transform_3, window_bounds = array<i64: 34, 128>}, {pipeline_mode = #tpu.pipeline_mode<synchronous>, transform_indices = @transform_4, window_bounds = array<i64: 34, 32>}, {pipeline_mode = #tpu.pipeline_mode<synchronous>, transform_indices = @transform_5, window_bounds = array<i64: 34, 32>}, {transform_indices = @transform_6, window_bounds = array<i64: 1, 1, 128>}, {transform_indices = @transform_7, window_bounds = array<i64: 1, 128, 128>}, {transform_indices = @transform_8, window_bounds = array<i64: 1, 128, 128>}, {transform_indices = @transform_9, window_bounds = array<i64: 1, 128, 32>}, {transform_indices = @transform_10, window_bounds = array<i64: 1, 128, 32>}, {transform_indices = @transform_11, window_bounds = array<i64: 1, 128, 32>}, {transform_indices = @transform_12, window_bounds = array<i64: 1, 2, 32>}, {transform_indices = @transform_13, window_bounds = array<i64: 1, 128, 128>}, {transform_indices = @transform_14, window_bounds = array<i64: 1, 1, 128>}, {transform_indices = @transform_15, window_bounds = array<i64: 1, 1, 128>}, {transform_indices = @transform_16, window_bounds = array<i64: 1, 128, 512>}, {transform_indices = @transform_17, window_bounds = array<i64: 1, 128, 512>}, {transform_indices = @transform_18, window_bounds = array<i64: 1, 512, 128>}, {pipeline_mode = #tpu.pipeline_mode<synchronous>, transform_indices = @transform_19, window_bounds = array<i64: 1, 128>}, {pipeline_mode = #tpu.pipeline_mode<synchronous>, transform_indices = @transform_20, window_bounds = array<i64: 128, 128>}, {transform_indices = @transform_21, window_bounds = array<i64: 2, 8, 128>}]} {
    %c0_i32 = arith.constant 0 : i32
    %0 = arith.cmpi eq, %arg1, %c0_i32 : i32
    %1 = arith.extui %0 : i1 to i32
    %c0_i32_0 = arith.constant 0 : i32
    %2 = arith.cmpi ne, %1, %c0_i32_0 : i32
    scf.if %2 {
      %c0_154 = arith.constant 0 : index
      %c0_155 = arith.constant 0 : index
      %c0_156 = arith.constant 0 : index
      %249 = vector.load %arg2[%c0_154, %c0_155, %c0_156] : memref<2x17x128xf32, #tpu.memory_space<vmem>>, vector<2x17x128xf32>
      %250 = vector.shape_cast %249 : vector<2x17x128xf32> to vector<34x128xf32>
      %c0_157 = arith.constant 0 : index
      %c0_158 = arith.constant 0 : index
      %251 = vector.load %arg24[%c0_157, %c0_158] : memref<34x128xf32, #tpu.memory_space<vmem>>, vector<34x128xf32>
      tpu.vector_store %arg24[%c0_157, %c0_158], %250 {strides = array<i32>} : memref<34x128xf32, #tpu.memory_space<vmem>>, vector<34x128xf32>,
      %cst_159 = arith.constant 0.000000e+00 : f32
      %252 = vector.broadcast %cst_159 : f32 to vector<6x32xf32>
      %c18 = arith.constant 18 : index
      %c0_160 = arith.constant 0 : index
      %253 = vector.load %arg25[%c18, %c0_160] : memref<24x32xf32, #tpu.memory_space<vmem>>, vector<6x32xf32>
      tpu.vector_store %arg25[%c18, %c0_160], %252 {strides = array<i32>} : memref<24x32xf32, #tpu.memory_space<vmem>>, vector<6x32xf32>,
      %cst_161 = arith.constant 0.000000e+00 : f32
      %254 = vector.broadcast %cst_161 : f32 to vector<6x32xf32>
      %c18_162 = arith.constant 18 : index
      %c0_163 = arith.constant 0 : index
      %255 = vector.load %arg26[%c18_162, %c0_163] : memref<24x32xf32, #tpu.memory_space<vmem>>, vector<6x32xf32>
      tpu.vector_store %arg26[%c18_162, %c0_163], %254 {strides = array<i32>} : memref<24x32xf32, #tpu.memory_space<vmem>>, vector<6x32xf32>,
    } else {
    }
    %c0 = arith.constant 0 : index
    %c0_1 = arith.constant 0 : index
    %3 = vector.load %arg24[%c0, %c0_1] : memref<34x128xf32, #tpu.memory_space<vmem>>, vector<34x128xf32>
    %c0_2 = arith.constant 0 : index
    %c0_3 = arith.constant 0 : index
    %c0_4 = arith.constant 0 : index
    %4 = vector.load %arg8[%c0_2, %c0_3, %c0_4] : memref<1x1x128xf32, #tpu.memory_space<vmem>>, vector<1x1x128xf32>
    %5 = vector.shape_cast %4 : vector<1x1x128xf32> to vector<1x128xf32>
    %cst = arith.constant dense<0.000000e+00> : vector<34xf32>
    %6 = vector.multi_reduction <add>, %3, %cst [1] : vector<34x128xf32> to vector<34xf32>
    %7 = vector.shape_cast %6 : vector<34xf32> to vector<34x1xf32>
    %cst_5 = arith.constant 1.280000e+02 : f32
    %8 = vector.broadcast %cst_5 : f32 to vector<34x1xf32>
    %9 = arith.divf %7, %8 : vector<34x1xf32>
    %10 = vector.broadcast %9 : vector<34x1xf32> to vector<34x128xf32>
    %11 = arith.subf %3, %10 : vector<34x128xf32>
    %12 = arith.mulf %11, %11 : vector<34x128xf32>
    %cst_6 = arith.constant dense<0.000000e+00> : vector<34xf32>
    %13 = vector.multi_reduction <add>, %12, %cst_6 [1] : vector<34x128xf32> to vector<34xf32>
    %14 = vector.shape_cast %13 : vector<34xf32> to vector<34x1xf32>
    %cst_7 = arith.constant 1.280000e+02 : f32
    %15 = vector.broadcast %cst_7 : f32 to vector<34x1xf32>
    %16 = arith.divf %14, %15 : vector<34x1xf32>
    %17 = vector.broadcast %9 : vector<34x1xf32> to vector<34x128xf32>
    %18 = arith.subf %3, %17 : vector<34x128xf32>
    %cst_8 = arith.constant 9.99999974E-6 : f32
    %19 = vector.broadcast %cst_8 : f32 to vector<34x1xf32>
    %20 = arith.addf %16, %19 : vector<34x1xf32>
    %21 = math.rsqrt %20 : vector<34x1xf32>
    %22 = vector.broadcast %21 : vector<34x1xf32> to vector<34x128xf32>
    %23 = arith.mulf %18, %22 : vector<34x128xf32>
    %24 = vector.broadcast %5 : vector<1x128xf32> to vector<34x128xf32>
    %25 = arith.mulf %23, %24 : vector<34x128xf32>
    %26 = arith.truncf %25 : vector<34x128xf32> to vector<34x128xbf16>
    %c0_9 = arith.constant 0 : index
    %c0_10 = arith.constant 0 : index
    %c0_11 = arith.constant 0 : index
    %27 = vector.load %arg9[%c0_9, %c0_10, %c0_11] : memref<1x128x128xbf16, #tpu.memory_space<vmem>>, vector<1x128x128xbf16>
    %28 = vector.shape_cast %27 : vector<1x128x128xbf16> to vector<128x128xbf16>
    %cst_12 = arith.constant dense<0.000000e+00> : vector<34x128xf32>
    %29 = tpu.matmul %26, %28, %cst_12 {dimension_numbers = #tpu.dot_dimension_numbers<[1], [0], [0], [1], [0, 0, 1, 1], [], []>} : vector<34x128xbf16>, vector<128x128xbf16>, vector<34x128xf32> -> vector<34x128xf32>
    %c0_13 = arith.constant 0 : index
    %c0_14 = arith.constant 0 : index
    %30 = vector.load %arg4[%c0_13, %c0_14] : memref<34x128xf32, #tpu.memory_space<vmem>>, vector<34x128xf32>
    %31 = arith.mulf %29, %30 : vector<34x128xf32>
    %c0_15 = arith.constant 0 : index
    %c0_16 = arith.constant 0 : index
    %c0_17 = arith.constant 0 : index
    %32 = vector.load %arg10[%c0_15, %c0_16, %c0_17] : memref<1x128x128xbf16, #tpu.memory_space<vmem>>, vector<1x128x128xbf16>
    %33 = vector.shape_cast %32 : vector<1x128x128xbf16> to vector<128x128xbf16>
    %cst_18 = arith.constant dense<0.000000e+00> : vector<34x128xf32>
    %34 = tpu.matmul %26, %33, %cst_18 {dimension_numbers = #tpu.dot_dimension_numbers<[1], [0], [0], [1], [0, 0, 1, 1], [], []>} : vector<34x128xbf16>, vector<128x128xbf16>, vector<34x128xf32> -> vector<34x128xf32>
    %c0_19 = arith.constant 0 : index
    %c0_20 = arith.constant 0 : index
    %35 = vector.load %arg5[%c0_19, %c0_20] : memref<34x128xf32, #tpu.memory_space<vmem>>, vector<34x128xf32>
    %36 = arith.mulf %34, %35 : vector<34x128xf32>
    %37 = arith.addf %31, %36 : vector<34x128xf32>
    %c0_21 = arith.constant 0 : index
    %c0_22 = arith.constant 0 : index
    %c0_23 = arith.constant 0 : index
    %38 = vector.load %arg11[%c0_21, %c0_22, %c0_23] : memref<1x128x32xbf16, #tpu.memory_space<vmem>>, vector<1x128x32xbf16>
    %39 = vector.shape_cast %38 : vector<1x128x32xbf16> to vector<128x32xbf16>
    %cst_24 = arith.constant dense<0.000000e+00> : vector<34x32xf32>
    %40 = tpu.matmul %26, %39, %cst_24 {dimension_numbers = #tpu.dot_dimension_numbers<[1], [0], [0], [1], [0, 0, 1, 1], [], []>} : vector<34x128xbf16>, vector<128x32xbf16>, vector<34x32xf32> -> vector<34x32xf32>
    %c0_25 = arith.constant 0 : index
    %c0_26 = arith.constant 0 : index
    %41 = vector.load %arg6[%c0_25, %c0_26] : memref<34x32xf32, #tpu.memory_space<vmem>>, vector<34x32xf32>
    %42 = arith.mulf %40, %41 : vector<34x32xf32>
    %c0_27 = arith.constant 0 : index
    %c0_28 = arith.constant 0 : index
    %c0_29 = arith.constant 0 : index
    %43 = vector.load %arg12[%c0_27, %c0_28, %c0_29] : memref<1x128x32xbf16, #tpu.memory_space<vmem>>, vector<1x128x32xbf16>
    %44 = vector.shape_cast %43 : vector<1x128x32xbf16> to vector<128x32xbf16>
    %cst_30 = arith.constant dense<0.000000e+00> : vector<34x32xf32>
    %45 = tpu.matmul %26, %44, %cst_30 {dimension_numbers = #tpu.dot_dimension_numbers<[1], [0], [0], [1], [0, 0, 1, 1], [], []>} : vector<34x128xbf16>, vector<128x32xbf16>, vector<34x32xf32> -> vector<34x32xf32>
    %c0_31 = arith.constant 0 : index
    %c0_32 = arith.constant 0 : index
    %46 = vector.load %arg7[%c0_31, %c0_32] : memref<34x32xf32, #tpu.memory_space<vmem>>, vector<34x32xf32>
    %47 = arith.mulf %45, %46 : vector<34x32xf32>
    %48 = arith.addf %42, %47 : vector<34x32xf32>
    %c0_33 = arith.constant 0 : index
    %c0_34 = arith.constant 0 : index
    %c0_35 = arith.constant 0 : index
    %49 = vector.load %arg13[%c0_33, %c0_34, %c0_35] : memref<1x128x32xbf16, #tpu.memory_space<vmem>>, vector<1x128x32xbf16>
    %50 = vector.shape_cast %49 : vector<1x128x32xbf16> to vector<128x32xbf16>
    %cst_36 = arith.constant dense<0.000000e+00> : vector<34x32xf32>
    %51 = tpu.matmul %26, %50, %cst_36 {dimension_numbers = #tpu.dot_dimension_numbers<[1], [0], [0], [1], [0, 0, 1, 1], [], []>} : vector<34x128xbf16>, vector<128x32xbf16>, vector<34x32xf32> -> vector<34x32xf32>
    %c0_37 = arith.constant 0 : index
    %c0_38 = arith.constant 0 : index
    %c0_39 = arith.constant 0 : index
    %52 = vector.load %arg14[%c0_37, %c0_38, %c0_39] : memref<1x2x32xf32, #tpu.memory_space<vmem>>, vector<1x2x32xf32>
    %53 = vector.shape_cast %52 : vector<1x2x32xf32> to vector<2x32xf32>
    %54 = vector.extract_strided_slice %37 {offsets = [0, 0], sizes = [17, 32], strides = [1, 1]} : vector<34x128xf32> to vector<17x32xf32>
    %c0_40 = arith.constant 0 : index
    %c0_41 = arith.constant 0 : index
    %55 = vector.load %arg27[%c0_40, %c0_41] : memref<68x32xf32, #tpu.memory_space<vmem>>, vector<17x32xf32>
    tpu.vector_store %arg27[%c0_40, %c0_41], %54 {strides = array<i32>} : memref<68x32xf32, #tpu.memory_space<vmem>>, vector<17x32xf32>,
    %56 = vector.extract_strided_slice %37 {offsets = [0, 32], sizes = [17, 32], strides = [1, 1]} : vector<34x128xf32> to vector<17x32xf32>
    %c17 = arith.constant 17 : index
    %c0_42 = arith.constant 0 : index
    %57 = vector.load %arg27[%c17, %c0_42] : memref<68x32xf32, #tpu.memory_space<vmem>>, vector<17x32xf32>
    tpu.vector_store %arg27[%c17, %c0_42], %56 {strides = array<i32>} : memref<68x32xf32, #tpu.memory_space<vmem>>, vector<17x32xf32>,
    %58 = vector.extract_strided_slice %37 {offsets = [0, 64], sizes = [17, 32], strides = [1, 1]} : vector<34x128xf32> to vector<17x32xf32>
    %c34 = arith.constant 34 : index
    %c0_43 = arith.constant 0 : index
    %59 = vector.load %arg27[%c34, %c0_43] : memref<68x32xf32, #tpu.memory_space<vmem>>, vector<17x32xf32>
    tpu.vector_store %arg27[%c34, %c0_43], %58 {strides = array<i32>} : memref<68x32xf32, #tpu.memory_space<vmem>>, vector<17x32xf32>,
    %60 = vector.extract_strided_slice %37 {offsets = [0, 96], sizes = [17, 32], strides = [1, 1]} : vector<34x128xf32> to vector<17x32xf32>
    %c51 = arith.constant 51 : index
    %c0_44 = arith.constant 0 : index
    %61 = vector.load %arg27[%c51, %c0_44] : memref<68x32xf32, #tpu.memory_space<vmem>>, vector<17x32xf32>
    tpu.vector_store %arg27[%c51, %c0_44], %60 {strides = array<i32>} : memref<68x32xf32, #tpu.memory_space<vmem>>, vector<17x32xf32>,
    %c0_45 = arith.constant 0 : index
    %c0_46 = arith.constant 0 : index
    %62 = vector.load %arg27[%c0_45, %c0_46] : memref<68x32xf32, #tpu.memory_space<vmem>>, vector<68x32xf32>
    %63 = arith.mulf %62, %62 : vector<68x32xf32>
    %cst_47 = arith.constant dense<0.000000e+00> : vector<68xf32>
    %64 = vector.multi_reduction <add>, %63, %cst_47 [1] : vector<68x32xf32> to vector<68xf32>
    %65 = vector.shape_cast %64 : vector<68xf32> to vector<68x1xf32>
    %cst_48 = arith.constant 9.99999996E-13 : f32
    %66 = vector.broadcast %cst_48 : f32 to vector<68x1xf32>
    %67 = arith.addf %65, %66 : vector<68x1xf32>
    %68 = math.rsqrt %67 : vector<68x1xf32>
    %69 = vector.broadcast %68 : vector<68x1xf32> to vector<68x32xf32>
    %70 = arith.mulf %62, %69 : vector<68x32xf32>
    %cst_49 = arith.constant 4.000000e+00 : f32
    %71 = vector.broadcast %cst_49 : f32 to vector<68x32xf32>
    %72 = arith.mulf %70, %71 : vector<68x32xf32>
    %73 = arith.truncf %72 : vector<68x32xf32> to vector<68x32xbf16>
    %74 = vector.extract_strided_slice %48 {offsets = [0, 0], sizes = [17, 32], strides = [1, 1]} : vector<34x32xf32> to vector<17x32xf32>
    %c0_50 = arith.constant 0 : index
    %c0_51 = arith.constant 0 : index
    %75 = vector.load %arg25[%c0_50, %c0_51] : memref<24x32xf32, #tpu.memory_space<vmem>>, vector<17x32xf32>
    tpu.vector_store %arg25[%c0_50, %c0_51], %74 {strides = array<i32>} : memref<24x32xf32, #tpu.memory_space<vmem>>, vector<17x32xf32>,
    %76 = vector.extract_strided_slice %51 {offsets = [0, 0], sizes = [17, 32], strides = [1, 1]} : vector<34x32xf32> to vector<17x32xf32>
    %c0_52 = arith.constant 0 : index
    %c0_53 = arith.constant 0 : index
    %77 = vector.load %arg26[%c0_52, %c0_53] : memref<24x32xf32, #tpu.memory_space<vmem>>, vector<17x32xf32>
    tpu.vector_store %arg26[%c0_52, %c0_53], %76 {strides = array<i32>} : memref<24x32xf32, #tpu.memory_space<vmem>>, vector<17x32xf32>,
    %78 = vector.extract_strided_slice %53 {offsets = [0, 0], sizes = [1, 32], strides = [1, 1]} : vector<2x32xf32> to vector<1x32xf32>
    %c17_54 = arith.constant 17 : index
    %c0_55 = arith.constant 0 : index
    %79 = vector.load %arg25[%c17_54, %c0_55] : memref<24x32xf32, #tpu.memory_space<vmem>>, vector<1x32xf32>
    tpu.vector_store %arg25[%c17_54, %c0_55], %78 {strides = array<i32>} : memref<24x32xf32, #tpu.memory_space<vmem>>, vector<1x32xf32>,
    %80 = vector.extract_strided_slice %53 {offsets = [1, 0], sizes = [1, 32], strides = [1, 1]} : vector<2x32xf32> to vector<1x32xf32>
    %c17_56 = arith.constant 17 : index
    %c0_57 = arith.constant 0 : index
    %81 = vector.load %arg26[%c17_56, %c0_57] : memref<24x32xf32, #tpu.memory_space<vmem>>, vector<1x32xf32>
    tpu.vector_store %arg26[%c17_56, %c0_57], %80 {strides = array<i32>} : memref<24x32xf32, #tpu.memory_space<vmem>>, vector<1x32xf32>,
    %c0_58 = arith.constant 0 : index
    %c0_59 = arith.constant 0 : index
    %82 = vector.load %arg25[%c0_58, %c0_59] : memref<24x32xf32, #tpu.memory_space<vmem>>, vector<24x32xf32>
    %83 = arith.mulf %82, %82 : vector<24x32xf32>
    %cst_60 = arith.constant dense<0.000000e+00> : vector<24xf32>
    %84 = vector.multi_reduction <add>, %83, %cst_60 [1] : vector<24x32xf32> to vector<24xf32>
    %85 = vector.shape_cast %84 : vector<24xf32> to vector<24x1xf32>
    %cst_61 = arith.constant 9.99999996E-13 : f32
    %86 = vector.broadcast %cst_61 : f32 to vector<24x1xf32>
    %87 = arith.addf %85, %86 : vector<24x1xf32>
    %88 = math.rsqrt %87 : vector<24x1xf32>
    %89 = vector.broadcast %88 : vector<24x1xf32> to vector<24x32xf32>
    %90 = arith.mulf %82, %89 : vector<24x32xf32>
    %cst_62 = arith.constant 4.000000e+00 : f32
    %91 = vector.broadcast %cst_62 : f32 to vector<24x32xf32>
    %92 = arith.mulf %90, %91 : vector<24x32xf32>
    %93 = arith.truncf %92 : vector<24x32xf32> to vector<24x32xbf16>
    %cst_63 = arith.constant dense<0.000000e+00> : vector<68x24xf32>
    %94 = tpu.matmul %73, %93, %cst_63 {dimension_numbers = #tpu.dot_dimension_numbers<[1], [1], [0], [0], [0, 0, 1, 0], [], []>} : vector<68x32xbf16>, vector<24x32xbf16>, vector<68x24xf32> -> vector<68x24xf32>
    %c0_64 = arith.constant 0 : index
    %c0_65 = arith.constant 0 : index
    %95 = vector.load %arg3[%c0_64, %c0_65] : memref<68x24xf32, #tpu.memory_space<vmem>>, vector<68x24xf32>
    %96 = arith.addf %94, %95 : vector<68x24xf32>
    %97 = math.exp %96 : vector<68x24xf32>
    %cst_66 = arith.constant dense<0.000000e+00> : vector<68xf32>
    %98 = vector.multi_reduction <add>, %97, %cst_66 [1] : vector<68x24xf32> to vector<68xf32>
    %99 = vector.shape_cast %98 : vector<68xf32> to vector<68x1xf32>
    %100 = tpu.reciprocal %99 {approx = true} : vector<68x1xf32> -> vector<68x1xf32>
    %101 = arith.truncf %97 : vector<68x24xf32> to vector<68x24xbf16>
    %c0_67 = arith.constant 0 : index
    %c0_68 = arith.constant 0 : index
    %102 = vector.load %arg26[%c0_67, %c0_68] : memref<24x32xf32, #tpu.memory_space<vmem>>, vector<24x32xf32>
    %103 = arith.truncf %102 : vector<24x32xf32> to vector<24x32xbf16>
    %cst_69 = arith.constant dense<0.000000e+00> : vector<68x32xf32>
    %104 = tpu.matmul %101, %103, %cst_69 {dimension_numbers = #tpu.dot_dimension_numbers<[1], [0], [0], [1], [0, 0, 1, 1], [], []>} : vector<68x24xbf16>, vector<24x32xbf16>, vector<68x32xf32> -> vector<68x32xf32>
    %105 = vector.broadcast %100 : vector<68x1xf32> to vector<68x32xf32>
    %106 = arith.mulf %104, %105 : vector<68x32xf32>
    %107 = vector.extract_strided_slice %106 {offsets = [0, 0], sizes = [17, 32], strides = [1, 1]} : vector<68x32xf32> to vector<17x32xf32>
    %c0_70 = arith.constant 0 : index
    %c0_71 = arith.constant 0 : index
    %108 = vector.load %arg28[%c0_70, %c0_71] : memref<34x128xf32, #tpu.memory_space<vmem>>, vector<17x32xf32>
    tpu.vector_store %arg28[%c0_70, %c0_71], %107 {strides = array<i32>} : memref<34x128xf32, #tpu.memory_space<vmem>>, vector<17x32xf32>,
    %109 = vector.extract_strided_slice %106 {offsets = [17, 0], sizes = [17, 32], strides = [1, 1]} : vector<68x32xf32> to vector<17x32xf32>
    %c0_72 = arith.constant 0 : index
    %c32 = arith.constant 32 : index
    %110 = vector.load %arg28[%c0_72, %c32] : memref<34x128xf32, #tpu.memory_space<vmem>>, vector<17x32xf32>
    tpu.vector_store %arg28[%c0_72, %c32], %109 {strides = array<i32>} : memref<34x128xf32, #tpu.memory_space<vmem>>, vector<17x32xf32>,
    %111 = vector.extract_strided_slice %106 {offsets = [34, 0], sizes = [17, 32], strides = [1, 1]} : vector<68x32xf32> to vector<17x32xf32>
    %c0_73 = arith.constant 0 : index
    %c64 = arith.constant 64 : index
    %112 = vector.load %arg28[%c0_73, %c64] : memref<34x128xf32, #tpu.memory_space<vmem>>, vector<17x32xf32>
    tpu.vector_store %arg28[%c0_73, %c64], %111 {strides = array<i32>} : memref<34x128xf32, #tpu.memory_space<vmem>>, vector<17x32xf32>,
    %113 = vector.extract_strided_slice %106 {offsets = [51, 0], sizes = [17, 32], strides = [1, 1]} : vector<68x32xf32> to vector<17x32xf32>
    %c0_74 = arith.constant 0 : index
    %c96 = arith.constant 96 : index
    %114 = vector.load %arg28[%c0_74, %c96] : memref<34x128xf32, #tpu.memory_space<vmem>>, vector<17x32xf32>
    tpu.vector_store %arg28[%c0_74, %c96], %113 {strides = array<i32>} : memref<34x128xf32, #tpu.memory_space<vmem>>, vector<17x32xf32>,
    %115 = vector.extract_strided_slice %37 {offsets = [17, 0], sizes = [17, 32], strides = [1, 1]} : vector<34x128xf32> to vector<17x32xf32>
    %c0_75 = arith.constant 0 : index
    %c0_76 = arith.constant 0 : index
    %116 = vector.load %arg27[%c0_75, %c0_76] : memref<68x32xf32, #tpu.memory_space<vmem>>, vector<17x32xf32>
    tpu.vector_store %arg27[%c0_75, %c0_76], %115 {strides = array<i32>} : memref<68x32xf32, #tpu.memory_space<vmem>>, vector<17x32xf32>,
    %117 = vector.extract_strided_slice %37 {offsets = [17, 32], sizes = [17, 32], strides = [1, 1]} : vector<34x128xf32> to vector<17x32xf32>
    %c17_77 = arith.constant 17 : index
    %c0_78 = arith.constant 0 : index
    %118 = vector.load %arg27[%c17_77, %c0_78] : memref<68x32xf32, #tpu.memory_space<vmem>>, vector<17x32xf32>
    tpu.vector_store %arg27[%c17_77, %c0_78], %117 {strides = array<i32>} : memref<68x32xf32, #tpu.memory_space<vmem>>, vector<17x32xf32>,
    %119 = vector.extract_strided_slice %37 {offsets = [17, 64], sizes = [17, 32], strides = [1, 1]} : vector<34x128xf32> to vector<17x32xf32>
    %c34_79 = arith.constant 34 : index
    %c0_80 = arith.constant 0 : index
    %120 = vector.load %arg27[%c34_79, %c0_80] : memref<68x32xf32, #tpu.memory_space<vmem>>, vector<17x32xf32>
    tpu.vector_store %arg27[%c34_79, %c0_80], %119 {strides = array<i32>} : memref<68x32xf32, #tpu.memory_space<vmem>>, vector<17x32xf32>,
    %121 = vector.extract_strided_slice %37 {offsets = [17, 96], sizes = [17, 32], strides = [1, 1]} : vector<34x128xf32> to vector<17x32xf32>
    %c51_81 = arith.constant 51 : index
    %c0_82 = arith.constant 0 : index
    %122 = vector.load %arg27[%c51_81, %c0_82] : memref<68x32xf32, #tpu.memory_space<vmem>>, vector<17x32xf32>
    tpu.vector_store %arg27[%c51_81, %c0_82], %121 {strides = array<i32>} : memref<68x32xf32, #tpu.memory_space<vmem>>, vector<17x32xf32>,
    %c0_83 = arith.constant 0 : index
    %c0_84 = arith.constant 0 : index
    %123 = vector.load %arg27[%c0_83, %c0_84] : memref<68x32xf32, #tpu.memory_space<vmem>>, vector<68x32xf32>
    %124 = arith.mulf %123, %123 : vector<68x32xf32>
    %cst_85 = arith.constant dense<0.000000e+00> : vector<68xf32>
    %125 = vector.multi_reduction <add>, %124, %cst_85 [1] : vector<68x32xf32> to vector<68xf32>
    %126 = vector.shape_cast %125 : vector<68xf32> to vector<68x1xf32>
    %cst_86 = arith.constant 9.99999996E-13 : f32
    %127 = vector.broadcast %cst_86 : f32 to vector<68x1xf32>
    %128 = arith.addf %126, %127 : vector<68x1xf32>
    %129 = math.rsqrt %128 : vector<68x1xf32>
    %130 = vector.broadcast %129 : vector<68x1xf32> to vector<68x32xf32>
    %131 = arith.mulf %123, %130 : vector<68x32xf32>
    %cst_87 = arith.constant 4.000000e+00 : f32
    %132 = vector.broadcast %cst_87 : f32 to vector<68x32xf32>
    %133 = arith.mulf %131, %132 : vector<68x32xf32>
    %134 = arith.truncf %133 : vector<68x32xf32> to vector<68x32xbf16>
    %135 = vector.extract_strided_slice %48 {offsets = [17, 0], sizes = [17, 32], strides = [1, 1]} : vector<34x32xf32> to vector<17x32xf32>
    %c0_88 = arith.constant 0 : index
    %c0_89 = arith.constant 0 : index
    %136 = vector.load %arg25[%c0_88, %c0_89] : memref<24x32xf32, #tpu.memory_space<vmem>>, vector<17x32xf32>
    tpu.vector_store %arg25[%c0_88, %c0_89], %135 {strides = array<i32>} : memref<24x32xf32, #tpu.memory_space<vmem>>, vector<17x32xf32>,
    %137 = vector.extract_strided_slice %51 {offsets = [17, 0], sizes = [17, 32], strides = [1, 1]} : vector<34x32xf32> to vector<17x32xf32>
    %c0_90 = arith.constant 0 : index
    %c0_91 = arith.constant 0 : index
    %138 = vector.load %arg26[%c0_90, %c0_91] : memref<24x32xf32, #tpu.memory_space<vmem>>, vector<17x32xf32>
    tpu.vector_store %arg26[%c0_90, %c0_91], %137 {strides = array<i32>} : memref<24x32xf32, #tpu.memory_space<vmem>>, vector<17x32xf32>,
    %139 = vector.extract_strided_slice %53 {offsets = [0, 0], sizes = [1, 32], strides = [1, 1]} : vector<2x32xf32> to vector<1x32xf32>
    %c17_92 = arith.constant 17 : index
    %c0_93 = arith.constant 0 : index
    %140 = vector.load %arg25[%c17_92, %c0_93] : memref<24x32xf32, #tpu.memory_space<vmem>>, vector<1x32xf32>
    tpu.vector_store %arg25[%c17_92, %c0_93], %139 {strides = array<i32>} : memref<24x32xf32, #tpu.memory_space<vmem>>, vector<1x32xf32>,
    %141 = vector.extract_strided_slice %53 {offsets = [1, 0], sizes = [1, 32], strides = [1, 1]} : vector<2x32xf32> to vector<1x32xf32>
    %c17_94 = arith.constant 17 : index
    %c0_95 = arith.constant 0 : index
    %142 = vector.load %arg26[%c17_94, %c0_95] : memref<24x32xf32, #tpu.memory_space<vmem>>, vector<1x32xf32>
    tpu.vector_store %arg26[%c17_94, %c0_95], %141 {strides = array<i32>} : memref<24x32xf32, #tpu.memory_space<vmem>>, vector<1x32xf32>,
    %c0_96 = arith.constant 0 : index
    %c0_97 = arith.constant 0 : index
    %143 = vector.load %arg25[%c0_96, %c0_97] : memref<24x32xf32, #tpu.memory_space<vmem>>, vector<24x32xf32>
    %144 = arith.mulf %143, %143 : vector<24x32xf32>
    %cst_98 = arith.constant dense<0.000000e+00> : vector<24xf32>
    %145 = vector.multi_reduction <add>, %144, %cst_98 [1] : vector<24x32xf32> to vector<24xf32>
    %146 = vector.shape_cast %145 : vector<24xf32> to vector<24x1xf32>
    %cst_99 = arith.constant 9.99999996E-13 : f32
    %147 = vector.broadcast %cst_99 : f32 to vector<24x1xf32>
    %148 = arith.addf %146, %147 : vector<24x1xf32>
    %149 = math.rsqrt %148 : vector<24x1xf32>
    %150 = vector.broadcast %149 : vector<24x1xf32> to vector<24x32xf32>
    %151 = arith.mulf %143, %150 : vector<24x32xf32>
    %cst_100 = arith.constant 4.000000e+00 : f32
    %152 = vector.broadcast %cst_100 : f32 to vector<24x32xf32>
    %153 = arith.mulf %151, %152 : vector<24x32xf32>
    %154 = arith.truncf %153 : vector<24x32xf32> to vector<24x32xbf16>
    %cst_101 = arith.constant dense<0.000000e+00> : vector<68x24xf32>
    %155 = tpu.matmul %134, %154, %cst_101 {dimension_numbers = #tpu.dot_dimension_numbers<[1], [1], [0], [0], [0, 0, 1, 0], [], []>} : vector<68x32xbf16>, vector<24x32xbf16>, vector<68x24xf32> -> vector<68x24xf32>
    %c0_102 = arith.constant 0 : index
    %c0_103 = arith.constant 0 : index
    %156 = vector.load %arg3[%c0_102, %c0_103] : memref<68x24xf32, #tpu.memory_space<vmem>>, vector<68x24xf32>
    %157 = arith.addf %155, %156 : vector<68x24xf32>
    %158 = math.exp %157 : vector<68x24xf32>
    %cst_104 = arith.constant dense<0.000000e+00> : vector<68xf32>
    %159 = vector.multi_reduction <add>, %158, %cst_104 [1] : vector<68x24xf32> to vector<68xf32>
    %160 = vector.shape_cast %159 : vector<68xf32> to vector<68x1xf32>
    %161 = tpu.reciprocal %160 {approx = true} : vector<68x1xf32> -> vector<68x1xf32>
    %162 = arith.truncf %158 : vector<68x24xf32> to vector<68x24xbf16>
    %c0_105 = arith.constant 0 : index
    %c0_106 = arith.constant 0 : index
    %163 = vector.load %arg26[%c0_105, %c0_106] : memref<24x32xf32, #tpu.memory_space<vmem>>, vector<24x32xf32>
    %164 = arith.truncf %163 : vector<24x32xf32> to vector<24x32xbf16>
    %cst_107 = arith.constant dense<0.000000e+00> : vector<68x32xf32>
    %165 = tpu.matmul %162, %164, %cst_107 {dimension_numbers = #tpu.dot_dimension_numbers<[1], [0], [0], [1], [0, 0, 1, 1], [], []>} : vector<68x24xbf16>, vector<24x32xbf16>, vector<68x32xf32> -> vector<68x32xf32>
    %166 = vector.broadcast %161 : vector<68x1xf32> to vector<68x32xf32>
    %167 = arith.mulf %165, %166 : vector<68x32xf32>
    %168 = vector.extract_strided_slice %167 {offsets = [0, 0], sizes = [17, 32], strides = [1, 1]} : vector<68x32xf32> to vector<17x32xf32>
    %c17_108 = arith.constant 17 : index
    %c0_109 = arith.constant 0 : index
    %169 = vector.load %arg28[%c17_108, %c0_109] : memref<34x128xf32, #tpu.memory_space<vmem>>, vector<17x32xf32>
    tpu.vector_store %arg28[%c17_108, %c0_109], %168 {strides = array<i32>} : memref<34x128xf32, #tpu.memory_space<vmem>>, vector<17x32xf32>,
    %170 = vector.extract_strided_slice %167 {offsets = [17, 0], sizes = [17, 32], strides = [1, 1]} : vector<68x32xf32> to vector<17x32xf32>
    %c17_110 = arith.constant 17 : index
    %c32_111 = arith.constant 32 : index
    %171 = vector.load %arg28[%c17_110, %c32_111] : memref<34x128xf32, #tpu.memory_space<vmem>>, vector<17x32xf32>
    tpu.vector_store %arg28[%c17_110, %c32_111], %170 {strides = array<i32>} : memref<34x128xf32, #tpu.memory_space<vmem>>, vector<17x32xf32>,
    %172 = vector.extract_strided_slice %167 {offsets = [34, 0], sizes = [17, 32], strides = [1, 1]} : vector<68x32xf32> to vector<17x32xf32>
    %c17_112 = arith.constant 17 : index
    %c64_113 = arith.constant 64 : index
    %173 = vector.load %arg28[%c17_112, %c64_113] : memref<34x128xf32, #tpu.memory_space<vmem>>, vector<17x32xf32>
    tpu.vector_store %arg28[%c17_112, %c64_113], %172 {strides = array<i32>} : memref<34x128xf32, #tpu.memory_space<vmem>>, vector<17x32xf32>,
    %174 = vector.extract_strided_slice %167 {offsets = [51, 0], sizes = [17, 32], strides = [1, 1]} : vector<68x32xf32> to vector<17x32xf32>
    %c17_114 = arith.constant 17 : index
    %c96_115 = arith.constant 96 : index
    %175 = vector.load %arg28[%c17_114, %c96_115] : memref<34x128xf32, #tpu.memory_space<vmem>>, vector<17x32xf32>
    tpu.vector_store %arg28[%c17_114, %c96_115], %174 {strides = array<i32>} : memref<34x128xf32, #tpu.memory_space<vmem>>, vector<17x32xf32>,
    %c0_116 = arith.constant 0 : index
    %c0_117 = arith.constant 0 : index
    %176 = vector.load %arg28[%c0_116, %c0_117] : memref<34x128xf32, #tpu.memory_space<vmem>>, vector<34x128xf32>
    %177 = arith.truncf %176 : vector<34x128xf32> to vector<34x128xbf16>
    %c0_118 = arith.constant 0 : index
    %c0_119 = arith.constant 0 : index
    %c0_120 = arith.constant 0 : index
    %178 = vector.load %arg15[%c0_118, %c0_119, %c0_120] : memref<1x128x128xbf16, #tpu.memory_space<vmem>>, vector<1x128x128xbf16>
    %179 = vector.shape_cast %178 : vector<1x128x128xbf16> to vector<128x128xbf16>
    %cst_121 = arith.constant dense<0.000000e+00> : vector<34x128xf32>
    %180 = tpu.matmul %177, %179, %cst_121 {dimension_numbers = #tpu.dot_dimension_numbers<[1], [0], [0], [1], [0, 0, 1, 1], [], []>} : vector<34x128xbf16>, vector<128x128xbf16>, vector<34x128xf32> -> vector<34x128xf32>
    %c0_122 = arith.constant 0 : index
    %c0_123 = arith.constant 0 : index
    %c0_124 = arith.constant 0 : index
    %181 = vector.load %arg16[%c0_122, %c0_123, %c0_124] : memref<1x1x128xf32, #tpu.memory_space<vmem>>, vector<1x1x128xf32>
    %182 = vector.shape_cast %181 : vector<1x1x128xf32> to vector<1x128xf32>
    %cst_125 = arith.constant dense<0.000000e+00> : vector<34xf32>
    %183 = vector.multi_reduction <add>, %180, %cst_125 [1] : vector<34x128xf32> to vector<34xf32>
    %184 = vector.shape_cast %183 : vector<34xf32> to vector<34x1xf32>
    %cst_126 = arith.constant 1.280000e+02 : f32
    %185 = vector.broadcast %cst_126 : f32 to vector<34x1xf32>
    %186 = arith.divf %184, %185 : vector<34x1xf32>
    %187 = vector.broadcast %186 : vector<34x1xf32> to vector<34x128xf32>
    %188 = arith.subf %180, %187 : vector<34x128xf32>
    %189 = arith.mulf %188, %188 : vector<34x128xf32>
    %cst_127 = arith.constant dense<0.000000e+00> : vector<34xf32>
    %190 = vector.multi_reduction <add>, %189, %cst_127 [1] : vector<34x128xf32> to vector<34xf32>
    %191 = vector.shape_cast %190 : vector<34xf32> to vector<34x1xf32>
    %cst_128 = arith.constant 1.280000e+02 : f32
    %192 = vector.broadcast %cst_128 : f32 to vector<34x1xf32>
    %193 = arith.divf %191, %192 : vector<34x1xf32>
    %194 = vector.broadcast %186 : vector<34x1xf32> to vector<34x128xf32>
    %195 = arith.subf %180, %194 : vector<34x128xf32>
    %cst_129 = arith.constant 9.99999974E-6 : f32
    %196 = vector.broadcast %cst_129 : f32 to vector<34x1xf32>
    %197 = arith.addf %193, %196 : vector<34x1xf32>
    %198 = math.rsqrt %197 : vector<34x1xf32>
    %199 = vector.broadcast %198 : vector<34x1xf32> to vector<34x128xf32>
    %200 = arith.mulf %195, %199 : vector<34x128xf32>
    %201 = vector.broadcast %182 : vector<1x128xf32> to vector<34x128xf32>
    %202 = arith.mulf %200, %201 : vector<34x128xf32>
    %203 = arith.addf %3, %202 : vector<34x128xf32>
    %c0_130 = arith.constant 0 : index
    %c0_131 = arith.constant 0 : index
    %c0_132 = arith.constant 0 : index
    %204 = vector.load %arg17[%c0_130, %c0_131, %c0_132] : memref<1x1x128xf32, #tpu.memory_space<vmem>>, vector<1x1x128xf32>
    %205 = vector.shape_cast %204 : vector<1x1x128xf32> to vector<1x128xf32>
    %cst_133 = arith.constant dense<0.000000e+00> : vector<34xf32>
    %206 = vector.multi_reduction <add>, %203, %cst_133 [1] : vector<34x128xf32> to vector<34xf32>
    %207 = vector.shape_cast %206 : vector<34xf32> to vector<34x1xf32>
    %cst_134 = arith.constant 1.280000e+02 : f32
    %208 = vector.broadcast %cst_134 : f32 to vector<34x1xf32>
    %209 = arith.divf %207, %208 : vector<34x1xf32>
    %210 = vector.broadcast %209 : vector<34x1xf32> to vector<34x128xf32>
    %211 = arith.subf %203, %210 : vector<34x128xf32>
    %212 = arith.mulf %211, %211 : vector<34x128xf32>
    %cst_135 = arith.constant dense<0.000000e+00> : vector<34xf32>
    %213 = vector.multi_reduction <add>, %212, %cst_135 [1] : vector<34x128xf32> to vector<34xf32>
    %214 = vector.shape_cast %213 : vector<34xf32> to vector<34x1xf32>
    %cst_136 = arith.constant 1.280000e+02 : f32
    %215 = vector.broadcast %cst_136 : f32 to vector<34x1xf32>
    %216 = arith.divf %214, %215 : vector<34x1xf32>
    %217 = vector.broadcast %209 : vector<34x1xf32> to vector<34x128xf32>
    %218 = arith.subf %203, %217 : vector<34x128xf32>
    %cst_137 = arith.constant 9.99999974E-6 : f32
    %219 = vector.broadcast %cst_137 : f32 to vector<34x1xf32>
    %220 = arith.addf %216, %219 : vector<34x1xf32>
    %221 = math.rsqrt %220 : vector<34x1xf32>
    %222 = vector.broadcast %221 : vector<34x1xf32> to vector<34x128xf32>
    %223 = arith.mulf %218, %222 : vector<34x128xf32>
    %224 = vector.broadcast %205 : vector<1x128xf32> to vector<34x128xf32>
    %225 = arith.mulf %223, %224 : vector<34x128xf32>
    %226 = arith.truncf %225 : vector<34x128xf32> to vector<34x128xbf16>
    %c0_138 = arith.constant 0 : index
    %c0_139 = arith.constant 0 : index
    %c0_140 = arith.constant 0 : index
    %227 = vector.load %arg18[%c0_138, %c0_139, %c0_140] : memref<1x128x512xbf16, #tpu.memory_space<vmem>>, vector<1x128x512xbf16>
    %228 = vector.shape_cast %227 : vector<1x128x512xbf16> to vector<128x512xbf16>
    %cst_141 = arith.constant dense<0.000000e+00> : vector<34x512xf32>
    %229 = tpu.matmul %226, %228, %cst_141 {dimension_numbers = #tpu.dot_dimension_numbers<[1], [0], [0], [1], [0, 0, 1, 1], [], []>} : vector<34x128xbf16>, vector<128x512xbf16>, vector<34x512xf32> -> vector<34x512xf32>
    %c0_142 = arith.constant 0 : index
    %c0_143 = arith.constant 0 : index
    %c0_144 = arith.constant 0 : index
    %230 = vector.load %arg19[%c0_142, %c0_143, %c0_144] : memref<1x128x512xbf16, #tpu.memory_space<vmem>>, vector<1x128x512xbf16>
    %231 = vector.shape_cast %230 : vector<1x128x512xbf16> to vector<128x512xbf16>
    %cst_145 = arith.constant dense<0.000000e+00> : vector<34x512xf32>
    %232 = tpu.matmul %226, %231, %cst_145 {dimension_numbers = #tpu.dot_dimension_numbers<[1], [0], [0], [1], [0, 0, 1, 1], [], []>} : vector<34x128xbf16>, vector<128x512xbf16>, vector<34x512xf32> -> vector<34x512xf32>
    %233 = arith.negf %232 : vector<34x512xf32>
    %234 = math.exp %233 : vector<34x512xf32>
    %cst_146 = arith.constant 1.000000e+00 : f32
    %235 = vector.broadcast %cst_146 : f32 to vector<34x512xf32>
    %236 = arith.addf %235, %234 : vector<34x512xf32>
    %237 = arith.divf %235, %236 : vector<34x512xf32>
    %238 = arith.mulf %232, %237 : vector<34x512xf32>
    %239 = arith.mulf %229, %238 : vector<34x512xf32>
    %240 = arith.truncf %239 : vector<34x512xf32> to vector<34x512xbf16>
    %c0_147 = arith.constant 0 : index
    %c0_148 = arith.constant 0 : index
    %c0_149 = arith.constant 0 : index
    %241 = vector.load %arg20[%c0_147, %c0_148, %c0_149] : memref<1x512x128xbf16, #tpu.memory_space<vmem>>, vector<1x512x128xbf16>
    %242 = vector.shape_cast %241 : vector<1x512x128xbf16> to vector<512x128xbf16>
    %cst_150 = arith.constant dense<0.000000e+00> : vector<34x128xf32>
    %243 = tpu.matmul %240, %242, %cst_150 {dimension_numbers = #tpu.dot_dimension_numbers<[1], [0], [0], [1], [0, 0, 1, 1], [], []>} : vector<34x512xbf16>, vector<512x128xbf16>, vector<34x128xf32> -> vector<34x128xf32>
    %244 = arith.addf %203, %243 : vector<34x128xf32>
    %c0_151 = arith.constant 0 : index
    %c0_152 = arith.constant 0 : index
    %245 = vector.load %arg24[%c0_151, %c0_152] : memref<34x128xf32, #tpu.memory_space<vmem>>, vector<34x128xf32>
    tpu.vector_store %arg24[%c0_151, %c0_152], %244 {strides = array<i32>} : memref<34x128xf32, #tpu.memory_space<vmem>>, vector<34x128xf32>,
    %c1_i32 = arith.constant 1 : i32
    %246 = arith.cmpi eq, %arg1, %c1_i32 : i32
    %247 = arith.extui %246 : i1 to i32
    %c0_i32_153 = arith.constant 0 : i32
    %248 = arith.cmpi ne, %247, %c0_i32_153 : i32
    scf.if %248 {
      %249 = vector.extract_strided_slice %244 {offsets = [9, 0], sizes = [8, 128], strides = [1, 1]} : vector<34x128xf32> to vector<8x128xf32>
      %c0_154 = arith.constant 0 : index
      %c0_155 = arith.constant 0 : index
      %250 = vector.load %arg21[%c0_154, %c0_155] : memref<1x128xf32, #tpu.memory_space<vmem>>, vector<1x128xf32>
      %cst_156 = arith.constant dense<0xFF800000> : vector<8xf32>
      %251 = vector.multi_reduction <maximumf>, %249, %cst_156 [1] : vector<8x128xf32> to vector<8xf32>
      %252 = vector.shape_cast %251 : vector<8xf32> to vector<8x1xf32>
      %253 = vector.broadcast %252 : vector<8x1xf32> to vector<8x128xf32>
      %254 = arith.divf %249, %253 : vector<8x128xf32>
      %cst_157 = arith.constant dense<0.000000e+00> : vector<8xf32>
      %255 = vector.multi_reduction <add>, %254, %cst_157 [1] : vector<8x128xf32> to vector<8xf32>
      %256 = vector.shape_cast %255 : vector<8xf32> to vector<8x1xf32>
      %cst_158 = arith.constant 1.280000e+02 : f32
      %257 = vector.broadcast %cst_158 : f32 to vector<8x1xf32>
      %258 = arith.divf %256, %257 : vector<8x1xf32>
      %259 = vector.broadcast %258 : vector<8x1xf32> to vector<8x128xf32>
      %260 = arith.subf %254, %259 : vector<8x128xf32>
      %261 = arith.mulf %260, %260 : vector<8x128xf32>
      %cst_159 = arith.constant dense<0.000000e+00> : vector<8xf32>
      %262 = vector.multi_reduction <add>, %261, %cst_159 [1] : vector<8x128xf32> to vector<8xf32>
      %263 = vector.shape_cast %262 : vector<8xf32> to vector<8x1xf32>
      %cst_160 = arith.constant 1.280000e+02 : f32
      %264 = vector.broadcast %cst_160 : f32 to vector<8x1xf32>
      %265 = arith.divf %263, %264 : vector<8x1xf32>
      %266 = vector.broadcast %258 : vector<8x1xf32> to vector<8x128xf32>
      %267 = arith.subf %254, %266 : vector<8x128xf32>
      %cst_161 = arith.constant 9.99999974E-6 : f32
      %268 = vector.broadcast %cst_161 : f32 to vector<8x1xf32>
      %269 = arith.addf %265, %268 : vector<8x1xf32>
      %270 = math.rsqrt %269 : vector<8x1xf32>
      %271 = vector.broadcast %270 : vector<8x1xf32> to vector<8x128xf32>
      %272 = arith.mulf %267, %271 : vector<8x128xf32>
      %273 = vector.broadcast %250 : vector<1x128xf32> to vector<8x128xf32>
      %274 = arith.mulf %272, %273 : vector<8x128xf32>
      %275 = arith.truncf %274 : vector<8x128xf32> to vector<8x128xbf16>
      %c0_162 = arith.constant 0 : index
      %c0_163 = arith.constant 0 : index
      %276 = vector.load %arg22[%c0_162, %c0_163] : memref<128x128xbf16, #tpu.memory_space<vmem>>, vector<128x128xbf16>
      %cst_164 = arith.constant dense<0.000000e+00> : vector<8x128xf32>
      %277 = tpu.matmul %275, %276, %cst_164 {dimension_numbers = #tpu.dot_dimension_numbers<[1], [0], [0], [1], [0, 0, 1, 1], [], []>} : vector<8x128xbf16>, vector<128x128xbf16>, vector<8x128xf32> -> vector<8x128xf32>
      %c0_165 = arith.constant 0 : index
      %c0_166 = arith.constant 0 : index
      %c0_167 = arith.constant 0 : index
      %278 = vector.load %arg23[%c0_165, %c0_166, %c0_167] : memref<2x8x128xf32, #tpu.memory_space<vmem>>, vector<1x8x128xf32>
      %279 = vector.shape_cast %278 : vector<1x8x128xf32> to vector<8x128xf32>
      %280 = vector.shape_cast %277 : vector<8x128xf32> to vector<1x8x128xf32>
      tpu.vector_store %arg23[%c0_165, %c0_166, %c0_167], %280 {strides = array<i32>} : memref<2x8x128xf32, #tpu.memory_space<vmem>>, vector<1x8x128xf32>,
      %281 = vector.extract_strided_slice %244 {offsets = [26, 0], sizes = [8, 128], strides = [1, 1]} : vector<34x128xf32> to vector<8x128xf32>
      %c0_168 = arith.constant 0 : index
      %c0_169 = arith.constant 0 : index
      %282 = vector.load %arg21[%c0_168, %c0_169] : memref<1x128xf32, #tpu.memory_space<vmem>>, vector<1x128xf32>
      %cst_170 = arith.constant dense<0xFF800000> : vector<8xf32>
      %283 = vector.multi_reduction <maximumf>, %281, %cst_170 [1] : vector<8x128xf32> to vector<8xf32>
      %284 = vector.shape_cast %283 : vector<8xf32> to vector<8x1xf32>
      %285 = vector.broadcast %284 : vector<8x1xf32> to vector<8x128xf32>
      %286 = arith.divf %281, %285 : vector<8x128xf32>
      %cst_171 = arith.constant dense<0.000000e+00> : vector<8xf32>
      %287 = vector.multi_reduction <add>, %286, %cst_171 [1] : vector<8x128xf32> to vector<8xf32>
      %288 = vector.shape_cast %287 : vector<8xf32> to vector<8x1xf32>
      %cst_172 = arith.constant 1.280000e+02 : f32
      %289 = vector.broadcast %cst_172 : f32 to vector<8x1xf32>
      %290 = arith.divf %288, %289 : vector<8x1xf32>
      %291 = vector.broadcast %290 : vector<8x1xf32> to vector<8x128xf32>
      %292 = arith.subf %286, %291 : vector<8x128xf32>
      %293 = arith.mulf %292, %292 : vector<8x128xf32>
      %cst_173 = arith.constant dense<0.000000e+00> : vector<8xf32>
      %294 = vector.multi_reduction <add>, %293, %cst_173 [1] : vector<8x128xf32> to vector<8xf32>
      %295 = vector.shape_cast %294 : vector<8xf32> to vector<8x1xf32>
      %cst_174 = arith.constant 1.280000e+02 : f32
      %296 = vector.broadcast %cst_174 : f32 to vector<8x1xf32>
      %297 = arith.divf %295, %296 : vector<8x1xf32>
      %298 = vector.broadcast %290 : vector<8x1xf32> to vector<8x128xf32>
      %299 = arith.subf %286, %298 : vector<8x128xf32>
      %cst_175 = arith.constant 9.99999974E-6 : f32
      %300 = vector.broadcast %cst_175 : f32 to vector<8x1xf32>
      %301 = arith.addf %297, %300 : vector<8x1xf32>
      %302 = math.rsqrt %301 : vector<8x1xf32>
      %303 = vector.broadcast %302 : vector<8x1xf32> to vector<8x128xf32>
      %304 = arith.mulf %299, %303 : vector<8x128xf32>
      %305 = vector.broadcast %282 : vector<1x128xf32> to vector<8x128xf32>
      %306 = arith.mulf %304, %305 : vector<8x128xf32>
      %307 = arith.truncf %306 : vector<8x128xf32> to vector<8x128xbf16>
      %c0_176 = arith.constant 0 : index
      %c0_177 = arith.constant 0 : index
      %308 = vector.load %arg22[%c0_176, %c0_177] : memref<128x128xbf16, #tpu.memory_space<vmem>>, vector<128x128xbf16>
      %cst_178 = arith.constant dense<0.000000e+00> : vector<8x128xf32>
      %309 = tpu.matmul %307, %308, %cst_178 {dimension_numbers = #tpu.dot_dimension_numbers<[1], [0], [0], [1], [0, 0, 1, 1], [], []>} : vector<8x128xbf16>, vector<128x128xbf16>, vector<8x128xf32> -> vector<8x128xf32>
      %c1 = arith.constant 1 : index
      %c0_179 = arith.constant 0 : index
      %c0_180 = arith.constant 0 : index
      %310 = vector.load %arg23[%c1, %c0_179, %c0_180] : memref<2x8x128xf32, #tpu.memory_space<vmem>>, vector<1x8x128xf32>
      %311 = vector.shape_cast %310 : vector<1x8x128xf32> to vector<8x128xf32>
      %312 = vector.shape_cast %309 : vector<8x128xf32> to vector<1x8x128xf32>
      tpu.vector_store %arg23[%c1, %c0_179, %c0_180], %312 {strides = array<i32>} : memref<2x8x128xf32, #tpu.memory_space<vmem>>, vector<1x8x128xf32>,
    } else {
    }
    return
  }
  func.func @transform_0(%arg0: i32, %arg1: i32) -> (i32, i32, i32) {
    %c0_i32 = arith.constant 0 : i32
    %c0_i32_0 = arith.constant 0 : i32
    %c0_i32_1 = arith.constant 0 : i32
    return %arg0, %c0_i32, %c0_i32_0 : i32, i32, i32
  }
  func.func @transform_1(%arg0: i32, %arg1: i32) -> (i32, i32) {
    %c0_i32 = arith.constant 0 : i32
    %c0_i32_0 = arith.constant 0 : i32
    %c0_i32_1 = arith.constant 0 : i32
    return %c0_i32, %c0_i32_0 : i32, i32
  }
  func.func @transform_2(%arg0: i32, %arg1: i32) -> (i32, i32) {
    %c0_i32 = arith.constant 0 : i32
    %c0_i32_0 = arith.constant 0 : i32
    %c0_i32_1 = arith.constant 0 : i32
    return %c0_i32, %c0_i32_0 : i32, i32
  }
  func.func @transform_3(%arg0: i32, %arg1: i32) -> (i32, i32) {
    %c0_i32 = arith.constant 0 : i32
    %c0_i32_0 = arith.constant 0 : i32
    %c0_i32_1 = arith.constant 0 : i32
    return %c0_i32, %c0_i32_0 : i32, i32
  }
  func.func @transform_4(%arg0: i32, %arg1: i32) -> (i32, i32) {
    %c0_i32 = arith.constant 0 : i32
    %c0_i32_0 = arith.constant 0 : i32
    %c0_i32_1 = arith.constant 0 : i32
    return %c0_i32, %c0_i32_0 : i32, i32
  }
  func.func @transform_5(%arg0: i32, %arg1: i32) -> (i32, i32) {
    %c0_i32 = arith.constant 0 : i32
    %c0_i32_0 = arith.constant 0 : i32
    %c0_i32_1 = arith.constant 0 : i32
    return %c0_i32, %c0_i32_0 : i32, i32
  }
  func.func @transform_6(%arg0: i32, %arg1: i32) -> (i32, i32, i32) {
    %c0_i32 = arith.constant 0 : i32
    %c0_i32_0 = arith.constant 0 : i32
    %c0_i32_1 = arith.constant 0 : i32
    return %arg1, %c0_i32, %c0_i32_0 : i32, i32, i32
  }
  func.func @transform_7(%arg0: i32, %arg1: i32) -> (i32, i32, i32) {
    %c0_i32 = arith.constant 0 : i32
    %c0_i32_0 = arith.constant 0 : i32
    %c0_i32_1 = arith.constant 0 : i32
    return %arg1, %c0_i32, %c0_i32_0 : i32, i32, i32
  }
  func.func @transform_8(%arg0: i32, %arg1: i32) -> (i32, i32, i32) {
    %c0_i32 = arith.constant 0 : i32
    %c0_i32_0 = arith.constant 0 : i32
    %c0_i32_1 = arith.constant 0 : i32
    return %arg1, %c0_i32, %c0_i32_0 : i32, i32, i32
  }
  func.func @transform_9(%arg0: i32, %arg1: i32) -> (i32, i32, i32) {
    %c0_i32 = arith.constant 0 : i32
    %c0_i32_0 = arith.constant 0 : i32
    %c0_i32_1 = arith.constant 0 : i32
    return %arg1, %c0_i32, %c0_i32_0 : i32, i32, i32
  }
  func.func @transform_10(%arg0: i32, %arg1: i32) -> (i32, i32, i32) {
    %c0_i32 = arith.constant 0 : i32
    %c0_i32_0 = arith.constant 0 : i32
    %c0_i32_1 = arith.constant 0 : i32
    return %arg1, %c0_i32, %c0_i32_0 : i32, i32, i32
  }
  func.func @transform_11(%arg0: i32, %arg1: i32) -> (i32, i32, i32) {
    %c0_i32 = arith.constant 0 : i32
    %c0_i32_0 = arith.constant 0 : i32
    %c0_i32_1 = arith.constant 0 : i32
    return %arg1, %c0_i32, %c0_i32_0 : i32, i32, i32
  }
  func.func @transform_12(%arg0: i32, %arg1: i32) -> (i32, i32, i32) {
    %c0_i32 = arith.constant 0 : i32
    %c0_i32_0 = arith.constant 0 : i32
    %c0_i32_1 = arith.constant 0 : i32
    return %arg1, %c0_i32, %c0_i32_0 : i32, i32, i32
  }
  func.func @transform_13(%arg0: i32, %arg1: i32) -> (i32, i32, i32) {
    %c0_i32 = arith.constant 0 : i32
    %c0_i32_0 = arith.constant 0 : i32
    %c0_i32_1 = arith.constant 0 : i32
    return %arg1, %c0_i32, %c0_i32_0 : i32, i32, i32
  }
  func.func @transform_14(%arg0: i32, %arg1: i32) -> (i32, i32, i32) {
    %c0_i32 = arith.constant 0 : i32
    %c0_i32_0 = arith.constant 0 : i32
    %c0_i32_1 = arith.constant 0 : i32
    return %arg1, %c0_i32, %c0_i32_0 : i32, i32, i32
  }
  func.func @transform_15(%arg0: i32, %arg1: i32) -> (i32, i32, i32) {
    %c0_i32 = arith.constant 0 : i32
    %c0_i32_0 = arith.constant 0 : i32
    %c0_i32_1 = arith.constant 0 : i32
    return %arg1, %c0_i32, %c0_i32_0 : i32, i32, i32
  }
  func.func @transform_16(%arg0: i32, %arg1: i32) -> (i32, i32, i32) {
    %c0_i32 = arith.constant 0 : i32
    %c0_i32_0 = arith.constant 0 : i32
    %c0_i32_1 = arith.constant 0 : i32
    return %arg1, %c0_i32, %c0_i32_0 : i32, i32, i32
  }
  func.func @transform_17(%arg0: i32, %arg1: i32) -> (i32, i32, i32) {
    %c0_i32 = arith.constant 0 : i32
    %c0_i32_0 = arith.constant 0 : i32
    %c0_i32_1 = arith.constant 0 : i32
    return %arg1, %c0_i32, %c0_i32_0 : i32, i32, i32
  }
  func.func @transform_18(%arg0: i32, %arg1: i32) -> (i32, i32, i32) {
    %c0_i32 = arith.constant 0 : i32
    %c0_i32_0 = arith.constant 0 : i32
    %c0_i32_1 = arith.constant 0 : i32
    return %arg1, %c0_i32, %c0_i32_0 : i32, i32, i32
  }
  func.func @transform_19(%arg0: i32, %arg1: i32) -> (i32, i32) {
    %c0_i32 = arith.constant 0 : i32
    %c0_i32_0 = arith.constant 0 : i32
    %c0_i32_1 = arith.constant 0 : i32
    return %c0_i32, %c0_i32_0 : i32, i32
  }
  func.func @transform_20(%arg0: i32, %arg1: i32) -> (i32, i32) {
    %c0_i32 = arith.constant 0 : i32
    %c0_i32_0 = arith.constant 0 : i32
    %c0_i32_1 = arith.constant 0 : i32
    return %c0_i32, %c0_i32_0 : i32, i32
  }
  func.func @transform_21(%arg0: i32, %arg1: i32) -> (i32, i32, i32) {
    %c0_i32 = arith.constant 0 : i32
    %c0_i32_0 = arith.constant 0 : i32
    %c0_i32_1 = arith.constant 0 : i32
    return %arg0, %c0_i32, %c0_i32_0 : i32, i32, i32
  }
}

</mosaic_0001>

<bundles_post_ra>
// kernel: tile.33
= control target key start
LH: loop header
LB: loop body
LE: loop exit
PB: predicated region body
PF: predicated region fallthrough
CT: control target
= control target key end

     0   :  { %s330_s0 = inlined_call_operand.vmem [shape: f32[17,32], index: 0, kind: input, shape index: {}]   ;;  %s331_s1 = inlined_call_operand.vmem [shape: f32[2,17,4,32], index: 1, kind: output, shape index: {}]  }
   0x1   :  { %v4_v0 = vld [vmem:[%s330_s0] ss:$0 sm:$0xff]  ;;  %v119_v1 = vld [vmem:[%s330_s0 + $0x1] ss:$0 sm:$0xff]  ;;  %v122_v2 = vld [vmem:[%s330_s0 + $0x2] ss:$0 sm:$0xff] }
   0x2   :  { %5 = vst [vmem:[%s331_s1] sm:$0xf] %v4_v0  ;;  %v125_v3 = vld [vmem:[%s330_s0 + $0x3] ss:$0 sm:$0xff]  ;;  %v128_v4 = vld [vmem:[%s330_s0 + $0x4] ss:$0 sm:$0xff] }
   0x3   :  { %118 = vst [vmem:[%s331_s1 + $0x44] sm:$0xf] %v4_v0  ;;  %v131_v5 = vld [vmem:[%s330_s0 + $0x5] ss:$0 sm:$0xff]  ;;  %v134_v6 = vld [vmem:[%s330_s0 + $0x6] ss:$0 sm:$0xff] }
   0x4   :  { %120 = vst [vmem:[%s331_s1 + $0x4] sm:$0xf] %v119_v1  ;;  %v137_v7 = vld [vmem:[%s330_s0 + $0x7] ss:$0 sm:$0xff]  ;;  %v140_v8 = vld [vmem:[%s330_s0 + $0x8] ss:$0 sm:$0xff] }
   0x5   :  { %121 = vst [vmem:[%s331_s1 + $0x48] sm:$0xf] %v119_v1  ;;  %v143_v9 = vld [vmem:[%s330_s0 + $0x9] ss:$0 sm:$0xff]  ;;  %v146_v10 = vld [vmem:[%s330_s0 + $0xa] ss:$0 sm:$0xff] }
   0x6   :  { %123 = vst [vmem:[%s331_s1 + $0x8] sm:$0xf] %v122_v2  ;;  %v149_v11 = vld [vmem:[%s330_s0 + $0xb] ss:$0 sm:$0xff]  ;;  %v152_v12 = vld [vmem:[%s330_s0 + $0xc] ss:$0 sm:$0xff] }
   0x7   :  { %124 = vst [vmem:[%s331_s1 + $0x4c] sm:$0xf] %v122_v2  ;;  %v155_v13 = vld [vmem:[%s330_s0 + $0xd] ss:$0 sm:$0xff]  ;;  %v158_v14 = vld [vmem:[%s330_s0 + $0xe] ss:$0 sm:$0xff] }
   0x8   :  { %126 = vst [vmem:[%s331_s1 + $0xc] sm:$0xf] %v125_v3  ;;  %v161_v15 = vld [vmem:[%s330_s0 + $0xf] ss:$0 sm:$0xff]  ;;  %v164_v16 = vld [vmem:[%s330_s0 + $0x10] ss:$0 sm:$0xff] }
   0x9   :  { %127 = vst [vmem:[%s331_s1 + $0x50] sm:$0xf] %v125_v3 }
   0xa   :  { %129 = vst [vmem:[%s331_s1 + $0x10] sm:$0xf] %v128_v4 }
   0xb   :  { %130 = vst [vmem:[%s331_s1 + $0x54] sm:$0xf] %v128_v4 }
   0xc   :  { %132 = vst [vmem:[%s331_s1 + $0x14] sm:$0xf] %v131_v5 }
   0xd   :  { %133 = vst [vmem:[%s331_s1 + $0x58] sm:$0xf] %v131_v5 }
   0xe   :  { %135 = vst [vmem:[%s331_s1 + $0x18] sm:$0xf] %v134_v6 }
   0xf   :  { %136 = vst [vmem:[%s331_s1 + $0x5c] sm:$0xf] %v134_v6 }
  0x10   :  { %138 = vst [vmem:[%s331_s1 + $0x1c] sm:$0xf] %v137_v7 }
  0x11   :  { %139 = vst [vmem:[%s331_s1 + $0x60] sm:$0xf] %v137_v7 }
  0x12   :  { %141 = vst [vmem:[%s331_s1 + $0x20] sm:$0xf] %v140_v8 }
  0x13   :  { %142 = vst [vmem:[%s331_s1 + $0x64] sm:$0xf] %v140_v8 }
  0x14   :  { %144 = vst [vmem:[%s331_s1 + $0x24] sm:$0xf] %v143_v9 }
  0x15   :  { %145 = vst [vmem:[%s331_s1 + $0x68] sm:$0xf] %v143_v9 }
  0x16   :  { %147 = vst [vmem:[%s331_s1 + $0x28] sm:$0xf] %v146_v10 }
  0x17   :  { %148 = vst [vmem:[%s331_s1 + $0x6c] sm:$0xf] %v146_v10 }
  0x18   :  { %150 = vst [vmem:[%s331_s1 + $0x2c] sm:$0xf] %v149_v11 }
  0x19   :  { %151 = vst [vmem:[%s331_s1 + $0x70] sm:$0xf] %v149_v11 }
  0x1a   :  { %153 = vst [vmem:[%s331_s1 + $0x30] sm:$0xf] %v152_v12 }
  0x1b   :  { %154 = vst [vmem:[%s331_s1 + $0x74] sm:$0xf] %v152_v12 }
  0x1c   :  { %156 = vst [vmem:[%s331_s1 + $0x34] sm:$0xf] %v155_v13 }
  0x1d   :  { %157 = vst [vmem:[%s331_s1 + $0x78] sm:$0xf] %v155_v13 }
  0x1e   :  { %159 = vst [vmem:[%s331_s1 + $0x38] sm:$0xf] %v158_v14 }
  0x1f   :  { %160 = vst [vmem:[%s331_s1 + $0x7c] sm:$0xf] %v158_v14 }
  0x20   :  { %162 = vst [vmem:[%s331_s1 + $0x3c] sm:$0xf] %v161_v15 }
  0x21   :  { %163 = vst [vmem:[%s331_s1 + $0x80] sm:$0xf] %v161_v15 }
  0x22   :  { %165 = vst [vmem:[%s331_s1 + $0x40] sm:$0xf] %v164_v16 }
  0x23   :  { %166 = vst [vmem:[%s331_s1 + $0x84] sm:$0xf] %v164_v16 }

// kernel: tile.34
= control target key start
LH: loop header
LB: loop body
LE: loop exit
PB: predicated region body
PF: predicated region fallthrough
CT: control target
= control target key end

     0   :  { %vm140_vm0 = vcmask 1047556   ;;  %s409_s15 = smov 96   ;;  %s195_s18 = smov 192  ;;  %vm192_vm1 = vcmask 1045506   ;;  %vm197_vm2 = vcmask 1047558   ;;  %vm142_vm3 = vcmask 261120   ;;  %s639_s0 = inlined_call_operand.vmem [shape: f32[2,17,4,32], index: 0, kind: input, shape index: {}]   ;;  %s640_s1 = inlined_call_operand.vmem [shape: f32[34,128], index: 1, kind: output, shape index: {}]  }
   0x1   :  { %v380_v0 = vld [vmem:[%s639_s0 + $0x1c] sm:$0xf]  ;;  %v381_v1 = vld [vmem:[%s639_s0 + $0x18] sm:$0xf]  ;;  %v382_v2 = vld [vmem:[%s639_s0 + $0x14] sm:$0xf] }
   0x2   :  { %111 = vst [vmem:[#allocation0 + $0x38] sm:$0xf] %v380_v0  ;;  %v383_v3 = vld [vmem:[%s639_s0 + $0x10] sm:$0xf]  ;;  %v384_v4 = vld [vmem:[%s639_s0 + $0xc] sm:$0xf] }
   0x3   :  { %115 = vst [vmem:[#allocation0 + $0x30] sm:$0xf] %v381_v1  ;;  %v385_v5 = vld [vmem:[%s639_s0 + $0x8] sm:$0xf]  ;;  %v386_v6 = vld [vmem:[%s639_s0 + $0x4] sm:$0xf] }
   0x4   :  { %119 = vst [vmem:[#allocation0 + $0x28] sm:$0xf] %v382_v2  ;;  %v136_v7 = vld [vmem:[%s639_s0] sm:$0xf]  ;;  %v366_v8 = vld [vmem:[%s639_s0 + $0x54] sm:$0xf] }
   0x5   :  { %123 = vst [vmem:[#allocation0 + $0x20] sm:$0xf] %v383_v3  ;;  %v367_v9 = vld [vmem:[%s639_s0 + $0x50] sm:$0xf]  ;;  %v368_v10 = vld [vmem:[%s639_s0 + $0x4c] sm:$0xf] }
   0x6   :  { %127 = vst [vmem:[#allocation0 + $0x18] sm:$0xf] %v384_v4  ;;  %v369_v11 = vld [vmem:[%s639_s0 + $0x48] sm:$0xf]  ;;  %v370_v12 = vld [vmem:[%s639_s0 + $0x44] sm:$0xf] }
   0x7   :  { %131 = vst [vmem:[#allocation0 + $0x10] sm:$0xf] %v385_v5  ;;  %v371_v13 = vld [vmem:[%s639_s0 + $0x40] sm:$0xf]  ;;  %v372_v14 = vld [vmem:[%s639_s0 + $0x3c] sm:$0xf] }
   0x8   :  { %135 = vst [vmem:[#allocation0 + $0x8] sm:$0xf] %v386_v6  ;;  %v373_v15 = vld [vmem:[%s639_s0 + $0x38] sm:$0xf]  ;;  %v358_v17 = vld [vmem:[%s639_s0 + $0x74] sm:$0xf] }
   0x9   :  { %137 = vst [vmem:[#allocation0] sm:$0xf] %v136_v7  ;;  %v359_v18 = vld [vmem:[%s639_s0 + $0x70] sm:$0xf]  ;;  %v360_v21 = vld [vmem:[%s639_s0 + $0x6c] sm:$0xf] }
   0xa   :  { %55 = vst [vmem:[#allocation0 + $0xa8] sm:$0xf] %v366_v8  ;;  %v361_v22 = vld [vmem:[%s639_s0 + $0x68] sm:$0xf]  ;;  %v362_v23 = vld [vmem:[%s639_s0 + $0x64] sm:$0xf] }
   0xb   :  { %59 = vst [vmem:[#allocation0 + $0xa0] sm:$0xf] %v367_v9  ;;  %v363_v24 = vld [vmem:[%s639_s0 + $0x60] sm:$0xf]  ;;  %v364_v25 = vld [vmem:[%s639_s0 + $0x5c] sm:$0xf] }
   0xc   :  { %63 = vst [vmem:[#allocation0 + $0x98] sm:$0xf] %v368_v10  ;;  %v180_v16 = vld [vmem:[#allocation0 + $0x3] ss:$8 sm:$0xf0]   ;;  %s247_s19 = smov 3 }
   0xd   :  { %67 = vst [vmem:[#allocation0 + $0x90] sm:$0xf] %v369_v11  ;;  %v365_v26 = vld [vmem:[%s639_s0 + $0x58] sm:$0xf]  ;;  %v354_v28 = vld [vmem:[%s639_s0 + $0x84] sm:$0xf] }
   0xe   :  { %71 = vst [vmem:[#allocation0 + $0x88] sm:$0xf] %v370_v12  ;;  %v355_v29 = vld [vmem:[%s639_s0 + $0x80] sm:$0xf]  ;;  %v374_v32 = vld [vmem:[%s639_s0 + $0x34] sm:$0xf] }
   0xf   :  { %75 = vst [vmem:[#allocation0 + $0x80] sm:$0xf] %v371_v13  ;;  %v375_v33 = vld [vmem:[%s639_s0 + $0x30] sm:$0xf]  ;;  %v376_v34 = vld [vmem:[%s639_s0 + $0x2c] sm:$0xf] }
  0x10   :  { %v178_v19 = vld [vmem:[#allocation0 + $0x3] ss:$8 sm:$0xf]   ;;  %79 = vst [vmem:[#allocation0 + $0x78] sm:$0xf] %v372_v14  ;;  %s229_s20 = smov 3 }
  0x11   :  { %v182_v20 = vsel %vm140_vm0, %v180_v16, %v178_v19  ;;  %83 = vst [vmem:[#allocation0 + $0x70] sm:$0xf] %v373_v15  ;;  %v377_v35 = vld [vmem:[%s639_s0 + $0x28] sm:$0xf]  ;;  %v378_v36 = vld [vmem:[%s639_s0 + $0x24] sm:$0xf] }
  0x12   :  { %183 = vrot.lane.b32.xlu0 %v182_v20, %s409_s15  ;;  %23 = vst [vmem:[#allocation0 + $0xe8] sm:$0xf] %v358_v17  ;;  %v379_v37 = vld [vmem:[%s639_s0 + $0x20] sm:$0xf]  ;;  %v356_v39 = vld [vmem:[%s639_s0 + $0x7c] sm:$0xf] }
  0x13   :  { %27 = vst [vmem:[#allocation0 + $0xe0] sm:$0xf] %v359_v18  ;;  %v357_v40 = vld [vmem:[%s639_s0 + $0x78] sm:$0xf]  ;;  %s188_s0 = smov 3  ;;  %s410_s21 = smov 64  }
  0x14   :  { %31 = vst [vmem:[#allocation0 + $0xd8] sm:$0xf] %v360_v21  ;;  %v209_v27 = vld [vmem:[#allocation0 + $0x73] ss:$8 sm:$0xf0]   ;;  %s254_s22 = smov 192 }
  0x15   :  { %35 = vst [vmem:[#allocation0 + $0xd0] sm:$0xf] %v361_v22  ;;  %v268_v44 = vld [vmem:[#allocation0 + $0x72] ss:$8 sm:$0xf0]   ;;  %s288_s23 = smov 3 }
  0x16   :  { %39 = vst [vmem:[#allocation0 + $0xc8] sm:$0xf] %v362_v23  ;;  %v296_v54 = vld [vmem:[#allocation0 + $0x1] ss:$8 sm:$0xf]   ;;  %s306_s24 = smov 3 }
  0x17   :  { %43 = vst [vmem:[#allocation0 + $0xc0] sm:$0xf] %v363_v24  ;;  %v298_v55 = vld [vmem:[#allocation0 + $0x1] ss:$8 sm:$0xf0]   ;;  %s313_s25 = smov 192 }
  0x18   :  { %v207_v30 = vld [vmem:[#allocation0 + $0x73] ss:$8 sm:$0xf]   ;;  %47 = vst [vmem:[#allocation0 + $0xb8] sm:$0xf] %v364_v25  ;;  %v300_v60 = vsel %vm140_vm0, %v298_v55, %v296_v54  ;;  %s347_s26 = smov 3 }
  0x19   :  { %v211_v31 = vsel %vm140_vm0, %v209_v27, %v207_v30  ;;  %51 = vst [vmem:[#allocation0 + $0xb0] sm:$0xf] %v365_v26  ;;  %v266_v43 = vld [vmem:[#allocation0 + $0x72] ss:$8 sm:$0xf]   ;;  %s172_s6 = smov 3 }
  0x1a   :  { %212 = vrot.lane.b32.xlu1 %v211_v31, %s409_s15  ;;  %7 = vst [vmem:[#allocation0 + $0x108] sm:$0xf] %v354_v28  ;;  %v270_v46 = vsel %vm140_vm0, %v268_v44, %v266_v43  ;;  %v237_v56 = vld [vmem:[#allocation0 + $0x2] ss:$8 sm:$0xf]   ;;  %vm185_vm4 = vcmask 1048320  }
  0x1b   :  { %11 = vst [vmem:[#allocation0 + $0x100] sm:$0xf] %v355_v29  ;;  %v239_v59 = vld [vmem:[#allocation0 + $0x2] ss:$8 sm:$0xf0]   ;;  %vm244_vm5 = vcmask 785920  }
  0x1c   :  { %87 = vst [vmem:[#allocation0 + $0x68] sm:$0xf] %v374_v32  ;;  %v220_v38 = vld [vmem:[#allocation0 + $0xb3] ss:$8 sm:$0xf0]   ;;  %v241_v62 = vsel %vm140_vm0, %v239_v59, %v237_v56  ;;  %vm303_vm6 = vcmask 523520  }
  0x1d   :  { %91 = vst [vmem:[#allocation0 + $0x60] sm:$0xf] %v375_v33  ;;  %v338_v0 = vld [vmem:[#allocation0 + $0xb1] ss:$8 sm:$0xf0]  }
  0x1e   :  { %95 = vst [vmem:[#allocation0 + $0x58] sm:$0xf] %v376_v34  ;;  %v279_v2 = vld [vmem:[#allocation0 + $0xb2] ss:$8 sm:$0xf0]  }
  0x1f   :  { %99 = vst [vmem:[#allocation0 + $0x50] sm:$0xf] %v377_v35  ;;  %v325_v8 = vld [vmem:[#allocation0 + $0x71] ss:$8 sm:$0xf]  }
  0x20   :  { %v218_v41 = vld [vmem:[#allocation0 + $0xb3] ss:$8 sm:$0xf]   ;;  %103 = vst [vmem:[#allocation0 + $0x48] sm:$0xf] %v378_v36 }
  0x21   :  { %v222_v42 = vsel %vm140_vm0, %v220_v38, %v218_v41  ;;  %107 = vst [vmem:[#allocation0 + $0x40] sm:$0xf] %v379_v37  ;;  %v336_v63 = vld [vmem:[#allocation0 + $0xb1] ss:$8 sm:$0xf]  }
  0x22   :  { %223 = vrot.lane.b32.xlu1 %v222_v42, %s409_s15  ;;  %15 = vst [vmem:[#allocation0 + $0xf8] sm:$0xf] %v356_v39  ;;  %v189_v45 = vld [vmem:[#allocation0 + $0x103] ss:$8 sm:%s188_s0]   ;;  %v248_v50 = vld [vmem:[#allocation0 + $0x102] ss:$8 sm:%s247_s19]   ;;  %v340_v3 = vsel %vm140_vm0, %v338_v0, %v336_v63 }
  0x23   :  { %19 = vst [vmem:[#allocation0 + $0xf0] sm:$0xf] %v357_v40  ;;  %v277_v1 = vld [vmem:[#allocation0 + $0xb2] ss:$8 sm:$0xf]  }
  0x24   :  { %v281_v5 = vsel %vm140_vm0, %v279_v2, %v277_v1  ;;  %v307_v6 = vld [vmem:[#allocation0 + $0x101] ss:$8 sm:%s306_s24]   ;;  %v138_v15 = vld [vmem:[#allocation0] ss:$8 sm:$0xf]  }
  0x25   :  { %v327_v9 = vld [vmem:[#allocation0 + $0x71] ss:$8 sm:$0xf0]   ;;  %v139_v16 = vld [vmem:[#allocation0] ss:$8 sm:$0xf0]  }
  0x26   :  { %v329_v12 = vsel %vm140_vm0, %v327_v9, %v325_v8  ;;  %v141_v17 = vsel %vm140_vm0, %v139_v16, %v138_v15  ;;  %v147_v19 = vld [vmem:[#allocation0 + $0x40] ss:$8 sm:$0xf0]  }
  0x27   :  { %143 = vst.msk [vmem:[%s640_s1] sm:$0xff] %vm142_vm3, %v141_v17   ;;  %v154_v21 = vld [vmem:[#allocation0 + $0x80] ss:$8 sm:$0xf]  }
  0x28   :  { %v191_v47 = vld [vmem:[#allocation0 + $0x33] ss:$8 sm:$0x3c]   ;;  %v250_v52 = vld [vmem:[#allocation0 + $0x32] ss:$8 sm:$0x3c]  }
  0x29   :  { %v196_v48 = vld [vmem:[#allocation0 + $0x33] ss:$8 sm:%s195_s18]   ;;  %v193_v49 = vsel %vm192_vm1, %v191_v47, %v189_v45  ;;  %v252_v57 = vsel %vm192_vm1, %v250_v52, %v248_v50  ;;  %v255_v58 = vld [vmem:[#allocation0 + $0x32] ss:$8 sm:%s254_s22]   ;;  %v314_v11 = vld [vmem:[#allocation0 + $0x31] ss:$8 sm:%s313_s25]  }
  0x2a   :  { %v198_v51 = vsel %vm197_vm2, %v196_v48, %v193_v49  ;;  %271 = vrot.lane.b32.xlu1 %v270_v46, %s410_s21  ;;  %v230_v53 = vld [vmem:[#allocation0 + $0xf3] ss:$8 sm:%s229_s20]   ;;  %v257_v61 = vsel %vm197_vm2, %v255_v58, %v252_v57  ;;  %v289_v4 = vld [vmem:[#allocation0 + $0xf2] ss:$8 sm:%s288_s23]   ;;  %v348_v14 = vld [vmem:[#allocation0 + $0xf1] ss:$8 sm:%s347_s26]  }
  0x2b   :  { %199 = vrot.lane.b32.xlu0 %v198_v51, %s409_s15  ;;  %231 = vrot.lane.b32.xlu2 %v230_v53, %s409_s15  ;;  %s411_s15 = smov 32   ;;  %v309_v7 = vld [vmem:[#allocation0 + $0x31] ss:$8 sm:$0x3c]   ;;  %v173_v27 = vld [vmem:[#allocation0 + $0x100] ss:$8 sm:%s172_s6]  }
  0x2c   :  { %v311_v10 = vsel %vm192_vm1, %v309_v7, %v307_v6  ;;  %v145_v18 = vld [vmem:[#allocation0 + $0x40] ss:$8 sm:$0xf]   ;;  %390 = vst.msk [vmem:[%s640_s1 + $0x20] sm:$0x3] %vm142_vm3, %v173_v27  }
  0x2d   :  { %v316_v13 = vsel %vm197_vm2, %v314_v11, %v311_v10  ;;  %v149_v20 = vsel %vm140_vm0, %v147_v19, %v145_v18  ;;  %v156_v22 = vld [vmem:[#allocation0 + $0x80] ss:$8 sm:$0xf0]  }
  0x2e   :  { %387 = vst.msk [vmem:[%s640_s1 + $0x8] sm:$0xff] %vm142_vm3, %v149_v20   ;;  %v158_v23 = vsel %vm140_vm0, %v156_v22, %v154_v21  ;;  %v163_v24 = vld [vmem:[#allocation0 + $0xc0] ss:$8 sm:$0xf]  }
  0x2f   :  { %v165_v25 = vld [vmem:[#allocation0 + $0xc0] ss:$8 sm:$0xf0]   ;;  %388 = vst.msk [vmem:[%s640_s1 + $0x10] sm:$0xff] %vm142_vm3, %v158_v23  }
  0x30   :  { %v167_v26 = vsel %vm140_vm0, %v165_v25, %v163_v24 }
  0x31   :  { %389 = vst.msk [vmem:[%s640_s1 + $0x18] sm:$0xff] %vm142_vm3, %v167_v26  }
  0x32   :  { %301 = vrot.lane.b32.xlu1 %v300_v60, %s411_s15 }
  0x33   :  { %258 = vrot.lane.b32.xlu0 %v257_v61, %s410_s21  ;;  %242 = vrot.lane.b32.xlu2 %v241_v62, %s410_s21 }
  0x3a   :  { %341 = vrot.lane.b32.xlu1 %v340_v3, %s411_s15 }
  0x3b   :  { %290 = vrot.lane.b32.xlu0 %v289_v4, %s410_s21  ;;  %282 = vrot.lane.b32.xlu2 %v281_v5, %s410_s21 }
  0x43   :  { %330 = vrot.lane.b32.xlu0 %v329_v12, %s411_s15  ;;  %317 = vrot.lane.b32.xlu2 %v316_v13, %s411_s15 }
  0x4b   :  { %349 = vrot.lane.b32.xlu2 %v348_v14, %s411_s15 }
  0x84   :  { %v184_v28 = vpop.permute.xlu0 %183  }
  0x85   :  { %186 = vst.msk [vmem:[%s640_s1] sm:$0xff] %vm185_vm4, %v184_v28   ;;  %v232_v29 = vpop.permute.xlu2 %231  }
  0x86   :  { %395 = vst.msk [vmem:[%s640_s1 + $0x1e] sm:$0x3] %vm185_vm4, %v232_v29  }
  0x8c   :  { %v213_v30 = vpop.permute.xlu1 %212  }
  0x8d   :  { %393 = vst.msk [vmem:[%s640_s1 + $0xe] sm:$0xff] %vm185_vm4, %v213_v30   ;;  %v243_v31 = vpop.permute.xlu2 %242  }
  0x8e   :  { %245 = vst.msk [vmem:[%s640_s1] sm:$0xff] %vm244_vm5, %v243_v31  }
  0x94   :  { %v224_v32 = vpop.permute.xlu1 %223  }
  0x95   :  { %394 = vst.msk [vmem:[%s640_s1 + $0x16] sm:$0xff] %vm185_vm4, %v224_v32   ;;  %v283_v33 = vpop.permute.xlu2 %282  }
  0x96   :  { %399 = vst.msk [vmem:[%s640_s1 + $0x16] sm:$0xff] %vm244_vm5, %v283_v33  }
  0x9c   :  { %v272_v34 = vpop.permute.xlu1 %271  }
  0x9d   :  { %v200_v35 = vpop.permute.xlu0 %199   ;;  %398 = vst.msk [vmem:[%s640_s1 + $0xe] sm:$0xff] %vm244_vm5, %v272_v34   ;;  %v318_v36 = vpop.permute.xlu2 %317  }
  0x9e   :  { %391 = vst.msk [vmem:[%s640_s1 + $0x20] sm:$0x3] %vm185_vm4, %v200_v35  }
  0x9f   :  { %392 = vst.msk [vmem:[%s640_s1 + $0x6] sm:$0xfc] %vm185_vm4, %v200_v35  }
  0xa4   :  { %v302_v37 = vpop.permute.xlu1 %301  }
  0xa5   :  { %v259_v38 = vpop.permute.xlu0 %258   ;;  %304 = vst.msk [vmem:[%s640_s1] sm:$0xff] %vm303_vm6, %v302_v37   ;;  %v350_v39 = vpop.permute.xlu2 %349  }
  0xa6   :  { %396 = vst.msk [vmem:[%s640_s1 + $0x20] sm:$0x3] %vm244_vm5, %v259_v38  }
  0xa7   :  { %397 = vst.msk [vmem:[%s640_s1 + $0x6] sm:$0xfc] %vm244_vm5, %v259_v38  }
  0xa8   :  { %401 = vst.msk [vmem:[%s640_s1 + $0x20] sm:$0x3] %vm303_vm6, %v318_v36  }
  0xa9   :  { %402 = vst.msk [vmem:[%s640_s1 + $0x6] sm:$0xfc] %vm303_vm6, %v318_v36  }
  0xac   :  { %v342_v40 = vpop.permute.xlu1 %341  }
  0xad   :  { %v291_v41 = vpop.permute.xlu0 %290   ;;  %404 = vst.msk [vmem:[%s640_s1 + $0x16] sm:$0xff] %vm303_vm6, %v342_v40  }
  0xae   :  { %400 = vst.msk [vmem:[%s640_s1 + $0x1e] sm:$0x3] %vm244_vm5, %v291_v41  }
  0xaf   :  { %405 = vst.msk [vmem:[%s640_s1 + $0x1e] sm:$0x3] %vm303_vm6, %v350_v39  }
  0xb5   :  { %v331_v42 = vpop.permute.xlu0 %330  }
  0xb6   :  { %403 = vst.msk [vmem:[%s640_s1 + $0xe] sm:$0xff] %vm303_vm6, %v331_v42  }

// kernel: tile.24
= control target key start
LH: loop header
LB: loop body
LE: loop exit
PB: predicated region body
PF: predicated region fallthrough
CT: control target
= control target key end

     0   :  { %vm3_vm0 = vcmask 261120   ;;  %s11_s6 = smov 3  ;;  %s74_s0 = inlined_call_operand.vmem [shape: f32[2,17,32], index: 0, kind: input, shape index: {}]   ;;  %s75_s1 = inlined_call_operand.vmem [shape: f32[34,32], index: 1, kind: output, shape index: {}]  }
   0x1   :  { %v2_v0 = vld [vmem:[%s74_s0] sm:$0xff]   ;;  %v26_v1 = vld [vmem:[%s74_s0 + $0x8] sm:$0xff]  }
   0x2   :  { %v28_v2 = vld [vmem:[%s74_s0 + $0x10] ss:$8 sm:%s11_s6]   ;;  %4 = vst.msk [vmem:[%s75_s1] sm:$0xff] %vm3_vm0, %v2_v0  }
   0x3   :  { %v30_v3 = vld [vmem:[%s74_s0 + $0x19] sm:$0xff]   ;;  %27 = vst.msk [vmem:[%s75_s1 + $0x8] sm:$0xff] %vm3_vm0, %v26_v1   ;;  %v32_v4 = vld [vmem:[%s74_s0 + $0x21] sm:$0xff]  }
   0x4   :  { %29 = vst.msk [vmem:[%s75_s1 + $0x10] sm:$0x3] %vm3_vm0, %v28_v2  }
   0x5   :  { %31 = vst.msk [vmem:[%s75_s1 + $0x12] sm:$0xff] %vm3_vm0, %v30_v3  }
   0x6   :  { %33 = vst.msk [vmem:[%s75_s1 + $0x1a] sm:$0xff] %vm3_vm0, %v32_v4  }

// kernel: versatile_prior_forward.2
= control target key start
LH: loop header
LB: loop body
LE: loop exit
PB: predicated region body
PF: predicated region fallthrough
CT: control target
= control target key end

     0   :  { %s876_s1 = inlined_call_operand.vmem [shape: f32[128,256], index: 1, kind: input, shape index: {}]   ;;  %s877_s0 = inlined_call_operand.vmem [shape: f32[2,128], index: 0, kind: input, shape index: {}]   ;;  %s878_s3 = inlined_call_operand.vmem [shape: f32[256,256], index: 3, kind: input, shape index: {}]   ;;  %s879_s2 = inlined_call_operand.vmem [shape: f32[1,256], index: 2, kind: input, shape index: {}, may-alias: {2,4}]   ;;  %s880_s5 = inlined_call_operand.vmem [shape: f32[256,128], index: 5, kind: input, shape index: {}]   ;;  %s881_s4 = inlined_call_operand.vmem [shape: f32[1,256], index: 4, kind: input, shape index: {}, may-alias: {2,4}]   ;;  %s882_s6 = inlined_call_operand.vmem [shape: f32[1,128], index: 6, kind: input, shape index: {}]   ;;  %s883_s7 = inlined_call_operand.vmem [shape: f32[2,128], index: 7, kind: output, shape index: {}]  }
   0x1   :  { %v57_v0 = vld [vmem:[%s876_s1 + $0xf0] sm:$0xff]  ;;  %v58_v1 = vld [vmem:[%s876_s1 + $0xf8] sm:$0xff]  ;;  %v55_v2 = vld [vmem:[%s876_s1 + $0xe0] sm:$0xff] }
   0x2   :  { %65 = vmatpush.msra.mxu0 %v57_v0  ;;  %85 = vmatpush.msra.mxu1 %v58_v1  ;;  %v56_v3 = vld [vmem:[%s876_s1 + $0xe8] sm:$0xff]  ;;  %v53_v4 = vld [vmem:[%s876_s1 + $0xd0] sm:$0xff]  ;;  %v54_v5 = vld [vmem:[%s876_s1 + $0xd8] sm:$0xff] }
   0x3   :  { %v51_v6 = vld [vmem:[%s876_s1 + $0xc0] sm:$0xff]  ;;  %v52_v7 = vld [vmem:[%s876_s1 + $0xc8] sm:$0xff]  ;;  %v49_v8 = vld [vmem:[%s876_s1 + $0xb0] sm:$0xff] }
   0x4   :  { %66 = vmatpush.msra.mxu0 %v55_v2  ;;  %86 = vmatpush.msra.mxu1 %v56_v3  ;;  %v50_v9 = vld [vmem:[%s876_s1 + $0xb8] sm:$0xff]  ;;  %v47_v10 = vld [vmem:[%s876_s1 + $0xa0] sm:$0xff]  ;;  %v48_v11 = vld [vmem:[%s876_s1 + $0xa8] sm:$0xff] }
   0x5   :  { %v45_v12 = vld [vmem:[%s876_s1 + $0x90] sm:$0xff]  ;;  %v46_v13 = vld [vmem:[%s876_s1 + $0x98] sm:$0xff]  ;;  %v43_v14 = vld [vmem:[%s876_s1 + $0x80] sm:$0xff] }
   0x6   :  { %67 = vmatpush.msra.mxu0 %v53_v4  ;;  %87 = vmatpush.msra.mxu1 %v54_v5  ;;  %v44_v15 = vld [vmem:[%s876_s1 + $0x88] sm:$0xff]  ;;  %v41_v16 = vld [vmem:[%s876_s1 + $0x70] sm:$0xff]  ;;  %v42_v17 = vld [vmem:[%s876_s1 + $0x78] sm:$0xff] }
   0x7   :  { %v39_v18 = vld [vmem:[%s876_s1 + $0x60] sm:$0xff]  ;;  %v40_v19 = vld [vmem:[%s876_s1 + $0x68] sm:$0xff]  ;;  %v37_v20 = vld [vmem:[%s876_s1 + $0x50] sm:$0xff] }
   0x8   :  { %68 = vmatpush.msra.mxu0 %v51_v6  ;;  %88 = vmatpush.msra.mxu1 %v52_v7  ;;  %v38_v21 = vld [vmem:[%s876_s1 + $0x58] sm:$0xff]  ;;  %v35_v22 = vld [vmem:[%s876_s1 + $0x40] sm:$0xff]  ;;  %v36_v23 = vld [vmem:[%s876_s1 + $0x48] sm:$0xff] }
   0x9   :  { %v33_v24 = vld [vmem:[%s876_s1 + $0x30] sm:$0xff]  ;;  %v34_v25 = vld [vmem:[%s876_s1 + $0x38] sm:$0xff]  ;;  %v31_v26 = vld [vmem:[%s876_s1 + $0x20] sm:$0xff] }
   0xa   :  { %69 = vmatpush.msra.mxu0 %v49_v8  ;;  %89 = vmatpush.msra.mxu1 %v50_v9  ;;  %v32_v27 = vld [vmem:[%s876_s1 + $0x28] sm:$0xff]  ;;  %v29_v28 = vld [vmem:[%s876_s1 + $0x10] sm:$0xff]  ;;  %v30_v29 = vld [vmem:[%s876_s1 + $0x18] sm:$0xff] }
   0xb   :  { %v27_v30 = vld [vmem:[%s876_s1] sm:$0xff]  ;;  %v28_v31 = vld [vmem:[%s876_s1 + $0x8] sm:$0xff]  ;;  %v175_v33 = vld [vmem:[%s878_s3 + $0xf0] sm:$0xff] }
   0xc   :  { %70 = vmatpush.msra.mxu0 %v47_v10  ;;  %90 = vmatpush.msra.mxu1 %v48_v11  ;;  %v26_v32 = vld [vmem:[%s877_s0] sm:$0x3]  ;;  %v207_v34 = vld [vmem:[%s878_s3 + $0x1f0] sm:$0xff]  ;;  %v176_v35 = vld [vmem:[%s878_s3 + $0xf8] sm:$0xff] }
   0xd   :  { %215 = vmatpush.msra.mxu2 %v175_v33  ;;  %235 = vmatpush.msra.mxu3 %v207_v34  ;;  %v208_v36 = vld [vmem:[%s878_s3 + $0x1f8] sm:$0xff]  ;;  %v173_v37 = vld [vmem:[%s878_s3 + $0xe0] sm:$0xff]  ;;  %v174_v39 = vld [vmem:[%s878_s3 + $0xe8] sm:$0xff] }
   0xe   :  { %71 = vmatpush.msra.mxu0 %v45_v12  ;;  %91 = vmatpush.msra.mxu1 %v46_v13  ;;  %v205_v38 = vld [vmem:[%s878_s3 + $0x1e0] sm:$0xff]  ;;  %v206_v40 = vld [vmem:[%s878_s3 + $0x1e8] sm:$0xff]  ;;  %v171_v41 = vld [vmem:[%s878_s3 + $0xd0] sm:$0xff] }
   0xf   :  { %216 = vmatpush.msra.mxu2 %v173_v37  ;;  %236 = vmatpush.msra.mxu3 %v205_v38  ;;  %v203_v42 = vld [vmem:[%s878_s3 + $0x1d0] sm:$0xff]  ;;  %v172_v43 = vld [vmem:[%s878_s3 + $0xd8] sm:$0xff]  ;;  %v169_v45 = vld [vmem:[%s878_s3 + $0xc0] sm:$0xff] }
  0x10   :  { %72 = vmatpush.msra.mxu0 %v43_v14  ;;  %92 = vmatpush.msra.mxu1 %v44_v15  ;;  %v204_v44 = vld [vmem:[%s878_s3 + $0x1d8] sm:$0xff]  ;;  %v201_v46 = vld [vmem:[%s878_s3 + $0x1c0] sm:$0xff]  ;;  %v170_v47 = vld [vmem:[%s878_s3 + $0xc8] sm:$0xff] }
  0x11   :  { %217 = vmatpush.msra.mxu2 %v171_v41  ;;  %237 = vmatpush.msra.mxu3 %v203_v42  ;;  %v202_v48 = vld [vmem:[%s878_s3 + $0x1c8] sm:$0xff]  ;;  %v167_v49 = vld [vmem:[%s878_s3 + $0xb0] sm:$0xff]  ;;  %v168_v51 = vld [vmem:[%s878_s3 + $0xb8] sm:$0xff] }
  0x12   :  { %73 = vmatpush.msra.mxu0 %v41_v16  ;;  %93 = vmatpush.msra.mxu1 %v42_v17  ;;  %v199_v50 = vld [vmem:[%s878_s3 + $0x1b0] sm:$0xff]  ;;  %v200_v52 = vld [vmem:[%s878_s3 + $0x1b8] sm:$0xff]  ;;  %v165_v53 = vld [vmem:[%s878_s3 + $0xa0] sm:$0xff] }
  0x13   :  { %218 = vmatpush.msra.mxu2 %v169_v45  ;;  %238 = vmatpush.msra.mxu3 %v201_v46  ;;  %v197_v54 = vld [vmem:[%s878_s3 + $0x1a0] sm:$0xff]  ;;  %v166_v55 = vld [vmem:[%s878_s3 + $0xa8] sm:$0xff]  ;;  %v163_v57 = vld [vmem:[%s878_s3 + $0x90] sm:$0xff] }
  0x14   :  { %74 = vmatpush.msra.mxu0 %v39_v18  ;;  %94 = vmatpush.msra.mxu1 %v40_v19  ;;  %v198_v56 = vld [vmem:[%s878_s3 + $0x1a8] sm:$0xff]  ;;  %v195_v58 = vld [vmem:[%s878_s3 + $0x190] sm:$0xff]  ;;  %v164_v59 = vld [vmem:[%s878_s3 + $0x98] sm:$0xff] }
  0x15   :  { %219 = vmatpush.msra.mxu2 %v167_v49  ;;  %239 = vmatpush.msra.mxu3 %v199_v50  ;;  %v196_v60 = vld [vmem:[%s878_s3 + $0x198] sm:$0xff]  ;;  %v161_v61 = vld [vmem:[%s878_s3 + $0x80] sm:$0xff]  ;;  %v162_v63 = vld [vmem:[%s878_s3 + $0x88] sm:$0xff] }
  0x16   :  { %75 = vmatpush.msra.mxu0 %v37_v20  ;;  %95 = vmatpush.msra.mxu1 %v38_v21  ;;  %v193_v62 = vld [vmem:[%s878_s3 + $0x180] sm:$0xff]  ;;  %v194_v0 = vld [vmem:[%s878_s3 + $0x188] sm:$0xff]  ;;  %v159_v1 = vld [vmem:[%s878_s3 + $0x70] sm:$0xff] }
  0x17   :  { %220 = vmatpush.msra.mxu2 %v165_v53  ;;  %240 = vmatpush.msra.mxu3 %v197_v54  ;;  %v191_v2 = vld [vmem:[%s878_s3 + $0x170] sm:$0xff]  ;;  %v160_v3 = vld [vmem:[%s878_s3 + $0x78] sm:$0xff]  ;;  %v157_v5 = vld [vmem:[%s878_s3 + $0x60] sm:$0xff] }
  0x18   :  { %76 = vmatpush.msra.mxu0 %v35_v22  ;;  %96 = vmatpush.msra.mxu1 %v36_v23  ;;  %v192_v4 = vld [vmem:[%s878_s3 + $0x178] sm:$0xff]  ;;  %v189_v6 = vld [vmem:[%s878_s3 + $0x160] sm:$0xff]  ;;  %v158_v7 = vld [vmem:[%s878_s3 + $0x68] sm:$0xff] }
  0x19   :  { %221 = vmatpush.msra.mxu2 %v163_v57  ;;  %241 = vmatpush.msra.mxu3 %v195_v58  ;;  %v190_v8 = vld [vmem:[%s878_s3 + $0x168] sm:$0xff]  ;;  %v155_v9 = vld [vmem:[%s878_s3 + $0x50] sm:$0xff]  ;;  %v156_v11 = vld [vmem:[%s878_s3 + $0x58] sm:$0xff] }
  0x1a   :  { %77 = vmatpush.msra.mxu0 %v33_v24  ;;  %97 = vmatpush.msra.mxu1 %v34_v25  ;;  %v187_v10 = vld [vmem:[%s878_s3 + $0x150] sm:$0xff]  ;;  %v188_v12 = vld [vmem:[%s878_s3 + $0x158] sm:$0xff]  ;;  %v153_v13 = vld [vmem:[%s878_s3 + $0x40] sm:$0xff] }
  0x1b   :  { %222 = vmatpush.msra.mxu2 %v161_v61  ;;  %242 = vmatpush.msra.mxu3 %v193_v62  ;;  %v185_v14 = vld [vmem:[%s878_s3 + $0x140] sm:$0xff]  ;;  %v154_v15 = vld [vmem:[%s878_s3 + $0x48] sm:$0xff]  ;;  %v151_v17 = vld [vmem:[%s878_s3 + $0x30] sm:$0xff] }
  0x1c   :  { %78 = vmatpush.msra.mxu0 %v31_v26  ;;  %98 = vmatpush.msra.mxu1 %v32_v27  ;;  %v186_v16 = vld [vmem:[%s878_s3 + $0x148] sm:$0xff]  ;;  %v183_v18 = vld [vmem:[%s878_s3 + $0x130] sm:$0xff]  ;;  %v152_v19 = vld [vmem:[%s878_s3 + $0x38] sm:$0xff] }
  0x1d   :  { %223 = vmatpush.msra.mxu2 %v159_v1  ;;  %243 = vmatpush.msra.mxu3 %v191_v2  ;;  %v184_v20 = vld [vmem:[%s878_s3 + $0x138] sm:$0xff]  ;;  %v59_v21 = vld [vmem:[%s879_s2] sm:$0x3]  ;;  %v150_v24 = vld [vmem:[%s878_s3 + $0x28] sm:$0xff] }
  0x1e   :  { %79 = vmatpush.msra.mxu0 %v29_v28  ;;  %99 = vmatpush.msra.mxu1 %v30_v29  ;;  %v149_v22 = vld [vmem:[%s878_s3 + $0x20] sm:$0xff]  ;;  %v182_v25 = vld [vmem:[%s878_s3 + $0x128] sm:$0xff]  ;;  %v147_v26 = vld [vmem:[%s878_s3 + $0x10] sm:$0xff]  ;;  %v61_v28 = vperm.slane %v59_v21, 0  ;;  %v62_v29 = vperm.slane %v59_v21, 1 }
  0x1f   :  { %224 = vmatpush.msra.mxu2 %v157_v5  ;;  %244 = vmatpush.msra.mxu3 %v189_v6  ;;  %v181_v23 = vld [vmem:[%s878_s3 + $0x120] sm:$0xff]  ;;  %v179_v27 = vld [vmem:[%s878_s3 + $0x110] sm:$0xff]  ;;  %v146_v34 = vld [vmem:[%s878_s3 + $0x8] sm:$0xff] }
  0x20   :  { %80 = vmatpush.msra.mxu0 %v27_v30  ;;  %100 = vmatpush.msra.mxu1 %v28_v31  ;;  %v148_v30 = vld [vmem:[%s878_s3 + $0x18] sm:$0xff]  ;;  %v177_v33 = vld [vmem:[%s878_s3 + $0x100] sm:$0xff]  ;;  %v365_v5 = vld [vmem:[%s880_s5 + $0xf0] sm:$0xff] }
  0x21   :  { %81 = vmatmul.f32.vlgmr.msra.gmra.mxu0 %v26_v32  ;;  %101 = vmatmul.f32.vlgmr.msra.gmra.mxu1 %v26_v32  ;;  %v180_v31 = vld [vmem:[%s878_s3 + $0x118] sm:$0xff]  ;;  %v145_v32 = vld [vmem:[%s878_s3] sm:$0xff]  ;;  %v364_v6 = vld [vmem:[%s880_s5 + $0xe8] sm:$0xff] }
  0x22   :  { %255 = vmatpush.msrb.mxu0 %v176_v35  ;;  %275 = vmatpush.msrb.mxu1 %v208_v36  ;;  %v178_v35 = vld [vmem:[%s878_s3 + $0x108] sm:$0xff]  ;;  %v343_v21 = vld [vmem:[%s880_s5 + $0x40] sm:$0xff] }
  0x23   :  { %225 = vmatpush.msra.mxu2 %v155_v9  ;;  %245 = vmatpush.msra.mxu3 %v187_v10  ;;  %v349_v9 = vld [vmem:[%s880_s5 + $0x70] sm:$0xff]  ;;  %v362_v10 = vld [vmem:[%s880_s5 + $0xd8] sm:$0xff] }
  0x24   :  { %256 = vmatpush.msrb.mxu0 %v174_v39  ;;  %276 = vmatpush.msrb.mxu1 %v206_v40 }
  0x25   :  { %226 = vmatpush.msra.mxu2 %v153_v13  ;;  %246 = vmatpush.msra.mxu3 %v185_v14  ;;  %v347_v13 = vld [vmem:[%s880_s5 + $0x60] sm:$0xff]  ;;  %v360_v14 = vld [vmem:[%s880_s5 + $0xc8] sm:$0xff] }
  0x26   :  { %257 = vmatpush.msrb.mxu0 %v172_v43  ;;  %277 = vmatpush.msrb.mxu1 %v204_v44 }
  0x27   :  { %227 = vmatpush.msra.mxu2 %v151_v17  ;;  %247 = vmatpush.msra.mxu3 %v183_v18  ;;  %v345_v17 = vld [vmem:[%s880_s5 + $0x50] sm:$0xff]  ;;  %v358_v18 = vld [vmem:[%s880_s5 + $0xb8] sm:$0xff] }
  0x28   :  { %258 = vmatpush.msrb.mxu0 %v170_v47  ;;  %278 = vmatpush.msrb.mxu1 %v202_v48 }
  0x29   :  { %228 = vmatpush.msra.mxu2 %v149_v22  ;;  %248 = vmatpush.msra.mxu3 %v181_v23  ;;  %v356_v22 = vld [vmem:[%s880_s5 + $0xa8] sm:$0xff]  ;;  %v209_v23 = vld [vmem:[%s881_s4] sm:$0x3] }
  0x2a   :  { %259 = vmatpush.msrb.mxu0 %v168_v51  ;;  %279 = vmatpush.msrb.mxu1 %v200_v52 }
  0x2b   :  { %229 = vmatpush.msra.mxu2 %v147_v26  ;;  %249 = vmatpush.msra.mxu3 %v179_v27  ;;  %v341_v26 = vld [vmem:[%s880_s5 + $0x30] sm:$0xff]  ;;  %v354_v27 = vld [vmem:[%s880_s5 + $0x98] sm:$0xff] }
  0x2c   :  { %260 = vmatpush.msrb.mxu0 %v166_v55  ;;  %280 = vmatpush.msrb.mxu1 %v198_v56 }
  0x2d   :  { %230 = vmatpush.msra.mxu2 %v145_v32  ;;  %250 = vmatpush.msra.mxu3 %v177_v33  ;;  %v339_v32 = vld [vmem:[%s880_s5 + $0x20] sm:$0xff]  ;;  %v352_v33 = vld [vmem:[%s880_s5 + $0x88] sm:$0xff] }
  0x2e   :  { %261 = vmatpush.msrb.mxu0 %v164_v59  ;;  %281 = vmatpush.msrb.mxu1 %v196_v60 }
  0x30   :  { %262 = vmatpush.msrb.mxu0 %v162_v63  ;;  %282 = vmatpush.msrb.mxu1 %v194_v0 }
  0x32   :  { %263 = vmatpush.msrb.mxu0 %v160_v3  ;;  %283 = vmatpush.msrb.mxu1 %v192_v4  ;;  %v366_v4 = vld [vmem:[%s880_s5 + $0xf8] sm:$0xff] }
  0x33   :  { %391 = vmatpush.msrb.mxu3 %v366_v4 }
  0x34   :  { %264 = vmatpush.msrb.mxu0 %v158_v7  ;;  %284 = vmatpush.msrb.mxu1 %v190_v8  ;;  %v350_v7 = vld [vmem:[%s880_s5 + $0x78] sm:$0xff]  ;;  %v363_v8 = vld [vmem:[%s880_s5 + $0xe0] sm:$0xff] }
  0x35   :  { %392 = vmatpush.msrb.mxu3 %v365_v5  ;;  %371 = vmatpush.msrb.mxu2 %v350_v7 }
  0x36   :  { %265 = vmatpush.msrb.mxu0 %v156_v11  ;;  %285 = vmatpush.msrb.mxu1 %v188_v12  ;;  %v348_v11 = vld [vmem:[%s880_s5 + $0x68] sm:$0xff]  ;;  %v361_v12 = vld [vmem:[%s880_s5 + $0xd0] sm:$0xff] }
  0x37   :  { %393 = vmatpush.msrb.mxu3 %v364_v6  ;;  %372 = vmatpush.msrb.mxu2 %v349_v9 }
  0x38   :  { %266 = vmatpush.msrb.mxu0 %v154_v15  ;;  %286 = vmatpush.msrb.mxu1 %v186_v16  ;;  %v346_v15 = vld [vmem:[%s880_s5 + $0x58] sm:$0xff]  ;;  %v359_v16 = vld [vmem:[%s880_s5 + $0xc0] sm:$0xff] }
  0x39   :  { %394 = vmatpush.msrb.mxu3 %v363_v8  ;;  %373 = vmatpush.msrb.mxu2 %v348_v11  ;;  %v420_v11 = vld [vmem:[%s882_s6] ss:$0 sm:$0xff] }
  0x3a   :  { %267 = vmatpush.msrb.mxu0 %v152_v19  ;;  %287 = vmatpush.msrb.mxu1 %v184_v20  ;;  %v344_v19 = vld [vmem:[%s880_s5 + $0x48] sm:$0xff]  ;;  %v357_v20 = vld [vmem:[%s880_s5 + $0xb0] sm:$0xff] }
  0x3b   :  { %395 = vmatpush.msrb.mxu3 %v362_v10  ;;  %374 = vmatpush.msrb.mxu2 %v347_v13 }
  0x3c   :  { %268 = vmatpush.msrb.mxu0 %v150_v24  ;;  %288 = vmatpush.msrb.mxu1 %v182_v25  ;;  %v342_v24 = vld [vmem:[%s880_s5 + $0x38] sm:$0xff]  ;;  %v355_v25 = vld [vmem:[%s880_s5 + $0xa0] sm:$0xff] }
  0x3d   :  { %396 = vmatpush.msrb.mxu3 %v361_v12  ;;  %375 = vmatpush.msrb.mxu2 %v346_v15 }
  0x3e   :  { %269 = vmatpush.msrb.mxu0 %v148_v30  ;;  %289 = vmatpush.msrb.mxu1 %v180_v31  ;;  %v353_v30 = vld [vmem:[%s880_s5 + $0x90] sm:$0xff] }
  0x3f   :  { %397 = vmatpush.msrb.mxu3 %v360_v14  ;;  %376 = vmatpush.msrb.mxu2 %v345_v17 }
  0x40   :  { %270 = vmatpush.msrb.mxu0 %v146_v34  ;;  %290 = vmatpush.msrb.mxu1 %v178_v35 }
  0x41   :  { %398 = vmatpush.msrb.mxu3 %v359_v16  ;;  %377 = vmatpush.msrb.mxu2 %v344_v19 }
  0x43   :  { %399 = vmatpush.msrb.mxu3 %v358_v18  ;;  %378 = vmatpush.msrb.mxu2 %v343_v21 }
  0x45   :  { %400 = vmatpush.msrb.mxu3 %v357_v20  ;;  %379 = vmatpush.msrb.mxu2 %v342_v24 }
  0x47   :  { %401 = vmatpush.msrb.mxu3 %v356_v22  ;;  %380 = vmatpush.msrb.mxu2 %v341_v26 }
  0x49   :  { %402 = vmatpush.msrb.mxu3 %v355_v25 }
  0x4b   :  { %403 = vmatpush.msrb.mxu3 %v354_v27 }
  0x4d   :  { %404 = vmatpush.msrb.mxu3 %v353_v30 }
  0x4f   :  { %405 = vmatpush.msrb.mxu3 %v352_v33 }
  0x9e   :  { %v82_v36 = vpop.f32.mrf.mxu0  ;;  %v102_v37 = vpop.f32.mrf.mxu1 }
  0x9f   :  { %v83_v38 = vadd.f32 %v82_v36, %v61_v28  ;;  %v103_v39 = vadd.f32 %v102_v37, %v62_v29  ;;  %v212_v28 = vperm.slane %v209_v23, 1  ;;  %v340_v29 = vld [vmem:[%s880_s5 + $0x28] sm:$0xff]  ;;  %v338_v36 = vld [vmem:[%s880_s5 + $0x18] sm:$0xff]  ;;  %v351_v37 = vld [vmem:[%s880_s5 + $0x80] sm:$0xff] }
  0xa0   :  { %381 = vmatpush.msrb.mxu2 %v340_v29  ;;  %406 = vmatpush.msrb.mxu3 %v351_v37 }
  0xa1   :  { %v416_v40 = vmul.f32 -1.442695, %v83_v38  ;;  %v417_v41 = vmul.f32 -1.442695, %v103_v39 }
  0xa2   :  { %382 = vmatpush.msrb.mxu2 %v339_v32 }
  0xa3   :  { %421 = vpow2.f32 %v416_v40  ;;  %v337_v40 = vld [vmem:[%s880_s5 + $0x10] sm:$0xff] }
  0xa4   :  { %423 = vpow2.f32 %v417_v41  ;;  %383 = vmatpush.msrb.mxu2 %v338_v36 }
  0xa6   :  { %384 = vmatpush.msrb.mxu2 %v337_v40 }
  0xa9   :  { %v422_v42 = vpop.eup %421 }
  0xaa   :  { %v424_v43 = vpop.eup %423  ;;  %v111_v44 = vadd.f32 1.0, %v422_v42 }
  0xab   :  { %v112_v45 = vadd.f32 1.0, %v424_v43  ;;  %v336_v43 = vld [vmem:[%s880_s5 + $0x8] sm:$0xff] }
  0xac   :  { %425 = vrcp.f32 %v111_v44  ;;  %v124_v51 = vand.u32 2147483648, %v111_v44  ;;  %v122_v54 = vand.u32 2147483647, %v111_v44  ;;  %vm118_vm2 = vweird.f32 %v111_v44  ;;  %385 = vmatpush.msrb.mxu2 %v336_v43 }
  0xad   :  { %427 = vrcp.f32 %v112_v45  ;;  %v139_v55 = vand.u32 2147483648, %v112_v45  ;;  %v137_v57 = vand.u32 2147483647, %v112_v45  ;;  %vm133_vm4 = vweird.f32 %v112_v45 }
  0xae   :  { %v125_v59 = vor.u32 1.1754944e-38, %v124_v51  ;;  %vm123_vm5 = vcmp.eq.f32.partialorder %v122_v54, 8.507059e+37 }
  0xaf   :  { %v140_v62 = vor.u32 1.1754944e-38, %v139_v55  ;;  %vm138_vm7 = vcmp.eq.f32.partialorder %v137_v57, 8.507059e+37 }
  0xb2   :  { %v426_v46 = vpop.eup %425 }
  0xb3   :  { %v428_v47 = vpop.eup %427  ;;  %v114_v48 = vmul.f32 %v426_v46, %v111_v44  ;;  %vm119_vm0 = vweird.f32 %v426_v46 }
  0xb4   :  { %v129_v49 = vmul.f32 %v428_v47, %v112_v45  ;;  %vm134_vm1 = vweird.f32 %v428_v47  ;;  %vm120_vm3 = vmor %vm118_vm2, %vm119_vm0  ;;  %v335_v45 = vld [vmem:[%s880_s5] sm:$0xff] }
  0xb5   :  { %v115_v50 = vsub.f32 1.0, %v114_v48  ;;  %vm135_vm6 = vmor %vm133_vm4, %vm134_vm1  ;;  %386 = vmatpush.msrb.mxu2 %v335_v45 }
  0xb6   :  { %v130_v52 = vsub.f32 1.0, %v129_v49 }
  0xb7   :  { %v116_v53 = vmul.f32 %v426_v46, %v115_v50 }
  0xb8   :  { %v131_v56 = vmul.f32 %v428_v47, %v130_v52 }
  0xb9   :  { %v117_v58 = vadd.f32 %v426_v46, %v116_v53 }
  0xba   :  { %v132_v60 = vadd.f32 %v428_v47, %v131_v56 }
  0xbb   :  { %v121_v61 = vsel %vm120_vm3, %v426_v46, %v117_v58 }
  0xbc   :  { %v126_v63 = vsel %vm123_vm5, %v125_v59, %v121_v61  ;;  %v136_v0 = vsel %vm135_vm6, %v428_v47, %v132_v60 }
  0xbd   :  { %v143_v1 = vmul.f32 %v126_v63, %v83_v38  ;;  %v141_v2 = vsel %vm138_vm7, %v140_v62, %v136_v0 }
  0xbe   :  { %v144_v3 = vmul.f32 %v141_v2, %v103_v39  ;;  %v211_v39 = vperm.slane %v209_v23, 0 }
  0xbf   :  { %231 = vmatmul.f32.vlgmr.msra.gmra.mxu2 %v143_v1  ;;  %271 = vmatmul.f32.vlgmr.msrb.gmra.mxu0 %v143_v1 }
  0xc0   :  { %251 = vmatmul.f32.vlgmr.msra.gmra.mxu3 %v144_v3  ;;  %291 = vmatmul.f32.vlgmr.msrb.gmra.mxu1 %v144_v3 }
 0x13c   :  { %v272_v31 = vpop.f32.mrf.mxu0 }
 0x13d   :  { %v273_v34 = vadd.f32 %v272_v31, %v212_v28  ;;  %v292_v35 = vpop.f32.mrf.mxu1 }
 0x13f   :  { %v293_v38 = vadd.f32 %v292_v35, %v273_v34 }
 0x141   :  { %v419_v41 = vmul.f32 -1.442695, %v293_v38 }
 0x142   :  { %v232_v42 = vpop.f32.mrf.mxu2 }
 0x143   :  { %429 = vpow2.f32 %v419_v41  ;;  %v233_v44 = vadd.f32 %v232_v42, %v211_v39  ;;  %v252_v46 = vpop.f32.mrf.mxu3 }
 0x145   :  { %v253_v47 = vadd.f32 %v252_v46, %v233_v44 }
 0x147   :  { %v418_v48 = vmul.f32 -1.442695, %v253_v47 }
 0x149   :  { %v430_v49 = vpop.eup %429  ;;  %431 = vpow2.f32 %v418_v48 }
 0x14a   :  { %v302_v50 = vadd.f32 1.0, %v430_v49 }
 0x14c   :  { %433 = vrcp.f32 %v302_v50  ;;  %v329_v56 = vand.u32 2147483648, %v302_v50  ;;  %v327_v58 = vand.u32 2147483647, %v302_v50  ;;  %vm323_vm9 = vweird.f32 %v302_v50 }
 0x14e   :  { %v330_v62 = vor.u32 1.1754944e-38, %v329_v56  ;;  %vm328_vm11 = vcmp.eq.f32.partialorder %v327_v58, 8.507059e+37 }
 0x14f   :  { %v432_v51 = vpop.eup %431 }
 0x150   :  { %v301_v52 = vadd.f32 1.0, %v432_v51 }
 0x152   :  { %v434_v53 = vpop.eup %433  ;;  %435 = vrcp.f32 %v301_v52  ;;  %v314_v2 = vand.u32 2147483648, %v301_v52  ;;  %v312_v5 = vand.u32 2147483647, %v301_v52  ;;  %vm308_vm13 = vweird.f32 %v301_v52 }
 0x153   :  { %v319_v54 = vmul.f32 %v434_v53, %v302_v50  ;;  %vm324_vm8 = vweird.f32 %v434_v53 }
 0x154   :  { %vm325_vm10 = vmor %vm323_vm9, %vm324_vm8  ;;  %v315_v7 = vor.u32 1.1754944e-38, %v314_v2  ;;  %vm313_vm15 = vcmp.eq.f32.partialorder %v312_v5, 8.507059e+37 }
 0x155   :  { %v320_v55 = vsub.f32 1.0, %v319_v54 }
 0x157   :  { %v321_v57 = vmul.f32 %v434_v53, %v320_v55 }
 0x158   :  { %v436_v59 = vpop.eup %435 }
 0x159   :  { %v322_v60 = vadd.f32 %v434_v53, %v321_v57  ;;  %v304_v61 = vmul.f32 %v436_v59, %v301_v52  ;;  %vm309_vm12 = vweird.f32 %v436_v59 }
 0x15a   :  { %vm310_vm14 = vmor %vm308_vm13, %vm309_vm12 }
 0x15b   :  { %v326_v63 = vsel %vm325_vm10, %v434_v53, %v322_v60  ;;  %v305_v0 = vsub.f32 1.0, %v304_v61 }
 0x15c   :  { %v331_v1 = vsel %vm328_vm11, %v330_v62, %v326_v63 }
 0x15d   :  { %v334_v3 = vmul.f32 %v331_v1, %v293_v38  ;;  %v306_v4 = vmul.f32 %v436_v59, %v305_v0 }
 0x15f   :  { %v307_v6 = vadd.f32 %v436_v59, %v306_v4  ;;  %407 = vmatmul.f32.vlgmr.msrb.gmra.mxu3 %v334_v3 }
 0x161   :  { %v311_v8 = vsel %vm310_vm14, %v436_v59, %v307_v6 }
 0x162   :  { %v316_v9 = vsel %vm313_vm15, %v315_v7, %v311_v8 }
 0x163   :  { %v333_v10 = vmul.f32 %v316_v9, %v253_v47 }
 0x165   :  { %387 = vmatmul.f32.vlgmr.msrb.gmra.mxu2 %v333_v10 }
 0x1e2   :  { %v408_v14 = vpop.f32.mrf.mxu3 }
 0x1e8   :  { %v388_v12 = vpop.f32.mrf.mxu2 }
 0x1e9   :  { %v389_v13 = vadd.f32 %v420_v11, %v388_v12 }
 0x1eb   :  { %v409_v15 = vadd.f32 %v408_v14, %v389_v13 }
 0x1ed   :  { %411 = vst [vmem:[%s883_s7] sm:$0x3] %v409_v15 }

// kernel: versatile_prior_forward.3
= control target key start
LH: loop header
LB: loop body
LE: loop exit
PB: predicated region body
PF: predicated region fallthrough
CT: control target
= control target key end

     0   :  { %s8124_s0 = inlined_call_operand.vmem [shape: f32[2,17,128], index: 0, kind: input, shape index: {}]   ;;  %s8125_s1 = inlined_call_operand.vmem [shape: f32[68,24], index: 1, kind: input, shape index: {}]   ;;  %s8126_s2 = inlined_call_operand.vmem [shape: f32[34,128], index: 2, kind: input, shape index: {}]   ;;  %s8127_s3 = inlined_call_operand.vmem [shape: f32[34,128], index: 3, kind: input, shape index: {}]   ;;  %s8128_s4 = inlined_call_operand.vmem [shape: f32[34,32], index: 4, kind: input, shape index: {}]   ;;  %s8129_s5 = inlined_call_operand.vmem [shape: f32[34,32], index: 5, kind: input, shape index: {}]   ;;  %s8130_s6 = inlined_call_operand.vmem [shape: f32[2,1,128], index: 6, kind: input, shape index: {}, may-alias: {6,14,15}]   ;;  %s8131_s7 = inlined_call_operand.vmem [shape: bf16[2,128,128], index: 7, kind: input, shape index: {}]   ;;  %s8132_s8 = inlined_call_operand.vmem [shape: bf16[2,128,128], index: 8, kind: input, shape index: {}]   ;;  %s8133_s9 = inlined_call_operand.vmem [shape: bf16[2,128,32], index: 9, kind: input, shape index: {}]   ;;  %s8134_s10 = inlined_call_operand.vmem [shape: bf16[2,128,32], index: 10, kind: input, shape index: {}]   ;;  %s8135_s11 = inlined_call_operand.vmem [shape: bf16[2,128,32], index: 11, kind: input, shape index: {}]   ;;  %s8136_s12 = inlined_call_operand.vmem [shape: f32[2,2,32], index: 12, kind: input, shape index: {}]   ;;  %s8137_s13 = inlined_call_operand.vmem [shape: bf16[2,128,128], index: 13, kind: input, shape index: {}]   ;;  %s8138_s14 = inlined_call_operand.vmem [shape: f32[2,1,128], index: 14, kind: input, shape index: {}, may-alias: {6,14,15}]   ;;  %s8139_s15 = inlined_call_operand.vmem [shape: f32[2,1,128], index: 15, kind: input, shape index: {}, may-alias: {6,14,15}]   ;;  %s8140_s16 = inlined_call_operand.vmem [shape: bf16[2,128,512], index: 16, kind: input, shape index: {}]   ;;  %s8141_s17 = inlined_call_operand.vmem [shape: bf16[2,128,512], index: 17, kind: input, shape index: {}]   ;;  %s8142_s18 = inlined_call_operand.vmem [shape: bf16[2,512,128], index: 18, kind: input, shape index: {}]   ;;  %s8143_s19 = inlined_call_operand.vmem [shape: f32[1,128], index: 19, kind: input, shape index: {}]   ;;  %s8144_s20 = inlined_call_operand.vmem [shape: bf16[128,128], index: 20, kind: input, shape index: {}]   ;;  %s8145_s21 = inlined_call_operand.hbm [shape: f32[2,8,128], index: 21, kind: output, shape index: {}]  }
   0x1   :  { %8163 = sst [smem:[#allocation24_spill]] %s8124_s0 }
   0x2   :  { %8164 = sst [smem:[#allocation25_spill]] %s8125_s1 }
   0x3   :  { %8165 = sst [smem:[#allocation26_spill]] %s8126_s2 }
   0x4   :  { %8166 = sst [smem:[#allocation27_spill]] %s8127_s3 }
   0x5   :  { %8167 = sst [smem:[#allocation28_spill]] %s8128_s4 }
   0x6   :  { %8168 = sst [smem:[#allocation29_spill]] %s8129_s5 }
   0x7   :  { %8169 = sst [smem:[#allocation30_spill]] %s8130_s6 }
   0x8   :  { %8170 = sst [smem:[#allocation31_spill]] %s8131_s7 }
   0x9   :  { %8171 = sst [smem:[#allocation32_spill]] %s8132_s8 }
   0xa   :  { %8172 = sst [smem:[#allocation33_spill]] %s8133_s9 }
   0xb   :  { %8173 = sst [smem:[#allocation34_spill]] %s8134_s10 }
   0xc   :  { %8174 = sst [smem:[#allocation35_spill]] %s8135_s11 }
   0xd   :  { %8175 = sst [smem:[#allocation36_spill]] %s8143_s19 }
   0xe   :  { %8176 = sst [smem:[#allocation37_spill]] %s8144_s20 }
   0xf   :  { %8177 = sst [smem:[#allocation38_spill]] %s8145_s21 }
  0x10   :  { %26 = vsyncpa [#allocation8], 0  ;;  %s6253_s2 = smov 0   ;;  %s6255_s25 = smov 0  }
  0x11   :  { %s6257_s26 = smov 0  }
  0x12 LB: > { %8178 = sst [smem:[#allocation10_spill]] %s6129_s25  ;;  %s41_s3 = sadd.s32 1, %s6129_s25  ;;  %s6133_s26 = sphi %s6257_s26, %s32_s26   ;;  %s6129_s25 = sphi %s6255_s25, %s8289_s25   ;;  %s6125_s2 = sphi %s6253_s2, %s8288_s2  }
  0x13   : > { %8179 = sst [smem:[#allocation11_spill]] %s6133_s26  ;;  %p42_p0 = scmp.ge.s32.totalorder %s41_s3, 2 }
  0x14   : > { %p4892_p1 = scmp.ge.s32.totalorder %s6133_s26, 1  ;;  %p725_p2 = scmp.lt.s32.totalorder %s6133_s26, 3 }
  0x15   : > { %s8291_s3 = smov (%p42_p0, %s41_s3), 0 }
  0x16   : > { %8180 = sst [smem:[#allocation12_spill]] %s8291_s3  ;;  %p726_p3 = pnand %p4892_p1, %p725_p2 }
  0x18   : > { %729 = sbr.rel (%p726_p3) target bundleno = 3075 (0xc03), region = 104 }
  0x1d   : > { %p846_p4 = scmp.lt.s32.totalorder %s6125_s2, 1  ;;  %s8182_s7 = sld [smem:[#allocation31_spill]] }
  0x1e   : > { %s8183_s8 = sld [smem:[#allocation32_spill]]  ;;  %p4912_p5 = scmp.ne.s32.totalorder %s6125_s2, 0 }
  0x1f   : > { %s6276_s28 = scalar_select %p846_p4, %s6125_s2, 1 }
  0x20   : > { %s8184_s9 = sld [smem:[#allocation33_spill]] }
  0x21   : > { %s5598_s30 = sshll.u32 %s6276_s28, 6  ;;  %s8185_s10 = sld [smem:[#allocation34_spill]] }
  0x22   : > { %s8186_s11 = sld [smem:[#allocation35_spill]]  ;;  %s4903_s22 = sshll.u32 %s6276_s28, 1 }
  0x23   : > { %s6286_s23 = scalar_lea.vmem %s8182_s7, %s5598_s30  ;;  %s6312_s24 = scalar_lea.vmem %s8136_s12, %s4903_s22 }
  0x24   : > { %s6291_s27 = scalar_lea.vmem %s8183_s8, %s5598_s30  ;;  %s6317_s3 = scalar_lea.vmem %s8137_s13, %s5598_s30 }
  0x25   : > { %s885_s0 = scalar_lea.vmem %s8138_s14, %s6276_s28  ;;  %s888_s19 = scalar_lea.vmem %s8139_s15, %s6276_s28 }
  0x26   : > { %s6296_s29 = scalar_lea.vmem %s8184_s9, %s5598_s30  ;;  %s5604_s26 = sshll.u32 %s6276_s28, 8 }
  0x27   : > { %s6301_s4 = scalar_lea.vmem %s8185_s10, %s5598_s30  ;;  %s6331_s7 = scalar_lea.vmem %s8140_s16, %s5604_s26 }
  0x28   : > { %s6306_s5 = scalar_lea.vmem %s8186_s11, %s5598_s30  ;;  %s6336_s8 = scalar_lea.vmem %s8141_s17, %s5604_s26 }
  0x29   : > { %s6341_s9 = scalar_lea.vmem %s8142_s18, %s5604_s26  ;;  %909 = sbr.rel (%p4912_p5) target bundleno = 124 (0x7c), region = 108 }
  0x2a   : > { %s8187_s21 = sld [smem:[#allocation24_spill]] (!%p4912_p5) }
  0x2e   : > { %vm1006_vm0 = vcmask 259072   ;;  %v6135_v26 = vmov 0.0  }
  0x2f   : > { %1007 = vst.msk [vmem:[#allocation3 + $0x12] sm:$0x3f] %vm1006_vm0, %v6135_v26 }
  0x30   : > { %v910_v0 = vld [vmem:[%s8187_s21] sm:$0xff]  ;;  %v911_v8 = vld [vmem:[%s8187_s21 + $0x8] sm:$0xff]  ;;  %v913_v17 = vld [vmem:[%s8187_s21 + $0x18] sm:$0xff]  ;;  %1008 = vst.msk [vmem:[#allocation4 + $0x12] sm:$0x3f] %vm1006_vm0, %v6135_v26 }
  0x31   : > { %950 = vst [vmem:[#allocation1] ss:$9 sm:$0xff] %v910_v0  ;;  %v922_v1 = vrot.slane %v910_v0, 1  ;;  %v923_v2 = vrot.slane %v910_v0, 2  ;;  %v924_v3 = vrot.slane %v910_v0, 3  ;;  %v925_v4 = vrot.slane %v910_v0, 4 }
  0x32   : > { %v926_v5 = vrot.slane %v910_v0, 5  ;;  %v927_v6 = vrot.slane %v910_v0, 6  ;;  %v928_v7 = vrot.slane %v910_v0, 7  ;;  %v929_v9 = vrot.slane %v911_v8, 1  ;;  %v912_v18 = vld [vmem:[%s8187_s21 + $0x10] sm:$0x1] }
  0x33   : > { %952 = vst [vmem:[#allocation1 + $0x1] ss:$9 sm:$0xff] %v922_v1  ;;  %v930_v11 = vrot.slane %v911_v8, 2  ;;  %v931_v12 = vrot.slane %v911_v8, 3  ;;  %v932_v13 = vrot.slane %v911_v8, 4  ;;  %v933_v14 = vrot.slane %v911_v8, 5 }
  0x34   : > { %954 = vst [vmem:[#allocation1 + $0x2] ss:$9 sm:$0xff] %v923_v2  ;;  %v934_v15 = vrot.slane %v911_v8, 6  ;;  %v935_v16 = vrot.slane %v911_v8, 7  ;;  %v936_v20 = vrot.slane %v913_v17, 1  ;;  %v937_v21 = vrot.slane %v913_v17, 2 }
  0x35   : > { %956 = vst [vmem:[#allocation1 + $0x3] ss:$9 sm:$0xff] %v924_v3  ;;  %v938_v22 = vrot.slane %v913_v17, 3  ;;  %v939_v23 = vrot.slane %v913_v17, 4  ;;  %v940_v24 = vrot.slane %v913_v17, 5  ;;  %v941_v25 = vrot.slane %v913_v17, 6 }
  0x36   : > { %958 = vst [vmem:[#allocation1 + $0x4] ss:$9 sm:$0xff] %v925_v4  ;;  %v942_v27 = vrot.slane %v913_v17, 7  ;;  %v914_v28 = vld [vmem:[%s8187_s21 + $0x20] sm:$0xff]  ;;  %v915_v38 = vld [vmem:[%s8187_s21 + $0x28] sm:$0x1] }
  0x37   : > { %960 = vst [vmem:[#allocation1 + $0x5] ss:$9 sm:$0xff] %v926_v5  ;;  %v943_v30 = vrot.slane %v914_v28, 1  ;;  %v944_v31 = vrot.slane %v914_v28, 2  ;;  %v945_v32 = vrot.slane %v914_v28, 3  ;;  %v946_v33 = vrot.slane %v914_v28, 4 }
  0x38   : > { %962 = vst [vmem:[#allocation1 + $0x6] ss:$9 sm:$0xff] %v927_v6  ;;  %v947_v34 = vrot.slane %v914_v28, 5  ;;  %v948_v35 = vrot.slane %v914_v28, 6  ;;  %v949_v36 = vrot.slane %v914_v28, 7 }
  0x39   : > { %964 = vst [vmem:[#allocation1 + $0x7] ss:$9 sm:$0xff] %v928_v7 }
  0x40   : > { %v965_v10 = vld [vmem:[#allocation1] sm:$0xff] }
  0x41   : > { %1001 = vst [vmem:[#allocation2 + $0x8] sm:$0xff] %v965_v10 }
  0x42   : > { %966 = vst [vmem:[#allocation1] ss:$9 sm:$0xff] %v911_v8 }
  0x43   : > { %967 = vst [vmem:[#allocation1 + $0x1] ss:$9 sm:$0xff] %v929_v9 }
  0x44   : > { %968 = vst [vmem:[#allocation1 + $0x2] ss:$9 sm:$0xff] %v930_v11 }
  0x45   : > { %969 = vst [vmem:[#allocation1 + $0x3] ss:$9 sm:$0xff] %v931_v12 }
  0x46   : > { %970 = vst [vmem:[#allocation1 + $0x4] ss:$9 sm:$0xff] %v932_v13 }
  0x47   : > { %971 = vst [vmem:[#allocation1 + $0x5] ss:$9 sm:$0xff] %v933_v14 }
  0x48   : > { %972 = vst [vmem:[#allocation1 + $0x6] ss:$9 sm:$0xff] %v934_v15 }
  0x49   : > { %973 = vst [vmem:[#allocation1 + $0x7] ss:$9 sm:$0xff] %v935_v16 }
  0x50   : > { %v974_v19 = vld [vmem:[#allocation1] sm:$0xff] }
  0x51   : > { %1002 = vst [vmem:[#allocation2] sm:$0xff] %v974_v19 }
  0x52   : > { %975 = vst [vmem:[#allocation1] ss:$9 sm:$0xff] %v912_v18 }
  0x53   : > { %976 = vst [vmem:[#allocation1 + $0x1] ss:$9 sm:$0xff] %v913_v17 }
  0x54   : > { %977 = vst [vmem:[#allocation1 + $0x2] ss:$9 sm:$0xff] %v936_v20 }
  0x55   : > { %978 = vst [vmem:[#allocation1 + $0x3] ss:$9 sm:$0xff] %v937_v21 }
  0x56   : > { %979 = vst [vmem:[#allocation1 + $0x4] ss:$9 sm:$0xff] %v938_v22 }
  0x57   : > { %980 = vst [vmem:[#allocation1 + $0x5] ss:$9 sm:$0xff] %v939_v23 }
  0x58   : > { %981 = vst [vmem:[#allocation1 + $0x6] ss:$9 sm:$0xff] %v940_v24 }
  0x59   : > { %982 = vst [vmem:[#allocation1 + $0x7] ss:$9 sm:$0xff] %v941_v25 }
  0x60   : > { %v983_v29 = vld [vmem:[#allocation1] sm:$0xff] }
  0x61   : > { %984 = vst [vmem:[#allocation1] ss:$9 sm:$0xff] %v942_v27 }
  0x62   : > { %1003 = vst [vmem:[#allocation2 + $0x20] sm:$0xff] %v983_v29 }
  0x63   : > { %985 = vst [vmem:[#allocation1 + $0x1] ss:$9 sm:$0xff] %v914_v28 }
  0x64   : > { %986 = vst [vmem:[#allocation1 + $0x2] ss:$9 sm:$0xff] %v943_v30 }
  0x65   : > { %987 = vst [vmem:[#allocation1 + $0x3] ss:$9 sm:$0xff] %v944_v31 }
  0x66   : > { %988 = vst [vmem:[#allocation1 + $0x4] ss:$9 sm:$0xff] %v945_v32 }
  0x67   : > { %989 = vst [vmem:[#allocation1 + $0x5] ss:$9 sm:$0xff] %v946_v33 }
  0x68   : > { %990 = vst [vmem:[#allocation1 + $0x6] ss:$9 sm:$0xff] %v947_v34 }
  0x69   : > { %991 = vst [vmem:[#allocation1 + $0x7] ss:$9 sm:$0xff] %v948_v35 }
  0x70   : > { %v992_v37 = vld [vmem:[#allocation1] sm:$0xff] }
  0x71   : > { %993 = vst [vmem:[#allocation1] ss:$9 sm:$0xff] %v949_v36 }
  0x72   : > { %1004 = vst [vmem:[#allocation2 + $0x10] sm:$0xff] %v992_v37 }
  0x73   : > { %994 = vst [vmem:[#allocation1 + $0x1] ss:$9 sm:$0xff] %v915_v38 }
  0x7a   : > { %v995_v39 = vld [vmem:[#allocation1] sm:$0xff] }
  0x7b   : > { %1005 = vst [vmem:[#allocation2 + $0x18] sm:$0x3] %v995_v39 }
  0x7c PF: > { %v1011_v40 = vld [vmem:[#allocation2 + $0x20] sm:$0xff]  ;;  %vm1023_vm1 = vcmask 1041408   ;;  %v1012_v44 = vld [vmem:[#allocation2 + $0x10] sm:$0xff]  ;;  %v1009_v45 = vld [vmem:[#allocation2 + $0x8] sm:$0xff]  ;;  %v6136_v46 = vmov 128.0   ;;  %s8193_s26 = sld [smem:[#allocation26_spill]] }
  0x7d   : > { %1019 = vadd.xlane.f32.xlu0 %v1011_v40  ;;  %v1010_v43 = vld [vmem:[#allocation2] sm:$0xff]  ;;  %5824 = vrcp.f32 %v6136_v46  ;;  %v5614_v51 = vld [vmem:[%s6286_s23 + $0x38] sm:$0xff]  ;;  %v5613_v52 = vld [vmem:[%s6286_s23 + $0x30] sm:$0xff]  ;;  %s8195_s25 = sld [smem:[#allocation27_spill]]  ;;  %s6137_s20 = smov 32  }
  0x7e   : > { %1017 = vadd.xlane.f32.xlu2 %v1010_v43  ;;  %5767 = vmatpush.bf16.msra.mxu2 %v5614_v51  ;;  %v5612_v54 = vld [vmem:[%s6286_s23 + $0x28] sm:$0xff]  ;;  %v5611_v59 = vld [vmem:[%s6286_s23 + $0x20] sm:$0xff]  ;;  %v5610_v14 = vld [vmem:[%s6286_s23 + $0x18] sm:$0xff]  ;;  %s6138_s6 = smov 64   ;;  %p5529_p6 = scmp.ne.s32.totalorder %s6125_s2, 1 }
  0x7f   : > { %1200 = vmatpush.bf16.msra.mxu0 %v5614_v51  ;;  %v5622_v15 = vld [vmem:[%s6291_s27 + $0x38] sm:$0xff]  ;;  %v5609_v16 = vld [vmem:[%s6286_s23 + $0x10] sm:$0xff]  ;;  %v5608_v18 = vld [vmem:[%s6286_s23 + $0x8] sm:$0xff]  ;;  %s8282_s2 = sld [smem:[#allocation36_spill]] (!%p5529_p6) }
  0x80   : > { %5775 = vmatpush.bf16.msra.mxu3 %v5622_v15  ;;  %1297 = vmatpush.bf16.msra.mxu1 %v5622_v15  ;;  %v5621_v17 = vld [vmem:[%s6291_s27 + $0x30] sm:$0xff]  ;;  %v5620_v19 = vld [vmem:[%s6291_s27 + $0x28] sm:$0xff]  ;;  %v5607_v20 = vld [vmem:[%s6286_s23] sm:$0xff]  ;;  %s8198_s23 = sld [smem:[#allocation29_spill]] }
  0x81   : > { %v5630_v21 = vld [vmem:[%s6296_s29 + $0x38] sm:$0xff]  ;;  %v5619_v22 = vld [vmem:[%s6291_s27 + $0x20] sm:$0xff]  ;;  %v5629_v23 = vld [vmem:[%s6296_s29 + $0x30] sm:$0xff] }
  0x82   : > { %v1013_v41 = vld [vmem:[#allocation2 + $0x18] sm:$0x3]  ;;  %5768 = vmatpush.bf16.msra.mxu2 %v5613_v52  ;;  %v5618_v24 = vld [vmem:[%s6291_s27 + $0x18] sm:$0xff]  ;;  %v5628_v25 = vld [vmem:[%s6296_s29 + $0x28] sm:$0xff]  ;;  %s8194_s22 = smov %s8193_s26 }
  0x83   : > { %v1024_v42 = vsel %vm1023_vm1, %v1013_v41, 0.0  ;;  %v5825_v47 = vpop.eup %5824  ;;  %1201 = vmatpush.bf16.msra.mxu0 %v5613_v52  ;;  %v5617_v26 = vld [vmem:[%s6291_s27 + $0x10] sm:$0xff]  ;;  %v5627_v27 = vld [vmem:[%s6296_s29 + $0x20] sm:$0xff]  ;;  %v5616_v28 = vld [vmem:[%s6291_s27 + $0x8] sm:$0xff]  ;;  %s8196_s10 = smov %s8195_s25 }
  0x84   : > { %1025 = vadd.xlane.f32.xlu1 %v1024_v42  ;;  %v1028_v48 = vmul.f32 128.0, %v5825_v47  ;;  %vm1032_vm2 = vweird.f32 %v5825_v47  ;;  %5776 = vmatpush.bf16.msra.mxu3 %v5621_v17  ;;  %v5626_v29 = vld [vmem:[%s6296_s29 + $0x18] sm:$0xff]  ;;  %v5615_v31 = vld [vmem:[%s6291_s27] sm:$0xff]  ;;  %v5625_v34 = vld [vmem:[%s6296_s29 + $0x10] sm:$0xff] }
  0x85   : > { %1021 = vadd.xlane.f32.xlu0 %v1012_v44  ;;  %1298 = vmatpush.bf16.msra.mxu1 %v5621_v17  ;;  %v5638_v37 = vld [vmem:[%s6301_s4 + $0x38] sm:$0xff]  ;;  %v5624_v39 = vld [vmem:[%s6296_s29 + $0x8] sm:$0xff]  ;;  %v5643_v17 = vld [vmem:[%s6306_s5 + $0x20] sm:$0xff] }
  0x86   : > { %v1029_v49 = vsub.f32 1.0, %v1028_v48  ;;  %5769 = vmatpush.bf16.msra.mxu2 %v5612_v54  ;;  %v5646_v51 = vld [vmem:[%s6306_s5 + $0x38] sm:$0xff] }
  0x87   : > { %1202 = vmatpush.bf16.msra.mxu0 %v5612_v54 }
  0x88   : > { %v1030_v50 = vmul.f32 %v5825_v47, %v1029_v49  ;;  %5777 = vmatpush.bf16.msra.mxu3 %v5620_v19 }
  0x89   : > { %1299 = vmatpush.bf16.msra.mxu1 %v5620_v19 }
  0x8a   : > { %v1031_v53 = vadd.f32 %v5825_v47, %v1030_v50  ;;  %5770 = vmatpush.bf16.msra.mxu2 %v5611_v59  ;;  %v5636_v50 = vld [vmem:[%s6301_s4 + $0x28] sm:$0xff] }
  0x8b   : > { %1203 = vmatpush.bf16.msra.mxu0 %v5611_v59 }
  0x8c   : > { %1015 = vadd.xlane.f32.xlu1 %v1009_v45  ;;  %v6366_v55 = vsel %vm1032_vm2, %v5825_v47, %v1031_v53  ;;  %5778 = vmatpush.bf16.msra.mxu3 %v5619_v22 }
  0x8d   : > { %8188 = vst [vmem:[#allocation13_spill] sm:$0xff] %v6366_v55  ;;  %1300 = vmatpush.bf16.msra.mxu1 %v5619_v22 }
  0x8e   : > { %5771 = vmatpush.bf16.msra.mxu2 %v5610_v14 }
  0x8f   : > { %1204 = vmatpush.bf16.msra.mxu0 %v5610_v14 }
  0x90   : > { %5779 = vmatpush.bf16.msra.mxu3 %v5618_v24 }
  0x91   : > { %1301 = vmatpush.bf16.msra.mxu1 %v5618_v24 }
  0x92   : > { %5772 = vmatpush.bf16.msra.mxu2 %v5609_v16 }
  0x93   : > { %1205 = vmatpush.bf16.msra.mxu0 %v5609_v16  ;;  %v5633_v16 = vld [vmem:[%s6301_s4 + $0x10] sm:$0xff] }
  0x94   : > { %5780 = vmatpush.bf16.msra.mxu3 %v5617_v26 }
  0x95   : > { %1302 = vmatpush.bf16.msra.mxu1 %v5617_v26 }
  0x96   : > { %5773 = vmatpush.bf16.msra.mxu2 %v5608_v18 }
  0x97   : > { %1206 = vmatpush.bf16.msra.mxu0 %v5608_v18 }
  0x98   : > { %5781 = vmatpush.bf16.msra.mxu3 %v5616_v28 }
  0x99   : > { %1303 = vmatpush.bf16.msra.mxu1 %v5616_v28 }
  0x9a   : > { %5774 = vmatpush.bf16.msra.mxu2 %v5607_v20 }
  0x9b   : > { %1207 = vmatpush.bf16.msra.mxu0 %v5607_v20 }
  0x9c   : > { %5782 = vmatpush.bf16.msra.mxu3 %v5615_v31 }
  0x9d   : > { %1304 = vmatpush.bf16.msra.mxu1 %v5615_v31 }
  0x9e   : > { %1399 = vmatpush.bf16.msrb.mxu2 %v5630_v21 }
  0x9f   : > { %1598 = vmatpush.bf16.msrb.mxu0 %v5646_v51 }
  0xa0   : > { %1496 = vmatpush.bf16.msrb.mxu3 %v5638_v37 }
  0xa2   : > { %1400 = vmatpush.bf16.msrb.mxu2 %v5629_v23 }
  0xa6   : > { %1401 = vmatpush.bf16.msrb.mxu2 %v5628_v25 }
  0xaa   : > { %1402 = vmatpush.bf16.msrb.mxu2 %v5627_v27 }
  0xae   : > { %1403 = vmatpush.bf16.msrb.mxu2 %v5626_v29 }
  0xb2   : > { %1404 = vmatpush.bf16.msrb.mxu2 %v5625_v34 }
  0xb6   : > { %1405 = vmatpush.bf16.msrb.mxu2 %v5624_v39  ;;  %v5631_v39 = vld [vmem:[%s6301_s4] sm:$0xff] }
  0xf0   : > { %v1020_v56 = vpop.xlane.xlu0 %1019 }
  0xf1   : > { %v1036_v57 = vmul.f32 %v6366_v55, %v1020_v56  ;;  %v1018_v3 = vpop.xlane.xlu2 %1017  ;;  %v5635_v56 = vld [vmem:[%s6301_s4 + $0x20] sm:$0xff] }
  0xf2   : > { %v1035_v8 = vmul.f32 %v6366_v55, %v1018_v3 }
  0xf3   : > { %v6371_v61 = vsub.f32 %v1011_v40, %v1036_v57  ;;  %v5645_v57 = vld [vmem:[%s6306_s5 + $0x30] sm:$0xff] }
  0xf4   : > { %v6391_v12 = vsub.f32 %v1010_v43, %v1035_v8  ;;  %1599 = vmatpush.bf16.msrb.mxu0 %v5645_v57  ;;  %v5634_v8 = vld [vmem:[%s6301_s4 + $0x18] sm:$0xff] }
  0xf5   : > { %v1046_v63 = vmul.f32 %v6371_v61, %v6371_v61 }
  0xf6   : > { %v1045_v13 = vmul.f32 %v6391_v12, %v6391_v12 }
  0xf7   : > { %v1026_v58 = vpop.xlane.xlu1 %1025  ;;  %1053 = vadd.xlane.f32.xlu2 %v1046_v63 }
  0xf8   : > { %v1038_v60 = vmul.f32 %v6366_v55, %v1026_v58  ;;  %v1022_v1 = vpop.xlane.xlu0 %1021 }
  0xf9   : > { %v1037_v4 = vmul.f32 %v6366_v55, %v1022_v1 }
  0xfa   : > { %v6373_v62 = vsub.f32 %v1013_v41, %v1038_v60  ;;  %v5637_v41 = vld [vmem:[%s6301_s4 + $0x30] sm:$0xff] }
  0xfb   : > { %v6382_v7 = vsub.f32 %v1012_v44, %v1037_v4  ;;  %v5623_v44 = vld [vmem:[%s6296_s29] sm:$0xff]  ;;  %1497 = vmatpush.bf16.msrb.mxu3 %v5637_v41  ;;  %s8189_s29 = sld [smem:[#allocation30_spill]] }
  0xfc   : > { %v1048_v0 = vmul.f32 %v6373_v62, %v6373_v62  ;;  %1406 = vmatpush.bf16.msrb.mxu2 %v5623_v44 }
  0xfd   : > { %v1047_v10 = vmul.f32 %v6382_v7, %v6382_v7 }
  0xfe   : > { %v1057_v2 = vsel %vm1023_vm1, %v1048_v0, 0.0 }
  0xff   : > { %1058 = vadd.xlane.f32.xlu1 %v1057_v2  ;;  %v1016_v5 = vpop.xlane.xlu1 %1015  ;;  %1055 = vadd.xlane.f32.xlu0 %v1047_v10  ;;  %v5644_v10 = vld [vmem:[%s6306_s5 + $0x28] sm:$0xff] }
 0x100   : > { %v1034_v6 = vmul.f32 %v6366_v55, %v1016_v5  ;;  %1498 = vmatpush.bf16.msrb.mxu3 %v5636_v50  ;;  %1600 = vmatpush.bf16.msrb.mxu0 %v5644_v10 }
 0x101   : > { %s8190_s11 = scalar_lea.vmem %s8189_s29, %s6276_s28  ;;  %s6139_s29 = smov 96  }
 0x102   : > { %v6385_v9 = vsub.f32 %v1009_v45, %v1034_v6  ;;  %v5821_v21 = vld [vmem:[%s8190_s11] ss:$0 sm:$0xff]  ;;  %s8283_s28 = smov (!%p5529_p6), %s8282_s2 }
 0x104   : > { %v1044_v11 = vmul.f32 %v6385_v9, %v6385_v9  ;;  %1499 = vmatpush.bf16.msrb.mxu3 %v5635_v56  ;;  %1601 = vmatpush.bf16.msrb.mxu0 %v5643_v17  ;;  %v1320_v56 = vld [vmem:[%s8195_s25] sm:$0xff] }
 0x106   : > { %1049 = vadd.xlane.f32.xlu2 %v1044_v11 }
 0x107   : > { %1051 = vadd.xlane.f32.xlu0 %v1045_v13 }
 0x108   : > { %1500 = vmatpush.bf16.msrb.mxu3 %v5634_v8 }
 0x10c   : > { %1501 = vmatpush.bf16.msrb.mxu3 %v5633_v16 }
 0x16a   : > { %v1054_v30 = vpop.xlane.xlu2 %1053 }
 0x16b   : > { %v1062_v32 = vmul.f32 %v1054_v30, %v6366_v55 }
 0x16d   : > { %v6414_v35 = vadd.f32 1e-05, %v1062_v32  ;;  %v5642_v32 = vld [vmem:[%s6306_s5 + $0x18] sm:$0xff] }
 0x16e   : > { %1602 = vmatpush.bf16.msrb.mxu0 %v5642_v32 }
 0x16f   : > { %5826 = vrsqrt.f32 %v6414_v35  ;;  %vm1096_vm7 = vweird.f32 %v6414_v35 }
 0x172   : > { %v1059_v33 = vpop.xlane.xlu1 %1058  ;;  %v1056_v40 = vpop.xlane.xlu0 %1055 }
 0x173   : > { %v1064_v36 = vmul.f32 %v1059_v33, %v6366_v55  ;;  %v1063_v42 = vmul.f32 %v1056_v40, %v6366_v55  ;;  %v5641_v40 = vld [vmem:[%s6306_s5 + $0x10] sm:$0xff] }
 0x174   : > { %1603 = vmatpush.bf16.msrb.mxu0 %v5641_v40 }
 0x175   : > { %v1069_v38 = vadd.f32 1e-05, %v1064_v36  ;;  %v6424_v46 = vpop.eup %5826  ;;  %v6426_v47 = vadd.f32 1e-05, %v1063_v42 }
 0x176   : > { %v1091_v48 = vmul.f32 %v6424_v46, %v6414_v35  ;;  %vm1097_vm5 = vweird.f32 %v6424_v46 }
 0x177   : > { %5828 = vrsqrt.f32 %v1069_v38  ;;  %vm1116_vm3 = vweird.f32 %v1069_v38  ;;  %vm6462_vm8 = vmor %vm1096_vm7, %vm1097_vm5  ;;  %vm1106_vm10 = vweird.f32 %v6426_v47  ;;  %vm1841_vm5 = vcmask 254977  }
 0x178   : > { %5830 = vrsqrt.f32 %v6426_v47  ;;  %v1092_v53 = vmul.f32 %v6424_v46, %v1091_v48  ;;  %vm2043_vm7 = vcmask 1043456  }
 0x179   : > { %v1050_v43 = vpop.xlane.xlu2 %1049 }
 0x17a   : > { %v1060_v45 = vmul.f32 %v1050_v43, %v6366_v55  ;;  %v1093_v58 = vmul.f32 0.5, %v1092_v53  ;;  %v1052_v60 = vpop.xlane.xlu0 %1051 }
 0x17b   : > { %v1061_v63 = vmul.f32 %v1052_v60, %v6366_v55 }
 0x17c   : > { %v6430_v49 = vadd.f32 1e-05, %v1060_v45  ;;  %v1094_v0 = vsub.f32 1.5, %v1093_v58 }
 0x17d   : > { %v5829_v52 = vpop.eup %5828  ;;  %v6440_v3 = vadd.f32 1e-05, %v1061_v63 }
 0x17e   : > { %v1111_v54 = vmul.f32 %v5829_v52, %v1069_v38  ;;  %5832 = vrsqrt.f32 %v6430_v49  ;;  %v5831_v2 = vpop.eup %5830  ;;  %vm1117_vm4 = vweird.f32 %v5829_v52  ;;  %v1095_v13 = vmul.f32 %v6424_v46, %v1094_v0 }
 0x17f   : > { %v1101_v6 = vmul.f32 %v5831_v2, %v6426_v47  ;;  %5834 = vrsqrt.f32 %v6440_v3  ;;  %vm1118_vm6 = vmor %vm1116_vm3, %vm1117_vm4  ;;  %vm1107_vm9 = vweird.f32 %v5831_v2  ;;  %vm1076_vm12 = vweird.f32 %v6430_v49 }
 0x180   : > { %v1112_v59 = vmul.f32 %v5829_v52, %v1111_v54  ;;  %v1099_v25 = vsel %vm6462_vm8, %v6424_v46, %v1095_v13  ;;  %vm1108_vm11 = vmor %vm1106_vm10, %vm1107_vm9  ;;  %vm1086_vm0 = vweird.f32 %v6440_v3  ;;  %vm1622_vm3 = vcmask 261120   ;;  %v1322_v13 = vld [vmem:[%s8196_s10 + $0x10] sm:$0xff] }
 0x181   : > { %v1102_v15 = vmul.f32 %v5831_v2, %v1101_v6  ;;  %v1122_v33 = vmul.f32 %v1099_v25, %v6371_v61  ;;  %vm1625_vm4 = vcmask 253952   ;;  %vm2147_vm8 = vcmask 254976  }
 0x182   : > { %v1113_v1 = vmul.f32 0.5, %v1112_v59 }
 0x183   : > { %v1103_v20 = vmul.f32 0.5, %v1102_v15  ;;  %v1130_v61 = vmul.f32 %v5821_v21, %v1122_v33  ;;  %v1225_v15 = vld [vmem:[%s8194_s22 + $0x10] sm:$0xff] }
 0x184   : > { %v6442_v4 = vpop.eup %5832  ;;  %v1114_v5 = vsub.f32 1.5, %v1113_v1 }
 0x185   : > { %v1071_v11 = vmul.f32 %v6442_v4, %v6430_v49  ;;  %v1104_v26 = vsub.f32 1.5, %v1103_v20  ;;  %v5835_v27 = vpop.eup %5834  ;;  %vm1077_vm13 = vweird.f32 %v6442_v4  ;;  %v5639_v49 = vld [vmem:[%s6306_s5] sm:$0xff] }
 0x186   : > { %v1115_v14 = vmul.f32 %v5829_v52, %v1114_v5  ;;  %v1081_v31 = vmul.f32 %v5835_v27, %v6440_v3  ;;  %vm1078_vm14 = vmor %vm1076_vm12, %vm1077_vm13  ;;  %vm1087_vm15 = vweird.f32 %v5835_v27  ;;  %v1321_v3 = vld [vmem:[%s8196_s10 + $0x8] sm:$0xff]  ;;  %v6515_v20 = vld [vmem:[%s6312_s24] sm:$0x3]  ;;  %s8197_s24 = sld [smem:[#allocation28_spill]] }
 0x187   : > { %v1072_v18 = vmul.f32 %v6442_v4, %v1071_v11  ;;  %v1105_v30 = vmul.f32 %v5831_v2, %v1104_v26  ;;  %vm1088_vm2 = vmor %vm1086_vm0, %vm1087_vm15  ;;  %1842 = vst.msk [vmem:[#allocation4 + $0x10] sm:$0x2] %vm1841_vm5, %v6515_v20  ;;  %v1226_v26 = vld [vmem:[%s8194_s22 + $0x18] sm:$0xff] }
 0x188   : > { %v1119_v19 = vsel %vm1118_vm6, %v5829_v52, %v1115_v14  ;;  %v1082_v37 = vmul.f32 %v5835_v27, %v1081_v31  ;;  %vm2144_vm6 = vcmask 261121   ;;  %1840 = vst.msk [vmem:[#allocation3 + $0x11] sm:$0x1] %vm1625_vm4, %v6515_v20 }
 0x189   : > { %v1124_v23 = vmul.f32 %v1119_v19, %v6373_v62  ;;  %v1073_v24 = vmul.f32 0.5, %v1072_v18  ;;  %v5632_v62 = vld [vmem:[%s6301_s4 + $0x8] sm:$0xff]  ;;  %v1109_v35 = vsel %vm1108_vm11, %v5831_v2, %v1105_v30 }
 0x18a   : > { %1502 = vmatpush.bf16.msrb.mxu3 %v5632_v62  ;;  %v1123_v38 = vmul.f32 %v1109_v35, %v6382_v7  ;;  %v1083_v41 = vmul.f32 0.5, %v1082_v37  ;;  %v5640_v7 = vld [vmem:[%s6306_s5 + $0x8] sm:$0xff]  ;;  %v1519_v35 = vld [vmem:[%s8198_s23] sm:$0xff]  ;;  %s8213_s5 = sld [smem:[#allocation25_spill]] }
 0x18b   : > { %v1132_v28 = vmul.f32 %v5821_v21, %v1124_v23  ;;  %v1074_v29 = vsub.f32 1.5, %v1073_v24  ;;  %1604 = vmatpush.bf16.msrb.mxu0 %v5640_v7  ;;  %v1224_v2 = vld [vmem:[%s8194_s22 + $0x8] sm:$0xff]  ;;  %v1323_v23 = vld [vmem:[%s8196_s10 + $0x18] sm:$0xff]  ;;  %v1324_v24 = vld [vmem:[%s8196_s10 + $0x20] sm:$0x3] }
 0x18c   : > { %v1131_v42 = vmul.f32 %v5821_v21, %v1123_v38  ;;  %v1084_v44 = vsub.f32 1.5, %v1083_v41 }
 0x18d   : > { %v1135_v34 = vpack.c.bf16 %v1132_v28, %v1132_v28  ;;  %v1075_v36 = vmul.f32 %v6442_v4, %v1074_v29 }
 0x18e   : > { %1503 = vmatpush.bf16.msrb.mxu3 %v5631_v39  ;;  %v1134_v45 = vpack.c.bf16 %v1131_v42, %v1130_v61  ;;  %v1085_v46 = vmul.f32 %v5835_v27, %v1084_v44  ;;  %v1520_v44 = vld [vmem:[%s8198_s23 + $0x8] sm:$0xff] }
 0x18f   : > { %1218 = vmatmul.bf16.vlgmr.msra.gmra.mxu2 %v1135_v34  ;;  %v1079_v43 = vsel %vm1078_vm14, %v6442_v4, %v1075_v36  ;;  %1605 = vmatpush.bf16.msrb.mxu0 %v5639_v49 }
 0x190   : > { %v1120_v47 = vmul.f32 %v1079_v43, %v6385_v9  ;;  %1310 = vmatmul.bf16.vlgmr.msra.gmra.mxu3 %v1134_v45  ;;  %v1089_v48 = vsel %vm1088_vm2, %v5835_v27, %v1085_v46  ;;  %v1227_v27 = vld [vmem:[%s8194_s22 + $0x20] sm:$0x3]  ;;  %v1423_v43 = vld [vmem:[%s8197_s24 + $0x8] sm:$0xff] }
 0x191   : > { %v1121_v50 = vmul.f32 %v1089_v48, %v6391_v12  ;;  %v1223_v12 = vld [vmem:[%s8193_s26] sm:$0xff] }
 0x192   : > { %v1128_v51 = vmul.f32 %v5821_v21, %v1120_v47 }
 0x193   : > { %v1129_v52 = vmul.f32 %v5821_v21, %v1121_v50  ;;  %v1424_v50 = vld [vmem:[%s8197_s24 + $0x10] sm:$0xff] }
 0x195   : > { %v1133_v53 = vpack.c.bf16 %v1129_v52, %v1128_v51  ;;  %v1521_v51 = vld [vmem:[%s8198_s23 + $0x10] sm:$0xff] }
 0x197   : > { %1208 = vmatmul.bf16.vlgmr.msra.gmra.mxu0 %v1133_v53  ;;  %1305 = vmatmul.bf16.vlgmr.msra.gmra.mxu1 %v1133_v53 }
 0x19f   : > { %1407 = vmatmul.bf16.vlgmr.msrb.gmra.mxu2 %v1133_v53 }
 0x1a0   : > { %1315 = vmatmul.bf16.gmra.mxu3 %v1135_v34 }
 0x1a7   : > { %1213 = vmatmul.bf16.gmra.mxu0 %v1134_v45 }
 0x1af   : > { %1412 = vmatmul.bf16.gmra.mxu2 %v1134_v45 }
 0x1b0   : > { %1504 = vmatmul.bf16.vlgmr.msrb.gmra.mxu3 %v1133_v53 }
 0x1b7   : > { %1606 = vmatmul.bf16.vlgmr.msrb.gmra.mxu0 %v1133_v53 }
 0x1bf   : > { %1417 = vmatmul.bf16.gmra.mxu2 %v1135_v34 }
 0x1c0   : > { %1509 = vmatmul.bf16.gmra.mxu3 %v1134_v45 }
 0x1c7   : > { %1611 = vmatmul.bf16.gmra.mxu0 %v1134_v45 }
 0x1d0   : > { %1514 = vmatmul.bf16.gmra.mxu3 %v1135_v34 }
 0x1d7   : > { %1616 = vmatmul.bf16.gmra.mxu0 %v1135_v34  ;;  %v1422_v34 = vld [vmem:[%s8197_s24] sm:$0xff] }
 0x212   : > { %v1219_v9 = vpop.f32.mrf.mxu2 }
 0x213   : > { %v1311_v54 = vpop.f32.mrf.mxu3  ;;  %v1232_v32 = vmul.f32 %v1227_v27, %v1219_v9 }
 0x214   : > { %v1209_v57 = vpop.f32.mrf.mxu0  ;;  %v1306_v60 = vpop.f32.mrf.mxu1  ;;  %v1327_v18 = vmul.f32 %v1322_v13, %v1311_v54 }
 0x215   : > { %v1228_v59 = vmul.f32 %v1223_v12, %v1209_v57  ;;  %v1325_v63 = vmul.f32 %v1320_v56, %v1306_v60  ;;  %v1522_v60 = vld [vmem:[%s8198_s23 + $0x18] sm:$0xff] }
 0x217   : > { %v1330_v0 = vadd.f32 %v1325_v63, %v1228_v59  ;;  %v1425_v59 = vld [vmem:[%s8197_s24 + $0x18] sm:$0xff] }
 0x219   : > { %1623 = vst.msk [vmem:[#allocation5] sm:$0xff] %vm1622_vm3, %v1330_v0  ;;  %1654 = vrot.lane.b32.xlu0 %v1330_v0, %s6137_s20  ;;  %1642 = vrot.lane.b32.xlu2 %v1330_v0, %s6138_s6 }
 0x21a   : > { %v1221_v58 = vpop.f32.mrf.mxu2  ;;  %1630 = vrot.lane.b32.xlu1 %v1330_v0, %s6139_s29 }
 0x21b   : > { %v1313_v1 = vpop.f32.mrf.mxu3 }
 0x21c   : > { %v1211_v4 = vpop.f32.mrf.mxu0  ;;  %v1308_v8 = vpop.f32.mrf.mxu1  ;;  %v1328_v30 = vmul.f32 %v1323_v23, %v1313_v1 }
 0x21d   : > { %v1229_v6 = vmul.f32 %v1224_v2, %v1211_v4  ;;  %v1326_v10 = vmul.f32 %v1321_v3, %v1308_v8 }
 0x21f   : > { %v1331_v11 = vadd.f32 %v1326_v10, %v1229_v6 }
 0x220   : > { %v6527_v22 = vld [vmem:[#allocation5] sm:$0xff] }
 0x221   : > { %1624 = vst.msk [vmem:[#allocation5 + $0x8] sm:$0xff] %vm1622_vm3, %v1331_v11  ;;  %1632 = vrot.lane.b32.xlu2 %v1331_v11, %s6139_s29  ;;  %v1675_v8 = vmul.f32 %v6527_v22, %v6527_v22 }
 0x222   : > { %v1408_v5 = vpop.f32.mrf.mxu2  ;;  %1644 = vrot.lane.b32.xlu1 %v1331_v11, %s6138_s6 }
 0x223   : > { %v1316_v14 = vpop.f32.mrf.mxu3  ;;  %v1427_v39 = vmul.f32 %v1422_v34, %v1408_v5 }
 0x224   : > { %v1214_v16 = vpop.f32.mrf.mxu0  ;;  %v1329_v31 = vmul.f32 %v1324_v24, %v1316_v14 }
 0x225   : > { %v1230_v19 = vmul.f32 %v1225_v15, %v1214_v16  ;;  %v1426_v15 = vld [vmem:[%s8197_s24 + $0x20] sm:$0x3] }
 0x226   : > { %v6556_v37 = vadd.f32 %v1329_v31, %v1232_v32  ;;  %v1523_v16 = vld [vmem:[%s8198_s23 + $0x20] sm:$0x3] }
 0x227   : > { %v6517_v21 = vadd.f32 %v1327_v18, %v1230_v19 }
 0x228   : > { %v6554_v36 = vld [vmem:[#allocation5 + $0x8] sm:$0xff] }
 0x229   : > { %1626 = vst.msk [vmem:[#allocation5 + $0x10] sm:$0x1] %vm1625_vm4, %v6517_v21  ;;  %1634 = vrot.lane.b32.xlu0 %v6517_v21, %s6139_s29  ;;  %1656 = vrot.lane.b32.xlu2 %v1331_v11, %s6137_s20  ;;  %v1676_v10 = vmul.f32 %v6554_v36, %v6554_v36 }
 0x22a   : > { %v1410_v17 = vpop.f32.mrf.mxu2  ;;  %2145 = vst.msk [vmem:[#allocation5 - $0x1] sm:$0xfe] %vm2144_vm6, %v6517_v21  ;;  %1646 = vrot.lane.b32.xlu1 %v6517_v21, %s6138_s6 }
 0x22b   : > { %v1318_v25 = vpop.f32.mrf.mxu3  ;;  %v1428_v46 = vmul.f32 %v1423_v43, %v1410_v17  ;;  %v1684_v17 = vsel %vm1622_vm3, %v1675_v8, 0.0  ;;  %v1687_v19 = vsel %vm1622_vm3, %v1676_v10, 0.0 }
 0x22c   : > { %v1216_v28 = vpop.f32.mrf.mxu0 }
 0x22d   : > { %v1231_v62 = vmul.f32 %v1226_v26, %v1216_v28 }
 0x22f   : > { %v6546_v33 = vadd.f32 %v1328_v30, %v1231_v62 }
 0x231   : > { %2146 = vst.msk [vmem:[#allocation5 + $0x7] sm:$0xff] %vm1622_vm3, %v6546_v33 }
 0x232   : > { %v1413_v29 = vpop.f32.mrf.mxu2  ;;  %2153 = vrot.lane.b32.xlu1 %v6556_v37, %s6139_s29 }
 0x233   : > { %v1505_v38 = vpop.f32.mrf.mxu3  ;;  %v1429_v53 = vmul.f32 %v1424_v50, %v1413_v29 }
 0x234   : > { %v1524_v40 = vmul.f32 %v1519_v35, %v1505_v38  ;;  %v1607_v61 = vpop.f32.mrf.mxu0 }
 0x235   : > { %1837 = vst.msk [vmem:[#allocation4] sm:$0xff] %vm1622_vm3, %v1607_v61 }
 0x236   : > { %v1529_v42 = vadd.f32 %v1524_v40, %v1427_v39 }
 0x238   : > { %1834 = vst.msk [vmem:[#allocation3] sm:$0xff] %vm1622_vm3, %v1529_v42 }
 0x23a   : > { %v1415_v41 = vpop.f32.mrf.mxu2 }
 0x23b   : > { %v1507_v45 = vpop.f32.mrf.mxu3  ;;  %v1430_v0 = vmul.f32 %v1425_v59, %v1415_v41 }
 0x23c   : > { %v1525_v7 = vmul.f32 %v1520_v44, %v1507_v45  ;;  %v1609_v48 = vpop.f32.mrf.mxu0  ;;  %v2023_v57 = vld [vmem:[#allocation4] sm:$0xff] }
 0x23d   : > { %1838 = vst.msk [vmem:[#allocation4 + $0x8] sm:$0xff] %vm1622_vm3, %v1609_v48 }
 0x23e   : > { %v1530_v49 = vadd.f32 %v1525_v7, %v1428_v46 }
 0x23f   : > { %v6581_v58 = vld [vmem:[#allocation3] sm:$0xff] }
 0x240   : > { %1835 = vst.msk [vmem:[#allocation3 + $0x8] sm:$0xff] %vm1622_vm3, %v1530_v49  ;;  %v1846_v28 = vmul.f32 %v6581_v58, %v6581_v58 }
 0x242   : > { %v1418_v47 = vpop.f32.mrf.mxu2  ;;  %v1849_v31 = vsel %vm1622_vm3, %v1846_v28, 0.0 }
 0x243   : > { %v1510_v52 = vpop.f32.mrf.mxu3 }
 0x244   : > { %v1526_v9 = vmul.f32 %v1521_v51, %v1510_v52  ;;  %v1612_v12 = vpop.f32.mrf.mxu0  ;;  %v2024_v6 = vld [vmem:[#allocation4 + $0x8] sm:$0xff] }
 0x245   : > { %1839 = vst.msk [vmem:[#allocation4 + $0x10] sm:$0x1] %vm1625_vm4, %v1612_v12  ;;  %v2026_v23 = vpack.c.bf16 %v2024_v6, %v2023_v57 }
 0x246   : > { %v1531_v56 = vadd.f32 %v1526_v9, %v1429_v53  ;;  %2348 = vst.msk [vmem:[#allocation4 - $0x1] sm:$0xfe] %vm2144_vm6, %v1612_v12 }
 0x247   : > { %v6602_v14 = vld [vmem:[#allocation3 + $0x8] sm:$0xff] }
 0x248   : > { %1836 = vst.msk [vmem:[#allocation3 + $0x10] sm:$0x1] %vm1625_vm4, %v1531_v56 }
 0x249   : > { %2345 = vst.msk [vmem:[#allocation3 - $0x1] sm:$0xfe] %vm2144_vm6, %v1531_v56 }
 0x24a   : > { %v1420_v54 = vpop.f32.mrf.mxu2 }
 0x24b   : > { %v1512_v63 = vpop.f32.mrf.mxu3 }
 0x24c   : > { %v1527_v1 = vmul.f32 %v1522_v60, %v1512_v63  ;;  %v1614_v2 = vpop.f32.mrf.mxu0  ;;  %v2025_v3 = vld [vmem:[#allocation4 + $0x10] sm:$0xff] }
 0x24d   : > { %v2027_v5 = vpack.c.bf16 %v2025_v3, %v2025_v3  ;;  %2352 = vst.msk [vmem:[#allocation4 + $0x10] sm:$0x2] %vm1841_vm5, %v6515_v20  ;;  %vm1708_vm5 = vcmask 257024  }
 0x24e   : > { %v1532_v4 = vadd.f32 %v1527_v1, %v1430_v0  ;;  %2349 = vst.msk [vmem:[#allocation4 + $0x7] sm:$0xff] %vm1622_vm3, %v1614_v2  ;;  %v6672_v1 = vld [vmem:[#allocation5] sm:$0xff] }
 0x24f   : > { %v6597_v11 = vld [vmem:[#allocation3 + $0x10] sm:$0xff]  ;;  %v2045_v13 = vsel %vm2043_vm7, %v2027_v5, 0  ;;  %v2187_v3 = vmul.f32 %v6672_v1, %v6672_v1 }
 0x250   : > { %2351 = vst.msk [vmem:[#allocation3 + $0x11] sm:$0x1] %vm1625_vm4, %v6515_v20  ;;  %2053 = vmatpush.bf16.msra.mxu2 %v2045_v13  ;;  %v1431_v20 = vmul.f32 %v1426_v15, %v1418_v47  ;;  %v1848_v27 = vmul.f32 %v6597_v11, %v6597_v11 }
 0x251   : > { %2346 = vst.msk [vmem:[#allocation3 + $0x7] sm:$0xff] %vm1622_vm3, %v1532_v4  ;;  %v2196_v5 = vsel %vm1622_vm3, %v2187_v3, 0.0 }
 0x252   : > { %1685 = vadd.xlane.f32.xlu2 %v1684_v17  ;;  %v1855_v30 = vsel %vm1622_vm3, %v1848_v27, 0.0 }
 0x253   : > { %v1515_v18 = vpop.f32.mrf.mxu3  ;;  %1688 = vadd.xlane.f32.xlu0 %v1687_v19 }
 0x254   : > { %v1528_v24 = vmul.f32 %v1523_v16, %v1515_v18  ;;  %v1617_v25 = vpop.f32.mrf.mxu0  ;;  %2054 = vmatpush.bf16.msra.mxu2 %v2026_v23 }
 0x255   : > { %2350 = vst.msk [vmem:[#allocation4 + $0xf] sm:$0x3] %vm2147_vm8, %v1617_v25  ;;  %v2531_v39 = vld [vmem:[#allocation4] sm:$0xff] }
 0x256   : > { %v1533_v26 = vadd.f32 %v1528_v24, %v1431_v20 }
 0x258   : > { %2347 = vst.msk [vmem:[#allocation3 + $0xf] sm:$0x3] %vm2147_vm8, %v1533_v26  ;;  %v6695_v28 = vld [vmem:[#allocation3] sm:$0xff] }
 0x25a   : > { %1856 = vadd.xlane.f32.xlu2 %v1855_v30 }
 0x25b   : > { %v1517_v29 = vpop.f32.mrf.mxu3 }
 0x25c   : > { %v1619_v62 = vpop.f32.mrf.mxu0  ;;  %v2533_v32 = vld [vmem:[#allocation4 + $0x10] sm:$0xff]  ;;  %1850 = vadd.xlane.f32.xlu1 %v1849_v31  ;;  %v2532_v38 = vld [vmem:[#allocation4 + $0x8] sm:$0xff] }
 0x25d   : > { %v2535_v34 = vpack.c.bf16 %v2533_v32, %v2533_v32  ;;  %v2534_v40 = vpack.c.bf16 %v2532_v38, %v2531_v39  ;;  %v2356_v32 = vmul.f32 %v6695_v28, %v6695_v28 }
 0x25f   : > { %v2552_v35 = vsel %vm2043_vm7, %v2535_v34, 0  ;;  %v6645_v47 = vld [vmem:[#allocation3 + $0x10] sm:$0xff]  ;;  %v6658_v54 = vld [vmem:[#allocation3 + $0x8] sm:$0xff] }
 0x260   : > { %2560 = vmatpush.bf16.msra.mxu0 %v2552_v35  ;;  %v2358_v50 = vmul.f32 %v6645_v47, %v6645_v47  ;;  %v2357_v59 = vmul.f32 %v6658_v54, %v6658_v54 }
 0x262   : > { %v2365_v53 = vsel %vm1622_vm3, %v2358_v50, 0.0  ;;  %v2362_v63 = vsel %vm1622_vm3, %v2357_v59, 0.0 }
 0x264   : > { %2561 = vmatpush.bf16.msra.mxu0 %v2534_v40 }
 0x267   : > { %2151 = vrot.lane.b32.xlu0 %v6546_v33, %s6139_s29 }
 0x26f   : > { %2160 = vrot.lane.b32.xlu0 %v6546_v33, %s6138_s6 }
 0x272   : > { %1658 = vrot.lane.b32.xlu2 %v6517_v21, %s6137_s20  ;;  %v1847_v21 = vmul.f32 %v6602_v14, %v6602_v14 }
 0x273   : > { %v1643_v41 = vpop.permute.xlu2 %1642 }
 0x274   : > { %1651 = vst.msk [vmem:[#allocation5 + $0x22] sm:$0xff] %vm1622_vm3, %v1643_v41  ;;  %v1852_v7 = vsel %vm1622_vm3, %v1847_v21, 0.0  ;;  %v2359_v41 = vsel %vm1622_vm3, %v2356_v32, 0.0 }
 0x275   : > { %2169 = vrot.lane.b32.xlu1 %v6546_v33, %s6137_s20 }
 0x27b   : > { %v1633_v61 = vpop.permute.xlu2 %1632 }
 0x27c   : > { %1640 = vst.msk [vmem:[#allocation5 + $0x19] sm:$0xff] %vm1622_vm3, %v1633_v61 }
 0x283   : > { %v1657_v42 = vpop.permute.xlu2 %1656 }
 0x284   : > { %1664 = vst.msk [vmem:[#allocation5 + $0x3b] sm:$0xff] %vm1622_vm3, %v1657_v42 }
 0x28b   : > { %v1655_v43 = vpop.permute.xlu0 %1654 }
 0x28c   : > { %1663 = vst.msk [vmem:[#allocation5 + $0x33] sm:$0xff] %vm1622_vm3, %v1655_v43  ;;  %v1631_v44 = vpop.permute.xlu1 %1630 }
 0x28d   : > { %1639 = vst.msk [vmem:[#allocation5 + $0x11] sm:$0xff] %vm1622_vm3, %v1631_v44 }
 0x293   : > { %v6700_v43 = vld [vmem:[#allocation5 + $0x38] sm:$0xff] }
 0x294   : > { %v1645_v45 = vpop.permute.xlu1 %1644  ;;  %v6637_v46 = vld [vmem:[#allocation5 + $0x10] sm:$0xff]  ;;  %v6703_v44 = vld [vmem:[#allocation5 + $0x18] sm:$0xff] }
 0x295   : > { %1652 = vst.msk [vmem:[#allocation5 + $0x2a] sm:$0xff] %vm1622_vm3, %v1645_v45  ;;  %v1677_v33 = vmul.f32 %v6637_v46, %v6637_v46  ;;  %v1678_v50 = vmul.f32 %v6703_v44, %v6703_v44 }
 0x296   : > { %2148 = vst.msk [vmem:[#allocation5 + $0xf] sm:$0x3] %vm2147_vm8, %v6556_v37 }
 0x297   : > { %v1690_v49 = vsel %vm1622_vm3, %v1677_v33, 0.0 }
 0x299   : > { %1853 = vadd.xlane.f32.xlu0 %v1852_v7 }
 0x29b   : > { %v1635_v48 = vpop.permute.xlu0 %1634  ;;  %1691 = vadd.xlane.f32.xlu2 %v1690_v49 }
 0x29c   : > { %1641 = vst.msk [vmem:[#allocation5 + $0x21] sm:$0x1] %vm1625_vm4, %v1635_v48  ;;  %v1647_v51 = vpop.permute.xlu1 %1646  ;;  %v6662_v56 = vld [vmem:[#allocation5 + $0x28] sm:$0xff] }
 0x29d   : > { %2157 = vst.msk [vmem:[#allocation5 + $0x10] sm:$0xfe] %vm2144_vm6, %v1635_v48  ;;  %v6653_v52 = vld [vmem:[#allocation5 + $0x8] sm:$0xff] }
 0x29e   : > { %1653 = vst.msk [vmem:[#allocation5 + $0x32] sm:$0x1] %vm1625_vm4, %v1647_v51  ;;  %v2188_v9 = vmul.f32 %v6653_v52, %v6653_v52 }
 0x29f   : > { %2366 = vadd.xlane.f32.xlu1 %v2365_v53 }
 0x2a0   : > { %v2199_v57 = vsel %vm1622_vm3, %v2188_v9, 0.0 }
 0x2a3   : > { %v6660_v12 = vld [vmem:[#allocation5 + $0x20] sm:$0xff]  ;;  %2200 = vadd.xlane.f32.xlu2 %v2199_v57 }
 0x2a4   : > { %2166 = vst.msk [vmem:[#allocation5 + $0x21] sm:$0xfe] %vm2144_vm6, %v1647_v51  ;;  %v2154_v60 = vpop.permute.xlu1 %2153  ;;  %v1679_v0 = vmul.f32 %v6660_v12, %v6660_v12  ;;  %v6677_v4 = vld [vmem:[#allocation5 + $0x10] sm:$0xff] }
 0x2a5   : > { %2159 = vst.msk [vmem:[#allocation5 + $0x20] sm:$0x3] %vm2147_vm8, %v2154_v60  ;;  %v2189_v6 = vmul.f32 %v6677_v4, %v6677_v4  ;;  %v6685_v10 = vld [vmem:[#allocation5 + $0x30] sm:$0xff] }
 0x2a6   : > { %v1696_v2 = vsel %vm1622_vm3, %v1679_v0, 0.0  ;;  %v1681_v13 = vmul.f32 %v6685_v10, %v6685_v10 }
 0x2a7   : > { %2363 = vadd.xlane.f32.xlu1 %v2362_v63  ;;  %v2202_v8 = vsel %vm1622_vm3, %v2189_v6, 0.0  ;;  %v1693_v63 = vsel %vm1622_vm3, %v1678_v50, 0.0 }
 0x2a8   : > { %v1702_v15 = vsel %vm1622_vm3, %v1681_v13, 0.0 }
 0x2ab   : > { %1697 = vadd.xlane.f32.xlu2 %v1696_v2 }
 0x2ac   : > { %v6690_v16 = vld [vmem:[#allocation5 + $0x20] sm:$0xff] }
 0x2ad   : > { %2162 = vrot.lane.b32.xlu0 %v6556_v37, %s6138_s6  ;;  %v2191_v17 = vmul.f32 %v6690_v16, %v6690_v16 }
 0x2af   : > { %2197 = vadd.xlane.f32.xlu1 %v2196_v5  ;;  %v2208_v18 = vsel %vm1622_vm3, %v2191_v17, 0.0 }
 0x2b3   : > { %2203 = vadd.xlane.f32.xlu2 %v2202_v8  ;;  %v1680_v8 = vmul.f32 %v6662_v56, %v6662_v56 }
 0x2bb   : > { %1703 = vadd.xlane.f32.xlu2 %v1702_v15 }
 0x2c3   : > { %2209 = vadd.xlane.f32.xlu2 %v2208_v18 }
 0x2c5   : > { %v1686_v19 = vpop.xlane.xlu2 %1685 }
 0x2c6   : > { %v1689_v23 = vpop.xlane.xlu0 %1688  ;;  %v1712_v20 = vadd.f32 1e-12, %v1686_v19  ;;  %v1699_v19 = vsel %vm1622_vm3, %v1680_v8, 0.0 }
 0x2c7   : > { %v1713_v24 = vadd.f32 1e-12, %v1689_v23 }
 0x2c8   : > { %5836 = vrsqrt.f32 %v1712_v20  ;;  %vm1727_vm11 = vweird.f32 %v1712_v20 }
 0x2c9   : > { %5838 = vrsqrt.f32 %v1713_v24  ;;  %vm1737_vm13 = vweird.f32 %v1713_v24 }
 0x2cd   : > { %v1857_v25 = vpop.xlane.xlu2 %1856 }
 0x2ce   : > { %v5837_v26 = vpop.eup %5836  ;;  %v1860_v27 = vadd.f32 1e-12, %v1857_v25 }
 0x2cf   : > { %v5839_v29 = vpop.eup %5838  ;;  %v1722_v30 = vmul.f32 %v5837_v26, %v1712_v20  ;;  %vm1728_vm9 = vweird.f32 %v5837_v26  ;;  %v1851_v2 = vpop.xlane.xlu1 %1850 }
 0x2d0   : > { %v1732_v31 = vmul.f32 %v5839_v29, %v1713_v24  ;;  %5840 = vrsqrt.f32 %v1860_v27  ;;  %vm1738_vm10 = vweird.f32 %v5839_v29  ;;  %vm1729_vm12 = vmor %vm1727_vm11, %vm1728_vm9  ;;  %vm1887_vm0 = vweird.f32 %v1860_v27 }
 0x2d1   : > { %v1723_v62 = vmul.f32 %v5837_v26, %v1722_v30  ;;  %vm1739_vm14 = vmor %vm1737_vm13, %vm1738_vm10  ;;  %v1682_v24 = vmul.f32 %v6700_v43, %v6700_v43 }
 0x2d2   : > { %v1733_v34 = vmul.f32 %v5839_v29, %v1732_v31 }
 0x2d3   : > { %v1724_v35 = vmul.f32 0.5, %v1723_v62  ;;  %v1858_v62 = vadd.f32 1e-12, %v1851_v2 }
 0x2d4   : > { %v1734_v38 = vmul.f32 0.5, %v1733_v34 }
 0x2d5   : > { %v1725_v39 = vsub.f32 1.5, %v1724_v35  ;;  %v1659_v40 = vpop.permute.xlu2 %1658  ;;  %5842 = vrsqrt.f32 %v1858_v62  ;;  %vm1867_vm7 = vweird.f32 %v1858_v62 }
 0x2d6   : > { %v5841_v61 = vpop.eup %5840  ;;  %v1735_v42 = vsub.f32 1.5, %v1734_v38  ;;  %1665 = vst.msk [vmem:[#allocation5 + $0x43] sm:$0x1] %vm1625_vm4, %v1659_v40 }
 0x2d7   : > { %2360 = vadd.xlane.f32.xlu0 %v2359_v41  ;;  %v1726_v21 = vmul.f32 %v5837_v26, %v1725_v39  ;;  %v1882_v45 = vmul.f32 %v5841_v61, %v1860_v27  ;;  %2175 = vst.msk [vmem:[#allocation5 + $0x32] sm:$0xfe] %vm2144_vm6, %v1659_v40  ;;  %vm1888_vm15 = vweird.f32 %v5841_v61 }
 0x2d8   : > { %v1736_v33 = vmul.f32 %v5839_v29, %v1735_v42  ;;  %vm1889_vm2 = vmor %vm1887_vm0, %vm1888_vm15 }
 0x2d9   : > { %v2152_v7 = vpop.permute.xlu0 %2151  ;;  %v1730_v48 = vsel %vm1729_vm12, %v5837_v26, %v1726_v21  ;;  %v1883_v49 = vmul.f32 %v5841_v61, %v1882_v45 }
 0x2da   : > { %2158 = vst.msk [vmem:[#allocation5 + $0x18] sm:$0xff] %vm1622_vm3, %v2152_v7  ;;  %v1811_v51 = vmul.f32 %v1730_v48, %v6527_v22  ;;  %v1740_v53 = vsel %vm1739_vm14, %v5839_v29, %v1736_v33 }
 0x2db   : > { %v1812_v9 = vmul.f32 %v1740_v53, %v6554_v36  ;;  %v1884_v57 = vmul.f32 0.5, %v1883_v49  ;;  %v5843_v34 = vpop.eup %5842 }
 0x2dc   : > { %v6711_v59 = vmul.f32 4.0, %v1811_v51  ;;  %v1862_v35 = vmul.f32 %v5843_v34, %v1858_v62  ;;  %vm1868_vm6 = vweird.f32 %v5843_v34 }
 0x2dd   : > { %v1885_v60 = vsub.f32 1.5, %v1884_v57  ;;  %v6714_v0 = vmul.f32 4.0, %v1812_v9  ;;  %v6730_v25 = vld [vmem:[#allocation5 + $0x40] sm:$0xf]  ;;  %vm1869_vm9 = vmor %vm1867_vm7, %vm1868_vm6 }
 0x2de   : > { %v1683_v31 = vmul.f32 %v6730_v25, %v6730_v25  ;;  %v1863_v39 = vmul.f32 %v5843_v34, %v1862_v35 }
 0x2df   : > { %1694 = vadd.xlane.f32.xlu0 %v1693_v63  ;;  %v1886_v3 = vmul.f32 %v5841_v61, %v1885_v60  ;;  %v1829_v5 = vpack.c.bf16 %v6714_v0, %v6711_v59 }
 0x2e0   : > { %v1709_v32 = vsel %vm1708_vm5, %v1683_v31, 0.0  ;;  %v1864_v41 = vmul.f32 0.5, %v1863_v39 }
 0x2e1   : > { %v2161_v22 = vpop.permute.xlu0 %2160  ;;  %v6718_v6 = vld [vmem:[#allocation5 + $0x18] sm:$0xff]  ;;  %v1890_v13 = vsel %vm1889_vm2, %v5841_v61, %v1886_v3 }
 0x2e2   : > { %2167 = vst.msk [vmem:[#allocation5 + $0x29] sm:$0xff] %vm1622_vm3, %v2161_v22  ;;  %v2190_v36 = vmul.f32 %v6718_v6, %v6718_v6  ;;  %v1893_v15 = vmul.f32 %v1890_v13, %v6597_v11  ;;  %v1705_v11 = vsel %vm1622_vm3, %v1682_v24, 0.0  ;;  %v1865_v45 = vsub.f32 1.5, %v1864_v41 }
 0x2e4   : > { %v2205_v17 = vsel %vm1622_vm3, %v2190_v36, 0.0  ;;  %v1896_v18 = vmul.f32 4.0, %v1893_v15 }
 0x2e5   : > { %2206 = vadd.xlane.f32.xlu1 %v2205_v17 }
 0x2e6   : > { %v1898_v23 = vpack.c.bf16 %v1896_v18, %v1896_v18 }
 0x2e7   : > { %1700 = vadd.xlane.f32.xlu0 %v1699_v19  ;;  %v2170_v20 = vpop.permute.xlu1 %2169 }
 0x2e8   : > { %v1927_v26 = vsel %vm1622_vm3, %v1898_v23, 0  ;;  %2176 = vst.msk [vmem:[#allocation5 + $0x3a] sm:$0xff] %vm1622_vm3, %v2170_v20 }
 0x2e9   : > { %1935 = vmatpush.bf16.xpose.msrb.mxu1 %v1927_v26  ;;  %v6735_v27 = vld [vmem:[#allocation5 + $0x28] sm:$0xff] }
 0x2ea   : > { %v2192_v29 = vmul.f32 %v6735_v27, %v6735_v27 }
 0x2ec   : > { %v2211_v30 = vsel %vm1622_vm3, %v2192_v29, 0.0 }
 0x2ed   : > { %1706 = vadd.xlane.f32.xlu1 %v1705_v11 }
 0x2ef   : > { %v6745_v53 = vld [vmem:[#allocation5 + $0x38] sm:$0xff] }
 0x2f0   : > { %v2194_v2 = vmul.f32 %v6745_v53, %v6745_v53 }
 0x2f2   : > { %v2217_v15 = vsel %vm1622_vm3, %v2194_v2, 0.0 }
 0x2f5   : > { %2212 = vadd.xlane.f32.xlu1 %v2211_v30 }
 0x2fb   : > { %2171 = vrot.lane.b32.xlu0 %v6556_v37, %s6137_s20  ;;  %v1866_v37 = vmul.f32 %v5843_v34, %v1865_v45 }
 0x2fd   : > { %1710 = vadd.xlane.f32.xlu1 %v1709_v32  ;;  %v1870_v9 = vsel %vm1869_vm9, %v5843_v34, %v1866_v37 }
 0x2fe   : > { %v1891_v22 = vmul.f32 %v1870_v9, %v6581_v58 }
 0x300   : > { %v1894_v17 = vmul.f32 4.0, %v1891_v22 }
 0x30c   : > { %v1854_v38 = vpop.xlane.xlu0 %1853 }
 0x30d   : > { %v1859_v40 = vadd.f32 1e-12, %v1854_v38 }
 0x30e   : > { %v1692_v30 = vpop.xlane.xlu2 %1691 }
 0x30f   : > { %5844 = vrsqrt.f32 %v1859_v40  ;;  %vm1877_vm11 = vweird.f32 %v1859_v40  ;;  %v6765_v38 = vadd.f32 1e-12, %v1692_v30 }
 0x311   : > { %vm1747_vm2 = vweird.f32 %v6765_v38 }
 0x312   : > { %v2367_v61 = vpop.xlane.xlu1 %2366 }
 0x313   : > { %v2370_v42 = vadd.f32 1e-12, %v2367_v61 }
 0x315   : > { %v5845_v21 = vpop.eup %5844  ;;  %5846 = vrsqrt.f32 %v2370_v42  ;;  %vm2397_vm14 = vweird.f32 %v2370_v42 }
 0x316   : > { %v1872_v33 = vmul.f32 %v5845_v21, %v1859_v40  ;;  %vm1878_vm10 = vweird.f32 %v5845_v21  ;;  %v2201_v34 = vpop.xlane.xlu2 %2200 }
 0x317   : > { %vm1879_vm12 = vmor %vm1877_vm11, %vm1878_vm10 }
 0x318   : > { %v1873_v7 = vmul.f32 %v5845_v21, %v1872_v33 }
 0x31a   : > { %v1874_v48 = vmul.f32 0.5, %v1873_v7  ;;  %v2364_v32 = vpop.xlane.xlu1 %2363 }
 0x31b   : > { %v5847_v49 = vpop.eup %5846  ;;  %v2369_v35 = vadd.f32 1e-12, %v2364_v32 }
 0x31c   : > { %v1875_v50 = vsub.f32 1.5, %v1874_v48  ;;  %v2392_v51 = vmul.f32 %v5847_v49, %v2370_v42  ;;  %vm2398_vm13 = vweird.f32 %v5847_v49 }
 0x31d   : > { %vm2399_vm15 = vmor %vm2397_vm14, %vm2398_vm13  ;;  %5848 = vrsqrt.f32 %v2369_v35  ;;  %vm2387_vm7 = vweird.f32 %v2369_v35 }
 0x31e   : > { %v1876_v57 = vmul.f32 %v5845_v21, %v1875_v50  ;;  %v2393_v60 = vmul.f32 %v5847_v49, %v2392_v51  ;;  %5850 = vrsqrt.f32 %v6765_v38  ;;  %v1698_v41 = vpop.xlane.xlu2 %1697 }
 0x31f   : > { %v2163_v63 = vpop.permute.xlu0 %2162  ;;  %v6792_v9 = vadd.f32 1e-12, %v1698_v41 }
 0x320   : > { %2168 = vst.msk [vmem:[#allocation5 + $0x31] sm:$0x3] %vm2147_vm8, %v2163_v63  ;;  %v1880_v3 = vsel %vm1879_vm12, %v5845_v21, %v1876_v57  ;;  %v2394_v36 = vmul.f32 0.5, %v2393_v60 }
 0x321   : > { %v1892_v8 = vmul.f32 %v1880_v3, %v6602_v14 }
 0x322   : > { %v2395_v13 = vsub.f32 1.5, %v2394_v36  ;;  %v2198_v39 = vpop.xlane.xlu1 %2197 }
 0x323   : > { %v1895_v18 = vmul.f32 4.0, %v1892_v8  ;;  %v6770_v40 = vadd.f32 1e-12, %v2198_v39  ;;  %v6773_v61 = vpop.eup %5848 }
 0x324   : > { %v2396_v19 = vmul.f32 %v5847_v49, %v2395_v13  ;;  %v6776_v59 = vpop.eup %5850  ;;  %vm2388_vm0 = vweird.f32 %v6773_v61 }
 0x325   : > { %2218 = vadd.xlane.f32.xlu0 %v2217_v15  ;;  %v1897_v23 = vpack.c.bf16 %v1895_v18, %v1894_v17  ;;  %v1742_v21 = vmul.f32 %v6776_v59, %v6765_v38  ;;  %vm1748_vm6 = vweird.f32 %v6776_v59  ;;  %vm6811_vm10 = vmor %vm2387_vm7, %vm2388_vm0 }
 0x326   : > { %v2400_v24 = vsel %vm2399_vm15, %v5847_v49, %v2396_v19  ;;  %v2204_v7 = vpop.xlane.xlu2 %2203  ;;  %vm6834_vm13 = vmor %vm1747_vm2, %vm1748_vm6  ;;  %vm2238_vm2 = vweird.f32 %v6770_v40 }
 0x327   : > { %v6753_v20 = vld [vmem:[#allocation5 + $0x30] sm:$0xff]  ;;  %v1924_v26 = vsel %vm1622_vm3, %v1897_v23, 0  ;;  %v2403_v14 = vmul.f32 %v2400_v24, %v6645_v47  ;;  %v6767_v47 = vadd.f32 1e-12, %v2201_v34  ;;  %v1743_v50 = vmul.f32 %v6776_v59, %v1742_v21 }
 0x328   : > { %v2193_v58 = vmul.f32 %v6753_v20, %v6753_v20  ;;  %1936 = vmatpush.bf16.xpose.msrb.mxu1 %v1924_v26  ;;  %v6795_v63 = vadd.f32 1e-12, %v2204_v7 }
 0x329   : > { %v2406_v29 = vmul.f32 4.0, %v2403_v14  ;;  %5852 = vrsqrt.f32 %v6767_v47  ;;  %v1744_v2 = vmul.f32 0.5, %v1743_v50  ;;  %vm2248_vm15 = vweird.f32 %v6767_v47 }
 0x32a   : > { %v2214_v11 = vsel %vm1622_vm3, %v2193_v58, 0.0  ;;  %5854 = vrsqrt.f32 %v6770_v40 }
 0x32b   : > { %2215 = vadd.xlane.f32.xlu2 %v2214_v11  ;;  %v2408_v31 = vpack.c.bf16 %v2406_v29, %v2406_v29  ;;  %v1745_v19 = vsub.f32 1.5, %v1744_v2 }
 0x32d   : > { %v2437_v62 = vsel %vm1622_vm3, %v2408_v31, 0  ;;  %v1746_v30 = vmul.f32 %v6776_v59, %v1745_v19 }
 0x32e   : > { %2445 = vmatpush.bf16.xpose.msra.mxu3 %v2437_v62  ;;  %v1704_v17 = vpop.xlane.xlu2 %1703 }
 0x32f   : > { %5073 = vmatmul.msk.bf16.vlgmr.msrb.gmra.mxu1 %vm1622_vm3, %v1829_v5  ;;  %v6778_v0 = vpop.eup %5852  ;;  %v2382_v5 = vmul.f32 %v6773_v61, %v2369_v35 }
 0x330   : > { %v6781_v42 = vpop.eup %5854  ;;  %v2243_v45 = vmul.f32 %v6778_v0, %v6767_v47  ;;  %vm2249_vm9 = vweird.f32 %v6778_v0 }
 0x331   : > { %v2383_v33 = vmul.f32 %v6773_v61, %v2382_v5  ;;  %v2233_v49 = vmul.f32 %v6781_v42, %v6770_v40  ;;  %vm2239_vm12 = vweird.f32 %v6781_v42  ;;  %vm6845_vm7 = vmor %vm2248_vm15, %vm2249_vm9  ;;  %v1750_v40 = vsel %vm6834_vm13, %v6776_v59, %v1746_v30 }
 0x332   : > { %v2244_v51 = vmul.f32 %v6778_v0, %v2243_v45  ;;  %v6825_v45 = vadd.f32 1e-12, %v1704_v17  ;;  %vm6857_vm6 = vmor %vm2238_vm2, %vm2239_vm12 }
 0x333   : > { %v2384_v57 = vmul.f32 0.5, %v2383_v33  ;;  %v2234_v60 = vmul.f32 %v6781_v42, %v2233_v49 }
 0x334   : > { %v2245_v3 = vmul.f32 0.5, %v2244_v51 }
 0x335   : > { %v2385_v22 = vsub.f32 1.5, %v2384_v57  ;;  %v2235_v15 = vmul.f32 0.5, %v2234_v60 }
 0x336   : > { %v2246_v23 = vsub.f32 1.5, %v2245_v3  ;;  %v2210_v51 = vpop.xlane.xlu2 %2209 }
 0x337   : > { %v2386_v24 = vmul.f32 %v6773_v61, %v2385_v22  ;;  %v2236_v14 = vsub.f32 1.5, %v2235_v15  ;;  %v6872_v15 = vadd.f32 1e-12, %v2210_v51 }
 0x338   : > { %v2247_v31 = vmul.f32 %v6778_v0, %v2246_v23 }
 0x339   : > { %v2390_v5 = vsel %vm6811_vm10, %v6773_v61, %v2386_v24 }
 0x33a   : > { %v2402_v50 = vmul.f32 %v2390_v5, %v6658_v54  ;;  %v2251_v47 = vsel %vm6845_vm7, %v6778_v0, %v2247_v31 }
 0x33b   : > { %v2323_v31 = vmul.f32 %v2251_v47, %v6653_v52 }
 0x33d   : > { %v2332_v38 = vmul.f32 4.0, %v2323_v31 }
 0x34a   : > { %v2361_v37 = vpop.xlane.xlu0 %2360 }
 0x34b   : > { %v2368_v48 = vadd.f32 1e-12, %v2361_v37  ;;  %v2237_v37 = vmul.f32 %v6781_v42, %v2236_v14  ;;  %v1813_v14 = vmul.f32 %v1750_v40, %v6637_v46 }
 0x34d   : > { %5856 = vrsqrt.f32 %v2368_v48  ;;  %vm2377_vm14 = vweird.f32 %v2368_v48  ;;  %v2241_v22 = vsel %vm6857_vm6, %v6781_v42, %v2237_v37  ;;  %vm1767_vm6 = vweird.f32 %v6792_v9 }
 0x34e   : > { %5858 = vrsqrt.f32 %v6792_v9  ;;  %v2322_v24 = vmul.f32 %v2241_v22, %v6672_v1 }
 0x34f   : > { %5860 = vrsqrt.f32 %v6795_v63 }
 0x350   : > { %v2331_v5 = vmul.f32 4.0, %v2322_v24 }
 0x352   : > { %v1695_v36 = vpop.xlane.xlu0 %1694 }
 0x353   : > { %v5857_v8 = vpop.eup %5856  ;;  %v6798_v13 = vadd.f32 1e-12, %v1695_v36 }
 0x354   : > { %v2372_v18 = vmul.f32 %v5857_v8, %v2368_v48  ;;  %v6804_v58 = vpop.eup %5858  ;;  %vm2378_vm11 = vweird.f32 %v5857_v8 }
 0x355   : > { %5862 = vrsqrt.f32 %v6798_v13  ;;  %v6817_v34 = vpop.eup %5860  ;;  %v1762_v35 = vmul.f32 %v6804_v58, %v6792_v9  ;;  %vm2379_vm0 = vmor %vm2377_vm14, %vm2378_vm11  ;;  %vm1757_vm10 = vweird.f32 %v6798_v13  ;;  %vm1768_vm14 = vweird.f32 %v6804_v58 }
 0x356   : > { %v2373_v26 = vmul.f32 %v5857_v8, %v2372_v18  ;;  %v2253_v48 = vmul.f32 %v6817_v34, %v6795_v63  ;;  %v2405_v18 = vmul.f32 4.0, %v2402_v50  ;;  %vm2259_vm15 = vweird.f32 %v6817_v34 }
 0x357   : > { %v1763_v3 = vmul.f32 %v6804_v58, %v1762_v35 }
 0x358   : > { %v2374_v11 = vmul.f32 0.5, %v2373_v26  ;;  %v2207_v29 = vpop.xlane.xlu1 %2206  ;;  %v2254_v59 = vmul.f32 %v6817_v34, %v2253_v48 }
 0x359   : > { %v6815_v32 = vadd.f32 1e-12, %v2207_v29  ;;  %v1764_v62 = vmul.f32 0.5, %v1763_v3 }
 0x35a   : > { %v2375_v39 = vsub.f32 1.5, %v2374_v11  ;;  %v1701_v41 = vpop.xlane.xlu0 %1700 }
 0x35b   : > { %v5863_v21 = vpop.eup %5862  ;;  %5864 = vrsqrt.f32 %v6815_v32  ;;  %v6828_v33 = vadd.f32 1e-12, %v1701_v41  ;;  %v1765_v48 = vsub.f32 1.5, %v1764_v62 }
 0x35c   : > { %v2376_v61 = vmul.f32 %v5857_v8, %v2375_v39  ;;  %v1752_v49 = vmul.f32 %v5863_v21, %v6798_v13  ;;  %vm1758_vm9 = vweird.f32 %v5863_v21  ;;  %v2255_v39 = vmul.f32 0.5, %v2254_v59 }
 0x35d   : > { %5866 = vrsqrt.f32 %v6828_v33  ;;  %vm1759_vm11 = vmor %vm1757_vm10, %vm1758_vm9  ;;  %v1766_v22 = vmul.f32 %v6804_v58, %v1765_v48  ;;  %vm1777_vm2 = vweird.f32 %v6828_v33 }
 0x35e   : > { %v1753_v57 = vmul.f32 %v5863_v21, %v1752_v49  ;;  %v2380_v60 = vsel %vm2379_vm0, %v5857_v8, %v2376_v61  ;;  %5868 = vrsqrt.f32 %v6825_v45  ;;  %v1822_v49 = vmul.f32 4.0, %v1813_v14  ;;  %vm6934_vm10 = vmor %vm1767_vm6, %vm1768_vm14 }
 0x35f   : > { %v2401_v2 = vmul.f32 %v2380_v60, %v6695_v28  ;;  %v2256_v60 = vsub.f32 1.5, %v2255_v39  ;;  %vm2268_vm0 = vweird.f32 %v6815_v32 }
 0x360   : > { %v1754_v0 = vmul.f32 0.5, %v1753_v57  ;;  %v1707_v36 = vpop.xlane.xlu1 %1706 }
 0x361   : > { %v6870_v8 = vpop.eup %5864  ;;  %v6874_v17 = vadd.f32 1e-12, %v1707_v36  ;;  %v2404_v28 = vmul.f32 4.0, %v2401_v2  ;;  %v2340_v2 = vpack.c.bf16 %v2332_v38, %v2331_v5  ;;  %v2257_v36 = vmul.f32 %v6817_v34, %v2256_v60 }
 0x362   : > { %v1755_v19 = vsub.f32 1.5, %v1754_v0  ;;  %v2263_v23 = vmul.f32 %v6870_v8, %v6815_v32  ;;  %vm2269_vm12 = vweird.f32 %v6870_v8 }
 0x363   : > { %v6879_v42 = vpop.eup %5866  ;;  %5870 = vrsqrt.f32 %v6874_v17  ;;  %v2407_v26 = vpack.c.bf16 %v2405_v18, %v2404_v28  ;;  %vm6921_vm7 = vmor %vm2268_vm0, %vm2269_vm12 }
 0x364   : > { %v1756_v11 = vmul.f32 %v5863_v21, %v1755_v19  ;;  %v2264_v29 = vmul.f32 %v6870_v8, %v2263_v23  ;;  %v1772_v30 = vmul.f32 %v6879_v42, %v6828_v33  ;;  %5872 = vrsqrt.f32 %v6872_v15  ;;  %v6891_v35 = vpop.eup %5868 }
 0x365   : > { %v2434_v1 = vsel %vm1622_vm3, %v2407_v26, 0  ;;  %vm1778_vm13 = vweird.f32 %v6879_v42  ;;  %v1782_v28 = vmul.f32 %v6891_v35, %v6825_v45  ;;  %vm1788_vm14 = vweird.f32 %v6891_v35 }
 0x366   : > { %v2265_v46 = vmul.f32 0.5, %v2264_v29  ;;  %v1773_v41 = vmul.f32 %v6879_v42, %v1772_v30  ;;  %2446 = vmatpush.bf16.xpose.msra.mxu3 %v2434_v1  ;;  %v1760_v13 = vsel %vm1759_vm11, %v5863_v21, %v1756_v11  ;;  %vm6930_vm9 = vmor %vm1777_vm2, %vm1778_vm13  ;;  %vm2258_vm11 = vweird.f32 %v6795_v63 }
 0x367   : > { %v1814_v7 = vmul.f32 %v1760_v13, %v6703_v44  ;;  %v1770_v63 = vsel %vm6934_vm10, %v6804_v58, %v1766_v22  ;;  %v1783_v11 = vmul.f32 %v6891_v35, %v1782_v28  ;;  %vm1787_vm2 = vweird.f32 %v6825_v45 }
 0x368   : > { %v2266_v37 = vsub.f32 1.5, %v2265_v46  ;;  %v1774_v61 = vmul.f32 0.5, %v1773_v41  ;;  %v2213_v52 = vpop.xlane.xlu1 %2212  ;;  %v1815_v58 = vmul.f32 %v1770_v63, %v6660_v12  ;;  %vm2278_vm10 = vweird.f32 %v6872_v15 }
 0x369   : > { %v6895_v50 = vpop.eup %5870  ;;  %v6897_v51 = vadd.f32 1e-12, %v2213_v52  ;;  %v1823_v57 = vmul.f32 4.0, %v1814_v7  ;;  %v1784_v41 = vmul.f32 0.5, %v1783_v11 }
 0x36a   : > { %v1775_v47 = vsub.f32 1.5, %v1774_v61  ;;  %v6899_v54 = vpop.eup %5872  ;;  %v2267_v21 = vmul.f32 %v6870_v8, %v2266_v37  ;;  %v1792_v3 = vmul.f32 %v6895_v50, %v6874_v17  ;;  %vm1798_vm12 = vweird.f32 %v6895_v50 }
 0x36b   : > { %5874 = vrsqrt.f32 %v6897_v51  ;;  %v1830_v44 = vpack.c.bf16 %v1823_v57, %v1822_v49  ;;  %v2273_v18 = vmul.f32 %v6899_v54, %v6872_v15  ;;  %v1824_v49 = vmul.f32 4.0, %v1815_v58 }
 0x36c   : > { %v1776_v40 = vmul.f32 %v6879_v42, %v1775_v47  ;;  %v1793_v23 = vmul.f32 %v6895_v50, %v1792_v3  ;;  %v2271_v9 = vsel %vm6921_vm7, %v6870_v8, %v2267_v21  ;;  %v1785_v48 = vsub.f32 1.5, %v1784_v41 }
 0x36d   : > { %v2172_v0 = vpop.permute.xlu0 %2171  ;;  %5074 = vmatmul.msk.bf16.gmra.mxu1 %vm1622_vm3, %v1830_v44  ;;  %5083 = vmatmul.msk.bf16.vlgmr.msra.gmra.mxu3 %vm1622_vm3, %v2340_v2  ;;  %v2274_v29 = vmul.f32 %v6899_v54, %v2273_v18  ;;  %v2325_v31 = vmul.f32 %v2271_v9, %v6718_v6  ;;  %vm2288_vm7 = vweird.f32 %v6897_v51 }
 0x36e   : > { %2177 = vst.msk [vmem:[#allocation5 + $0x42] sm:$0x3] %vm2147_vm8, %v2172_v0  ;;  %v1780_v33 = vsel %vm6930_vm9, %v6879_v42, %v1776_v40  ;;  %vm2260_vm8 = vmor %vm2258_vm11, %vm2259_vm15  ;;  %v1794_v62 = vmul.f32 0.5, %v1793_v23  ;;  %v1786_v44 = vmul.f32 %v6891_v35, %v1785_v48  ;;  %vm2279_vm15 = vweird.f32 %v6899_v54 }
 0x36f   : > { %v2261_v30 = vsel %vm2260_vm8, %v6817_v34, %v2257_v36  ;;  %v1816_v8 = vmul.f32 %v1780_v33, %v6662_v56  ;;  %v2275_v13 = vmul.f32 0.5, %v2274_v29  ;;  %v2334_v37 = vmul.f32 4.0, %v2325_v31  ;;  %vm1789_vm9 = vmor %vm1787_vm2, %vm1788_vm14 }
 0x370   : > { %v1711_v24 = vpop.xlane.xlu1 %1710  ;;  %v2324_v46 = vmul.f32 %v2261_v30, %v6677_v4  ;;  %v1795_v61 = vsub.f32 1.5, %v1794_v62  ;;  %vm2280_vm11 = vmor %vm2278_vm10, %vm2279_vm15  ;;  %v1790_v22 = vsel %vm1789_vm9, %v6891_v35, %v1786_v44  ;;  %v1899_v62 = vld [vmem:[%s8213_s5] sm:$0xff] }
 0x371   : > { %v5875_v26 = vpop.eup %5874  ;;  %v6948_v14 = vadd.f32 1e-12, %v1711_v24  ;;  %v1825_v7 = vmul.f32 4.0, %v1816_v8  ;;  %v2276_v12 = vsub.f32 1.5, %v2275_v13  ;;  %v1817_v45 = vmul.f32 %v1790_v22, %v6685_v10  ;;  %v1902_v22 = vld [vmem:[%s8213_s5 + $0x18] sm:$0xff] }
 0x372   : > { %v2283_v42 = vmul.f32 %v5875_v26, %v6897_v51  ;;  %v2333_v38 = vmul.f32 4.0, %v2324_v46  ;;  %v1796_v60 = vmul.f32 %v6895_v50, %v1795_v61  ;;  %vm2289_vm13 = vweird.f32 %v5875_v26  ;;  %v1900_v61 = vld [vmem:[%s8213_s5 + $0x8] sm:$0xff] }
 0x373   : > { %5876 = vrsqrt.f32 %v6948_v14  ;;  %v1831_v4 = vpack.c.bf16 %v1825_v7, %v1824_v49  ;;  %v2277_v21 = vmul.f32 %v6899_v54, %v2276_v12  ;;  %vm2290_vm6 = vmor %vm2288_vm7, %vm2289_vm13  ;;  %v1826_v19 = vmul.f32 4.0, %v1817_v45 }
 0x374   : > { %v2284_v1 = vmul.f32 %v5875_v26, %v2283_v42  ;;  %v2341_v57 = vpack.c.bf16 %v2334_v37, %v2333_v38 }
 0x375   : > { %v6960_v39 = vld [vmem:[#allocation5 + $0x40] sm:$0xf]  ;;  %v2281_v0 = vsel %vm2280_vm11, %v6899_v54, %v2277_v21 }
 0x376   : > { %v2285_v5 = vmul.f32 0.5, %v2284_v1  ;;  %v2195_v34 = vmul.f32 %v6960_v39, %v6960_v39  ;;  %v2326_v18 = vmul.f32 %v2281_v0, %v6690_v16 }
 0x378   : > { %v2286_v56 = vsub.f32 1.5, %v2285_v5  ;;  %v2220_v6 = vsel %vm1708_vm5, %v2195_v34, 0.0  ;;  %vm1797_vm5 = vweird.f32 %v6874_v17 }
 0x379   : > { %v5877_v52 = vpop.eup %5876  ;;  %2221 = vadd.xlane.f32.xlu2 %v2220_v6  ;;  %vm1799_vm0 = vmor %vm1797_vm5, %vm1798_vm12  ;;  %vm1807_vm12 = vweird.f32 %v6948_v14 }
 0x37a   : > { %v2287_v47 = vmul.f32 %v5875_v26, %v2286_v56  ;;  %v1802_v2 = vmul.f32 %v5877_v52, %v6948_v14  ;;  %v1800_v40 = vsel %vm1799_vm0, %v6895_v50, %v1796_v60  ;;  %v2335_v50 = vmul.f32 4.0, %v2326_v18 }
 0x37b   : > { %v1818_v36 = vmul.f32 %v1800_v40, %v6700_v43  ;;  %vm1808_vm8 = vweird.f32 %v5877_v52 }
 0x37c   : > { %v1803_v17 = vmul.f32 %v5877_v52, %v1802_v2  ;;  %v2291_v3 = vsel %vm2290_vm6, %v5875_v26, %v2287_v47  ;;  %vm1809_vm13 = vmor %vm1807_vm12, %vm1808_vm8  ;;  %vm1980_vm6 = vcmask 195584   ;;  %vm2005_vm8 = vcmask 191488  }
 0x37d   : > { %5075 = vmatmul.msk.bf16.gmra.mxu1 %vm1622_vm3, %v1831_v4  ;;  %5084 = vmatmul.msk.bf16.gmra.mxu3 %vm1622_vm3, %v2341_v57  ;;  %v2327_v28 = vmul.f32 %v2291_v3, %v6735_v27  ;;  %v1827_v59 = vmul.f32 4.0, %v1818_v36  ;;  %vm2108_vm12 = vcmask 517376  }
 0x37e   : > { %v1804_v51 = vmul.f32 0.5, %v1803_v17 }
 0x37f   : > { %v2336_v15 = vmul.f32 4.0, %v2327_v28  ;;  %v1832_v23 = vpack.c.bf16 %v1827_v59, %v1826_v19 }
 0x380   : > { %v1805_v32 = vsub.f32 1.5, %v1804_v51 }
 0x381   : > { %v2342_v24 = vpack.c.bf16 %v2336_v15, %v2335_v50  ;;  %v1903_v50 = vld [vmem:[%s8213_s5 + $0x20] sm:$0xff] }
 0x382   : > { %v1806_v33 = vmul.f32 %v5877_v52, %v1805_v32 }
 0x384   : > { %v1810_v43 = vsel %vm1809_vm13, %v5877_v52, %v1806_v33  ;;  %vm2104_vm13 = vcmask 523521  }
 0x385   : > { %v1819_v10 = vmul.f32 %v1810_v43, %v6730_v25 }
 0x387   : > { %v1828_v16 = vmul.f32 4.0, %v1819_v10 }
 0x389   : > { %v1833_v54 = vpack.c.bf16 %v1828_v16, %v1828_v16 }
 0x38d   : > { %5076 = vmatmul.msk.bf16.gmra.mxu1 %vm1622_vm3, %v1832_v23  ;;  %5085 = vmatmul.msk.bf16.gmra.mxu3 %vm1622_vm3, %v2342_v24 }
 0x398   : > { %v2219_v27 = vpop.xlane.xlu0 %2218 }
 0x399   : > { %v2230_v35 = vadd.f32 1e-12, %v2219_v27 }
 0x39b   : > { %5878 = vrsqrt.f32 %v2230_v35  ;;  %vm2308_vm5 = vweird.f32 %v2230_v35 }
 0x39d   : > { %5077 = vmatmul.msk.bf16.gmra.mxu1 %vm1622_vm3, %v1833_v54 }
 0x39e   : > { %v2216_v9 = vpop.xlane.xlu2 %2215 }
 0x39f   : > { %v2229_v26 = vadd.f32 1e-12, %v2216_v9 }
 0x3a1   : > { %v5879_v63 = vpop.eup %5878  ;;  %5880 = vrsqrt.f32 %v2229_v26  ;;  %vm2298_vm7 = vweird.f32 %v2229_v26 }
 0x3a2   : > { %v2303_v11 = vmul.f32 %v5879_v63, %v2230_v35  ;;  %vm2309_vm14 = vweird.f32 %v5879_v63 }
 0x3a3   : > { %vm2310_vm15 = vmor %vm2308_vm5, %vm2309_vm14  ;;  %vm2123_vm14 = vcmask 785920   ;;  %vm2125_vm5 = vcmask 780800  }
 0x3a4   : > { %v2304_v29 = vmul.f32 %v5879_v63, %v2303_v11 }
 0x3a6   : > { %v2305_v42 = vmul.f32 0.5, %v2304_v29  ;;  %v1904_v29 = vld [vmem:[%s8213_s5 + $0x28] sm:$0xff] }
 0x3a7   : > { %v5881_v30 = vpop.eup %5880 }
 0x3a8   : > { %v2306_v14 = vsub.f32 1.5, %v2305_v42  ;;  %v2293_v8 = vmul.f32 %v5881_v30, %v2229_v26  ;;  %vm2299_vm0 = vweird.f32 %v5881_v30 }
 0x3a9   : > { %vm2300_vm2 = vmor %vm2298_vm7, %vm2299_vm0  ;;  %vm2140_vm0 = vcmask 1048320   ;;  %vm2138_vm7 = vcmask 1048323  }
 0x3aa   : > { %v2307_v31 = vmul.f32 %v5879_v63, %v2306_v14  ;;  %v2294_v25 = vmul.f32 %v5881_v30, %v2293_v8 }
 0x3ac   : > { %v2295_v1 = vmul.f32 0.5, %v2294_v25  ;;  %v1938_v58 = vpop.f32.mrf.mxu1  ;;  %v2311_v13 = vsel %vm2310_vm15, %v5879_v63, %v2307_v31  ;;  %vm2121_vm15 = vcmask 785922  }
 0x3ad   : > { %v1939_v41 = vadd.f32 %v1938_v58, %v1899_v62  ;;  %v2329_v7 = vmul.f32 %v2311_v13, %v6745_v53 }
 0x3ae   : > { %v2296_v46 = vsub.f32 1.5, %v2295_v1 }
 0x3af   : > { %v1962_v34 = vmul.f32 1.442695, %v1939_v41  ;;  %v2338_v49 = vmul.f32 4.0, %v2329_v7  ;;  %v7032_v7 = vld [vmem:[%s8213_s5 + $0x30] sm:$0xff] }
 0x3b0   : > { %v2297_v5 = vmul.f32 %v5881_v30, %v2296_v46 }
 0x3b1   : > { %5882 = vpow2.f32 %v1962_v34 }
 0x3b2   : > { %v2301_v37 = vsel %vm2300_vm2, %v5881_v30, %v2297_v5  ;;  %vm2142_vm2 = vcmask 1044224  }
 0x3b3   : > { %v2328_v56 = vmul.f32 %v2301_v37, %v6753_v20  ;;  %v1901_v20 = vld [vmem:[%s8213_s5 + $0x10] sm:$0xff] }
 0x3b4   : > { %v1940_v6 = vpop.f32.mrf.mxu1 }
 0x3b5   : > { %v2337_v52 = vmul.f32 4.0, %v2328_v56  ;;  %v1941_v38 = vadd.f32 %v1940_v6, %v1900_v61 }
 0x3b7   : > { %v2343_v48 = vpack.c.bf16 %v2338_v49, %v2337_v52  ;;  %v5883_v12 = vpop.eup %5882  ;;  %v1964_v4 = vmul.f32 1.442695, %v1941_v38 }
 0x3b8   : > { %v1981_v57 = vsel %vm1980_vm6, %v5883_v12, 0.0 }
 0x3b9   : > { %5086 = vmatmul.msk.bf16.gmra.mxu3 %vm1622_vm3, %v2343_v48  ;;  %5884 = vpow2.f32 %v1964_v4  ;;  %1982 = vadd.xlane.f32.xlu0 %v1981_v57  ;;  %v1906_v57 = vld [vmem:[%s8213_s5 + $0x38] sm:$0xff] }
 0x3bf   : > { %v5885_v53 = vpop.eup %5884 }
 0x3c0   : > { %v2018_v60 = vpack.c.bf16 %v5885_v53, %v5883_v12  ;;  %v1984_v47 = vsel %vm1980_vm6, %v5885_v53, 0.0 }
 0x3c1   : > { %1985 = vadd.xlane.f32.xlu1 %v1984_v47 }
 0x3c2   : > { %5078 = vmatmul.msk.bf16.vlgmr.msra.gmra.mxu2 %vm1980_vm6, %v2018_v60 }
 0x3ea   : > { %v1943_v2 = vpop.f32.mrf.mxu1 }
 0x3eb   : > { %v1944_v44 = vadd.f32 %v1943_v2, %v1901_v20 }
 0x3ec   : > { %v2222_v21 = vpop.xlane.xlu2 %2221 }
 0x3ed   : > { %v1966_v17 = vmul.f32 1.442695, %v1944_v44  ;;  %v2231_v40 = vadd.f32 1e-12, %v2222_v21 }
 0x3ef   : > { %5886 = vpow2.f32 %v1966_v17  ;;  %vm2318_vm10 = vweird.f32 %v2231_v40 }
 0x3f0   : > { %5888 = vrsqrt.f32 %v2231_v40  ;;  %v2448_v3 = vpop.f32.mrf.mxu3 }
 0x3f1   : > { %v2449_v28 = vadd.f32 %v2448_v3, %v1899_v62 }
 0x3f2   : > { %v1945_v0 = vpop.f32.mrf.mxu1 }
 0x3f3   : > { %v1946_v36 = vadd.f32 %v1945_v0, %v1902_v22  ;;  %v2472_v32 = vmul.f32 1.442695, %v2449_v28 }
 0x3f5   : > { %v5887_v51 = vpop.eup %5886  ;;  %v1968_v45 = vmul.f32 1.442695, %v1946_v36  ;;  %v1907_v36 = vld [vmem:[%s8213_s5 + $0x40] sm:$0xf] }
 0x3f6   : > { %v5889_v18 = vpop.eup %5888  ;;  %v1987_v59 = vsel %vm1980_vm6, %v5887_v51, 0.0 }
 0x3f7   : > { %v2313_v15 = vmul.f32 %v5889_v18, %v2231_v40  ;;  %5890 = vpow2.f32 %v1968_v45  ;;  %1988 = vadd.xlane.f32.xlu1 %v1987_v59  ;;  %vm2319_vm9 = vweird.f32 %v5889_v18 }
 0x3f8   : > { %v2450_v19 = vpop.f32.mrf.mxu3  ;;  %5892 = vpow2.f32 %v2472_v32  ;;  %vm2320_vm11 = vmor %vm2318_vm10, %vm2319_vm9 }
 0x3f9   : > { %v2314_v23 = vmul.f32 %v5889_v18, %v2313_v15  ;;  %v2451_v24 = vadd.f32 %v2450_v19, %v1900_v61 }
 0x3fa   : > { %v1948_v33 = vpop.f32.mrf.mxu1 }
 0x3fb   : > { %v2315_v43 = vmul.f32 0.5, %v2314_v23  ;;  %v2474_v10 = vmul.f32 1.442695, %v2451_v24  ;;  %v1949_v16 = vadd.f32 %v1948_v33, %v1903_v50 }
 0x3fd   : > { %v5891_v27 = vpop.eup %5890  ;;  %v2316_v35 = vsub.f32 1.5, %v2315_v43  ;;  %5894 = vpow2.f32 %v2474_v10  ;;  %v1970_v54 = vmul.f32 1.442695, %v1949_v16 }
 0x3fe   : > { %v1990_v9 = vsel %vm1980_vm6, %v5891_v27, 0.0  ;;  %v2019_v26 = vpack.c.bf16 %v5891_v27, %v5887_v51  ;;  %v7019_v14 = vpop.eup %5892 }
 0x3ff   : > { %v2317_v63 = vmul.f32 %v5889_v18, %v2316_v35  ;;  %5896 = vpow2.f32 %v1970_v54  ;;  %1991 = vadd.xlane.f32.xlu2 %v1990_v9 }
 0x400   : > { %5079 = vmatmul.msk.bf16.gmra.mxu2 %vm1980_vm6, %v2019_v26  ;;  %v2453_v11 = vpop.f32.mrf.mxu3 }
 0x401   : > { %v2454_v42 = vadd.f32 %v2453_v11, %v1901_v20  ;;  %v2321_v30 = vsel %vm2320_vm11, %v5889_v18, %v2317_v63 }
 0x402   : > { %v1950_v8 = vpop.f32.mrf.mxu1  ;;  %v2330_v31 = vmul.f32 %v2321_v30, %v6960_v39 }
 0x403   : > { %v7022_v25 = vpop.eup %5894  ;;  %v2476_v62 = vmul.f32 1.442695, %v2454_v42  ;;  %v1951_v1 = vadd.f32 %v1950_v8, %v1904_v29 }
 0x404   : > { %v2526_v58 = vpack.c.bf16 %v7022_v25, %v7019_v14  ;;  %v2339_v46 = vmul.f32 4.0, %v2330_v31 }
 0x405   : > { %v5897_v41 = vpop.eup %5896  ;;  %5898 = vpow2.f32 %v2476_v62  ;;  %v1972_v13 = vmul.f32 1.442695, %v1951_v1 }
 0x406   : > { %5088 = vmatmul.msk.bf16.vlgmr.msra.gmra.mxu0 %vm1980_vm6, %v2526_v58  ;;  %v1993_v5 = vsel %vm1980_vm6, %v5897_v41, 0.0  ;;  %v2344_v34 = vpack.c.bf16 %v2339_v46, %v2339_v46 }
 0x407   : > { %5900 = vpow2.f32 %v1972_v13  ;;  %1994 = vadd.xlane.f32.xlu1 %v1993_v5 }
 0x408   : > { %5087 = vmatmul.msk.bf16.gmra.mxu3 %vm1622_vm3, %v2344_v34  ;;  %v2455_v39 = vpop.f32.mrf.mxu3 }
 0x409   : > { %v2456_v37 = vadd.f32 %v2455_v39, %v1902_v22 }
 0x40a   : > { %v1953_v61 = vpop.f32.mrf.mxu1 }
 0x40b   : > { %v5899_v56 = vpop.eup %5898  ;;  %v2478_v6 = vmul.f32 1.442695, %v2456_v37  ;;  %v1954_v52 = vadd.f32 %v1953_v61, %v7032_v7 }
 0x40c   : > { %v2496_v49 = vsel %vm1980_vm6, %v5899_v56, 0.0 }
 0x40d   : > { %v5901_v38 = vpop.eup %5900  ;;  %5902 = vpow2.f32 %v2478_v6  ;;  %v1974_v48 = vmul.f32 1.442695, %v1954_v52  ;;  %2497 = vadd.xlane.f32.xlu2 %v2496_v49 }
 0x40e   : > { %v2020_v12 = vpack.c.bf16 %v5901_v38, %v5897_v41  ;;  %v1996_v21 = vsel %vm1980_vm6, %v5901_v38, 0.0  ;;  %v2417_v38 = vld [vmem:[%s8213_s5 + $0x40] sm:$0xf] }
 0x40f   : > { %5904 = vpow2.f32 %v1974_v48 }
 0x410   : > { %5080 = vmatmul.msk.bf16.gmra.mxu2 %vm1980_vm6, %v2020_v12  ;;  %v2458_v4 = vpop.f32.mrf.mxu3 }
 0x411   : > { %v2459_v53 = vadd.f32 %v2458_v4, %v1903_v50 }
 0x412   : > { %v1955_v60 = vpop.f32.mrf.mxu1 }
 0x413   : > { %v5903_v47 = vpop.eup %5902  ;;  %v2480_v20 = vmul.f32 1.442695, %v2459_v53  ;;  %v1956_v2 = vadd.f32 %v1955_v60, %v1906_v57 }
 0x414   : > { %v2499_v44 = vsel %vm1980_vm6, %v5903_v47, 0.0  ;;  %v2527_v17 = vpack.c.bf16 %v5903_v47, %v5899_v56 }
 0x415   : > { %v5905_v40 = vpop.eup %5904  ;;  %5906 = vpow2.f32 %v2480_v20  ;;  %v1976_v3 = vmul.f32 1.442695, %v1956_v2  ;;  %2500 = vadd.xlane.f32.xlu0 %v2499_v44  ;;  %1997 = vadd.xlane.f32.xlu2 %v1996_v21 }
 0x416   : > { %5089 = vmatmul.msk.bf16.gmra.mxu0 %vm1980_vm6, %v2527_v17  ;;  %v1999_v22 = vsel %vm1980_vm6, %v5905_v40, 0.0 }
 0x417   : > { %5908 = vpow2.f32 %v1976_v3  ;;  %2000 = vadd.xlane.f32.xlu1 %v1999_v22 }
 0x418   : > { %v2460_v0 = vpop.f32.mrf.mxu3 }
 0x419   : > { %v2461_v28 = vadd.f32 %v2460_v0, %v1904_v29 }
 0x41a   : > { %v1958_v51 = vpop.f32.mrf.mxu1 }
 0x41b   : > { %v5907_v45 = vpop.eup %5906  ;;  %v2482_v18 = vmul.f32 1.442695, %v2461_v28  ;;  %v1959_v59 = vadd.f32 %v1958_v51, %v1907_v36 }
 0x41c   : > { %v2502_v50 = vsel %vm1980_vm6, %v5907_v45, 0.0 }
 0x41d   : > { %v5909_v15 = vpop.eup %5908  ;;  %5910 = vpow2.f32 %v2482_v18  ;;  %v1978_v32 = vmul.f32 1.442695, %v1959_v59 }
 0x41e   : > { %v2002_v19 = vsel %vm1980_vm6, %v5909_v15, 0.0  ;;  %v2021_v23 = vpack.c.bf16 %v5909_v15, %v5905_v40 }
 0x41f   : > { %5912 = vpow2.f32 %v1978_v32  ;;  %2003 = vadd.xlane.f32.xlu2 %v2002_v19  ;;  %2503 = vadd.xlane.f32.xlu1 %v2502_v50 }
 0x420   : > { %5081 = vmatmul.msk.bf16.gmra.mxu2 %vm1980_vm6, %v2021_v23 }
 0x422   : > { %v1960_v24 = vpop.f32.mrf.mxu1 }
 0x423   : > { %v5911_v33 = vpop.eup %5910 }
 0x424   : > { %v2528_v43 = vpack.c.bf16 %v5911_v33, %v5907_v45  ;;  %v2505_v16 = vsel %vm1980_vm6, %v5911_v33, 0.0 }
 0x425   : > { %v5913_v10 = vpop.eup %5912 }
 0x426   : > { %5090 = vmatmul.msk.bf16.gmra.mxu0 %vm1980_vm6, %v2528_v43  ;;  %v2006_v27 = vsel %vm2005_vm8, %v5913_v10, 0.0  ;;  %v2022_v35 = vpack.c.bf16 %v5913_v10, %v5913_v10 }
 0x427   : > { %2506 = vadd.xlane.f32.xlu2 %v2505_v16  ;;  %2007 = vadd.xlane.f32.xlu1 %v2006_v27 }
 0x42c   : > { %v1983_v9 = vpop.xlane.xlu0 %1982 }
 0x42d   : > { %5914 = vrcp.f32 %v1983_v9 }
 0x430   : > { %5082 = vmatmul.msk.bf16.gmra.mxu2 %vm1980_vm6, %v2022_v35 }
 0x433   : > { %v5915_v30 = vpop.eup %5914 }
 0x434   : > { %v1986_v29 = vpop.xlane.xlu1 %1985 }
 0x43c   : > { %v2463_v54 = vpop.f32.mrf.mxu3 }
 0x43d   : > { %v2464_v26 = vadd.f32 %v2463_v54, %v7032_v7 }
 0x43f   : > { %v2484_v63 = vmul.f32 1.442695, %v2464_v26 }
 0x441   : > { %5916 = vpow2.f32 %v2484_v63 }
 0x442   : > { %5918 = vrcp.f32 %v1986_v29 }
 0x444   : > { %v2465_v11 = vpop.f32.mrf.mxu3 }
 0x445   : > { %v2466_v42 = vadd.f32 %v2465_v11, %v1906_v57  ;;  %v2056_v8 = vpop.f32.mrf.mxu2 }
 0x446   : > { %v2080_v1 = vmul.f32 %v5915_v30, %v2056_v8 }
 0x447   : > { %v5917_v31 = vpop.eup %5916  ;;  %v2486_v62 = vmul.f32 1.442695, %v2466_v42 }
 0x448   : > { %v2508_v58 = vsel %vm1980_vm6, %v5917_v31, 0.0  ;;  %2089 = vst.msk [vmem:[#allocation6] sm:$0xff] %vm1622_vm3, %v2080_v1  ;;  %v5919_v46 = vpop.eup %5918 }
 0x449   : > { %5920 = vpow2.f32 %v2486_v62  ;;  %2509 = vadd.xlane.f32.xlu0 %v2508_v58 }
 0x44d   : > { %v2058_v41 = vpop.f32.mrf.mxu2 }
 0x44e   : > { %v2081_v5 = vmul.f32 %v5919_v46, %v2058_v41 }
 0x44f   : > { %v5921_v13 = vpop.eup %5920 }
 0x450   : > { %v2511_v34 = vsel %vm1980_vm6, %v5921_v13, 0.0  ;;  %v2529_v39 = vpack.c.bf16 %v5921_v13, %v5917_v31  ;;  %2090 = vst.msk [vmem:[#allocation6 + $0x8] sm:$0xff] %vm1622_vm3, %v2081_v5  ;;  %v2493_v13 = vsel %vm1980_vm6, %v7022_v25, 0.0 }
 0x451   : > { %2512 = vadd.xlane.f32.xlu1 %v2511_v34 }
 0x452   : > { %5091 = vmatmul.msk.bf16.gmra.mxu0 %vm1980_vm6, %v2529_v39 }
 0x46a   : > { %v1989_v7 = vpop.xlane.xlu1 %1988 }
 0x46b   : > { %5922 = vrcp.f32 %v1989_v7 }
 0x471   : > { %v5923_v61 = vpop.eup %5922 }
 0x472   : > { %v1992_v37 = vpop.xlane.xlu2 %1991 }
 0x473   : > { %5924 = vrcp.f32 %v1992_v37  ;;  %v2490_v37 = vsel %vm1980_vm6, %v7019_v14, 0.0  ;;  %v5654_v14 = vld [vmem:[%s6317_s3 + $0x38] sm:$0xff] }
 0x474   : > { %2714 = vmatpush.bf16.msra.mxu1 %v5654_v14 }
 0x479   : > { %v5925_v12 = vpop.eup %5924 }
 0x47a   : > { %v1995_v48 = vpop.xlane.xlu1 %1994 }
 0x47b   : > { %5926 = vrcp.f32 %v1995_v48 }
 0x480   : > { %v2498_v49 = vpop.xlane.xlu2 %2497 }
 0x481   : > { %5928 = vrcp.f32 %v2498_v49  ;;  %v5927_v44 = vpop.eup %5926 }
 0x483   : > { %v2061_v56 = vpop.f32.mrf.mxu2  ;;  %v7060_v6 = vpop.f32.mrf.mxu0 }
 0x484   : > { %v2082_v52 = vmul.f32 %v5923_v61, %v2061_v56 }
 0x486   : > { %2091 = vst.msk [vmem:[#allocation6 + $0x10] sm:$0x1] %vm1625_vm4, %v2082_v52 }
 0x487   : > { %v5929_v40 = vpop.eup %5928 }
 0x488   : > { %v1998_v2 = vpop.xlane.xlu2 %1997  ;;  %v2501_v24 = vpop.xlane.xlu0 %2500 }
 0x48a   : > { %v2001_v45 = vpop.xlane.xlu1 %2000 }
 0x48b   : > { %v2468_v4 = vpop.f32.mrf.mxu3  ;;  %v2063_v57 = vpop.f32.mrf.mxu2 }
 0x48c   : > { %v2469_v53 = vadd.f32 %v2468_v4, %v2417_v38  ;;  %v2083_v60 = vmul.f32 %v5925_v12, %v2063_v57  ;;  %v7066_v47 = vpop.f32.mrf.mxu0  ;;  %v5653_v38 = vld [vmem:[%s6317_s3 + $0x30] sm:$0xff] }
 0x48d   : > { %2715 = vmatpush.bf16.msra.mxu1 %v5653_v38 }
 0x48e   : > { %v2488_v20 = vmul.f32 1.442695, %v2469_v53  ;;  %2097 = vrot.lane.b32.xlu0 %v2083_v60, %s6137_s20 }
 0x490   : > { %5930 = vpow2.f32 %v2488_v20  ;;  %v5652_v20 = vld [vmem:[%s6317_s3 + $0x28] sm:$0xff] }
 0x491   : > { %5932 = vrcp.f32 %v1998_v2  ;;  %2716 = vmatpush.bf16.msra.mxu1 %v5652_v20  ;;  %v5651_v2 = vld [vmem:[%s6317_s3 + $0x20] sm:$0xff] }
 0x492   : > { %5934 = vrcp.f32 %v2001_v45  ;;  %v2004_v32 = vpop.xlane.xlu2 %2003  ;;  %v2504_v27 = vpop.xlane.xlu1 %2503  ;;  %v5647_v45 = vld [vmem:[%s6317_s3] sm:$0xff] }
 0x493   : > { %v2470_v21 = vpop.f32.mrf.mxu3  ;;  %v2066_v17 = vpop.f32.mrf.mxu2  ;;  %5936 = vrcp.f32 %v2004_v32 }
 0x494   : > { %v2084_v3 = vmul.f32 %v5927_v44, %v2066_v17  ;;  %v2568_v22 = vpop.f32.mrf.mxu0  ;;  %5938 = vrcp.f32 %v2501_v24 }
 0x495   : > { %v2589_v0 = vmul.f32 %v5929_v40, %v2568_v22  ;;  %5940 = vrcp.f32 %v2504_v27  ;;  %2717 = vmatpush.bf16.msra.mxu1 %v5651_v2  ;;  %v5649_v22 = vld [vmem:[%s6317_s3 + $0x10] sm:$0xff] }
 0x496   : > { %v5931_v36 = vpop.eup %5930  ;;  %2099 = vrot.lane.b32.xlu1 %v2084_v3, %s6137_s20 }
 0x497   : > { %2598 = vst.msk [vmem:[#allocation6 + $0x21] sm:$0x1] %vm1625_vm4, %v2589_v0  ;;  %v2514_v28 = vsel %vm2005_vm8, %v5931_v36, 0.0  ;;  %v2530_v51 = vpack.c.bf16 %v5931_v36, %v5931_v36  ;;  %v5933_v18 = vpop.eup %5932  ;;  %vm2106_vm4 = vcmask 523520  }
 0x498   : > { %2515 = vadd.xlane.f32.xlu2 %v2514_v28  ;;  %v5935_v19 = vpop.eup %5934  ;;  %v5648_v28 = vld [vmem:[%s6317_s3 + $0x8] sm:$0xff] }
 0x499   : > { %5092 = vmatmul.msk.bf16.gmra.mxu0 %vm1980_vm6, %v2530_v51  ;;  %v5937_v33 = vpop.eup %5936 }
 0x49a   : > { %v5939_v35 = vpop.eup %5938  ;;  %v2507_v42 = vpop.xlane.xlu2 %2506 }
 0x49b   : > { %v2068_v59 = vpop.f32.mrf.mxu2  ;;  %v5941_v63 = vpop.eup %5940  ;;  %5942 = vrcp.f32 %v2507_v42 }
 0x49c   : > { %v2085_v15 = vmul.f32 %v5933_v18, %v2068_v59  ;;  %v2570_v16 = vpop.f32.mrf.mxu0  ;;  %v2008_v8 = vpop.xlane.xlu1 %2007 }
 0x49d   : > { %v2590_v9 = vmul.f32 %v5939_v35, %v2570_v16  ;;  %5944 = vrcp.f32 %v2008_v8 }
 0x49e   : > { %2114 = vrot.lane.b32.xlu0 %v2085_v15, %s6138_s6 }
 0x4a1   : > { %v5943_v31 = vpop.eup %5942 }
 0x4a3   : > { %v2071_v50 = vpop.f32.mrf.mxu2  ;;  %v5945_v46 = vpop.eup %5944 }
 0x4a4   : > { %v2086_v23 = vmul.f32 %v5935_v19, %v2071_v50  ;;  %v2573_v26 = vpop.f32.mrf.mxu0 }
 0x4a5   : > { %v2591_v29 = vmul.f32 %v5941_v63, %v2573_v26 }
 0x4a6   : > { %2116 = vrot.lane.b32.xlu1 %v2086_v23, %s6138_s6 }
 0x4ab   : > { %v2073_v43 = vpop.f32.mrf.mxu2 }
 0x4ac   : > { %v2087_v10 = vmul.f32 %v5937_v33, %v2073_v43  ;;  %v2575_v30 = vpop.f32.mrf.mxu0 }
 0x4ad   : > { %v2592_v62 = vmul.f32 %v5943_v31, %v2575_v30 }
 0x4ae   : > { %2131 = vrot.lane.b32.xlu0 %v2087_v10, %s6139_s29  ;;  %2602 = vrot.lane.b32.xlu1 %v2589_v0, %s6137_s20 }
 0x4b0   : > { %2095 = vrot.lane.b32.xlu2 %v2082_v52, %s6137_s20 }
 0x4b3   : > { %v2076_v54 = vpop.f32.mrf.mxu2 }
 0x4b4   : > { %v2088_v41 = vmul.f32 %v5945_v46, %v2076_v54 }
 0x4b6   : > { %2604 = vrot.lane.b32.xlu1 %v2590_v9, %s6137_s20 }
 0x4b8   : > { %2112 = vrot.lane.b32.xlu2 %v2084_v3, %s6138_s6  ;;  %v5650_v3 = vld [vmem:[%s6317_s3 + $0x18] sm:$0xff] }
 0x4b9   : > { %2718 = vmatpush.bf16.msra.mxu1 %v5650_v3 }
 0x4bb   : > { %v2078_v11 = vpop.f32.mrf.mxu2 }
 0x4bc   : > { %v2510_v7 = vpop.xlane.xlu0 %2509 }
 0x4bd   : > { %2719 = vmatpush.bf16.msra.mxu1 %v5649_v22 }
 0x4be   : > { %2606 = vrot.lane.b32.xlu1 %v2591_v29, %s6137_s20 }
 0x4c0   : > { %2129 = vrot.lane.b32.xlu2 %v2086_v23, %s6139_s29 }
 0x4c1   : > { %2720 = vmatpush.bf16.msra.mxu1 %v5648_v28 }
 0x4c4   : > { %v2513_v58 = vpop.xlane.xlu1 %2512 }
 0x4c5   : > { %5946 = vrcp.f32 %v2513_v58  ;;  %2721 = vmatpush.bf16.msra.mxu1 %v5647_v45 }
 0x4c6   : > { %2616 = vrot.lane.b32.xlu1 %v2591_v29, %s6138_s6  ;;  %5948 = vrcp.f32 %v2510_v7 }
 0x4cb   : > { %v5947_v34 = vpop.eup %5946 }
 0x4cc   : > { %v5949_v61 = vpop.eup %5948 }
 0x4ce   : > { %2618 = vrot.lane.b32.xlu1 %v2592_v62, %s6138_s6 }
 0x4cf   : > { %v2578_v1 = vpop.f32.mrf.mxu0 }
 0x4d0   : > { %v2593_v56 = vmul.f32 %v5949_v61, %v2578_v1 }
 0x4d6   : > { %2133 = vrot.lane.b32.xlu1 %v2088_v41, %s6139_s29 }
 0x4d7   : > { %v2580_v5 = vpop.f32.mrf.mxu0 }
 0x4d8   : > { %2494 = vadd.xlane.f32.xlu0 %v2493_v13  ;;  %v2594_v39 = vmul.f32 %v5947_v34, %v2580_v5 }
 0x4de   : > { %2632 = vrot.lane.b32.xlu1 %v2594_v39, %s6139_s29 }
 0x4e9   : > { %2491 = vadd.xlane.f32.xlu2 %v2490_v37 }
 0x4ec   : > { %2630 = vrot.lane.b32.xlu0 %v2593_v56, %s6139_s29 }
 0x500   : > { %v2098_v25 = vpop.permute.xlu0 %2097 }
 0x501   : > { %2107 = vst.msk [vmem:[#allocation6 + $0x7] sm:$0xff] %vm2106_vm4, %v2098_v25  ;;  %2620 = vrot.lane.b32.xlu2 %v2593_v56, %s6138_s6 }
 0x508   : > { %v2100_v52 = vpop.permute.xlu1 %2099 }
 0x509   : > { %2109 = vst.msk [vmem:[#allocation6 + $0xf] sm:$0x3] %vm2108_vm12, %v2100_v52 }
 0x50b   : > { %v2516_v49 = vpop.xlane.xlu2 %2515 }
 0x50c   : > { %5950 = vrcp.f32 %v2516_v49 }
 0x510   : > { %v2115_v12 = vpop.permute.xlu0 %2114 }
 0x512   : > { %v5951_v4 = vpop.eup %5950 }
 0x513   : > { %v2096_v48 = vpop.permute.xlu2 %2095 }
 0x514   : > { %2105 = vst.msk [vmem:[#allocation6 - $0x1] sm:$0xfe] %vm2104_vm13, %v2096_v48 }
 0x515   : > { %2124 = vst.msk [vmem:[#allocation6 + $0x6] sm:$0xff] %vm2123_vm14, %v2115_v12 }
 0x516   : > { %v2583_v57 = vpop.f32.mrf.mxu0 }
 0x517   : > { %v2595_v53 = vmul.f32 %v5951_v4, %v2583_v57 }
 0x518   : > { %v2117_v60 = vpop.permute.xlu1 %2116 }
 0x519   : > { %2634 = vrot.lane.b32.xlu1 %v2595_v53, %s6139_s29  ;;  %2126 = vst.msk [vmem:[#allocation6 + $0xe] sm:$0x7] %vm2125_vm5, %v2117_v60 }
 0x51b   : > { %v2113_v44 = vpop.permute.xlu2 %2112 }
 0x51c   : > { %2122 = vst.msk [vmem:[#allocation6 - $0x2] sm:$0xfc] %vm2121_vm15, %v2113_v44 }
 0x51e   : > { %v2585_v21 = vpop.f32.mrf.mxu0 }
 0x520   : > { %v2132_v17 = vpop.permute.xlu0 %2131  ;;  %v2603_v40 = vpop.permute.xlu1 %2602 }
 0x521   : > { %2141 = vst.msk [vmem:[#allocation6 + $0x5] sm:$0xff] %vm2140_vm0, %v2132_v17 }
 0x523   : > { %v2130_v0 = vpop.permute.xlu2 %2129 }
 0x524   : > { %2139 = vst.msk [vmem:[#allocation6 - $0x3] sm:$0xf8] %vm2138_vm7, %v2130_v0 }
 0x528   : > { %v2605_v36 = vpop.permute.xlu1 %2604 }
 0x52b   : > { %v2642_v19 = vld [vmem:[#allocation6] sm:$0xff] }
 0x530   : > { %v2607_v51 = vpop.permute.xlu1 %2606 }
 0x538   : > { %v2617_v18 = vpop.permute.xlu1 %2616 }
 0x540   : > { %v2619_v59 = vpop.permute.xlu1 %2618 }
 0x548   : > { %v2134_v15 = vpop.permute.xlu1 %2133 }
 0x549   : > { %2143 = vst.msk [vmem:[#allocation6 + $0xd] sm:$0xf] %vm2142_vm2, %v2134_v15 }
 0x54b   : > { %v2495_v32 = vpop.xlane.xlu0 %2494 }
 0x54c   : > { %5952 = vrcp.f32 %v2495_v32 }
 0x550   : > { %v2643_v50 = vld [vmem:[#allocation6 + $0x8] sm:$0xff]  ;;  %v2633_v35 = vpop.permute.xlu1 %2632 }
 0x551   : > { %v2647_v23 = vpack.c.bf16 %v2643_v50, %v2642_v19 }
 0x552   : > { %v5953_v24 = vpop.eup %5952 }
 0x553   : > { %v2588_v33 = vmul.f32 %v5953_v24, %v7066_v47  ;;  %2722 = vmatmul.bf16.vlgmr.msra.gmra.mxu1 %v2647_v23  ;;  %v6056_v24 = vld [vmem:[#allocation2 + $0x8] sm:$0xff] }
 0x555   : > { %2597 = vst.msk [vmem:[#allocation6 + $0x19] sm:$0xff] %vm1622_vm3, %v2588_v33 }
 0x556   : > { %2613 = vst.msk [vmem:[#allocation6 + $0x20] sm:$0x3] %vm2108_vm12, %v2607_v51 }
 0x55c   : > { %v2492_v43 = vpop.xlane.xlu2 %2491 }
 0x55d   : > { %5954 = vrcp.f32 %v2492_v43 }
 0x55e   : > { %v2631_v27 = vpop.permute.xlu0 %2630 }
 0x563   : > { %v5955_v10 = vpop.eup %5954 }
 0x564   : > { %v2587_v16 = vmul.f32 %v5955_v10, %v7060_v6  ;;  %v2621_v47 = vpop.permute.xlu2 %2620 }
 0x566   : > { %2596 = vst.msk [vmem:[#allocation6 + $0x11] sm:$0xff] %vm1622_vm3, %v2587_v16 }
 0x567   : > { %2611 = vst.msk [vmem:[#allocation6 + $0x10] sm:$0xfe] %vm2104_vm13, %v2603_v40 }
 0x568   : > { %2625 = vst.msk [vmem:[#allocation6 + $0xf] sm:$0xfc] %vm2121_vm15, %v2617_v18  ;;  %v7149_v18 = vld [vmem:[%s885_s0] ss:$0 sm:$0xff] }
 0x569   : > { %2639 = vst.msk [vmem:[#allocation6 + $0xe] sm:$0xf8] %vm2138_vm7, %v2631_v27 }
 0x56a   : > { %2612 = vst.msk [vmem:[#allocation6 + $0x18] sm:$0xff] %vm2106_vm4, %v2605_v36 }
 0x56b   : > { %2627 = vst.msk [vmem:[#allocation6 + $0x1f] sm:$0x7] %vm2125_vm5, %v2621_v47  ;;  %v6057_v47 = vld [vmem:[#allocation2] sm:$0xff] }
 0x56c   : > { %2626 = vst.msk [vmem:[#allocation6 + $0x17] sm:$0xff] %vm2123_vm14, %v2619_v59 }
 0x56d   : > { %2640 = vst.msk [vmem:[#allocation6 + $0x16] sm:$0xff] %vm2140_vm0, %v2633_v35 }
 0x574   : > { %v2644_v54 = vld [vmem:[#allocation6 + $0x10] sm:$0xff] }
 0x58b   : > { %v2635_v6 = vpop.permute.xlu1 %2634 }
 0x58c   : > { %2641 = vst.msk [vmem:[#allocation6 + $0x1e] sm:$0xf] %vm2142_vm2, %v2635_v6 }
 0x593   : > { %v2645_v9 = vld [vmem:[#allocation6 + $0x18] sm:$0xff]  ;;  %v2646_v63 = vld [vmem:[#allocation6 + $0x20] sm:$0x3] }
 0x594   : > { %v2648_v26 = vpack.c.bf16 %v2645_v9, %v2644_v54  ;;  %v2649_v11 = vpack.c.bf16 %v2646_v63, %v2646_v63 }
 0x596   : > { %2727 = vmatmul.bf16.gmra.mxu1 %v2648_v26 }
 0x5a6   : > { %2732 = vmatmul.bf16.gmra.mxu1 %v2649_v11 }
 0x5d0   : > { %v2723_v29 = vpop.f32.mrf.mxu1 }
 0x5d1   : > { %2738 = vadd.xlane.f32.xlu0 %v2723_v29 }
 0x5d8   : > { %v2725_v42 = vpop.f32.mrf.mxu1 }
 0x5d9   : > { %2740 = vadd.xlane.f32.xlu1 %v2725_v42 }
 0x613   : > { %v2728_v30 = vpop.f32.mrf.mxu1 }
 0x614   : > { %2742 = vadd.xlane.f32.xlu2 %v2728_v30 }
 0x61b   : > { %v2730_v8 = vpop.f32.mrf.mxu1 }
 0x61c   : > { %2744 = vadd.xlane.f32.xlu0 %v2730_v8 }
 0x623   : > { %v2733_v31 = vpop.f32.mrf.mxu1 }
 0x624   : > { %v2746_v62 = vsel %vm1023_vm1, %v2733_v31, 0.0 }
 0x625   : > { %2747 = vadd.xlane.f32.xlu1 %v2746_v62 }
 0x62b   : > { %v2735_v1 = vpop.f32.mrf.mxu1 }
 0x644   : > { %v2739_v58 = vpop.xlane.xlu0 %2738 }
 0x645   : > { %v2749_v46 = vmul.f32 %v2739_v58, %v6366_v55 }
 0x647   : > { %v2754_v41 = vsub.f32 %v2723_v29, %v2749_v46 }
 0x649   : > { %v2759_v13 = vmul.f32 %v2754_v41, %v2754_v41 }
 0x64b   : > { %2764 = vadd.xlane.f32.xlu2 %v2759_v13 }
 0x64c   : > { %v2741_v5 = vpop.xlane.xlu1 %2740 }
 0x64d   : > { %v2750_v34 = vmul.f32 %v2741_v5, %v6366_v55 }
 0x64f   : > { %v2755_v39 = vsub.f32 %v2725_v42, %v2750_v34 }
 0x651   : > { %v2760_v7 = vmul.f32 %v2755_v39, %v2755_v39 }
 0x653   : > { %2766 = vadd.xlane.f32.xlu0 %v2760_v7 }
 0x687   : > { %v2743_v37 = vpop.xlane.xlu2 %2742 }
 0x688   : > { %v2751_v61 = vmul.f32 %v2743_v37, %v6366_v55 }
 0x68a   : > { %v7127_v56 = vsub.f32 %v2728_v30, %v2751_v61 }
 0x68c   : > { %v2761_v25 = vmul.f32 %v7127_v56, %v7127_v56 }
 0x68e   : > { %2768 = vadd.xlane.f32.xlu1 %v2761_v25  ;;  %v6058_v25 = vld [vmem:[#allocation2 + $0x20] sm:$0xff] }
 0x68f   : > { %v2745_v52 = vpop.xlane.xlu0 %2744 }
 0x690   : > { %v2752_v49 = vmul.f32 %v2745_v52, %v6366_v55 }
 0x692   : > { %v7132_v14 = vsub.f32 %v2730_v8, %v2752_v49 }
 0x694   : > { %v2762_v38 = vmul.f32 %v7132_v14, %v7132_v14 }
 0x696   : > { %2770 = vadd.xlane.f32.xlu2 %v2762_v38 }
 0x698   : > { %v2748_v48 = vpop.xlane.xlu1 %2747 }
 0x699   : > { %v2753_v12 = vmul.f32 %v2748_v48, %v6366_v55 }
 0x69b   : > { %v7137_v4 = vsub.f32 %v2733_v31, %v2753_v12 }
 0x69d   : > { %v2763_v57 = vmul.f32 %v7137_v4, %v7137_v4 }
 0x69f   : > { %v2772_v53 = vsel %vm1023_vm1, %v2763_v57, 0.0 }
 0x6a0   : > { %2773 = vadd.xlane.f32.xlu0 %v2772_v53 }
 0x6be   : > { %v2765_v60 = vpop.xlane.xlu2 %2764 }
 0x6bf   : > { %v2775_v20 = vmul.f32 %v2765_v60, %v6366_v55 }
 0x6c1   : > { %v2780_v2 = vadd.f32 1e-05, %v2775_v20  ;;  %v6059_v20 = vld [vmem:[#allocation2 + $0x10] sm:$0xff] }
 0x6c3   : > { %5956 = vrsqrt.f32 %v2780_v2  ;;  %vm2791_vm6 = vweird.f32 %v2780_v2 }
 0x6c6   : > { %v2767_v44 = vpop.xlane.xlu0 %2766 }
 0x6c7   : > { %v2776_v21 = vmul.f32 %v2767_v44, %v6366_v55 }
 0x6c9   : > { %v5957_v17 = vpop.eup %5956  ;;  %v2781_v40 = vadd.f32 1e-05, %v2776_v21 }
 0x6ca   : > { %v2786_v3 = vmul.f32 %v5957_v17, %v2780_v2  ;;  %vm2792_vm3 = vweird.f32 %v5957_v17 }
 0x6cb   : > { %5958 = vrsqrt.f32 %v2781_v40  ;;  %vm2793_vm9 = vmor %vm2791_vm6, %vm2792_vm3  ;;  %vm2801_vm11 = vweird.f32 %v2781_v40 }
 0x6cc   : > { %v2787_v22 = vmul.f32 %v5957_v17, %v2786_v3 }
 0x6ce   : > { %v2788_v0 = vmul.f32 0.5, %v2787_v22 }
 0x6d0   : > { %v2789_v36 = vsub.f32 1.5, %v2788_v0 }
 0x6d1   : > { %v5959_v28 = vpop.eup %5958 }
 0x6d2   : > { %v2790_v51 = vmul.f32 %v5957_v17, %v2789_v36  ;;  %v2796_v45 = vmul.f32 %v5959_v28, %v2781_v40  ;;  %vm2802_vm10 = vweird.f32 %v5959_v28 }
 0x6d3   : > { %vm2803_vm8 = vmor %vm2801_vm11, %vm2802_vm10 }
 0x6d4   : > { %v2794_v59 = vsel %vm2793_vm9, %v5957_v17, %v2790_v51  ;;  %v2797_v15 = vmul.f32 %v5959_v28, %v2796_v45 }
 0x6d5   : > { %v2835_v32 = vmul.f32 %v2794_v59, %v2754_v41 }
 0x6d6   : > { %v2798_v19 = vmul.f32 0.5, %v2797_v15 }
 0x6d7   : > { %v2843_v50 = vmul.f32 %v7149_v18, %v2835_v32 }
 0x6d8   : > { %v2799_v23 = vsub.f32 1.5, %v2798_v19 }
 0x6d9   : > { %v7152_v33 = vadd.f32 %v6056_v24, %v2843_v50 }
 0x6da   : > { %v2800_v43 = vmul.f32 %v5959_v28, %v2799_v23 }
 0x6db   : > { %8214 = vst [vmem:[#allocation14_spill] sm:$0xff] %v7152_v33  ;;  %2854 = vadd.xlane.f32.xlu1 %v7152_v33 }
 0x6dc   : > { %v2804_v10 = vsel %vm2803_vm8, %v5959_v28, %v2800_v43 }
 0x6dd   : > { %v2836_v16 = vmul.f32 %v2804_v10, %v2755_v39 }
 0x6df   : > { %v2844_v27 = vmul.f32 %v7149_v18, %v2836_v16 }
 0x6e1   : > { %v7156_v35 = vadd.f32 %v6057_v47, %v2844_v27 }
 0x6e3   : > { %8215 = vst [vmem:[#allocation15_spill] sm:$0xff] %v7156_v35  ;;  %2856 = vadd.xlane.f32.xlu2 %v7156_v35 }
 0x701   : > { %v2769_v6 = vpop.xlane.xlu1 %2768 }
 0x702   : > { %v2777_v54 = vmul.f32 %v2769_v6, %v6366_v55 }
 0x704   : > { %v2782_v9 = vadd.f32 1e-05, %v2777_v54 }
 0x706   : > { %5960 = vrsqrt.f32 %v2782_v9  ;;  %vm2811_vm12 = vweird.f32 %v2782_v9 }
 0x709   : > { %v2771_v26 = vpop.xlane.xlu2 %2770 }
 0x70a   : > { %v2778_v63 = vmul.f32 %v2771_v26, %v6366_v55  ;;  %v5239_v26 = vld [vmem:[%s6331_s7 + $0xe0] sm:$0xf] }
 0x70c   : > { %v5961_v11 = vpop.eup %5960  ;;  %v2783_v29 = vadd.f32 1e-05, %v2778_v63  ;;  %v5685_v63 = vld [vmem:[%s6331_s7 + $0xec] sm:$0xf0] }
 0x70d   : > { %v2806_v42 = vmul.f32 %v5961_v11, %v2782_v9  ;;  %vm2812_vm4 = vweird.f32 %v5961_v11 }
 0x70e   : > { %5962 = vrsqrt.f32 %v2783_v29  ;;  %vm2813_vm13 = vmor %vm2811_vm12, %vm2812_vm4  ;;  %vm2821_vm5 = vweird.f32 %v2783_v29 }
 0x70f   : > { %v2807_v30 = vmul.f32 %v5961_v11, %v2806_v42  ;;  %v5241_v42 = vld [vmem:[%s6331_s7 + $0xf0] sm:$0xf0] }
 0x711   : > { %v2808_v8 = vmul.f32 0.5, %v2807_v30  ;;  %v5247_v30 = vld [vmem:[%s6331_s7 + $0xe8] sm:$0xf] }
 0x713   : > { %v2809_v31 = vsub.f32 1.5, %v2808_v8  ;;  %v2774_v62 = vpop.xlane.xlu0 %2773  ;;  %v5686_v8 = vld [vmem:[%s6331_s7 + $0xf4] sm:$0xf0] }
 0x714   : > { %v5963_v1 = vpop.eup %5962  ;;  %v2779_v58 = vmul.f32 %v2774_v62, %v6366_v55  ;;  %v5248_v62 = vor.u32 %v5686_v8, %v5247_v30  ;;  %v5185_v30 = vld [vmem:[%s6331_s7 + $0x78] sm:$0xf0] }
 0x715   : > { %v2810_v46 = vmul.f32 %v5961_v11, %v2809_v31  ;;  %v2816_v41 = vmul.f32 %v5963_v1, %v2783_v29  ;;  %vm2822_vm14 = vweird.f32 %v5963_v1  ;;  %v5240_v29 = vor.u32 %v5685_v63, %v5239_v26  ;;  %v5183_v26 = vld [vmem:[%s6331_s7 + $0x68] sm:$0xf]  ;;  %v5670_v63 = vld [vmem:[%s6331_s7 + $0x74] sm:$0xf0] }
 0x716   : > { %v2784_v13 = vadd.f32 1e-05, %v2779_v58  ;;  %vm2823_vm15 = vmor %vm2821_vm5, %vm2822_vm14  ;;  %v5249_v58 = vld [vmem:[%s6331_s7 + $0xf8] sm:$0xf0]  ;;  %3205 = vmatpush.bf16.msrb.mxu0 %v5248_v62  ;;  %v5665_v62 = vld [vmem:[%s6331_s7 + $0x4c] sm:$0xf0] }
 0x717   : > { %v2814_v5 = vsel %vm2813_vm13, %v5961_v11, %v2810_v46  ;;  %v2817_v34 = vmul.f32 %v5963_v1, %v2816_v41  ;;  %v5683_v11 = vld [vmem:[%s6331_s7 + $0xe4] sm:$0xf]  ;;  %3159 = vmatpush.bf16.msrb.mxu2 %v5240_v29  ;;  %v5223_v41 = vld [vmem:[%s6331_s7 + $0xc0] sm:$0xf]  ;;  %v5184_v29 = vor.u32 %v5670_v63, %v5183_v26 }
 0x718   : > { %5964 = vrsqrt.f32 %v2784_v13  ;;  %v2837_v39 = vmul.f32 %v2814_v5, %v7127_v56  ;;  %vm2831_vm7 = vweird.f32 %v2784_v13  ;;  %v5244_v31 = vor.u32 %v5683_v11, %v5241_v42  ;;  %v5679_v5 = vld [vmem:[%s6331_s7 + $0xc4] sm:$0xf]  ;;  %v5668_v42 = vld [vmem:[%s6331_s7 + $0x6c] sm:$0xf] }
 0x719   : > { %v2818_v7 = vmul.f32 0.5, %v2817_v34  ;;  %v5188_v8 = vor.u32 %v5668_v42, %v5185_v30 }
 0x71a   : > { %v2845_v37 = vmul.f32 %v7149_v18, %v2837_v39  ;;  %3182 = vmatpush.bf16.msrb.mxu3 %v5244_v31  ;;  %v5225_v39 = vld [vmem:[%s6331_s7 + $0xd0] sm:$0xf0]  ;;  %v5159_v31 = vld [vmem:[%s6331_s7 + $0x40] sm:$0xf] }
 0x71b   : > { %v2819_v61 = vsub.f32 1.5, %v2818_v7  ;;  %v5231_v7 = vld [vmem:[%s6331_s7 + $0xc8] sm:$0xf] }
 0x71c   : > { %v7164_v52 = vadd.f32 %v6058_v25, %v2845_v37  ;;  %v5682_v37 = vld [vmem:[%s6331_s7 + $0xd4] sm:$0xf0] }
 0x71d   : > { %v2820_v49 = vmul.f32 %v5963_v1, %v2819_v61  ;;  %v5228_v61 = vor.u32 %v5679_v5, %v5225_v39  ;;  %v5232_v25 = vor.u32 %v5682_v37, %v5231_v7  ;;  %v5664_v39 = vld [vmem:[%s6331_s7 + $0x4c] sm:$0xf]  ;;  %v5169_v7 = vld [vmem:[%s6331_s7 + $0x58] sm:$0xf0] }
 0x71e   : > { %8216 = vst [vmem:[#allocation16_spill] sm:$0xff] %v7164_v52  ;;  %v5965_v38 = vpop.eup %5964  ;;  %2858 = vadd.xlane.f32.xlu0 %v7164_v52  ;;  %v5172_v37 = vor.u32 %v5664_v39, %v5169_v7  ;;  %v5367_v7 = vld [vmem:[%s6336_s8 + $0xe0] sm:$0xf] }
 0x71f   : > { %v2824_v48 = vsel %vm2823_vm15, %v5963_v1, %v2820_v49  ;;  %v2826_v12 = vmul.f32 %v5965_v38, %v2784_v13  ;;  %vm2832_vm0 = vweird.f32 %v5965_v38  ;;  %v5684_v1 = vld [vmem:[%s6331_s7 + $0xec] sm:$0xf]  ;;  %v5681_v13 = vld [vmem:[%s6331_s7 + $0xcc] sm:$0xf0]  ;;  %3183 = vmatpush.bf16.msrb.mxu3 %v5228_v61  ;;  %3206 = vmatpush.bf16.msrb.mxu0 %v5232_v25  ;;  %v5143_v25 = vld [vmem:[%s6331_s7 + $0x20] sm:$0xf] }
 0x720   : > { %v2838_v57 = vmul.f32 %v2824_v48, %v7132_v14  ;;  %vm2833_vm2 = vmor %vm2831_vm7, %vm2832_vm0  ;;  %v6060_v14 = vld [vmem:[#allocation2 + $0x18] sm:$0x3]  ;;  %v5252_v46 = vor.u32 %v5684_v1, %v5249_v58  ;;  %v5224_v34 = vor.u32 %v5681_v13, %v5223_v41  ;;  %v5680_v49 = vld [vmem:[%s6331_s7 + $0xcc] sm:$0xf]  ;;  %v5160_v58 = vor.u32 %v5665_v62, %v5159_v31 }
 0x721   : > { %v2827_v53 = vmul.f32 %v5965_v38, %v2826_v12  ;;  %v5207_v12 = vld [vmem:[%s6331_s7 + $0xa0] sm:$0xf]  ;;  %v5663_v1 = vld [vmem:[%s6331_s7 + $0x44] sm:$0xf]  ;;  %v5167_v41 = vld [vmem:[%s6331_s7 + $0x48] sm:$0xf] }
 0x722   : > { %v2846_v56 = vmul.f32 %v7149_v18, %v2838_v57  ;;  %3228 = vmatpush.bf16.msrb.mxu1 %v5252_v46  ;;  %3160 = vmatpush.bf16.msrb.mxu2 %v5224_v34  ;;  %v5677_v57 = vld [vmem:[%s6331_s7 + $0xac] sm:$0xf0]  ;;  %v5161_v46 = vld [vmem:[%s6331_s7 + $0x50] sm:$0xf0]  ;;  %v5666_v13 = vld [vmem:[%s6331_s7 + $0x54] sm:$0xf0] }
 0x723   : > { %v2828_v60 = vmul.f32 0.5, %v2827_v53  ;;  %v5675_v53 = vld [vmem:[%s6331_s7 + $0xa4] sm:$0xf]  ;;  %v5164_v5 = vor.u32 %v5663_v1, %v5161_v46  ;;  %v5168_v34 = vor.u32 %v5666_v13, %v5167_v41  ;;  %v7280_v1 = vld [vmem:[%s888_s19] ss:$0 sm:$0xff]  ;;  %s8279_s19 = sld [smem:[#allocation37_spill]] (!%p5529_p6) }
 0x724   : > { %v7169_v2 = vadd.f32 %v6059_v20, %v2846_v56  ;;  %v5208_v56 = vor.u32 %v5677_v57, %v5207_v12  ;;  %v5215_v20 = vld [vmem:[%s6331_s7 + $0xa8] sm:$0xf]  ;;  %v5145_v57 = vld [vmem:[%s6331_s7 + $0x30] sm:$0xf0] }
 0x725   : > { %v2829_v44 = vsub.f32 1.5, %v2828_v60  ;;  %v5209_v60 = vld [vmem:[%s6331_s7 + $0xb0] sm:$0xf0] }
 0x726   : > { %8217 = vst [vmem:[#allocation17_spill] sm:$0xff] %v7169_v2  ;;  %2860 = vadd.xlane.f32.xlu1 %v7169_v2  ;;  %3161 = vmatpush.bf16.msrb.mxu2 %v5208_v56  ;;  %v5662_v56 = vld [vmem:[%s6331_s7 + $0x34] sm:$0xf0] }
 0x727   : > { %v2830_v21 = vmul.f32 %v5965_v38, %v2829_v44  ;;  %v5678_v44 = vld [vmem:[%s6331_s7 + $0xb4] sm:$0xf0] }
 0x729   : > { %v2834_v17 = vsel %vm2833_vm2, %v5965_v38, %v2830_v21  ;;  %v5233_v38 = vld [vmem:[%s6331_s7 + $0xd8] sm:$0xf0]  ;;  %v5212_v21 = vor.u32 %v5675_v53, %v5209_v60  ;;  %v5151_v53 = vld [vmem:[%s6331_s7 + $0x28] sm:$0xf] }
 0x72a   : > { %v2839_v40 = vmul.f32 %v2834_v17, %v7137_v4  ;;  %v5236_v48 = vor.u32 %v5680_v49, %v5233_v38  ;;  %v5216_v17 = vor.u32 %v5678_v44, %v5215_v20  ;;  %v5661_v49 = vld [vmem:[%s6331_s7 + $0x2c] sm:$0xf0]  ;;  %v5659_v38 = vld [vmem:[%s6331_s7 + $0x24] sm:$0xf]  ;;  %v5152_v20 = vor.u32 %v5662_v56, %v5151_v53  ;;  %v5660_v44 = vld [vmem:[%s6331_s7 + $0x2c] sm:$0xf] }
 0x72b   : > { %3184 = vmatpush.bf16.msrb.mxu3 %v5212_v21  ;;  %v5144_v12 = vor.u32 %v5661_v49, %v5143_v25  ;;  %v5148_v60 = vor.u32 %v5659_v38, %v5145_v57  ;;  %v5153_v21 = vld [vmem:[%s6331_s7 + $0x38] sm:$0xf0]  ;;  %v5369_v38 = vld [vmem:[%s6336_s8 + $0xf0] sm:$0xf0] }
 0x72c   : > { %v2847_v3 = vmul.f32 %v7149_v18, %v2839_v40  ;;  %3229 = vmatpush.bf16.msrb.mxu1 %v5236_v48  ;;  %v5676_v40 = vld [vmem:[%s6331_s7 + $0xac] sm:$0xf]  ;;  %3207 = vmatpush.bf16.msrb.mxu0 %v5216_v17 }
 0x72e   : > { %v7174_v22 = vadd.f32 %v6060_v14, %v2847_v3  ;;  %v5217_v3 = vld [vmem:[%s6331_s7 + $0xb8] sm:$0xf0] }
 0x72f   : > { %v5220_v14 = vor.u32 %v5676_v40, %v5217_v3  ;;  %v5156_v40 = vor.u32 %v5660_v44, %v5153_v21  ;;  %v5127_v3 = vld [vmem:[%s6331_s7] sm:$0xf] }
 0x730   : > { %8218 = vst [vmem:[#allocation18_spill] sm:$0xff] %v7174_v22  ;;  %v2862_v0 = vsel %vm1023_vm1, %v7174_v22, 0.0 }
 0x731   : > { %2863 = vadd.xlane.f32.xlu2 %v2862_v0  ;;  %v5191_v0 = vld [vmem:[%s6331_s7 + $0x80] sm:$0xf]  ;;  %3230 = vmatpush.bf16.msrb.mxu1 %v5220_v14  ;;  %v5657_v14 = vld [vmem:[%s6331_s7 + $0xc] sm:$0xf0] }
 0x74e   : > { %v2855_v36 = vpop.xlane.xlu1 %2854 }
 0x74f   : > { %v2865_v28 = vmul.f32 %v2855_v36, %v6366_v55  ;;  %v5673_v36 = vld [vmem:[%s6331_s7 + $0x8c] sm:$0xf0] }
 0x751   : > { %v7180_v51 = vsub.f32 %v7152_v33, %v2865_v28  ;;  %v5671_v28 = vld [vmem:[%s6331_s7 + $0x84] sm:$0xf] }
 0x753   : > { %v2875_v45 = vmul.f32 %v7180_v51, %v7180_v51 }
 0x755   : > { %2880 = vadd.xlane.f32.xlu0 %v2875_v45  ;;  %v5192_v45 = vor.u32 %v5673_v36, %v5191_v0  ;;  %v5128_v0 = vor.u32 %v5657_v14, %v5127_v3  ;;  %v5655_v36 = vld [vmem:[%s6331_s7 + $0x4] sm:$0xf]  ;;  %v5713_v3 = vld [vmem:[%s6336_s8 + $0xcc] sm:$0xf0] }
 0x756   : > { %v2857_v4 = vpop.xlane.xlu2 %2856 }
 0x757   : > { %v2866_v18 = vmul.f32 %v2857_v4, %v6366_v55  ;;  %v5193_v4 = vld [vmem:[%s6331_s7 + $0x90] sm:$0xf0]  ;;  %3162 = vmatpush.bf16.msrb.mxu2 %v5192_v45  ;;  %v5135_v45 = vld [vmem:[%s6331_s7 + $0x8] sm:$0xf] }
 0x759   : > { %v7186_v59 = vsub.f32 %v7156_v35, %v2866_v18  ;;  %v5199_v18 = vld [vmem:[%s6331_s7 + $0x88] sm:$0xf] }
 0x75b   : > { %v2876_v15 = vmul.f32 %v7186_v59, %v7186_v59 }
 0x75d   : > { %2882 = vadd.xlane.f32.xlu1 %v2876_v15  ;;  %v5674_v15 = vld [vmem:[%s6331_s7 + $0x94] sm:$0xf0] }
 0x791   : > { %v2859_v32 = vpop.xlane.xlu0 %2858 }
 0x792   : > { %v2867_v19 = vmul.f32 %v2859_v32, %v6366_v55  ;;  %v5196_v32 = vor.u32 %v5671_v28, %v5193_v4  ;;  %v5129_v28 = vld [vmem:[%s6331_s7 + $0x10] sm:$0xf0] }
 0x793   : > { %v5132_v4 = vor.u32 %v5655_v36, %v5129_v28  ;;  %v5711_v36 = vld [vmem:[%s6336_s8 + $0xc4] sm:$0xf]  ;;  %v5353_v28 = vld [vmem:[%s6336_s8 + $0xd0] sm:$0xf0] }
 0x794   : > { %v7192_v50 = vsub.f32 %v7164_v52, %v2867_v19  ;;  %v5200_v19 = vor.u32 %v5674_v15, %v5199_v18  ;;  %3185 = vmatpush.bf16.msrb.mxu3 %v5196_v32  ;;  %v5658_v18 = vld [vmem:[%s6331_s7 + $0x14] sm:$0xf0]  ;;  %v5656_v15 = vld [vmem:[%s6331_s7 + $0xc] sm:$0xf]  ;;  %v5137_v32 = vld [vmem:[%s6331_s7 + $0x18] sm:$0xf0] }
 0x796   : > { %v2877_v23 = vmul.f32 %v7192_v50, %v7192_v50  ;;  %3208 = vmatpush.bf16.msrb.mxu0 %v5200_v19  ;;  %v5136_v19 = vor.u32 %v5658_v18, %v5135_v45  ;;  %v5359_v45 = vld [vmem:[%s6336_s8 + $0xc8] sm:$0xf]  ;;  %v5714_v18 = vld [vmem:[%s6336_s8 + $0xd4] sm:$0xf0] }
 0x798   : > { %2884 = vadd.xlane.f32.xlu2 %v2877_v23  ;;  %v5672_v23 = vld [vmem:[%s6331_s7 + $0x8c] sm:$0xf] }
 0x799   : > { %v2861_v24 = vpop.xlane.xlu1 %2860 }
 0x79a   : > { %v2868_v43 = vmul.f32 %v2861_v24, %v6366_v55  ;;  %v5201_v24 = vld [vmem:[%s6331_s7 + $0x98] sm:$0xf0]  ;;  %3209 = vmatpush.bf16.msrb.mxu0 %v5184_v29 }
 0x79c   : > { %v7198_v10 = vsub.f32 %v7169_v2, %v2868_v43  ;;  %v5204_v43 = vor.u32 %v5672_v23, %v5201_v24  ;;  %v5140_v23 = vor.u32 %v5656_v15, %v5137_v32  ;;  %v5712_v15 = vld [vmem:[%s6336_s8 + $0xcc] sm:$0xf] }
 0x79e   : > { %v2878_v16 = vmul.f32 %v7198_v10, %v7198_v10  ;;  %3231 = vmatpush.bf16.msrb.mxu1 %v5204_v43  ;;  %3210 = vmatpush.bf16.msrb.mxu0 %v5168_v34 }
 0x7a0   : > { %2886 = vadd.xlane.f32.xlu0 %v2878_v16  ;;  %v5175_v16 = vld [vmem:[%s6331_s7 + $0x60] sm:$0xf] }
 0x7a2   : > { %3232 = vmatpush.bf16.msrb.mxu1 %v5188_v8  ;;  %3211 = vmatpush.bf16.msrb.mxu0 %v5152_v20  ;;  %v5377_v20 = vld [vmem:[%s6336_s8 + $0xf8] sm:$0xf0] }
 0x7a4   : > { %v2864_v27 = vpop.xlane.xlu2 %2863 }
 0x7a5   : > { %v2869_v47 = vmul.f32 %v2864_v27, %v6366_v55  ;;  %v5669_v27 = vld [vmem:[%s6331_s7 + $0x6c] sm:$0xf0] }
 0x7a6   : > { %3233 = vmatpush.bf16.msrb.mxu1 %v5172_v37  ;;  %3212 = vmatpush.bf16.msrb.mxu0 %v5136_v19  ;;  %v5717_v37 = vld [vmem:[%s6336_s8 + $0xec] sm:$0xf0]  ;;  %v5360_v19 = vor.u32 %v5714_v18, %v5359_v45  ;;  %v5311_v18 = vld [vmem:[%s6336_s8 + $0x68] sm:$0xf] }
 0x7a7   : > { %v7204_v6 = vsub.f32 %v7174_v22, %v2869_v47  ;;  %v5667_v47 = vld [vmem:[%s6331_s7 + $0x64] sm:$0xf]  ;;  %v5368_v49 = vor.u32 %v5717_v37, %v5367_v7  ;;  %v5710_v7 = vld [vmem:[%s6336_s8 + $0xb4] sm:$0xf0]  ;;  %v5708_v37 = vld [vmem:[%s6336_s8 + $0xac] sm:$0xf] }
 0x7a9   : > { %v2879_v54 = vmul.f32 %v7204_v6, %v7204_v6 }
 0x7aa   : > { %3234 = vmatpush.bf16.msrb.mxu1 %v5156_v40  ;;  %v5351_v40 = vld [vmem:[%s6336_s8 + $0xc0] sm:$0xf] }
 0x7ab   : > { %v2888_v9 = vsel %vm1023_vm1, %v2879_v54, 0.0  ;;  %v5176_v54 = vor.u32 %v5669_v27, %v5175_v16 }
 0x7ac   : > { %2889 = vadd.xlane.f32.xlu1 %v2888_v9  ;;  %v5177_v9 = vld [vmem:[%s6331_s7 + $0x70] sm:$0xf0] }
 0x7ad   : > { %v5180_v11 = vor.u32 %v5667_v47, %v5177_v9  ;;  %3163 = vmatpush.bf16.msrb.mxu2 %v5176_v54 }
 0x7ae   : > { %3235 = vmatpush.bf16.msrb.mxu1 %v5140_v23  ;;  %v5361_v23 = vld [vmem:[%s6336_s8 + $0xd8] sm:$0xf0] }
 0x7af   : > { %3186 = vmatpush.bf16.msrb.mxu3 %v5180_v11 }
 0x7b1   : > { %3164 = vmatpush.bf16.msrb.mxu2 %v5160_v58 }
 0x7b3   : > { %3187 = vmatpush.bf16.msrb.mxu3 %v5164_v5 }
 0x7b5   : > { %3165 = vmatpush.bf16.msrb.mxu2 %v5144_v12  ;;  %v5718_v12 = vld [vmem:[%s6336_s8 + $0xf4] sm:$0xf0] }
 0x7b7   : > { %3188 = vmatpush.bf16.msrb.mxu3 %v5148_v60  ;;  %v5716_v60 = vld [vmem:[%s6336_s8 + $0xec] sm:$0xf] }
 0x7b8   : > { %v5380_v44 = vor.u32 %v5716_v60, %v5377_v20  ;;  %v5704_v60 = vld [vmem:[%s6336_s8 + $0x8c] sm:$0xf]  ;;  %v5329_v20 = vld [vmem:[%s6336_s8 + $0x98] sm:$0xf0] }
 0x7b9   : > { %3166 = vmatpush.bf16.msrb.mxu2 %v5128_v0  ;;  %v5352_v0 = vor.u32 %v5713_v3, %v5351_v40 }
 0x7ba   : > { %3512 = vmatpush.bf16.msra.mxu1 %v5380_v44  ;;  %v5287_v44 = vld [vmem:[%s6336_s8 + $0x40] sm:$0xf] }
 0x7bb   : > { %3189 = vmatpush.bf16.msrb.mxu3 %v5132_v4  ;;  %v5356_v4 = vor.u32 %v5711_v36, %v5353_v28  ;;  %v5695_v36 = vld [vmem:[%s6336_s8 + $0x44] sm:$0xf] }
 0x7bd   : > { %3443 = vmatpush.bf16.msra.mxu2 %v5368_v49 }
 0x7c1   : > { %3444 = vmatpush.bf16.msra.mxu2 %v5352_v0  ;;  %v5697_v0 = vld [vmem:[%s6336_s8 + $0x4c] sm:$0xf0] }
 0x7c8   : > { %v2881_v61 = vpop.xlane.xlu0 %2880 }
 0x7c9   : > { %v2891_v48 = vmul.f32 %v2881_v61, %v6366_v55  ;;  %v5715_v61 = vld [vmem:[%s6336_s8 + $0xe4] sm:$0xf] }
 0x7ca   : > { %v5372_v53 = vor.u32 %v5715_v61, %v5369_v38  ;;  %v5345_v61 = vld [vmem:[%s6336_s8 + $0xb8] sm:$0xf0] }
 0x7cb   : > { %v2896_v17 = vadd.f32 1e-05, %v2891_v48  ;;  %v5375_v48 = vld [vmem:[%s6336_s8 + $0xe8] sm:$0xf]  ;;  %v5348_v38 = vor.u32 %v5708_v37, %v5345_v61  ;;  %v5689_v37 = vld [vmem:[%s6336_s8 + $0xc] sm:$0xf0] }
 0x7cc   : > { %v5376_v56 = vor.u32 %v5718_v12, %v5375_v48  ;;  %3466 = vmatpush.bf16.msra.mxu3 %v5372_v53  ;;  %v5327_v48 = vld [vmem:[%s6336_s8 + $0x88] sm:$0xf]  ;;  %v5706_v12 = vld [vmem:[%s6336_s8 + $0x94] sm:$0xf0] }
 0x7cd   : > { %5966 = vrsqrt.f32 %v2896_v17  ;;  %vm2907_vm6 = vweird.f32 %v2896_v17 }
 0x7ce   : > { %3489 = vmatpush.bf16.msra.mxu0 %v5376_v56 }
 0x7d0   : > { %v2883_v24 = vpop.xlane.xlu1 %2882  ;;  %3467 = vmatpush.bf16.msra.mxu3 %v5356_v4  ;;  %v5332_v4 = vor.u32 %v5704_v60, %v5329_v20 }
 0x7d1   : > { %v2892_v43 = vmul.f32 %v2883_v24, %v6366_v55  ;;  %v5335_v24 = vld [vmem:[%s6336_s8 + $0xa0] sm:$0xf] }
 0x7d2   : > { %3490 = vmatpush.bf16.msra.mxu0 %v5360_v19  ;;  %v5313_v19 = vld [vmem:[%s6336_s8 + $0x78] sm:$0xf0] }
 0x7d3   : > { %v5967_v16 = vpop.eup %5966  ;;  %v2897_v27 = vadd.f32 1e-05, %v2892_v43  ;;  %v5709_v43 = vld [vmem:[%s6336_s8 + $0xac] sm:$0xf0] }
 0x7d4   : > { %v2902_v47 = vmul.f32 %v5967_v16, %v2896_v17  ;;  %vm2908_vm3 = vweird.f32 %v5967_v16 }
 0x7d5   : > { %5968 = vrsqrt.f32 %v2897_v27  ;;  %vm2909_vm9 = vmor %vm2907_vm6, %vm2908_vm3  ;;  %vm2917_vm11 = vweird.f32 %v2897_v27 }
 0x7d6   : > { %v2903_v54 = vmul.f32 %v5967_v16, %v2902_v47 }
 0x7d8   : > { %v2904_v9 = vmul.f32 0.5, %v2903_v54  ;;  %v5336_v54 = vor.u32 %v5709_v43, %v5335_v24  ;;  %v5288_v43 = vor.u32 %v5697_v0, %v5287_v44  ;;  %v5263_v44 = vld [vmem:[%s6336_s8 + $0x8] sm:$0xf]  ;;  %v5265_v0 = vld [vmem:[%s6336_s8 + $0x18] sm:$0xf0] }
 0x7da   : > { %v2905_v26 = vsub.f32 1.5, %v2904_v9  ;;  %v5337_v9 = vld [vmem:[%s6336_s8 + $0xb0] sm:$0xf0]  ;;  %3445 = vmatpush.bf16.msra.mxu2 %v5336_v54  ;;  %v5693_v54 = vld [vmem:[%s6336_s8 + $0x2c] sm:$0xf0] }
 0x7db   : > { %v5969_v63 = vpop.eup %5968 }
 0x7dc   : > { %v2912_v11 = vmul.f32 %v5969_v63, %v2897_v27  ;;  %v2906_v29 = vmul.f32 %v5967_v16, %v2905_v26  ;;  %vm2918_vm10 = vweird.f32 %v5969_v63  ;;  %v5364_v27 = vor.u32 %v5712_v15, %v5361_v23  ;;  %v5319_v26 = vld [vmem:[%s6336_s8 + $0x80] sm:$0xf]  ;;  %v5702_v15 = vld [vmem:[%s6336_s8 + $0x74] sm:$0xf0] }
 0x7dd   : > { %vm2919_vm8 = vmor %vm2917_vm11, %vm2918_vm10 }
 0x7de   : > { %v2913_v42 = vmul.f32 %v5969_v63, %v2912_v11  ;;  %v2910_v8 = vsel %vm2909_vm9, %v5967_v16, %v2906_v29  ;;  %v5707_v16 = vld [vmem:[%s6336_s8 + $0xa4] sm:$0xf]  ;;  %v5705_v11 = vld [vmem:[%s6336_s8 + $0x8c] sm:$0xf0]  ;;  %3513 = vmatpush.bf16.msra.mxu1 %v5364_v27  ;;  %v5312_v27 = vor.u32 %v5702_v15, %v5311_v18 }
 0x7df   : > { %v2951_v58 = vmul.f32 %v2910_v8, %v7180_v51  ;;  %v5703_v29 = vld [vmem:[%s6336_s8 + $0x84] sm:$0xf]  ;;  %v5320_v8 = vor.u32 %v5705_v11, %v5319_v26  ;;  %v5295_v11 = vld [vmem:[%s6336_s8 + $0x48] sm:$0xf] }
 0x7e0   : > { %v2914_v30 = vmul.f32 0.5, %v2913_v42  ;;  %v5321_v42 = vld [vmem:[%s6336_s8 + $0x90] sm:$0xf0] }
 0x7e1   : > { %v2959_v13 = vmul.f32 %v7280_v1, %v2951_v58  ;;  %3446 = vmatpush.bf16.msra.mxu2 %v5320_v8  ;;  %v5297_v8 = vld [vmem:[%s6336_s8 + $0x58] sm:$0xf0] }
 0x7e2   : > { %v2915_v31 = vsub.f32 1.5, %v2914_v30  ;;  %3514 = vmatpush.bf16.msra.mxu1 %v5348_v38  ;;  %v5257_v38 = vld [vmem:[%s6336_s8 + $0x10] sm:$0xf0] }
 0x7e4   : > { %v2916_v62 = vmul.f32 %v5969_v63, %v2915_v31  ;;  %v5303_v31 = vld [vmem:[%s6336_s8 + $0x60] sm:$0xf] }
 0x7e6   : > { %v2920_v46 = vsel %vm2919_vm8, %v5969_v63, %v2916_v62  ;;  %v5340_v63 = vor.u32 %v5707_v16, %v5337_v9  ;;  %v5701_v62 = vld [vmem:[%s6336_s8 + $0x6c] sm:$0xf0]  ;;  %v5691_v9 = vld [vmem:[%s6336_s8 + $0x24] sm:$0xf]  ;;  %3515 = vmatpush.bf16.msra.mxu1 %v5332_v4 }
 0x7e7   : > { %v2952_v41 = vmul.f32 %v2920_v46, %v7186_v59  ;;  %v5324_v46 = vor.u32 %v5703_v29, %v5321_v42  ;;  %v5304_v56 = vor.u32 %v5701_v62, %v5303_v31  ;;  %v5698_v29 = vld [vmem:[%s6336_s8 + $0x54] sm:$0xf0] }
 0x7e8   : > { %3468 = vmatpush.bf16.msra.mxu3 %v5340_v63  ;;  %v5273_v63 = vld [vmem:[%s6336_s8 + $0x30] sm:$0xf0] }
 0x7e9   : > { %v2960_v5 = vmul.f32 %v7280_v1, %v2952_v41  ;;  %v5699_v41 = vld [vmem:[%s6336_s8 + $0x64] sm:$0xf]  ;;  %3447 = vmatpush.bf16.msra.mxu2 %v5304_v56 }
 0x7eb   : > { %v7286_v34 = vpack.c.bf16 %v2960_v5, %v2959_v13  ;;  %v5305_v13 = vld [vmem:[%s6336_s8 + $0x70] sm:$0xf0]  ;;  %v5343_v5 = vld [vmem:[%s6336_s8 + $0xa8] sm:$0xf] }
 0x7ec   : > { %v5344_v49 = vor.u32 %v5710_v7, %v5343_v5  ;;  %3469 = vmatpush.bf16.msra.mxu3 %v5324_v46  ;;  %v5308_v3 = vor.u32 %v5699_v41, %v5305_v13  ;;  %v5296_v41 = vor.u32 %v5698_v29, %v5295_v11  ;;  %v5279_v13 = vld [vmem:[%s6336_s8 + $0x28] sm:$0xf]  ;;  %v5694_v5 = vld [vmem:[%s6336_s8 + $0x34] sm:$0xf0]  ;;  %v5255_v7 = vld [vmem:[%s6336_s8] sm:$0xf] }
 0x7ed   : > { %3167 = vmatmul.bf16.vlgmr.msrb.gmra.mxu2 %v7286_v34  ;;  %3190 = vmatmul.bf16.vlgmr.msrb.gmra.mxu3 %v7286_v34 }
 0x7ee   : > { %3213 = vmatmul.bf16.vlgmr.msrb.gmra.mxu0 %v7286_v34  ;;  %3236 = vmatmul.bf16.vlgmr.msrb.gmra.mxu1 %v7286_v34 }
 0x7ef   : > { %3491 = vmatpush.bf16.msra.mxu0 %v5344_v49  ;;  %3448 = vmatpush.bf16.msra.mxu2 %v5288_v43  ;;  %v5687_v49 = vld [vmem:[%s6336_s8 + $0x4] sm:$0xf] }
 0x7f0   : > { %3470 = vmatpush.bf16.msra.mxu3 %v5308_v3  ;;  %v5260_v20 = vor.u32 %v5687_v49, %v5257_v38  ;;  %v5690_v3 = vld [vmem:[%s6336_s8 + $0x14] sm:$0xf0]  ;;  %v5732_v49 = vld [vmem:[%s6341_s9 + $0x68] sm:$0xff] }
 0x7f1   : > { %v5264_v28 = vor.u32 %v5690_v3, %v5263_v44  ;;  %v5740_v44 = vld [vmem:[%s6341_s9 + $0xa8] sm:$0xff] }
 0x7f2   : > { %v5748_v3 = vld [vmem:[%s6341_s9 + $0xe8] sm:$0xff] }
 0x80b   : > { %v2885_v51 = vpop.xlane.xlu2 %2884 }
 0x80c   : > { %v2893_v59 = vmul.f32 %v2885_v51, %v6366_v55 }
 0x80e   : > { %v7293_v39 = vadd.f32 1e-05, %v2893_v59 }
 0x810   : > { %5970 = vrsqrt.f32 %v7293_v39  ;;  %vm2927_vm12 = vweird.f32 %v7293_v39 }
 0x813   : > { %v2887_v25 = vpop.xlane.xlu0 %2886 }
 0x814   : > { %v2894_v57 = vmul.f32 %v2887_v25, %v6366_v55 }
 0x816   : > { %v7305_v21 = vpop.eup %5970  ;;  %v7307_v17 = vadd.f32 1e-05, %v2894_v57 }
 0x817   : > { %v2922_v14 = vmul.f32 %v7305_v21, %v7293_v39  ;;  %vm2928_vm4 = vweird.f32 %v7305_v21  ;;  %v5289_v39 = vld [vmem:[%s6336_s8 + $0x50] sm:$0xf0] }
 0x818   : > { %5972 = vrsqrt.f32 %v7307_v17  ;;  %vm7357_vm13 = vmor %vm2927_vm12, %vm2928_vm4  ;;  %v5292_v16 = vor.u32 %v5695_v36, %v5289_v39  ;;  %vm2937_vm5 = vweird.f32 %v7307_v17 }
 0x819   : > { %v2923_v32 = vmul.f32 %v7305_v21, %v2922_v14  ;;  %v5328_v14 = vor.u32 %v5706_v12, %v5327_v48 }
 0x81a   : > { %3471 = vmatpush.bf16.msra.mxu3 %v5292_v16 }
 0x81b   : > { %v2924_v47 = vmul.f32 0.5, %v2923_v32  ;;  %v5700_v32 = vld [vmem:[%s6336_s8 + $0x6c] sm:$0xf]  ;;  %3492 = vmatpush.bf16.msra.mxu0 %v5328_v14 }
 0x81c   : > { %v5688_v14 = vld [vmem:[%s6336_s8 + $0xc] sm:$0xf] }
 0x81d   : > { %v2925_v30 = vsub.f32 1.5, %v2924_v47  ;;  %v5271_v47 = vld [vmem:[%s6336_s8 + $0x20] sm:$0xf]  ;;  %v5268_v4 = vor.u32 %v5688_v14, %v5265_v0 }
 0x81e   : > { %v7331_v58 = vpop.eup %5972 }
 0x81f   : > { %v2932_v51 = vmul.f32 %v7331_v58, %v7307_v17  ;;  %v2890_v59 = vpop.xlane.xlu1 %2889  ;;  %v2926_v57 = vmul.f32 %v7305_v21, %v2925_v30  ;;  %vm2938_vm14 = vweird.f32 %v7331_v58  ;;  %v5696_v30 = vld [vmem:[%s6336_s8 + $0x4c] sm:$0xf]  ;;  %v5272_v17 = vor.u32 %v5693_v54, %v5271_v47  ;;  %3493 = vmatpush.bf16.msra.mxu0 %v5312_v27 }
 0x820   : > { %v2895_v25 = vmul.f32 %v2890_v59, %v6366_v55  ;;  %vm2939_vm15 = vmor %vm2937_vm5, %vm2938_vm14  ;;  %v5300_v59 = vor.u32 %v5696_v30, %v5297_v8  ;;  %v5734_v30 = vld [vmem:[%s6341_s9 + $0x78] sm:$0xff] }
 0x821   : > { %v2933_v53 = vmul.f32 %v7331_v58, %v2932_v51  ;;  %v2930_v23 = vsel %vm7357_vm13, %v7305_v21, %v2926_v57  ;;  %v5316_v21 = vor.u32 %v5700_v32, %v5313_v19  ;;  %3449 = vmatpush.bf16.msra.mxu2 %v5272_v17  ;;  %v5280_v57 = vor.u32 %v5694_v5, %v5279_v13  ;;  %v5742_v8 = vld [vmem:[%s6341_s9 + $0xb8] sm:$0xff]  ;;  %v5741_v5 = vld [vmem:[%s6341_s9 + $0xb0] sm:$0xff] }
 0x822   : > { %v7351_v40 = vadd.f32 1e-05, %v2895_v25  ;;  %v2953_v42 = vmul.f32 %v2930_v23, %v7192_v50  ;;  %v5276_v50 = vor.u32 %v5691_v9, %v5273_v63  ;;  %v5281_v25 = vld [vmem:[%s6336_s8 + $0x38] sm:$0xf0] }
 0x823   : > { %v2934_v45 = vmul.f32 0.5, %v2933_v53  ;;  %3516 = vmatpush.bf16.msra.mxu1 %v5316_v21  ;;  %3494 = vmatpush.bf16.msra.mxu0 %v5296_v41  ;;  %v5256_v53 = vor.u32 %v5689_v37, %v5255_v7 }
 0x824   : > { %5974 = vrsqrt.f32 %v7351_v40  ;;  %v2961_v61 = vmul.f32 %v7280_v1, %v2953_v42  ;;  %3472 = vmatpush.bf16.msra.mxu3 %v5276_v50  ;;  %vm2947_vm7 = vweird.f32 %v7351_v40  ;;  %v5726_v42 = vld [vmem:[%s6341_s9 + $0x38] sm:$0xff]  ;;  %v5733_v50 = vld [vmem:[%s6341_s9 + $0x70] sm:$0xff] }
 0x825   : > { %v2935_v24 = vsub.f32 1.5, %v2934_v45  ;;  %3450 = vmatpush.bf16.msra.mxu2 %v5256_v53 }
 0x827   : > { %v2936_v26 = vmul.f32 %v7331_v58, %v2935_v24  ;;  %3517 = vmatpush.bf16.msra.mxu1 %v5300_v59  ;;  %3495 = vmatpush.bf16.msra.mxu0 %v5280_v57 }
 0x828   : > { %3473 = vmatpush.bf16.msra.mxu3 %v5260_v20 }
 0x829   : > { %v2940_v31 = vsel %vm2939_vm15, %v7331_v58, %v2936_v26  ;;  %v5692_v58 = vld [vmem:[%s6336_s8 + $0x2c] sm:$0xf]  ;;  %4223 = vmatpush.bf16.msrb.mxu2 %v5726_v42 }
 0x82a   : > { %v5975_v62 = vpop.eup %5974  ;;  %v2954_v46 = vmul.f32 %v2940_v31, %v7198_v10  ;;  %v5284_v60 = vor.u32 %v5692_v58, %v5281_v25  ;;  %v5750_v31 = vld [vmem:[%s6341_s9 + $0xf8] sm:$0xff]  ;;  %v5724_v25 = vld [vmem:[%s6341_s9 + $0x28] sm:$0xff] }
 0x82b   : > { %v2942_v51 = vmul.f32 %v5975_v62, %v7351_v40  ;;  %vm2948_vm0 = vweird.f32 %v5975_v62  ;;  %3496 = vmatpush.bf16.msra.mxu0 %v5264_v28 }
 0x82c   : > { %v2962_v10 = vmul.f32 %v7280_v1, %v2954_v46  ;;  %3518 = vmatpush.bf16.msra.mxu1 %v5284_v60  ;;  %vm2949_vm2 = vmor %vm2947_vm7, %vm2948_vm0  ;;  %4246 = vmatpush.bf16.msrb.mxu3 %v5734_v30  ;;  %v5725_v46 = vld [vmem:[%s6341_s9 + $0x30] sm:$0xff] }
 0x82d   : > { %v2943_v48 = vmul.f32 %v5975_v62, %v2942_v51  ;;  %4224 = vmatpush.bf16.msrb.mxu2 %v5725_v46  ;;  %v5749_v51 = vld [vmem:[%s6341_s9 + $0xf0] sm:$0xff] }
 0x82e   : > { %v2965_v12 = vpack.c.bf16 %v2962_v10, %v2961_v61 }
 0x82f   : > { %v2944_v56 = vmul.f32 0.5, %v2943_v48  ;;  %4269 = vmatpush.bf16.msrb.mxu0 %v5742_v8 }
 0x830   : > { %3172 = vmatmul.bf16.gmra.mxu2 %v2965_v12  ;;  %3195 = vmatmul.bf16.gmra.mxu3 %v2965_v12 }
 0x831   : > { %v2945_v36 = vsub.f32 1.5, %v2944_v56  ;;  %3218 = vmatmul.bf16.gmra.mxu0 %v2965_v12  ;;  %3241 = vmatmul.bf16.gmra.mxu1 %v2965_v12 }
 0x832   : > { %3519 = vmatpush.bf16.msra.mxu1 %v5268_v4  ;;  %4247 = vmatpush.bf16.msrb.mxu3 %v5733_v50 }
 0x833   : > { %v2946_v45 = vmul.f32 %v5975_v62, %v2945_v36  ;;  %4270 = vmatpush.bf16.msrb.mxu0 %v5741_v5  ;;  %4225 = vmatpush.bf16.msrb.mxu2 %v5724_v25 }
 0x835   : > { %v2950_v39 = vsel %vm2949_vm2, %v5975_v62, %v2946_v45 }
 0x836   : > { %v2955_v18 = vmul.f32 %v2950_v39, %v7204_v6  ;;  %4292 = vmatpush.bf16.msrb.mxu1 %v5750_v31  ;;  %4248 = vmatpush.bf16.msrb.mxu3 %v5732_v49 }
 0x837   : > { %4271 = vmatpush.bf16.msrb.mxu0 %v5740_v44  ;;  %v5739_v44 = vld [vmem:[%s6341_s9 + $0xa0] sm:$0xff] }
 0x838   : > { %v2963_v15 = vmul.f32 %v7280_v1, %v2955_v18 }
 0x83a   : > { %v2966_v32 = vpack.c.bf16 %v2963_v15, %v2963_v15  ;;  %4293 = vmatpush.bf16.msrb.mxu1 %v5749_v51  ;;  %v5723_v51 = vld [vmem:[%s6341_s9 + $0x20] sm:$0xff] }
 0x83b   : > { %4226 = vmatpush.bf16.msrb.mxu2 %v5723_v51  ;;  %4272 = vmatpush.bf16.msrb.mxu0 %v5739_v44  ;;  %v5746_v44 = vld [vmem:[%s6341_s9 + $0xd8] sm:$0xff] }
 0x83e   : > { %4294 = vmatpush.bf16.msrb.mxu1 %v5748_v3 }
 0x840   : > { %3177 = vmatmul.bf16.gmra.mxu2 %v2966_v32  ;;  %3200 = vmatmul.bf16.gmra.mxu3 %v2966_v32 }
 0x841   : > { %3223 = vmatmul.bf16.gmra.mxu0 %v2966_v32  ;;  %3246 = vmatmul.bf16.gmra.mxu1 %v2966_v32 }
 0x850   : > { %3451 = vmatmul.bf16.vlgmr.msra.gmra.mxu2 %v7286_v34  ;;  %3474 = vmatmul.bf16.vlgmr.msra.gmra.mxu3 %v7286_v34 }
 0x851   : > { %3497 = vmatmul.bf16.vlgmr.msra.gmra.mxu0 %v7286_v34  ;;  %3520 = vmatmul.bf16.vlgmr.msra.gmra.mxu1 %v7286_v34 }
 0x860   : > { %3456 = vmatmul.bf16.gmra.mxu2 %v2965_v12  ;;  %3479 = vmatmul.bf16.gmra.mxu3 %v2965_v12 }
 0x861   : > { %3502 = vmatmul.bf16.gmra.mxu0 %v2965_v12  ;;  %3525 = vmatmul.bf16.gmra.mxu1 %v2965_v12 }
 0x86b   : > { %v7408_v6 = vpop.f32.mrf.mxu0  ;;  %v7410_v1 = vpop.f32.mrf.mxu1 }
 0x870   : > { %3461 = vmatmul.bf16.gmra.mxu2 %v2966_v32  ;;  %3484 = vmatmul.bf16.gmra.mxu3 %v2966_v32  ;;  %v7412_v40 = vpop.f32.mrf.mxu2  ;;  %v7414_v19 = vpop.f32.mrf.mxu3 }
 0x871   : > { %3507 = vmatmul.bf16.gmra.mxu0 %v2966_v32  ;;  %3530 = vmatmul.bf16.gmra.mxu1 %v2966_v32 }
 0x873   : > { %v7416_v23 = vpop.f32.mrf.mxu0  ;;  %v7418_v34 = vpop.f32.mrf.mxu1 }
 0x878   : > { %v7420_v24 = vpop.f32.mrf.mxu2  ;;  %v7422_v43 = vpop.f32.mrf.mxu3 }
 0x8ae   : > { %v7424_v16 = vpop.f32.mrf.mxu0  ;;  %v7426_v27 = vpop.f32.mrf.mxu1 }
 0x8b3   : > { %v7428_v47 = vpop.f32.mrf.mxu2  ;;  %v7430_v54 = vpop.f32.mrf.mxu3 }
 0x8b6   : > { %v7432_v9 = vpop.f32.mrf.mxu0  ;;  %v7434_v26 = vpop.f32.mrf.mxu1 }
 0x8bb   : > { %v7436_v21 = vpop.f32.mrf.mxu2  ;;  %v7438_v63 = vpop.f32.mrf.mxu3 }
 0x8bc   : > { %8221 = vst [vmem:[#allocation19_spill] sm:$0xff] %v7438_v63  ;;  %v5730_v63 = vld [vmem:[%s6341_s9 + $0x58] sm:$0xff] }
 0x8be   : > { %v7440_v11 = vpop.f32.mrf.mxu0  ;;  %v7442_v29 = vpop.f32.mrf.mxu1 }
 0x8bf   : > { %8222 = vst [vmem:[#allocation20_spill] sm:$0xff] %v7440_v11  ;;  %v5722_v11 = vld [vmem:[%s6341_s9 + $0x18] sm:$0xff] }
 0x8c0   : > { %8223 = vst [vmem:[#allocation21_spill] sm:$0xff] %v7442_v29  ;;  %4227 = vmatpush.bf16.msrb.mxu2 %v5722_v11 }
 0x8c3   : > { %v7448_v17 = vpop.f32.mrf.mxu2  ;;  %v7450_v62 = vpop.f32.mrf.mxu3 }
 0x8c4   : > { %8224 = vst [vmem:[#allocation22_spill] sm:$0xff] %v7448_v17 }
 0x8c5   : > { %8225 = vst [vmem:[#allocation23_spill] sm:$0xff] %v7450_v62 }
 0x8c6   : > { %v3226_v41 = vpop.f32.mrf.mxu0  ;;  %v3249_v13 = vpop.f32.mrf.mxu1 }
 0x8cb   : > { %v3180_v59 = vpop.f32.mrf.mxu2  ;;  %v3203_v58 = vpop.f32.mrf.mxu3 }
 0x8cc   : > { %v5731_v59 = vld [vmem:[%s6341_s9 + $0x60] sm:$0xff] }
 0x8cd   : > { %4249 = vmatpush.bf16.msrb.mxu3 %v5731_v59 }
 0x8ce   : > { %v7456_v7 = vpop.f32.mrf.mxu0  ;;  %v7458_v37 = vpop.f32.mrf.mxu1 }
 0x8cf   : > { %v5383_v61 = vmul.f32 -1.442695, %v7456_v7  ;;  %v5384_v10 = vmul.f32 -1.442695, %v7458_v37 }
 0x8d1   : > { %5976 = vpow2.f32 %v5383_v61  ;;  %4250 = vmatpush.bf16.msrb.mxu3 %v5730_v63 }
 0x8d2   : > { %5978 = vpow2.f32 %v5384_v10 }
 0x8d3   : > { %v7464_v38 = vpop.f32.mrf.mxu2  ;;  %v7466_v48 = vpop.f32.mrf.mxu3 }
 0x8d4   : > { %v5381_v12 = vmul.f32 -1.442695, %v7464_v38  ;;  %v5382_v57 = vmul.f32 -1.442695, %v7466_v48 }
 0x8d6   : > { %5980 = vpow2.f32 %v5381_v12  ;;  %v7470_v53 = vpop.f32.mrf.mxu0  ;;  %v7472_v56 = vpop.f32.mrf.mxu1 }
 0x8d7   : > { %v5977_v60 = vpop.eup %5976  ;;  %5982 = vpow2.f32 %v5382_v57  ;;  %v5387_v20 = vmul.f32 -1.442695, %v7470_v53  ;;  %v5388_v36 = vmul.f32 -1.442695, %v7472_v56 }
 0x8d8   : > { %v5979_v14 = vpop.eup %5978  ;;  %v7477_v0 = vadd.f32 1.0, %v5977_v60 }
 0x8d9   : > { %v7480_v28 = vadd.f32 1.0, %v5979_v14  ;;  %5984 = vpow2.f32 %v5387_v20 }
 0x8da   : > { %5986 = vrcp.f32 %v7477_v0  ;;  %v3654_v13 = vand.u32 2147483647, %v7477_v0  ;;  %v3656_v5 = vand.u32 2147483648, %v7477_v0  ;;  %vm3650_vm3 = vweird.f32 %v7477_v0 }
 0x8db   : > { %5988 = vrcp.f32 %v7480_v28  ;;  %v7484_v4 = vpop.f32.mrf.mxu2  ;;  %v7488_v15 = vpop.f32.mrf.mxu3  ;;  %vm3665_vm6 = vweird.f32 %v7480_v28  ;;  %v3669_v49 = vand.u32 2147483647, %v7480_v28  ;;  %v3671_v60 = vand.u32 2147483648, %v7480_v28 }
 0x8dc   : > { %v5981_v45 = vpop.eup %5980  ;;  %5990 = vpow2.f32 %v5388_v36  ;;  %v5385_v8 = vmul.f32 -1.442695, %v7484_v4  ;;  %v5386_v46 = vmul.f32 -1.442695, %v7488_v15  ;;  %vm7524_vm9 = vcmp.eq.f32.partialorder %v3654_v13, 8.507059e+37 }
 0x8dd   : > { %v5983_v39 = vpop.eup %5982  ;;  %v7486_v18 = vadd.f32 1.0, %v5981_v45  ;;  %v3657_v45 = vor.u32 1.1754944e-38, %v3656_v5  ;;  %vm7557_vm4 = vcmp.eq.f32.partialorder %v3669_v49, 8.507059e+37 }
 0x8de   : > { %v7490_v32 = vadd.f32 1.0, %v5983_v39  ;;  %v7492_v42 = vpop.f32.mrf.mxu0  ;;  %v7512_v10 = vpop.f32.mrf.mxu1  ;;  %v5747_v39 = vld [vmem:[%s6341_s9 + $0xe0] sm:$0xff] }
 0x8df   : > { %v5985_v30 = vpop.eup %5984  ;;  %5992 = vrcp.f32 %v7486_v18  ;;  %v3624_v5 = vand.u32 2147483647, %v7486_v18  ;;  %4295 = vmatpush.bf16.msrb.mxu1 %v5747_v39  ;;  %vm3620_vm12 = vweird.f32 %v7486_v18 }
 0x8e0   : > { %v7496_v31 = vpop.eup %5986  ;;  %5994 = vrcp.f32 %v7490_v32  ;;  %v7515_v12 = vadd.f32 1.0, %v5985_v30  ;;  %v3641_v59 = vand.u32 2147483648, %v7490_v32  ;;  %vm3635_vm0 = vweird.f32 %v7490_v32 }
 0x8e1   : > { %v7500_v50 = vpop.eup %5988  ;;  %v3646_v41 = vmul.f32 %v7496_v31, %v7477_v0  ;;  %5996 = vpow2.f32 %v5385_v8  ;;  %vm3651_vm10 = vweird.f32 %v7496_v31  ;;  %vm7575_vm14 = vcmp.eq.f32.partialorder %v3624_v5, 8.507059e+37 }
 0x8e2   : > { %v5991_v58 = vpop.eup %5990  ;;  %v3661_v61 = vmul.f32 %v7500_v50, %v7480_v28  ;;  %5998 = vpow2.f32 %v5386_v46  ;;  %vm3666_vm11 = vweird.f32 %v7500_v50  ;;  %vm7553_vm8 = vmor %vm3650_vm3, %vm3651_vm10  ;;  %v7579_v55 = vor.u32 1.1754944e-38, %v3641_v59 }
 0x8e3   : > { %v3647_v25 = vsub.f32 1.0, %v3646_v41  ;;  %v7518_v20 = vadd.f32 1.0, %v5991_v58  ;;  %6000 = vrcp.f32 %v7515_v12  ;;  %v3626_v41 = vand.u32 2147483648, %v7486_v18  ;;  %vm7571_vm13 = vmor %vm3665_vm6, %vm3666_vm11  ;;  %4296 = vmatpush.bf16.msrb.mxu1 %v5746_v44  ;;  %v7593_v59 = vpop.f32.mrf.mxu3 }
 0x8e4   : > { %v3662_v57 = vsub.f32 1.0, %v3661_v61  ;;  %vm3710_vm5 = vweird.f32 %v7515_v12 }
 0x8e5   : > { %v7521_v3 = vpop.eup %5992  ;;  %v3648_v14 = vmul.f32 %v7496_v31, %v3647_v25  ;;  %6002 = vrcp.f32 %v7518_v20  ;;  %v3627_v52 = vor.u32 1.1754944e-38, %v3626_v41  ;;  %v5392_v41 = vmul.f32 -1.442695, %v7512_v10 }
 0x8e6   : > { %v7530_v30 = vpop.eup %5994  ;;  %v3663_v8 = vmul.f32 %v7500_v50, %v3662_v57  ;;  %v3616_v46 = vmul.f32 %v7521_v3, %v7486_v18  ;;  %v7545_v25 = vpop.f32.mrf.mxu0  ;;  %v5738_v57 = vld [vmem:[%s6341_s9 + $0x98] sm:$0xff]  ;;  %vm3621_vm15 = vweird.f32 %v7521_v3  ;;  %vm3725_vm11 = vweird.f32 %v7518_v20  ;;  %v5745_v18 = vld [vmem:[%s6341_s9 + $0xd0] sm:$0xff] }
 0x8e7   : > { %v3649_v13 = vadd.f32 %v7496_v31, %v3648_v14  ;;  %v3631_v51 = vmul.f32 %v7530_v30, %v7490_v32  ;;  %v5997_v14 = vpop.eup %5996  ;;  %4273 = vmatpush.bf16.msrb.mxu0 %v5738_v57  ;;  %vm3636_vm7 = vweird.f32 %v7530_v30  ;;  %vm7619_vm2 = vmor %vm3620_vm12, %vm3621_vm15  ;;  %4297 = vmatpush.bf16.msrb.mxu1 %v5745_v18 }
 0x8e8   : > { %v3664_v58 = vadd.f32 %v7500_v50, %v3663_v8  ;;  %v3617_v61 = vsub.f32 1.0, %v3616_v46  ;;  %v3672_v8 = vor.u32 1.1754944e-38, %v3671_v60  ;;  %v3639_v46 = vand.u32 2147483647, %v7490_v32  ;;  %v5999_v22 = vpop.eup %5998  ;;  %vm7656_vm12 = vmor %vm3635_vm0, %vm3636_vm7 }
 0x8e9   : > { %v3653_v2 = vsel %vm7553_vm8, %v7496_v31, %v3649_v13  ;;  %v3632_v35 = vsub.f32 1.0, %v3631_v51  ;;  %v6001_v33 = vpop.eup %6000  ;;  %v5391_v31 = vmul.f32 -1.442695, %v7492_v42  ;;  %v7584_v13 = vpop.f32.mrf.mxu2  ;;  %v3714_v51 = vand.u32 2147483647, %v7515_v12 }
 0x8ea   : > { %v3618_v0 = vmul.f32 %v7521_v3, %v3617_v61  ;;  %v3668_v28 = vsel %vm7571_vm13, %v7500_v50, %v3664_v58  ;;  %v3706_v5 = vmul.f32 %v6001_v33, %v7515_v12  ;;  %v7595_v61 = vpop.f32.mrf.mxu1  ;;  %v3658_v57 = vsel %vm7524_vm9, %v3657_v45, %v3653_v2 }
 0x8eb   : > { %v3716_v50 = vand.u32 2147483648, %v7515_v12  ;;  %v7601_v58 = vadd.f32 1.0, %v5997_v14  ;;  %v6003_v49 = vpop.eup %6002  ;;  %v3633_v62 = vmul.f32 %v7530_v30, %v3632_v35  ;;  %v7605_v29 = vadd.f32 1.0, %v5999_v22  ;;  %v5736_v12 = vld [vmem:[%s6341_s9 + $0x88] sm:$0xff] }
 0x8ec   : > { %v3619_v44 = vadd.f32 %v7521_v3, %v3618_v0  ;;  %v3707_v17 = vsub.f32 1.0, %v3706_v5  ;;  %v3673_v36 = vsel %vm7557_vm4, %v3672_v8, %v3668_v28  ;;  %v3721_v2 = vmul.f32 %v6003_v49, %v7518_v20 }
 0x8ed   : > { %v3729_v45 = vand.u32 2147483647, %v7518_v20  ;;  %v3731_v14 = vand.u32 2147483648, %v7518_v20  ;;  %v3917_v0 = vmul.f32 %v3658_v57, %v7456_v7  ;;  %vm7623_vm3 = vcmp.eq.f32.partialorder %v3639_v46, 8.507059e+37 }
 0x8ee   : > { %v3708_v39 = vmul.f32 %v6001_v33, %v3707_v17  ;;  %vm3711_vm6 = vweird.f32 %v6001_v33  ;;  %6004 = vrcp.f32 %v7601_v58  ;;  %v3623_v7 = vsel %vm7619_vm2, %v7521_v3, %v3619_v44  ;;  %v7638_v57 = vpop.f32.mrf.mxu0 }
 0x8ef   : > { %vm7631_vm9 = vcmp.eq.f32.partialorder %v3714_v51, 8.507059e+37  ;;  %v3717_v8 = vor.u32 1.1754944e-38, %v3716_v50  ;;  %v3722_v28 = vsub.f32 1.0, %v3721_v2  ;;  %v3918_v46 = vmul.f32 %v3673_v36, %v7458_v37  ;;  %vm3712_vm10 = vmor %vm3710_vm5, %vm3711_vm6  ;;  %v5721_v2 = vld [vmem:[%s6341_s9 + $0x10] sm:$0xff] }
 0x8f0   : > { %v3634_v5 = vadd.f32 %v7530_v30, %v3633_v62  ;;  %v3709_v17 = vadd.f32 %v6001_v33, %v3708_v39  ;;  %6006 = vrcp.f32 %v7605_v29  ;;  %vm3726_vm8 = vweird.f32 %v6003_v49  ;;  %4228 = vmatpush.bf16.msrb.mxu2 %v5721_v2 }
 0x8f1   : > { %v3723_v63 = vmul.f32 %v6003_v49, %v3722_v28  ;;  %vm7643_vm4 = vcmp.eq.f32.partialorder %v3729_v45, 8.507059e+37  ;;  %v7648_v37 = vmul.f32 %v3917_v0, %v7408_v6  ;;  %v3628_v62 = vsel %vm7575_vm14, %v3627_v52, %v3623_v7  ;;  %v7663_v52 = vpop.f32.mrf.mxu2  ;;  %vm3727_vm13 = vmor %vm3725_vm11, %vm3726_vm8  ;;  %v5729_v45 = vld [vmem:[%s6341_s9 + $0x50] sm:$0xff] }
 0x8f2   : > { %v3713_v3 = vsel %vm3712_vm10, %v6001_v33, %v3709_v17  ;;  %v3732_v51 = vor.u32 1.1754944e-38, %v3731_v14  ;;  %6008 = vpow2.f32 %v5391_v31  ;;  %v5389_v60 = vmul.f32 -1.442695, %v7584_v13  ;;  %v7677_v31 = vpop.f32.mrf.mxu3  ;;  %v7681_v14 = vpop.f32.mrf.mxu1  ;;  %4251 = vmatpush.bf16.msrb.mxu3 %v5729_v45 }
 0x8f3   : > { %v3718_v44 = vsel %vm7631_vm9, %v3717_v8, %v3713_v3  ;;  %v3724_v6 = vadd.f32 %v6003_v49, %v3723_v63  ;;  %v7668_v50 = vmul.f32 %v3918_v46, %v7410_v1  ;;  %v3638_v32 = vsel %vm7656_vm12, %v7530_v30, %v3634_v5 }
 0x8f4   : > { %v7665_v33 = vpop.eup %6004  ;;  %v3684_v36 = vand.u32 2147483647, %v7601_v58  ;;  %6010 = vpow2.f32 %v5392_v41  ;;  %v7684_v1 = vmul.f32 %v3628_v62, %v7464_v38  ;;  %v3921_v30 = vmul.f32 %v3718_v44, %v7470_v53  ;;  %v5737_v38 = vld [vmem:[%s6341_s9 + $0x90] sm:$0xff] }
 0x8f5   : > { %v3728_v0 = vsel %vm3727_vm13, %v6003_v49, %v3724_v6  ;;  %v3676_v20 = vmul.f32 %v7665_v33, %v7601_v58  ;;  %6012 = vpow2.f32 %v5389_v60  ;;  %v5390_v39 = vmul.f32 -1.442695, %v7593_v59  ;;  %4274 = vmatpush.bf16.msrb.mxu0 %v5737_v38  ;;  %v5743_v38 = vld [vmem:[%s6341_s9 + $0xc0] sm:$0xff] }
 0x8f6   : > { %v7689_v35 = vpop.eup %6006  ;;  %v3733_v41 = vsel %vm7643_vm4, %v3732_v51, %v3728_v0  ;;  %v5395_v7 = vmul.f32 -1.442695, %v7545_v25  ;;  %v3643_v53 = vsel %vm7623_vm3, %v7579_v55, %v3638_v32  ;;  %vm3680_vm14 = vweird.f32 %v7601_v58  ;;  %v3510_v22 = vpop.f32.mrf.mxu0  ;;  %v5744_v32 = vld [vmem:[%s6341_s9 + $0xc8] sm:$0xff] }
 0x8f7   : > { %v3677_v49 = vsub.f32 1.0, %v3676_v20  ;;  %v3691_v8 = vmul.f32 %v7689_v35, %v7605_v29  ;;  %v3922_v28 = vmul.f32 %v3733_v41, %v7472_v56  ;;  %vm7704_vm5 = vcmp.eq.f32.partialorder %v3684_v36, 8.507059e+37  ;;  %4298 = vmatpush.bf16.msrb.mxu1 %v5744_v32  ;;  %v5720_v22 = vld [vmem:[%s6341_s9 + $0x8] sm:$0xff] }
 0x8f8   : > { %v3686_v5 = vand.u32 2147483648, %v7601_v58  ;;  %6014 = vpow2.f32 %v5390_v39  ;;  %v6009_v55 = vpop.eup %6008  ;;  %vm3681_vm15 = vweird.f32 %v7665_v33  ;;  %v3941_v11 = vmul.f32 %v3921_v30, %v7416_v23  ;;  %4229 = vmatpush.bf16.msrb.mxu2 %v5720_v22 }
 0x8f9   : > { %v3678_v17 = vmul.f32 %v7665_v33, %v3677_v49  ;;  %v3692_v63 = vsub.f32 1.0, %v3691_v8  ;;  %6016 = vpow2.f32 %v5395_v7  ;;  %v3699_v62 = vand.u32 2147483647, %v7605_v29  ;;  %vm3682_vm7 = vmor %vm3680_vm14, %vm3681_vm15  ;;  %4275 = vmatpush.bf16.msrb.mxu0 %v5736_v12  ;;  %v7739_v39 = vpop.f32.mrf.mxu2 }
 0x8fa   : > { %v6011_v56 = vpop.eup %6010  ;;  %v3701_v3 = vand.u32 2147483648, %v7605_v29  ;;  %v7714_v51 = vadd.f32 1.0, %v6009_v55  ;;  %vm3696_vm0 = vweird.f32 %v7689_v35  ;;  %v3942_v2 = vmul.f32 %v3922_v28, %v7418_v34  ;;  %v3533_v30 = vpop.f32.mrf.mxu1  ;;  %v5728_v55 = vld [vmem:[%s6341_s9 + $0x48] sm:$0xff] }
 0x8fb   : > { %v3679_v44 = vadd.f32 %v7665_v33, %v3678_v17  ;;  %v3693_v6 = vmul.f32 %v7689_v35, %v3692_v63  ;;  %v7720_v60 = vadd.f32 1.0, %v6011_v56  ;;  %v6013_v36 = vpop.eup %6012  ;;  %v3687_v23 = vor.u32 1.1754944e-38, %v3686_v5  ;;  %v7741_v7 = vpop.f32.mrf.mxu3  ;;  %4299 = vmatpush.bf16.msrb.mxu1 %v5743_v38  ;;  %4252 = vmatpush.bf16.msrb.mxu3 %v5728_v55 }
 0x8fc   : > { %6018 = vrcp.f32 %v7714_v51  ;;  %v5396_v45 = vmul.f32 -1.442695, %v7595_v61  ;;  %vm3695_vm2 = vweird.f32 %v7605_v29  ;;  %v3916_v58 = vmul.f32 %v3643_v53, %v7466_v48  ;;  %v5735_v29 = vld [vmem:[%s6341_s9 + $0x80] sm:$0xff] }
 0x8fd   : > { %v3683_v0 = vsel %vm3682_vm7, %v7665_v33, %v3679_v44  ;;  %v3694_v20 = vadd.f32 %v7689_v35, %v3693_v6  ;;  %6020 = vrcp.f32 %v7720_v60  ;;  %vm3697_vm3 = vmor %vm3695_vm2, %vm3696_vm0  ;;  %vm3700_vm6 = vcmp.eq.f32.partialorder %v3699_v62, 8.507059e+37  ;;  %4276 = vmatpush.bf16.msrb.mxu0 %v5735_v29  ;;  %v5719_v62 = vld [vmem:[%s6341_s9] sm:$0xff] }
 0x8fe   : > { %v6015_v34 = vpop.eup %6014  ;;  %v3688_v41 = vsel %vm7704_vm5, %v3687_v23, %v3683_v0  ;;  %v3702_v33 = vor.u32 1.1754944e-38, %v3701_v3  ;;  %v3957_v49 = vpack.c.bf16 %v3941_v11, %v7648_v37  ;;  %v7748_v8 = vadd.f32 1.0, %v6013_v36  ;;  %v5727_v3 = vld [vmem:[%s6341_s9 + $0x40] sm:$0xff]  ;;  %4230 = vmatpush.bf16.msrb.mxu2 %v5719_v62 }
 0x8ff   : > { %v6017_v18 = vpop.eup %6016  ;;  %v3919_v48 = vmul.f32 %v3688_v41, %v7484_v4  ;;  %v3698_v53 = vsel %vm3697_vm3, %v7689_v35, %v3694_v20  ;;  %v3958_v28 = vpack.c.bf16 %v3942_v2, %v7668_v50  ;;  %v7751_v5 = vadd.f32 1.0, %v6015_v34  ;;  %4253 = vmatpush.bf16.msrb.mxu3 %v5727_v3 }
 0x900   : > { %v3703_v46 = vsel %vm3700_vm6, %v3702_v33, %v3698_v53  ;;  %6022 = vpow2.f32 %v5396_v45  ;;  %v7761_v50 = vadd.f32 1.0, %v6017_v18  ;;  %v3936_v63 = vmul.f32 %v3916_v58, %v7414_v19  ;;  %4277 = vmatmul.bf16.vlgmr.msrb.gmra.mxu0 %v3957_v49 }
 0x901   : > { %v3939_v17 = vmul.f32 %v3919_v48, %v7420_v24  ;;  %v3920_v37 = vmul.f32 %v3703_v46, %v7488_v15  ;;  %6024 = vrcp.f32 %v7748_v8  ;;  %v3935_v24 = vmul.f32 %v7684_v1, %v7412_v40  ;;  %4300 = vmatmul.bf16.vlgmr.msrb.gmra.mxu1 %v3958_v28  ;;  %v3464_v19 = vpop.f32.mrf.mxu2 }
 0x902   : > { %v7758_v4 = vpop.eup %6018  ;;  %6026 = vrcp.f32 %v7751_v5  ;;  %v5393_v40 = vmul.f32 -1.442695, %v7663_v52  ;;  %v3774_v23 = vand.u32 2147483647, %v7714_v51  ;;  %v3776_v45 = vand.u32 2147483648, %v7714_v51 }
 0x903   : > { %v7763_v35 = vpop.eup %6020  ;;  %v3940_v15 = vmul.f32 %v3920_v37, %v7422_v43  ;;  %v3766_v56 = vmul.f32 %v7758_v4, %v7714_v51  ;;  %v3955_v12 = vpack.c.bf16 %v3939_v17, %v3935_v24  ;;  %6028 = vrcp.f32 %v7761_v50  ;;  %v3487_v43 = vpop.f32.mrf.mxu3 }
 0x904   : > { %v3781_v11 = vmul.f32 %v7763_v35, %v7720_v60  ;;  %v3789_v30 = vand.u32 2147483647, %v7720_v60  ;;  %v3791_v20 = vand.u32 2147483648, %v7720_v60  ;;  %v5394_v58 = vmul.f32 -1.442695, %v7677_v31 }
 0x905   : > { %v3956_v44 = vpack.c.bf16 %v3940_v15, %v3936_v63  ;;  %v3767_v6 = vsub.f32 1.0, %v3766_v56  ;;  %v7790_v41 = vmul.f32 -1.442695, %v7638_v57  ;;  %vm3771_vm9 = vweird.f32 %v7758_v4  ;;  %4231 = vmatmul.bf16.vlgmr.msrb.gmra.mxu2 %v3955_v12 }
 0x906   : > { %v6023_v32 = vpop.eup %6022  ;;  %v3782_v36 = vsub.f32 1.0, %v3781_v11  ;;  %vm3770_vm10 = vweird.f32 %v7714_v51  ;;  %vm3785_vm11 = vweird.f32 %v7720_v60  ;;  %v3746_v18 = vand.u32 2147483648, %v7748_v8 }
 0x907   : > { %v7777_v1 = vpop.eup %6024  ;;  %v3768_v2 = vmul.f32 %v7758_v4, %v3767_v6  ;;  %4254 = vmatmul.bf16.vlgmr.msrb.gmra.mxu3 %v3956_v44  ;;  %v7800_v49 = vadd.f32 1.0, %v6023_v32  ;;  %vm7802_vm8 = vcmp.eq.f32.partialorder %v3774_v23, 8.507059e+37  ;;  %v3777_v53 = vor.u32 1.1754944e-38, %v3776_v45  ;;  %vm7810_vm12 = vmor %vm3770_vm10, %vm3771_vm9 }
 0x908   : > { %v7783_v0 = vpop.eup %6026  ;;  %v3736_v34 = vmul.f32 %v7777_v1, %v7748_v8  ;;  %v3783_v29 = vmul.f32 %v7763_v35, %v3782_v36  ;;  %vm7806_vm4 = vcmp.eq.f32.partialorder %v3789_v30, 8.507059e+37  ;;  %6030 = vpow2.f32 %v5393_v40 }
 0x909   : > { %v3769_v33 = vadd.f32 %v7758_v4, %v3768_v2  ;;  %v3751_v38 = vmul.f32 %v7783_v0, %v7751_v5  ;;  %v6029_v46 = vpop.eup %6028  ;;  %vm3786_vm13 = vweird.f32 %v7763_v35  ;;  %v3792_v51 = vor.u32 1.1754944e-38, %v3791_v20 }
 0x90a   : > { %v3737_v55 = vsub.f32 1.0, %v3736_v34  ;;  %6032 = vrcp.f32 %v7800_v49  ;;  %v3784_v37 = vadd.f32 %v7763_v35, %v3783_v29  ;;  %v3826_v63 = vmul.f32 %v6029_v46, %v7761_v50  ;;  %vm7836_vm15 = vmor %vm3785_vm11, %vm3786_vm13 }
 0x90b   : > { %v3773_v17 = vsel %vm7810_vm12, %v7758_v4, %v3769_v33  ;;  %v3752_v24 = vsub.f32 1.0, %v3751_v38  ;;  %v3744_v15 = vand.u32 2147483647, %v7748_v8  ;;  %v7822_v56 = vor.u32 1.1754944e-38, %v3746_v18 }
 0x90c   : > { %v3761_v11 = vand.u32 2147483648, %v7751_v5  ;;  %v3834_v62 = vand.u32 2147483647, %v7761_v50  ;;  %vm3740_vm14 = vweird.f32 %v7748_v8  ;;  %v3759_v3 = vand.u32 2147483647, %v7751_v5 }
 0x90d   : > { %v3827_v12 = vsub.f32 1.0, %v3826_v63  ;;  %vm3830_vm5 = vweird.f32 %v7761_v50  ;;  %v3836_v4 = vand.u32 2147483648, %v7761_v50  ;;  %v3778_v44 = vsel %vm7802_vm8, %v3777_v53, %v3773_v17 }
 0x90e   : > { %v3738_v32 = vmul.f32 %v7777_v1, %v3737_v55  ;;  %vm3741_vm0 = vweird.f32 %v7777_v1  ;;  %vm3755_vm7 = vweird.f32 %v7751_v5  ;;  %6034 = vpow2.f32 %v5394_v58  ;;  %v6031_v36 = vpop.eup %6030 }
 0x90f   : > { %v3788_v40 = vsel %vm7836_vm15, %v7763_v35, %v3784_v37  ;;  %v3753_v19 = vmul.f32 %v7783_v0, %v3752_v24  ;;  %v3828_v43 = vmul.f32 %v6029_v46, %v3827_v12  ;;  %vm3831_vm2 = vweird.f32 %v6029_v46  ;;  %vm7882_vm8 = vmor %vm3740_vm14, %vm3741_vm0 }
 0x910   : > { %v6033_v60 = vpop.eup %6032  ;;  %vm3756_vm3 = vweird.f32 %v7783_v0  ;;  %v3762_v2 = vor.u32 1.1754944e-38, %v3761_v11  ;;  %vm7848_vm6 = vcmp.eq.f32.partialorder %v3834_v62, 8.507059e+37  ;;  %v7852_v45 = vadd.f32 1.0, %v6031_v36  ;;  %vm3832_vm10 = vmor %vm3830_vm5, %vm3831_vm2 }
 0x911   : > { %vm7854_vm9 = vcmp.eq.f32.partialorder %v3744_v15, 8.507059e+37  ;;  %v3829_v20 = vadd.f32 %v6029_v46, %v3828_v43  ;;  %v3837_v35 = vor.u32 1.1754944e-38, %v3836_v4  ;;  %v3841_v34 = vmul.f32 %v6033_v60, %v7800_v49  ;;  %vm7895_vm12 = vmor %vm3755_vm7, %vm3756_vm3 }
 0x912   : > { %v5400_v58 = vmul.f32 -1.442695, %v7681_v14  ;;  %v3925_v33 = vmul.f32 %v3778_v44, %v7492_v42  ;;  %v3793_v29 = vsel %vm7806_vm4, %v3792_v51, %v3788_v40  ;;  %v3739_v38 = vadd.f32 %v7777_v1, %v3738_v32 }
 0x913   : > { %6036 = vrcp.f32 %v7852_v45  ;;  %v3754_v18 = vadd.f32 %v7783_v0, %v3753_v19  ;;  %v3833_v48 = vsel %vm3832_vm10, %v6029_v46, %v3829_v20  ;;  %v3842_v53 = vsub.f32 1.0, %v3841_v34 }
 0x914   : > { %v3849_v22 = vand.u32 2147483647, %v7800_v49  ;;  %v6035_v55 = vpop.eup %6034  ;;  %v3838_v42 = vsel %vm7848_vm6, %v3837_v35, %v3833_v48  ;;  %v3851_v28 = vand.u32 2147483648, %v7800_v49  ;;  %6038 = vpow2.f32 %v7790_v41 }
 0x915   : > { %v5397_v51 = vmul.f32 -1.442695, %v7739_v39  ;;  %v3929_v50 = vmul.f32 %v3838_v42, %v7545_v25  ;;  %v3843_v17 = vmul.f32 %v6033_v60, %v3842_v53  ;;  %vm3846_vm11 = vweird.f32 %v6033_v60 }
 0x916   : > { %v7875_v37 = vadd.f32 1.0, %v6035_v55  ;;  %v3926_v46 = vmul.f32 %v3793_v29, %v7512_v10  ;;  %vm3845_vm4 = vweird.f32 %v7800_v49  ;;  %6040 = vpow2.f32 %v5400_v58 }
 0x917   : > { %v5398_v41 = vmul.f32 -1.442695, %v7741_v7  ;;  %v3743_v25 = vsel %vm7882_vm8, %v7777_v1, %v3739_v38  ;;  %v3949_v8 = vmul.f32 %v3929_v50, %v7432_v9  ;;  %v3844_v63 = vadd.f32 %v6033_v60, %v3843_v17  ;;  %vm3847_vm13 = vmor %vm3845_vm4, %vm3846_vm11 }
 0x918   : > { %6042 = vrcp.f32 %v7875_v37  ;;  %v3945_v15 = vmul.f32 %v3925_v33, %v7424_v16  ;;  %v3758_v1 = vsel %vm7895_vm12, %v7783_v0, %v3754_v18  ;;  %v3852_v11 = vor.u32 1.1754944e-38, %v3851_v28 }
 0x919   : > { %v6037_v49 = vpop.eup %6036  ;;  %6044 = vpow2.f32 %v5397_v51  ;;  %v3848_v62 = vsel %vm3847_vm13, %v6033_v60, %v3844_v63  ;;  %vm3850_vm14 = vcmp.eq.f32.partialorder %v3849_v22, 8.507059e+37  ;;  %v3748_v4 = vsel %vm7854_vm9, %v7822_v56, %v3743_v25 }
 0x91a   : > { %v3796_v12 = vmul.f32 %v6037_v49, %v7852_v45  ;;  %6046 = vpow2.f32 %v5398_v41  ;;  %v6039_v9 = vpop.eup %6038  ;;  %vm3760_vm5 = vcmp.eq.f32.partialorder %v3759_v3, 8.507059e+37  ;;  %v3853_v16 = vsel %vm3850_vm14, %v3852_v11, %v3848_v62  ;;  %v8266_v11 = vld [vmem:[#allocation19_spill] sm:$0xff] }
 0x91b   : > { %v3961_v44 = vpack.c.bf16 %v3949_v8, %v3945_v15  ;;  %v3763_v0 = vsel %vm3760_vm5, %v3762_v2, %v3758_v1  ;;  %v3930_v6 = vmul.f32 %v3853_v16, %v7595_v61  ;;  %v7913_v36 = vadd.f32 1.0, %v6039_v9 }
 0x91c   : > { %v3797_v32 = vsub.f32 1.0, %v3796_v12  ;;  %v6041_v40 = vpop.eup %6040  ;;  %v3946_v19 = vmul.f32 %v3926_v46, %v7426_v27  ;;  %v3804_v43 = vand.u32 2147483647, %v7852_v45  ;;  %v3806_v60 = vand.u32 2147483648, %v7852_v45 }
 0x91d   : > { %4282 = vmatmul.bf16.gmra.mxu0 %v3961_v44  ;;  %v3950_v5 = vmul.f32 %v3930_v6, %v7434_v26  ;;  %vm3801_vm15 = vweird.f32 %v6037_v49  ;;  %6048 = vrcp.f32 %v7913_v36  ;;  %v3923_v61 = vmul.f32 %v3748_v4, %v7584_v13 }
 0x91e   : > { %v6043_v56 = vpop.eup %6042  ;;  %v3798_v3 = vmul.f32 %v6037_v49, %v3797_v32  ;;  %v3924_v23 = vmul.f32 %v3763_v0, %v7593_v59  ;;  %vm3800_vm0 = vweird.f32 %v7852_v45  ;;  %v7924_v35 = vadd.f32 1.0, %v6041_v40 }
 0x91f   : > { %v6045_v2 = vpop.eup %6044  ;;  %v3811_v27 = vmul.f32 %v6043_v56, %v7875_v37  ;;  %v3962_v26 = vpack.c.bf16 %v3950_v5, %v3946_v19  ;;  %vm3802_vm7 = vmor %vm3800_vm0, %vm3801_vm15  ;;  %vm3805_vm2 = vcmp.eq.f32.partialorder %v3804_v43, 8.507059e+37  ;;  %v3807_v58 = vor.u32 1.1754944e-38, %v3806_v60 }
 0x920   : > { %v6047_v30 = vpop.eup %6046  ;;  %v3799_v20 = vadd.f32 %v6037_v49, %v3798_v3  ;;  %v7926_v34 = vadd.f32 1.0, %v6045_v2  ;;  %v3819_v29 = vand.u32 2147483647, %v7875_v37  ;;  %v3821_v59 = vand.u32 2147483648, %v7875_v37 }
 0x921   : > { %v3812_v33 = vsub.f32 1.0, %v3811_v27  ;;  %6050 = vrcp.f32 %v7924_v35  ;;  %v7931_v45 = vadd.f32 1.0, %v6047_v30  ;;  %4305 = vmatmul.bf16.gmra.mxu1 %v3962_v26  ;;  %vm3816_vm3 = vweird.f32 %v6043_v56  ;;  %v8269_v30 = vld [vmem:[#allocation20_spill] sm:$0xff] }
 0x922   : > { %v3803_v13 = vsel %vm3802_vm7, %v6037_v49, %v3799_v20  ;;  %6052 = vrcp.f32 %v7926_v34  ;;  %v3943_v53 = vmul.f32 %v3923_v61, %v7428_v47  ;;  %v3894_v55 = vand.u32 2147483647, %v7913_v36 }
 0x923   : > { %v3808_v38 = vsel %vm3805_vm2, %v3807_v58, %v3803_v13  ;;  %v3813_v18 = vmul.f32 %v6043_v56, %v3812_v33  ;;  %v6049_v48 = vpop.eup %6048  ;;  %v3944_v42 = vmul.f32 %v3924_v23, %v7430_v54  ;;  %vm3815_vm6 = vweird.f32 %v7875_v37  ;;  %v8273_v37 = vld [vmem:[#allocation14_spill] sm:$0xff] }
 0x924   : > { %v3927_v22 = vmul.f32 %v3808_v38, %v7663_v52  ;;  %v3886_v51 = vmul.f32 %v6049_v48, %v7913_v36  ;;  %vm3817_vm9 = vmor %vm3815_vm6, %vm3816_vm3  ;;  %v3822_v17 = vor.u32 1.1754944e-38, %v3821_v59  ;;  %v3896_v46 = vand.u32 2147483648, %v7913_v36 }
 0x925   : > { %v3814_v28 = vadd.f32 %v6043_v56, %v3813_v18  ;;  %6054 = vrcp.f32 %v7931_v45  ;;  %vm3820_vm10 = vcmp.eq.f32.partialorder %v3819_v29, 8.507059e+37  ;;  %v3909_v24 = vand.u32 2147483647, %v7924_v35 }
 0x926   : > { %v3947_v50 = vmul.f32 %v3927_v22, %v7436_v21  ;;  %v3887_v52 = vsub.f32 1.0, %v3886_v51  ;;  %vm3890_vm11 = vweird.f32 %v7913_v36  ;;  %vm7945_vm8 = vcmp.eq.f32.partialorder %v3894_v55, 8.507059e+37  ;;  %v8271_v22 = vld [vmem:[#allocation22_spill] sm:$0xff] }
 0x927   : > { %v3818_v47 = vsel %vm3817_vm9, %v6043_v56, %v3814_v28  ;;  %v6051_v41 = vpop.eup %6050  ;;  %vm3891_vm4 = vweird.f32 %v6049_v48  ;;  %v3897_v49 = vor.u32 1.1754944e-38, %v3896_v46  ;;  %vm3905_vm12 = vweird.f32 %v7924_v35 }
 0x928   : > { %v3823_v54 = vsel %vm3820_vm10, %v3822_v17, %v3818_v47  ;;  %v3959_v21 = vpack.c.bf16 %v3947_v50, %v3943_v53  ;;  %v6053_v25 = vpop.eup %6052  ;;  %v3888_v8 = vmul.f32 %v6049_v48, %v3887_v52  ;;  %v3901_v63 = vmul.f32 %v6051_v41, %v7924_v35  ;;  %vm3892_vm14 = vmor %vm3890_vm11, %vm3891_vm4 }
 0x929   : > { %v3928_v10 = vmul.f32 %v3823_v54, %v7677_v31  ;;  %v3911_v15 = vand.u32 2147483648, %v7924_v35  ;;  %v3856_v1 = vmul.f32 %v6053_v25, %v7926_v34  ;;  %vm7955_vm13 = vcmp.eq.f32.partialorder %v3909_v24, 8.507059e+37 }
 0x92a   : > { %4236 = vmatmul.bf16.gmra.mxu2 %v3959_v21  ;;  %v3889_v12 = vadd.f32 %v6049_v48, %v3888_v8  ;;  %v3902_v9 = vsub.f32 1.0, %v3901_v63  ;;  %vm3860_vm5 = vweird.f32 %v7926_v34  ;;  %v3864_v44 = vand.u32 2147483647, %v7926_v34 }
 0x92b   : > { %v3948_v62 = vmul.f32 %v3928_v10, %v8266_v11  ;;  %v6055_v31 = vpop.eup %6054  ;;  %v3857_v16 = vsub.f32 1.0, %v3856_v1  ;;  %v3866_v0 = vand.u32 2147483648, %v7926_v34  ;;  %vm3906_vm15 = vweird.f32 %v6051_v41  ;;  %v8270_v34 = vld [vmem:[#allocation21_spill] sm:$0xff]  ;;  %v8274_v1 = vld [vmem:[#allocation15_spill] sm:$0xff] }
 0x92c   : > { %v3893_v6 = vsel %vm3892_vm14, %v6049_v48, %v3889_v12  ;;  %v3903_v32 = vmul.f32 %v6051_v41, %v3902_v9  ;;  %v3871_v40 = vmul.f32 %v6055_v31, %v7931_v45  ;;  %vm3861_vm0 = vweird.f32 %v6053_v25  ;;  %vm3907_vm7 = vmor %vm3905_vm12, %vm3906_vm15 }
 0x92d   : > { %v3898_v19 = vsel %vm7945_vm8, %v3897_v49, %v3893_v6  ;;  %v3858_v43 = vmul.f32 %v6053_v25, %v3857_v16  ;;  %v3960_v60 = vpack.c.bf16 %v3948_v62, %v3944_v42  ;;  %v3912_v5 = vor.u32 1.1754944e-38, %v3911_v15  ;;  %vm3862_vm2 = vmor %vm3860_vm5, %vm3861_vm0 }
 0x92e   : > { %v3933_v36 = vmul.f32 %v3898_v19, %v7638_v57  ;;  %v3904_v56 = vadd.f32 %v6051_v41, %v3903_v32  ;;  %v3872_v3 = vsub.f32 1.0, %v3871_v40  ;;  %v3867_v61 = vor.u32 1.1754944e-38, %v3866_v0 }
 0x92f   : > { %v3859_v2 = vadd.f32 %v6053_v25, %v3858_v43  ;;  %v3879_v23 = vand.u32 2147483647, %v7931_v45  ;;  %v3881_v27 = vand.u32 2147483648, %v7931_v45  ;;  %4259 = vmatmul.bf16.gmra.mxu3 %v3960_v60  ;;  %vm3876_vm3 = vweird.f32 %v6055_v31  ;;  %v8275_v43 = vld [vmem:[#allocation16_spill] sm:$0xff] }
 0x930   : > { %v3953_v20 = vmul.f32 %v3933_v36, %v8269_v30  ;;  %v3908_v26 = vsel %vm3907_vm7, %v6051_v41, %v3904_v56  ;;  %v3873_v57 = vmul.f32 %v6055_v31, %v3872_v3  ;;  %vm3865_vm6 = vcmp.eq.f32.partialorder %v3864_v44, 8.507059e+37 }
 0x931   : > { %v3913_v58 = vsel %vm7955_vm13, %v3912_v5, %v3908_v26  ;;  %v3863_v35 = vsel %vm3862_vm2, %v6053_v25, %v3859_v2  ;;  %vm3875_vm9 = vweird.f32 %v7931_v45  ;;  %v3882_v18 = vor.u32 1.1754944e-38, %v3881_v27  ;;  %v8276_v27 = vld [vmem:[#allocation17_spill] sm:$0xff] }
 0x932   : > { %v3934_v33 = vmul.f32 %v3913_v58, %v7681_v14  ;;  %v3868_v29 = vsel %vm3865_vm6, %v3867_v61, %v3863_v35  ;;  %v3874_v13 = vadd.f32 %v6055_v31, %v3873_v57  ;;  %v3965_v59 = vpack.c.bf16 %v3953_v20, %v3953_v20  ;;  %vm3877_vm10 = vmor %vm3875_vm9, %vm3876_vm3  ;;  %v8272_v14 = vld [vmem:[#allocation23_spill] sm:$0xff] }
 0x933   : > { %v3931_v38 = vmul.f32 %v3868_v29, %v7739_v39  ;;  %vm3880_vm11 = vcmp.eq.f32.partialorder %v3879_v23, 8.507059e+37 }
 0x934   : > { %v3954_v48 = vmul.f32 %v3934_v33, %v8270_v34  ;;  %v3878_v53 = vsel %vm3877_vm10, %v6055_v31, %v3874_v13  ;;  %4287 = vmatmul.bf16.gmra.mxu0 %v3965_v59  ;;  %v8277_v33 = vld [vmem:[#allocation18_spill] sm:$0xff] }
 0x935   : > { %v3951_v55 = vmul.f32 %v3931_v38, %v8271_v22  ;;  %v3883_v42 = vsel %vm3880_vm11, %v3882_v18, %v3878_v53 }
 0x936   : > { %v3932_v28 = vmul.f32 %v3883_v42, %v7741_v7  ;;  %v3966_v45 = vpack.c.bf16 %v3954_v48, %v3954_v48 }
 0x937   : > { %v3963_v51 = vpack.c.bf16 %v3951_v55, %v3951_v55 }
 0x938   : > { %4310 = vmatmul.bf16.gmra.mxu1 %v3966_v45  ;;  %v3952_v50 = vmul.f32 %v3932_v28, %v8272_v14 }
 0x93a   : > { %4241 = vmatmul.bf16.gmra.mxu2 %v3963_v51  ;;  %v3964_v17 = vpack.c.bf16 %v3952_v50, %v3952_v50 }
 0x93f   : > { %4264 = vmatmul.bf16.gmra.mxu3 %v3964_v17 }
 0x97d   : > { %v4278_v39 = vpop.f32.mrf.mxu0 }
 0x97e   : > { %v4301_v24 = vpop.f32.mrf.mxu1 }
 0x985   : > { %v4280_v7 = vpop.f32.mrf.mxu0 }
 0x986   : > { %v4303_v49 = vpop.f32.mrf.mxu1 }
 0x988   : > { %v4232_v46 = vpop.f32.mrf.mxu2 }
 0x98a   : > { %v4255_v47 = vpop.f32.mrf.mxu3 }
 0x98b   : > { %v4256_v52 = vadd.f32 %v4255_v47, %v4232_v46 }
 0x98d   : > { %v4279_v41 = vadd.f32 %v4278_v39, %v4256_v52 }
 0x98f   : > { %v4302_v54 = vadd.f32 %v4301_v24, %v4279_v41 }
 0x990   : > { %v4234_v25 = vpop.f32.mrf.mxu2 }
 0x991   : > { %v4315_v21 = vadd.f32 %v4302_v54, %v8273_v37 }
 0x992   : > { %v4257_v10 = vpop.f32.mrf.mxu3 }
 0x993   : > { %4320 = vst [vmem:[#allocation2 + $0x8] sm:$0xff] %v4315_v21  ;;  %v4258_v8 = vadd.f32 %v4257_v10, %v4234_v25 }
 0x995   : > { %v4281_v63 = vadd.f32 %v4280_v7, %v4258_v8 }
 0x997   : > { %v4304_v15 = vadd.f32 %v4303_v49, %v4281_v63 }
 0x999   : > { %v7986_v11 = vadd.f32 %v4304_v15, %v8274_v1 }
 0x99a   : > { %v4283_v62 = vpop.f32.mrf.mxu0 }
 0x99b   : > { %4321 = vst [vmem:[#allocation2] sm:$0xff] %v7986_v11 }
 0x99e   : > { %v4306_v12 = vpop.f32.mrf.mxu1 }
 0x9a2   : > { %v4285_v9 = vpop.f32.mrf.mxu0 }
 0x9a6   : > { %v4308_v4 = vpop.f32.mrf.mxu1 }
 0x9ad   : > { %v4237_v31 = vpop.f32.mrf.mxu2 }
 0x9b1   : > { %v4288_v16 = vpop.f32.mrf.mxu0 }
 0x9b2   : > { %v4260_v44 = vpop.f32.mrf.mxu3 }
 0x9b3   : > { %v4261_v0 = vadd.f32 %v4260_v44, %v4237_v31 }
 0x9b5   : > { %v4239_v6 = vpop.f32.mrf.mxu2  ;;  %v4284_v32 = vadd.f32 %v4283_v62, %v4261_v0  ;;  %v4311_v40 = vpop.f32.mrf.mxu1 }
 0x9b7   : > { %v4307_v19 = vadd.f32 %v4306_v12, %v4284_v32 }
 0x9b9   : > { %v7990_v60 = vadd.f32 %v4307_v19, %v8275_v43  ;;  %v4290_v36 = vpop.f32.mrf.mxu0 }
 0x9ba   : > { %v4262_v56 = vpop.f32.mrf.mxu3 }
 0x9bb   : > { %4322 = vst [vmem:[#allocation2 + $0x20] sm:$0xff] %v7990_v60  ;;  %v4263_v5 = vadd.f32 %v4262_v56, %v4239_v6 }
 0x9bd   : > { %v4242_v3 = vpop.f32.mrf.mxu2  ;;  %v4286_v2 = vadd.f32 %v4285_v9, %v4263_v5  ;;  %v4313_v61 = vpop.f32.mrf.mxu1 }
 0x9bf   : > { %v4309_v23 = vadd.f32 %v4308_v4, %v4286_v2 }
 0x9c1   : > { %v7994_v30 = vadd.f32 %v4309_v23, %v8276_v27 }
 0x9c2   : > { %v4265_v20 = vpop.f32.mrf.mxu3 }
 0x9c3   : > { %4323 = vst [vmem:[#allocation2 + $0x10] sm:$0xff] %v7994_v30  ;;  %v4266_v26 = vadd.f32 %v4265_v20, %v4242_v3 }
 0x9c5   : > { %v4244_v57 = vpop.f32.mrf.mxu2  ;;  %v4289_v58 = vadd.f32 %v4288_v16, %v4266_v26 }
 0x9c7   : > { %v4312_v35 = vadd.f32 %v4311_v40, %v4289_v58  ;;  %4328 = sbr.rel (%p5529_p6) target bundleno = 3063 (0xbf7), region = 112 }
 0x9c9   : > { %v7998_v29 = vadd.f32 %v4312_v35, %v8277_v33 }
 0x9ca   : > { %v4267_v13 = vpop.f32.mrf.mxu3 }
 0x9cb   : > { %4324 = vst [vmem:[#allocation2 + $0x18] sm:$0x3] %v7998_v29 }
 0x9cc   : > { %vm4505_vm8 = vcmask 1047554   ;;  %vm4330_vm4 = vcmask 1047553   ;;  %vm4334_vm12 = vcmask 1040384   ;;  %v4509_v18 = vsel %vm1023_vm1, %v7998_v29, -inf  ;;  %v8278_v58 = vld [vmem:[#allocation13_spill] sm:$0xff] }
 0x9cd   : > { %v4506_v59 = vsel %vm4505_vm8, %v7994_v30, -inf  ;;  %v4331_v38 = vsel %vm4330_vm4, %v7986_v11, -inf  ;;  %v4335_v34 = vsel %vm4334_vm12, %v7990_v60, -inf }
 0x9ce   : > { %4507 = vmax.xlane.f32.xlu1 %v4506_v59  ;;  %4332 = vmax.xlane.f32.xlu0 %v4331_v38 }
 0x9d6   : > { %4510 = vmax.xlane.f32.xlu1 %v4509_v18  ;;  %4336 = vmax.xlane.f32.xlu0 %v4335_v34 }
 0xa41   : > { %v4508_v48 = vpop.xlane.xlu1 %4507  ;;  %v4333_v53 = vpop.xlane.xlu0 %4332 }
 0xa42   : > { %6063 = vrcp.f32 %v4508_v48  ;;  %v4523_v17 = vand.u32 2147483648, %v4508_v48  ;;  %v4521_v46 = vand.u32 2147483647, %v4508_v48  ;;  %v4349_v47 = vand.u32 2147483648, %v4333_v53 }
 0xa43   : > { %6065 = vrcp.f32 %v4333_v53  ;;  %v4347_v24 = vand.u32 2147483647, %v4333_v53  ;;  %vm4517_vm5 = vweird.f32 %v4508_v48  ;;  %vm4343_vm0 = vweird.f32 %v4333_v53 }
 0xa44   : > { %v4524_v37 = vor.u32 1.1754944e-38, %v4523_v17  ;;  %vm4522_vm7 = vcmp.eq.f32.partialorder %v4521_v46, 8.507059e+37  ;;  %v4350_v8 = vor.u32 1.1754944e-38, %v4349_v47  ;;  %v5758_v17 = vld [vmem:[%s8279_s19 + $0x38] sm:$0xff]  ;;  %v5757_v46 = vld [vmem:[%s8279_s19 + $0x30] sm:$0xff]  ;;  %v5764_v47 = vld [vmem:[%s8279_s19 + $0x28] sm:$0xff] }
 0xa45   : > { %vm4348_vm3 = vcmp.eq.f32.partialorder %v4347_v24, 8.507059e+37  ;;  %4490 = vmatpush.bf16.msra.mxu0 %v5758_v17  ;;  %v5763_v24 = vld [vmem:[%s8279_s19 + $0x20] sm:$0xff] }
 0xa48   : > { %v6064_v22 = vpop.eup %6063 }
 0xa49   : > { %v6066_v55 = vpop.eup %6065  ;;  %v4513_v42 = vmul.f32 %v6064_v22, %v4508_v48  ;;  %v4511_v28 = vpop.xlane.xlu1 %4510  ;;  %vm4518_vm13 = vweird.f32 %v6064_v22  ;;  %4491 = vmatpush.bf16.msra.mxu0 %v5757_v46 }
 0xa4a   : > { %v4337_v45 = vpop.xlane.xlu0 %4336  ;;  %v4339_v51 = vmul.f32 %v6066_v55, %v4333_v53  ;;  %6067 = vrcp.f32 %v4511_v28  ;;  %vm4344_vm14 = vweird.f32 %v6066_v55  ;;  %vm4519_vm15 = vmor %vm4517_vm5, %vm4518_vm13  ;;  %v4536_v31 = vand.u32 2147483647, %v4511_v28 }
 0xa4b   : > { %v4514_v14 = vsub.f32 1.0, %v4513_v42  ;;  %6069 = vrcp.f32 %v4337_v45  ;;  %vm4345_vm2 = vmor %vm4343_vm0, %vm4344_vm14  ;;  %v4538_v16 = vand.u32 2147483648, %v4511_v28  ;;  %v4364_v6 = vand.u32 2147483648, %v4337_v45 }
 0xa4c   : > { %v4340_v50 = vsub.f32 1.0, %v4339_v51  ;;  %v4362_v19 = vand.u32 2147483647, %v4337_v45  ;;  %vm4532_vm10 = vweird.f32 %v4511_v28  ;;  %vm4358_vm13 = vweird.f32 %v4337_v45 }
 0xa4d   : > { %v4515_v39 = vmul.f32 %v6064_v22, %v4514_v14  ;;  %v4539_v36 = vor.u32 1.1754944e-38, %v4538_v16  ;;  %vm4537_vm14 = vcmp.eq.f32.partialorder %v4536_v31, 8.507059e+37  ;;  %v4365_v5 = vor.u32 1.1754944e-38, %v4364_v6 }
 0xa4e   : > { %v4341_v52 = vmul.f32 %v6066_v55, %v4340_v50  ;;  %v5766_v50 = vld [vmem:[%s8279_s19 + $0x38] sm:$0xff] }
 0xa4f   : > { %v4516_v41 = vadd.f32 %v6064_v22, %v4515_v39  ;;  %4659 = vmatpush.bf16.msra.mxu1 %v5766_v50  ;;  %v5765_v39 = vld [vmem:[%s8279_s19 + $0x30] sm:$0xff] }
 0xa50   : > { %v6068_v54 = vpop.eup %6067  ;;  %v4342_v21 = vadd.f32 %v6066_v55, %v4341_v52  ;;  %v5756_v52 = vld [vmem:[%s8279_s19 + $0x28] sm:$0xff] }
 0xa51   : > { %v6070_v25 = vpop.eup %6069  ;;  %v4528_v10 = vmul.f32 %v6068_v54, %v4511_v28  ;;  %v4520_v7 = vsel %vm4519_vm15, %v6064_v22, %v4516_v41  ;;  %vm4533_vm6 = vweird.f32 %v6068_v54  ;;  %vm4363_vm15 = vcmp.eq.f32.partialorder %v4362_v19, 8.507059e+37  ;;  %4492 = vmatpush.bf16.msra.mxu0 %v5756_v52  ;;  %v5755_v41 = vld [vmem:[%s8279_s19 + $0x20] sm:$0xff] }
 0xa52   : > { %v4354_v63 = vmul.f32 %v6070_v25, %v4337_v45  ;;  %v4525_v49 = vsel %vm4522_vm7, %v4524_v37, %v4520_v7  ;;  %v4346_v15 = vsel %vm4345_vm2, %v6066_v55, %v4342_v21  ;;  %vm4359_vm9 = vweird.f32 %v6070_v25  ;;  %vm4534_vm11 = vmor %vm4532_vm10, %vm4533_vm6  ;;  %v5754_v37 = vld [vmem:[%s8279_s19 + $0x18] sm:$0xff]  ;;  %v5761_v21 = vld [vmem:[%s8279_s19 + $0x10] sm:$0xff] }
 0xa53   : > { %v4529_v1 = vsub.f32 1.0, %v4528_v10  ;;  %v4526_v62 = vmul.f32 %v4525_v49, %v7994_v30  ;;  %v4351_v12 = vsel %vm4348_vm3, %v4350_v8, %v4346_v15  ;;  %vm4360_vm5 = vmor %vm4358_vm13, %vm4359_vm9  ;;  %4660 = vmatpush.bf16.msra.mxu1 %v5765_v39  ;;  %v5753_v10 = vld [vmem:[%s8279_s19 + $0x10] sm:$0xff]  ;;  %v5760_v7 = vld [vmem:[%s8279_s19 + $0x8] sm:$0xff] }
 0xa54   : > { %v4355_v9 = vsub.f32 1.0, %v4354_v63  ;;  %v4352_v4 = vmul.f32 %v4351_v12, %v7986_v11  ;;  %v5752_v15 = vld [vmem:[%s8279_s19 + $0x8] sm:$0xff] }
 0xa55   : > { %v4530_v44 = vmul.f32 %v6068_v54, %v4529_v1  ;;  %v4542_v0 = vsel %vm4505_vm8, %v4526_v62, 0.0  ;;  %4493 = vmatpush.bf16.msra.mxu0 %v5755_v41  ;;  %v5759_v1 = vld [vmem:[%s8279_s19] sm:$0xff] }
 0xa56   : > { %v4356_v32 = vmul.f32 %v6070_v25, %v4355_v9  ;;  %4543 = vadd.xlane.f32.xlu0 %v4542_v0  ;;  %v4368_v40 = vsel %vm4330_vm4, %v4352_v4, 0.0  ;;  %v5751_v9 = vld [vmem:[%s8279_s19] sm:$0xff] }
 0xa57   : > { %4369 = vadd.xlane.f32.xlu2 %v4368_v40  ;;  %v4531_v43 = vadd.f32 %v6068_v54, %v4530_v44  ;;  %4661 = vmatpush.bf16.msra.mxu1 %v5764_v47 }
 0xa58   : > { %v4357_v56 = vadd.f32 %v6070_v25, %v4356_v32 }
 0xa59   : > { %v4535_v11 = vsel %vm4534_vm11, %v6068_v54, %v4531_v43  ;;  %v5762_v54 = vld [vmem:[%s8279_s19 + $0x18] sm:$0xff]  ;;  %4494 = vmatpush.bf16.msra.mxu0 %v5754_v37 }
 0xa5a   : > { %v4540_v3 = vsel %vm4537_vm14, %v4539_v36, %v4535_v11  ;;  %v4361_v2 = vsel %vm4360_vm5, %v6070_v25, %v4357_v56 }
 0xa5b   : > { %v4541_v61 = vmul.f32 %v4540_v3, %v7998_v29  ;;  %v4366_v23 = vsel %vm4363_vm15, %v4365_v5, %v4361_v2  ;;  %4662 = vmatpush.bf16.msra.mxu1 %v5763_v24 }
 0xa5c   : > { %v4367_v27 = vmul.f32 %v4366_v23, %v7990_v60 }
 0xa5d   : > { %v4545_v30 = vsel %vm1023_vm1, %v4541_v61, 0.0  ;;  %4495 = vmatpush.bf16.msra.mxu0 %v5753_v10 }
 0xa5e   : > { %4546 = vadd.xlane.f32.xlu1 %v4545_v30  ;;  %v4371_v20 = vsel %vm4334_vm12, %v4367_v27, 0.0 }
 0xa5f   : > { %4372 = vadd.xlane.f32.xlu2 %v4371_v20  ;;  %4663 = vmatpush.bf16.msra.mxu1 %v5762_v54 }
 0xa61   : > { %4496 = vmatpush.bf16.msra.mxu0 %v5752_v15 }
 0xa63   : > { %4664 = vmatpush.bf16.msra.mxu1 %v5761_v21 }
 0xa65   : > { %4497 = vmatpush.bf16.msra.mxu0 %v5751_v9 }
 0xa67   : > { %4665 = vmatpush.bf16.msra.mxu1 %v5760_v7 }
 0xa6b   : > { %4666 = vmatpush.bf16.msra.mxu1 %v5759_v1 }
 0xac9   : > { %v4544_v26 = vpop.xlane.xlu0 %4543 }
 0xaca   : > { %v4370_v57 = vpop.xlane.xlu2 %4369  ;;  %v4548_v35 = vmul.f32 %v4544_v26, %v8278_v58 }
 0xacb   : > { %v4374_v33 = vmul.f32 %v4370_v57, %v8278_v58 }
 0xacc   : > { %v8020_v13 = vsub.f32 %v4526_v62, %v4548_v35 }
 0xacd   : > { %v8022_v59 = vsub.f32 %v4352_v4, %v4374_v33 }
 0xace   : > { %v4552_v29 = vmul.f32 %v8020_v13, %v8020_v13 }
 0xacf   : > { %v4378_v60 = vmul.f32 %v8022_v59, %v8022_v59 }
 0xad0   : > { %v4554_v38 = vsel %vm4505_vm8, %v4552_v29, 0.0 }
 0xad1   : > { %v4547_v18 = vpop.xlane.xlu1 %4546  ;;  %v4380_v34 = vsel %vm4330_vm4, %v4378_v60, 0.0  ;;  %4555 = vadd.xlane.f32.xlu1 %v4554_v38 }
 0xad2   : > { %v4549_v48 = vmul.f32 %v4547_v18, %v8278_v58  ;;  %4381 = vadd.xlane.f32.xlu2 %v4380_v34  ;;  %v4373_v53 = vpop.xlane.xlu2 %4372 }
 0xad3   : > { %v4375_v22 = vmul.f32 %v4373_v53, %v8278_v58 }
 0xad4   : > { %v8032_v55 = vsub.f32 %v4541_v61, %v4549_v48 }
 0xad5   : > { %v8034_v42 = vsub.f32 %v4367_v27, %v4375_v22 }
 0xad6   : > { %v4553_v28 = vmul.f32 %v8032_v55, %v8032_v55 }
 0xad7   : > { %v4379_v45 = vmul.f32 %v8034_v42, %v8034_v42 }
 0xad8   : > { %v4557_v51 = vsel %vm1023_vm1, %v4553_v28, 0.0  ;;  %v6061_v28 = vld [vmem:[%s8282_s2] ss:$0 sm:$0xff] }
 0xad9   : > { %v4383_v14 = vsel %vm4334_vm12, %v4379_v45, 0.0 }
 0xada   : > { %4558 = vadd.xlane.f32.xlu2 %v4557_v51  ;;  %4384 = vadd.xlane.f32.xlu0 %v4383_v14  ;;  %v6062_v14 = vld [vmem:[%s8283_s28] ss:$0 sm:$0xff] }
 0xb44   : > { %v4556_v25 = vpop.xlane.xlu1 %4555 }
 0xb45   : > { %v4382_v8 = vpop.xlane.xlu2 %4381  ;;  %v4560_v63 = vmul.f32 %v4556_v25, %v8278_v58 }
 0xb46   : > { %v4386_v49 = vmul.f32 %v4382_v8, %v8278_v58 }
 0xb47   : > { %v4562_v62 = vadd.f32 1e-05, %v4560_v63 }
 0xb48   : > { %v4388_v12 = vadd.f32 1e-05, %v4386_v49 }
 0xb49   : > { %6071 = vrsqrt.f32 %v4562_v62  ;;  %vm4570_vm4 = vweird.f32 %v4562_v62 }
 0xb4a   : > { %6073 = vrsqrt.f32 %v4388_v12  ;;  %vm4396_vm12 = vweird.f32 %v4388_v12 }
 0xb4d   : > { %v4559_v4 = vpop.xlane.xlu2 %4558  ;;  %v4385_v31 = vpop.xlane.xlu0 %4384 }
 0xb4e   : > { %v4561_v16 = vmul.f32 %v4559_v4, %v8278_v58  ;;  %v4387_v44 = vmul.f32 %v4385_v31, %v8278_v58 }
 0xb4f   : > { %v6072_v0 = vpop.eup %6071 }
 0xb50   : > { %v6074_v6 = vpop.eup %6073  ;;  %v4565_v32 = vmul.f32 %v6072_v0, %v4562_v62  ;;  %v4563_v40 = vadd.f32 1e-05, %v4561_v16  ;;  %v4389_v19 = vadd.f32 1e-05, %v4387_v44  ;;  %vm4571_vm1 = vweird.f32 %v6072_v0 }
 0xb51   : > { %v4391_v43 = vmul.f32 %v6074_v6, %v4388_v12  ;;  %vm4397_vm8 = vweird.f32 %v6074_v6  ;;  %vm4572_vm0 = vmor %vm4570_vm4, %vm4571_vm1 }
 0xb52   : > { %v4566_v36 = vmul.f32 %v6072_v0, %v4565_v32  ;;  %6075 = vrsqrt.f32 %v4563_v40  ;;  %vm8094_vm7 = vmor %vm4396_vm12, %vm4397_vm8  ;;  %vm4580_vm6 = vweird.f32 %v4563_v40  ;;  %vm4406_vm10 = vweird.f32 %v4389_v19 }
 0xb53   : > { %v4392_v56 = vmul.f32 %v6074_v6, %v4391_v43  ;;  %6077 = vrsqrt.f32 %v4389_v19 }
 0xb54   : > { %v4567_v11 = vmul.f32 0.5, %v4566_v36 }
 0xb55   : > { %v4393_v5 = vmul.f32 0.5, %v4392_v56 }
 0xb56   : > { %v4568_v3 = vsub.f32 1.5, %v4567_v11 }
 0xb57   : > { %v4394_v61 = vsub.f32 1.5, %v4393_v5 }
 0xb58   : > { %v6076_v2 = vpop.eup %6075  ;;  %v4569_v20 = vmul.f32 %v6072_v0, %v4568_v3 }
 0xb59   : > { %v6078_v23 = vpop.eup %6077  ;;  %v4575_v27 = vmul.f32 %v6076_v2, %v4563_v40  ;;  %v4395_v57 = vmul.f32 %v6074_v6, %v4394_v61  ;;  %vm4581_vm2 = vweird.f32 %v6076_v2 }
 0xb5a   : > { %v4401_v30 = vmul.f32 %v6078_v23, %v4389_v19  ;;  %v4573_v38 = vsel %vm4572_vm0, %v6072_v0, %v4569_v20  ;;  %vm4407_vm3 = vweird.f32 %v6078_v23  ;;  %vm4582_vm9 = vmor %vm4580_vm6, %vm4581_vm2 }
 0xb5b   : > { %v4576_v26 = vmul.f32 %v6076_v2, %v4575_v27  ;;  %v4399_v18 = vsel %vm8094_vm7, %v6074_v6, %v4395_v57  ;;  %v4584_v22 = vmul.f32 %v4573_v38, %v8020_v13  ;;  %vm4408_vm11 = vmor %vm4406_vm10, %vm4407_vm3 }
 0xb5c   : > { %v4402_v58 = vmul.f32 %v6078_v23, %v4401_v30  ;;  %v4410_v51 = vmul.f32 %v4399_v18, %v8022_v59 }
 0xb5d   : > { %v4577_v35 = vmul.f32 0.5, %v4576_v26  ;;  %v4589_v46 = vmul.f32 %v6061_v28, %v4584_v22 }
 0xb5e   : > { %v4403_v33 = vmul.f32 0.5, %v4402_v58  ;;  %v4415_v13 = vmul.f32 %v6062_v14, %v4410_v51 }
 0xb5f   : > { %v4578_v60 = vsub.f32 1.5, %v4577_v35 }
 0xb60   : > { %v4404_v34 = vsub.f32 1.5, %v4403_v33 }
 0xb61   : > { %v4579_v48 = vmul.f32 %v6076_v2, %v4578_v60 }
 0xb62   : > { %v4405_v53 = vmul.f32 %v6078_v23, %v4404_v34 }
 0xb63   : > { %v4583_v45 = vsel %vm4582_vm9, %v6076_v2, %v4579_v48 }
 0xb64   : > { %v4409_v50 = vsel %vm4408_vm11, %v6078_v23, %v4405_v53  ;;  %v4585_v17 = vmul.f32 %v4583_v45, %v8032_v55 }
 0xb65   : > { %v4411_v39 = vmul.f32 %v4409_v50, %v8034_v42 }
 0xb66   : > { %v4590_v47 = vmul.f32 %v6061_v28, %v4585_v17 }
 0xb67   : > { %v4416_v52 = vmul.f32 %v6062_v14, %v4411_v39 }
 0xb68   : > { %v4591_v24 = vpack.c.bf16 %v4590_v47, %v4589_v46 }
 0xb69   : > { %v4417_v41 = vpack.c.bf16 %v4416_v52, %v4415_v13 }
 0xb6a   : > { %v4609_v54 = vrot.slane %v4591_v24, 1 }
 0xb6b   : > { %v4437_v37 = vshll.u32 %v4417_v41, 16  ;;  %v4435_v21 = vshrl.u32 %v4417_v41, 16 }
 0xb6c   : > { %4667 = vmatmul.bf16.vlgmr.msra.gmra.mxu1 %v4609_v54 }
 0xb6d   : > { %v4439_v59 = vrot.slane %v4437_v37, 1 }
 0xb6f   : > { %v4440_v25 = vor.u32 %v4439_v59, %v4435_v21 }
 0xb71   : > { %4498 = vmatmul.bf16.vlgmr.msra.gmra.mxu0 %v4440_v25 }
 0xbe9   : > { %v4668_v10 = vpop.f32.mrf.mxu1 }
 0xbea   : > { %4673 = vst [vmem:[#allocation7 + $0x8] sm:$0xff] %v4668_v10 }
 0xbee   : > { %v4499_v7 = vpop.f32.mrf.mxu0 }
 0xbef   : > { %4503 = vst [vmem:[#allocation7] sm:$0xff] %v4499_v7 }
 0xbf1   : > { %v4670_v55 = vpop.f32.mrf.mxu1 }
 0xbf6   : > { %v4501_v8 = vpop.f32.mrf.mxu0 }
 0xbf7 PF: > { %s8284_s6 = sld [smem:[#allocation11_spill]]  ;;  %s6140_s1 = smov [#allocation7]  }
 0xbf8   : > { %s8286_s4 = sld [smem:[#allocation38_spill]]  ;;  %s4682_s30 = sshll.u32 %s6140_s1, 4  ;;  %s4683_s30 = int_to_ptr.vmem [resolvable:$true] %s4682_s30 }
 0xbf9   : > { %s6141_s25 = smov 128   ;;  %s6142_s3 = smov 8  }
 0xbfd   : > { %s8285_s29 = sadd.s32 4294967295, %s8284_s6  }
 0xbfe   : > { %p5787_p7 = scmp.eq.s32.totalorder %s8285_s29, 1  ;;  %s4684_s26 = sshll.u32 %s8286_s4, 4  ;;  %s4685_s26 = int_to_ptr.hbm [resolvable:$true] %s4684_s26 }
 0xc00   : > { %5784 = dma.vmem_to_hbm [thread:$0]  (%p5787_p7), %s4683_s30, 256, %s4685_s26, [#allocation8], %s6141_s25, %s6141_s25, %s6142_s3  }
 0xc01   : > { %6120 = dma.done.wait (%p5787_p7), [#allocation8], 256  }
 0xc02   : > { %6122 = vsyncadd (%p5787_p7), [#allocation8], 4294967040 }
 0xc03 PF: > { %s8287_s20 = sld [smem:[#allocation11_spill]] }
 0xc04   : > { %s8288_s2 = sld [smem:[#allocation10_spill]] }
 0xc05   : > { %s8289_s25 = sld [smem:[#allocation12_spill]] }
 0xc09   : > { %s32_s26 = sadd.s32 1, %s8287_s20  }
 0xc0a   : > { %p29_p8 = scmp.ge.s32.totalorder %s32_s26, 4  }
 0xc0c   :  { %31 = sbr.rel (!%p29_p8) target bundleno = 18 (0x12), region = 187 }
 0xc11   :  { %4701 = vsyncpa [#allocation8], 1 }
 0xc12   :  { %4703 = vsyncpa [#allocation8 + $0x1], 1 }

</bundles_post_ra>
